<compile_context>
chip_gen: v6e
topology: v6e:2x2x1
jax: 0.10.0
libtpu: 0.0.40
codegen_flags: <defaults>
</compile_context>

<pallas_src>
import functools
import math

import jax
import jax.numpy as jnp
from jax import lax
from jax.experimental import pallas as pl
from jax.experimental.pallas import tpu as pltpu
import numpy as np

LN_EPS = 1e-5
_INV_SQRT2 = 0.7071067811865476
# Abramowitz & Stegun 7.1.26 erf coefficients (max abs error ~1.5e-7).
_A1, _A2, _A3, _A4, _A5 = 0.254829592, -0.284496736, 1.421413741, -1.453152027, 1.061405429
_PP = 0.3275911


def _gelu_exact(x):
    """PyTorch F.gelu (approximate='none'): 0.5*x*(1+erf(x/sqrt(2))), erf via A&S 7.1.26."""
    xs = x * _INV_SQRT2
    sgn = jnp.where(xs >= 0.0, 1.0, -1.0)
    ax = jnp.abs(xs)
    den = 1.0 + _PP * ax
    # EUP reciprocal (approx) + one Newton step instead of a VALU divide.
    t0 = pl.reciprocal(den, approx=True)
    t = t0 * (2.0 - den * t0)
    poly = ((((_A5 * t + _A4) * t + _A3) * t + _A2) * t + _A1) * t
    erf = sgn * (1.0 - poly * jnp.exp(-ax * ax))
    return 0.5 * x * (1.0 + erf)


def _layernorm_over_f(p, gamma, beta):
    """p: (F, W) one channel plane; LayerNorm over n_feats (axis 0) per time column."""
    mean = jnp.mean(p, axis=0, keepdims=True)
    cen = p - mean
    var = jnp.mean(cen * cen, axis=0, keepdims=True)
    return cen * lax.rsqrt(var + LN_EPS) * gamma + beta


def _conv_taps_vpu(taps, w_ref, b_ref, cin, cout, K):
    """'same' KxK conv (stride 1) given time-resolved taps.

    taps[ci][kt]: (F, Wout) f32 plane equal to the conv input h[ci] sampled at the output
    column's time plus (kt - P), already zero wherever the conv's *time* zero padding applies.
    The feature-axis (sublane) zero-shift is applied once per (co, kf) partial sum.  All work is
    scalar-times-plane VPU FMAs (no MXU at these tiny channel counts); weights/bias are SMEM
    scalars.
    """
    P = K // 2
    kk = K * K
    _, Wout = taps[0][0].shape
    zrows = jnp.zeros((max(P, 1), Wout), jnp.float32)   # hoisted zero rows for the f-shifts

    def shift_f(p, d):   # out[f, :] = p[f + d, :], zero for f + d outside [0, F)
        if d == 0:
            return p
        if d > 0:
            return jnp.concatenate([p[d:, :], zrows[:d, :]], axis=0)
        return jnp.concatenate([zrows[:(-d), :], p[:d, :]], axis=0)

    outs = []
    for co in range(cout):
        acc = None
        for kf in range(K):
            part = None
            for ci in range(cin):
                base = co * cin * kk + ci * kk + kf * K
                for kt in range(K):
                    term = w_ref[base + kt] * taps[ci][kt]
                    part = term if part is None else part + term
            part = shift_f(part, kf - P)
            acc = part if acc is None else acc + part
        outs.append(acc + b_ref[co])
    return outs


def residual_cnn_kernel(x_ref, halo_ref, ln_ref, w1_ref, b1_ref, w2_ref, b2_ref, o_ref,
                        *, T, TT, K, P, HALO):
    j = pl.program_id(1)
    C, F = x_ref.shape[1], x_ref.shape[2]
    W1 = TT + 2 * P                      # width of the y1 / h2 frame (global t0-P .. t0+TT+P-1)
    t0 = j * TT                          # global time of the first main column of this tile

    # Loop-invariant validity masks.  Columns whose global time lies outside [0, T) must
    # contribute exactly zero to the convolutions (nn.Conv2d zero padding); the same masks also
    # neutralise clamped halo columns and garbage columns of a partial edge block.
    col_m = lax.broadcasted_iota(jnp.int32, (1, TT), 1)
    valid_main = (t0 + col_m) < T                                        # (1, TT)
    col_h = lax.broadcasted_iota(jnp.int32, (1, 2 * HALO), 1)
    tg_h = t0 + jnp.where(col_h < HALO, col_h - HALO, TT + col_h - HALO)
    valid_halo = jnp.logical_and(tg_h >= 0, tg_h < T)                    # (1, 2*HALO)
    col_y = lax.broadcasted_iota(jnp.int32, (1, W1), 1)
    tg_y = t0 - P + col_y
    valid_mid = jnp.logical_and(tg_y >= 0, tg_y < T)                     # (1, W1)

    # Hoisted LayerNorm parameter broadcasts (JAX does not CSE broadcast_in_dim).
    ln = ln_ref[...].astype(jnp.float32)                                 # (F,4)=[g1|be1|g2|be2]
    g1, be1, g2, be2 = ln[:, 0:1], ln[:, 1:2], ln[:, 2:3], ln[:, 3:4]
    g1m, be1m = jnp.broadcast_to(g1, (F, TT)), jnp.broadcast_to(be1, (F, TT))
    g2m, be2m = jnp.broadcast_to(g2, (F, W1)), jnp.broadcast_to(be2, (F, W1))

    # h1 = LN1 -> GELU (dropout1 = identity, eval mode), masked -> conv1 zero padding.
    h1_main, h1_halo = [], []
    for c in range(C):
        h1_main.append(jnp.where(
            valid_main,
            _gelu_exact(_layernorm_over_f(x_ref[0, c].astype(jnp.float32), g1m, be1m)), 0.0))
        h1_halo.append(jnp.where(
            valid_halo,
            _gelu_exact(_layernorm_over_f(halo_ref[0, c].astype(jnp.float32), g1, be1)), 0.0))

    # conv1 taps: tap1[ci][kt][f, u] = h1[ci][f, global (t0 - P + u) + (kt - P)]
    #   = window column (u + kt) = [left-halo tail | main tile | right-halo head].
    taps1 = []
    for ci in range(C):
        per_kt = []
        for kt in range(K):
            pieces = []
            if kt < 2 * P:
                pieces.append(h1_halo[ci][:, kt:2 * P])
            pieces.append(h1_main[ci])
            if kt > 0:
                pieces.append(h1_halo[ci][:, 2 * P:2 * P + kt])
            per_kt.append(pieces[0] if len(pieces) == 1 else jnp.concatenate(pieces, axis=1))
        taps1.append(per_kt)
    y1 = _conv_taps_vpu(taps1, w1_ref, b1_ref, C, C, K)                  # C planes of (F, W1)

    # h2 = LN2 -> GELU (dropout2 = identity), masked -> conv2 zero padding.
    h2 = [jnp.where(valid_mid, _gelu_exact(_layernorm_over_f(y1[c], g2m, be2m)), 0.0)
          for c in range(C)]

    # conv2 taps live directly in the aligned (F, TT) output frame (the +P offset of the y1/h2
    # frame is folded into the slice start), so y2 needs no final misaligned slice.
    taps2 = [[h2[ci][:, kt:kt + TT] for kt in range(K)] for ci in range(C)]
    y2 = _conv_taps_vpu(taps2, w2_ref, b2_ref, C, C, K)                  # C planes of (F, TT)

    for c in range(C):
        o_ref[0, c] = (y2[c] + x_ref[0, c].astype(jnp.float32)).astype(o_ref.dtype)


def residual_cnn_forward(x_nchw, params, tile_t=None):
    """x_nchw: (B, C, n_feats, T) float32, same NCHW convention as the PyTorch module."""
    B, C, F, T = x_nchw.shape
    Cout, Cin, K, K2 = params["w1"].shape
    assert K == K2 and Cin == C and Cout == C, "residual block needs in_channels == out_channels"
    assert K % 2 == 1 and K >= 3, "odd kernel >= 3 expected ('same' conv with padding=K//2)"
    P = K // 2
    HALO = 2 * P                          # receptive-field halo of the two stacked 'same' convs

    if tile_t is None:
        TT = T if T <= 256 else 256       # lane-dense T tile (128-multiple whenever T is tiled)
        if B * pl.cdiv(T, TT) < 2 and T >= 256:
            TT = 128                      # v7x megacore: ensure >= 2 grid steps when cheap
    else:
        TT = tile_t
    nT = pl.cdiv(T, TT)
    if nT > 1 and TT % 128 != 0:
        raise ValueError("tile_t must be a multiple of 128 when the time axis is tiled")

    # Tiny halo side-input gathered straight from x — no full-tensor pad / slice / output trim.
    # Out-of-range halo positions are clamped duplicates; the in-kernel masks zero them.
    starts = jnp.arange(nT, dtype=jnp.int32) * TT
    offs = jnp.concatenate([jnp.arange(-HALO, 0, dtype=jnp.int32),
                            jnp.arange(TT, TT + HALO, dtype=jnp.int32)])
    halo_t = jnp.clip((starts[:, None] + offs[None, :]).reshape(-1), 0, T - 1)  # (nT*2*HALO,)
    halos = jnp.take(x_nchw, halo_t, axis=3)                                    # (B,C,F,nT*2H)
    halos = halos.reshape(B, C, F, nT, 2 * HALO).transpose(0, 3, 1, 2, 4)
    halos = halos.reshape(B * nT, C, F, 2 * HALO)

    # Packed small parameters: one lane-padded VMEM block for the 4 LN vectors, SMEM scalars for
    # the conv weights/biases.
    ln_pack = jnp.stack([params["g1"], params["be1"], params["g2"], params["be2"]],
                        axis=1).astype(jnp.float32)                             # (F, 4)
    w1f = params["w1"].reshape(-1).astype(jnp.float32)
    w2f = params["w2"].reshape(-1).astype(jnp.float32)
    b1 = params["b1"].astype(jnp.float32)
    b2 = params["b2"].astype(jnp.float32)

    return pl.pallas_call(
        functools.partial(residual_cnn_kernel, T=T, TT=TT, K=K, P=P, HALO=HALO),
        out_shape=jax.ShapeDtypeStruct((B, C, F, T), x_nchw.dtype),
        grid=(B, nT),
        in_specs=[
            pl.BlockSpec((1, C, F, TT), lambda b, j: (b, 0, 0, j)),                  # x tile
            pl.BlockSpec((1, C, F, 2 * HALO), lambda b, j: (b * nT + j, 0, 0, 0)),   # halo strips
            pl.BlockSpec((F, 4), lambda b, j: (0, 0)),                               # LN params
            pl.BlockSpec(memory_space=pltpu.MemorySpace.SMEM),                       # w1 (flat OIHW)
            pl.BlockSpec(memory_space=pltpu.MemorySpace.SMEM),                       # b1
            pl.BlockSpec(memory_space=pltpu.MemorySpace.SMEM),                       # w2
            pl.BlockSpec(memory_space=pltpu.MemorySpace.SMEM),                       # b2
        ],
        out_specs=pl.BlockSpec((1, C, F, TT), lambda b, j: (b, 0, 0, j)),
        compiler_params=pltpu.CompilerParams(
            dimension_semantics=("parallel", "parallel"),
            vmem_limit_bytes=32 * 1024 * 1024),
    )(x_nchw, halos, ln_pack, w1f, b1, w2f, b2)


def residual_cnn_ref(x, params):
    """Pure-JAX reference of the PyTorch forward (eval mode), NCHW."""
    P = params["w1"].shape[-1] // 2

    def ln(x, g, b):
        m = x.mean(axis=2, keepdims=True)
        v = ((x - m) ** 2).mean(axis=2, keepdims=True)
        return (x - m) / jnp.sqrt(v + LN_EPS) * g[None, None, :, None] + b[None, None, :, None]

    def gelu(x):
        return 0.5 * x * (1.0 + lax.erf(x * _INV_SQRT2))

    def conv(x, w, b):
        y = lax.conv_general_dilated(
            x, w, (1, 1), [(P, P), (P, P)],
            dimension_numbers=("NCHW", "OIHW", "NCHW"),
            precision=lax.Precision.HIGHEST)
        return y + b[None, :, None, None]

    h = gelu(ln(x, params["g1"], params["be1"]))
    y1 = conv(h, params["w1"], params["b1"])
    h2 = gelu(ln(y1, params["g2"], params["be2"]))
    y2 = conv(h2, params["w2"], params["b2"])
    return y2 + x


if __name__ == "__main__":
    # ResidualCNN(in_channels=4, out_channels=4, kernel=3, stride=1, dropout=0.1, n_feats=16)
    B, C, n_feats, T, K = 2, 4, 16, 16, 3

    key = jax.random.PRNGKey(0)
    keys = jax.random.split(key, 10)
    x = jax.random.normal(keys[0], (B, C, n_feats, T), dtype=jnp.float32)

    bound = 1.0 / math.sqrt(C * K * K)   # PyTorch Conv2d default init bound
    params = {
        "w1": jax.random.uniform(keys[1], (C, C, K, K), jnp.float32, -bound, bound),
        "b1": jax.random.uniform(keys[2], (C,), jnp.float32, -bound, bound),
        "w2": jax.random.uniform(keys[3], (C, C, K, K), jnp.float32, -bound, bound),
        "b2": jax.random.uniform(keys[4], (C,), jnp.float32, -bound, bound),
        "g1": 1.0 + 0.1 * jax.random.normal(keys[5], (n_feats,), jnp.float32),
        "be1": 0.1 * jax.random.normal(keys[6], (n_feats,), jnp.float32),
        "g2": 1.0 + 0.1 * jax.random.normal(keys[7], (n_feats,), jnp.float32),
        "be2": 0.1 * jax.random.normal(keys[8], (n_feats,), jnp.float32),
    }

    # 1) module-sized check (single T tile).
    out = jax.block_until_ready(residual_cnn_forward(x, params))
    ref = jax.block_until_ready(residual_cnn_ref(x, params))
    assert out.shape == x.shape and out.dtype == x.dtype
    np.testing.assert_allclose(np.asarray(out), np.asarray(ref), rtol=1e-3, atol=1e-3)

    # 2) longer sequence exercising tiled-T halos and a partial edge block (320 = 2*128 + 64).
    x2 = jax.random.normal(keys[9], (B, C, n_feats, 320), dtype=jnp.float32)
    out2 = jax.block_until_ready(residual_cnn_forward(x2, params, tile_t=128))
    ref2 = jax.block_until_ready(residual_cnn_ref(x2, params))
    assert out2.shape == x2.shape and out2.dtype == x2.dtype
    np.testing.assert_allclose(np.asarray(out2), np.asarray(ref2), rtol=1e-3, atol=1e-3)

    print("KERNEL_OK")
</pallas_src>

<mosaic_0001>
module attributes {stable_mosaic.version = 11 : i64} {
  func.func @residual_cnn_kernel(%arg0: i32, %arg1: i32, %arg2: memref<1x4x16x16xf32, #tpu.memory_space<vmem>>, %arg3: memref<1x4x16x4xf32, #tpu.memory_space<vmem>>, %arg4: memref<16x4xf32, #tpu.memory_space<vmem>>, %arg5: memref<144xf32, #tpu.memory_space<smem>>, %arg6: memref<4xf32, #tpu.memory_space<smem>>, %arg7: memref<144xf32, #tpu.memory_space<smem>>, %arg8: memref<4xf32, #tpu.memory_space<smem>>, %arg9: memref<1x4x16x16xf32, #tpu.memory_space<vmem>>) attributes {dimension_semantics = [#tpu.dimension_semantics<parallel>, #tpu.dimension_semantics<parallel>], iteration_bounds = array<i64: 2, 1>, scalar_prefetch = 0 : i64, scratch_operands = 0 : i64, tpu.core_type = #tpu.core_type<tc>, window_params = [{transform_indices = @transform_0, window_bounds = array<i64: 1, 4, 16, 16>}, {transform_indices = @transform_1, window_bounds = array<i64: 1, 4, 16, 4>}, {pipeline_mode = #tpu.pipeline_mode<synchronous>, transform_indices = @transform_2, window_bounds = array<i64: 16, 4>}, {transform_indices = @transform_3, window_bounds = array<i64: 144>}, {transform_indices = @transform_4, window_bounds = array<i64: 4>}, {transform_indices = @transform_5, window_bounds = array<i64: 144>}, {transform_indices = @transform_6, window_bounds = array<i64: 4>}, {transform_indices = @transform_7, window_bounds = array<i64: 1, 4, 16, 16>}]} {
    %c16_i32 = arith.constant 16 : i32
    %0 = arith.muli %arg1, %c16_i32 : i32
    %1 = tpu.iota {dimensions = array<i32: 1>} : vector<1x16xi32>
    %2 = vector.broadcast %0 : i32 to vector<1x16xi32>
    %3 = arith.addi %2, %1 : vector<1x16xi32>
    %c16_i32_0 = arith.constant 16 : i32
    %4 = vector.broadcast %c16_i32_0 : i32 to vector<1x16xi32>
    %5 = arith.cmpi slt, %3, %4 : vector<1x16xi32>
    %6 = tpu.iota {dimensions = array<i32: 1>} : vector<1x4xi32>
    %c2_i32 = arith.constant 2 : i32
    %7 = vector.broadcast %c2_i32 : i32 to vector<1x4xi32>
    %8 = arith.cmpi slt, %6, %7 : vector<1x4xi32>
    %c2_i32_1 = arith.constant 2 : i32
    %9 = vector.broadcast %c2_i32_1 : i32 to vector<1x4xi32>
    %10 = arith.subi %6, %9 : vector<1x4xi32>
    %c16_i32_2 = arith.constant 16 : i32
    %11 = vector.broadcast %c16_i32_2 : i32 to vector<1x4xi32>
    %12 = arith.addi %11, %6 : vector<1x4xi32>
    %c2_i32_3 = arith.constant 2 : i32
    %13 = vector.broadcast %c2_i32_3 : i32 to vector<1x4xi32>
    %14 = arith.subi %12, %13 : vector<1x4xi32>
    %15 = arith.select %8, %10, %14 : vector<1x4xi1>, vector<1x4xi32>
    %16 = vector.broadcast %0 : i32 to vector<1x4xi32>
    %17 = arith.addi %16, %15 : vector<1x4xi32>
    %c0_i32 = arith.constant 0 : i32
    %18 = vector.broadcast %c0_i32 : i32 to vector<1x4xi32>
    %19 = arith.cmpi sge, %17, %18 : vector<1x4xi32>
    %c16_i32_4 = arith.constant 16 : i32
    %20 = vector.broadcast %c16_i32_4 : i32 to vector<1x4xi32>
    %21 = arith.cmpi slt, %17, %20 : vector<1x4xi32>
    %22 = arith.andi %19, %21 : vector<1x4xi1>
    %23 = tpu.iota {dimensions = array<i32: 1>} : vector<1x18xi32>
    %c1_i32 = arith.constant 1 : i32
    %24 = arith.subi %0, %c1_i32 : i32
    %25 = vector.broadcast %24 : i32 to vector<1x18xi32>
    %26 = arith.addi %25, %23 : vector<1x18xi32>
    %c0_i32_5 = arith.constant 0 : i32
    %27 = vector.broadcast %c0_i32_5 : i32 to vector<1x18xi32>
    %28 = arith.cmpi sge, %26, %27 : vector<1x18xi32>
    %c16_i32_6 = arith.constant 16 : i32
    %29 = vector.broadcast %c16_i32_6 : i32 to vector<1x18xi32>
    %30 = arith.cmpi slt, %26, %29 : vector<1x18xi32>
    %31 = arith.andi %28, %30 : vector<1x18xi1>
    %c0 = arith.constant 0 : index
    %c0_7 = arith.constant 0 : index
    %32 = vector.load %arg4[%c0, %c0_7] : memref<16x4xf32, #tpu.memory_space<vmem>>, vector<16x4xf32>
    %33 = vector.extract_strided_slice %32 {offsets = [0, 0], sizes = [16, 1], strides = [1, 1]} : vector<16x4xf32> to vector<16x1xf32>
    %34 = vector.extract_strided_slice %32 {offsets = [0, 1], sizes = [16, 1], strides = [1, 1]} : vector<16x4xf32> to vector<16x1xf32>
    %35 = vector.extract_strided_slice %32 {offsets = [0, 2], sizes = [16, 1], strides = [1, 1]} : vector<16x4xf32> to vector<16x1xf32>
    %36 = vector.extract_strided_slice %32 {offsets = [0, 3], sizes = [16, 1], strides = [1, 1]} : vector<16x4xf32> to vector<16x1xf32>
    %37 = vector.shape_cast %33 : vector<16x1xf32> to vector<16x1xf32>
    %38 = vector.broadcast %37 : vector<16x1xf32> to vector<16x16xf32>
    %39 = vector.shape_cast %34 : vector<16x1xf32> to vector<16x1xf32>
    %40 = vector.broadcast %39 : vector<16x1xf32> to vector<16x16xf32>
    %41 = vector.shape_cast %35 : vector<16x1xf32> to vector<16x1xf32>
    %42 = vector.broadcast %41 : vector<16x1xf32> to vector<16x18xf32>
    %43 = vector.shape_cast %36 : vector<16x1xf32> to vector<16x1xf32>
    %44 = vector.broadcast %43 : vector<16x1xf32> to vector<16x18xf32>
    %c0_8 = arith.constant 0 : index
    %c0_9 = arith.constant 0 : index
    %c0_10 = arith.constant 0 : index
    %c0_11 = arith.constant 0 : index
    %45 = vector.load %arg2[%c0_8, %c0_9, %c0_10, %c0_11] : memref<1x4x16x16xf32, #tpu.memory_space<vmem>>, vector<1x1x16x16xf32>
    %46 = vector.shape_cast %45 : vector<1x1x16x16xf32> to vector<16x16xf32>
    %cst = arith.constant dense<0.000000e+00> : vector<16xf32>
    %47 = vector.multi_reduction <add>, %46, %cst [0] : vector<16x16xf32> to vector<16xf32>
    %48 = vector.shape_cast %47 : vector<16xf32> to vector<1x16xf32>
    %cst_12 = arith.constant 1.600000e+01 : f32
    %49 = vector.broadcast %cst_12 : f32 to vector<1x16xf32>
    %50 = arith.divf %48, %49 : vector<1x16xf32>
    %51 = vector.broadcast %50 : vector<1x16xf32> to vector<16x16xf32>
    %52 = arith.subf %46, %51 : vector<16x16xf32>
    %53 = arith.mulf %52, %52 : vector<16x16xf32>
    %cst_13 = arith.constant dense<0.000000e+00> : vector<16xf32>
    %54 = vector.multi_reduction <add>, %53, %cst_13 [0] : vector<16x16xf32> to vector<16xf32>
    %55 = vector.shape_cast %54 : vector<16xf32> to vector<1x16xf32>
    %cst_14 = arith.constant 1.600000e+01 : f32
    %56 = vector.broadcast %cst_14 : f32 to vector<1x16xf32>
    %57 = arith.divf %55, %56 : vector<1x16xf32>
    %cst_15 = arith.constant 9.99999974E-6 : f32
    %58 = vector.broadcast %cst_15 : f32 to vector<1x16xf32>
    %59 = arith.addf %57, %58 : vector<1x16xf32>
    %60 = math.rsqrt %59 : vector<1x16xf32>
    %61 = vector.broadcast %60 : vector<1x16xf32> to vector<16x16xf32>
    %62 = arith.mulf %52, %61 : vector<16x16xf32>
    %63 = arith.mulf %62, %38 : vector<16x16xf32>
    %64 = arith.addf %63, %40 : vector<16x16xf32>
    %cst_16 = arith.constant 0.707106769 : f32
    %65 = vector.broadcast %cst_16 : f32 to vector<16x16xf32>
    %66 = arith.mulf %64, %65 : vector<16x16xf32>
    %cst_17 = arith.constant 0.000000e+00 : f32
    %67 = vector.broadcast %cst_17 : f32 to vector<16x16xf32>
    %68 = arith.cmpf oge, %66, %67 : vector<16x16xf32>
    %cst_18 = arith.constant 1.000000e+00 : f32
    %cst_19 = arith.constant -1.000000e+00 : f32
    %69 = vector.broadcast %cst_18 : f32 to vector<16x16xf32>
    %70 = vector.broadcast %cst_19 : f32 to vector<16x16xf32>
    %71 = arith.select %68, %69, %70 : vector<16x16xi1>, vector<16x16xf32>
    %72 = math.absf %66 : vector<16x16xf32>
    %cst_20 = arith.constant 0.327591091 : f32
    %73 = vector.broadcast %cst_20 : f32 to vector<16x16xf32>
    %74 = arith.mulf %73, %72 : vector<16x16xf32>
    %cst_21 = arith.constant 1.000000e+00 : f32
    %75 = vector.broadcast %cst_21 : f32 to vector<16x16xf32>
    %76 = arith.addf %75, %74 : vector<16x16xf32>
    %77 = tpu.reciprocal %76 {approx = true} : vector<16x16xf32> -> vector<16x16xf32>
    %78 = arith.mulf %76, %77 : vector<16x16xf32>
    %cst_22 = arith.constant 2.000000e+00 : f32
    %79 = vector.broadcast %cst_22 : f32 to vector<16x16xf32>
    %80 = arith.subf %79, %78 : vector<16x16xf32>
    %81 = arith.mulf %77, %80 : vector<16x16xf32>
    %cst_23 = arith.constant 1.06140542 : f32
    %82 = vector.broadcast %cst_23 : f32 to vector<16x16xf32>
    %83 = arith.mulf %82, %81 : vector<16x16xf32>
    %cst_24 = arith.constant -1.45315206 : f32
    %84 = vector.broadcast %cst_24 : f32 to vector<16x16xf32>
    %85 = arith.addf %83, %84 : vector<16x16xf32>
    %86 = arith.mulf %85, %81 : vector<16x16xf32>
    %cst_25 = arith.constant 1.42141378 : f32
    %87 = vector.broadcast %cst_25 : f32 to vector<16x16xf32>
    %88 = arith.addf %86, %87 : vector<16x16xf32>
    %89 = arith.mulf %88, %81 : vector<16x16xf32>
    %cst_26 = arith.constant -0.284496725 : f32
    %90 = vector.broadcast %cst_26 : f32 to vector<16x16xf32>
    %91 = arith.addf %89, %90 : vector<16x16xf32>
    %92 = arith.mulf %91, %81 : vector<16x16xf32>
    %cst_27 = arith.constant 0.254829586 : f32
    %93 = vector.broadcast %cst_27 : f32 to vector<16x16xf32>
    %94 = arith.addf %92, %93 : vector<16x16xf32>
    %95 = arith.mulf %94, %81 : vector<16x16xf32>
    %cst_28 = arith.constant 0.000000e+00 : f32
    %96 = vector.broadcast %cst_28 : f32 to vector<16x16xf32>
    %97 = arith.subf %96, %72 : vector<16x16xf32>
    %98 = arith.mulf %97, %72 : vector<16x16xf32>
    %99 = math.exp %98 : vector<16x16xf32>
    %100 = arith.mulf %95, %99 : vector<16x16xf32>
    %cst_29 = arith.constant 1.000000e+00 : f32
    %101 = vector.broadcast %cst_29 : f32 to vector<16x16xf32>
    %102 = arith.subf %101, %100 : vector<16x16xf32>
    %103 = arith.mulf %71, %102 : vector<16x16xf32>
    %cst_30 = arith.constant 5.000000e-01 : f32
    %104 = vector.broadcast %cst_30 : f32 to vector<16x16xf32>
    %105 = arith.mulf %104, %64 : vector<16x16xf32>
    %cst_31 = arith.constant 1.000000e+00 : f32
    %106 = vector.broadcast %cst_31 : f32 to vector<16x16xf32>
    %107 = arith.addf %106, %103 : vector<16x16xf32>
    %108 = arith.mulf %105, %107 : vector<16x16xf32>
    %cst_32 = arith.constant 0.000000e+00 : f32
    %109 = vector.shape_cast %5 : vector<1x16xi1> to vector<1x16xi1>
    %110 = vector.broadcast %109 : vector<1x16xi1> to vector<16x16xi1>
    %111 = vector.broadcast %cst_32 : f32 to vector<16x16xf32>
    %112 = arith.select %110, %108, %111 : vector<16x16xi1>, vector<16x16xf32>
    %c0_33 = arith.constant 0 : index
    %c0_34 = arith.constant 0 : index
    %c0_35 = arith.constant 0 : index
    %c0_36 = arith.constant 0 : index
    %113 = vector.load %arg3[%c0_33, %c0_34, %c0_35, %c0_36] : memref<1x4x16x4xf32, #tpu.memory_space<vmem>>, vector<1x1x16x4xf32>
    %114 = vector.shape_cast %113 : vector<1x1x16x4xf32> to vector<16x4xf32>
    %cst_37 = arith.constant dense<0.000000e+00> : vector<4xf32>
    %115 = vector.multi_reduction <add>, %114, %cst_37 [0] : vector<16x4xf32> to vector<4xf32>
    %116 = vector.shape_cast %115 : vector<4xf32> to vector<1x4xf32>
    %cst_38 = arith.constant 1.600000e+01 : f32
    %117 = vector.broadcast %cst_38 : f32 to vector<1x4xf32>
    %118 = arith.divf %116, %117 : vector<1x4xf32>
    %119 = vector.broadcast %118 : vector<1x4xf32> to vector<16x4xf32>
    %120 = arith.subf %114, %119 : vector<16x4xf32>
    %121 = arith.mulf %120, %120 : vector<16x4xf32>
    %cst_39 = arith.constant dense<0.000000e+00> : vector<4xf32>
    %122 = vector.multi_reduction <add>, %121, %cst_39 [0] : vector<16x4xf32> to vector<4xf32>
    %123 = vector.shape_cast %122 : vector<4xf32> to vector<1x4xf32>
    %cst_40 = arith.constant 1.600000e+01 : f32
    %124 = vector.broadcast %cst_40 : f32 to vector<1x4xf32>
    %125 = arith.divf %123, %124 : vector<1x4xf32>
    %cst_41 = arith.constant 9.99999974E-6 : f32
    %126 = vector.broadcast %cst_41 : f32 to vector<1x4xf32>
    %127 = arith.addf %125, %126 : vector<1x4xf32>
    %128 = math.rsqrt %127 : vector<1x4xf32>
    %129 = vector.broadcast %128 : vector<1x4xf32> to vector<16x4xf32>
    %130 = arith.mulf %120, %129 : vector<16x4xf32>
    %131 = vector.broadcast %33 : vector<16x1xf32> to vector<16x4xf32>
    %132 = arith.mulf %130, %131 : vector<16x4xf32>
    %133 = vector.broadcast %34 : vector<16x1xf32> to vector<16x4xf32>
    %134 = arith.addf %132, %133 : vector<16x4xf32>
    %cst_42 = arith.constant 0.707106769 : f32
    %135 = vector.broadcast %cst_42 : f32 to vector<16x4xf32>
    %136 = arith.mulf %134, %135 : vector<16x4xf32>
    %cst_43 = arith.constant 0.000000e+00 : f32
    %137 = vector.broadcast %cst_43 : f32 to vector<16x4xf32>
    %138 = arith.cmpf oge, %136, %137 : vector<16x4xf32>
    %cst_44 = arith.constant 1.000000e+00 : f32
    %cst_45 = arith.constant -1.000000e+00 : f32
    %139 = vector.broadcast %cst_44 : f32 to vector<16x4xf32>
    %140 = vector.broadcast %cst_45 : f32 to vector<16x4xf32>
    %141 = arith.select %138, %139, %140 : vector<16x4xi1>, vector<16x4xf32>
    %142 = math.absf %136 : vector<16x4xf32>
    %cst_46 = arith.constant 0.327591091 : f32
    %143 = vector.broadcast %cst_46 : f32 to vector<16x4xf32>
    %144 = arith.mulf %143, %142 : vector<16x4xf32>
    %cst_47 = arith.constant 1.000000e+00 : f32
    %145 = vector.broadcast %cst_47 : f32 to vector<16x4xf32>
    %146 = arith.addf %145, %144 : vector<16x4xf32>
    %147 = tpu.reciprocal %146 {approx = true} : vector<16x4xf32> -> vector<16x4xf32>
    %148 = arith.mulf %146, %147 : vector<16x4xf32>
    %cst_48 = arith.constant 2.000000e+00 : f32
    %149 = vector.broadcast %cst_48 : f32 to vector<16x4xf32>
    %150 = arith.subf %149, %148 : vector<16x4xf32>
    %151 = arith.mulf %147, %150 : vector<16x4xf32>
    %cst_49 = arith.constant 1.06140542 : f32
    %152 = vector.broadcast %cst_49 : f32 to vector<16x4xf32>
    %153 = arith.mulf %152, %151 : vector<16x4xf32>
    %cst_50 = arith.constant -1.45315206 : f32
    %154 = vector.broadcast %cst_50 : f32 to vector<16x4xf32>
    %155 = arith.addf %153, %154 : vector<16x4xf32>
    %156 = arith.mulf %155, %151 : vector<16x4xf32>
    %cst_51 = arith.constant 1.42141378 : f32
    %157 = vector.broadcast %cst_51 : f32 to vector<16x4xf32>
    %158 = arith.addf %156, %157 : vector<16x4xf32>
    %159 = arith.mulf %158, %151 : vector<16x4xf32>
    %cst_52 = arith.constant -0.284496725 : f32
    %160 = vector.broadcast %cst_52 : f32 to vector<16x4xf32>
    %161 = arith.addf %159, %160 : vector<16x4xf32>
    %162 = arith.mulf %161, %151 : vector<16x4xf32>
    %cst_53 = arith.constant 0.254829586 : f32
    %163 = vector.broadcast %cst_53 : f32 to vector<16x4xf32>
    %164 = arith.addf %162, %163 : vector<16x4xf32>
    %165 = arith.mulf %164, %151 : vector<16x4xf32>
    %cst_54 = arith.constant 0.000000e+00 : f32
    %166 = vector.broadcast %cst_54 : f32 to vector<16x4xf32>
    %167 = arith.subf %166, %142 : vector<16x4xf32>
    %168 = arith.mulf %167, %142 : vector<16x4xf32>
    %169 = math.exp %168 : vector<16x4xf32>
    %170 = arith.mulf %165, %169 : vector<16x4xf32>
    %cst_55 = arith.constant 1.000000e+00 : f32
    %171 = vector.broadcast %cst_55 : f32 to vector<16x4xf32>
    %172 = arith.subf %171, %170 : vector<16x4xf32>
    %173 = arith.mulf %141, %172 : vector<16x4xf32>
    %cst_56 = arith.constant 5.000000e-01 : f32
    %174 = vector.broadcast %cst_56 : f32 to vector<16x4xf32>
    %175 = arith.mulf %174, %134 : vector<16x4xf32>
    %cst_57 = arith.constant 1.000000e+00 : f32
    %176 = vector.broadcast %cst_57 : f32 to vector<16x4xf32>
    %177 = arith.addf %176, %173 : vector<16x4xf32>
    %178 = arith.mulf %175, %177 : vector<16x4xf32>
    %cst_58 = arith.constant 0.000000e+00 : f32
    %179 = vector.shape_cast %22 : vector<1x4xi1> to vector<1x4xi1>
    %180 = vector.broadcast %179 : vector<1x4xi1> to vector<16x4xi1>
    %181 = vector.broadcast %cst_58 : f32 to vector<16x4xf32>
    %182 = arith.select %180, %178, %181 : vector<16x4xi1>, vector<16x4xf32>
    %c0_59 = arith.constant 0 : index
    %c1 = arith.constant 1 : index
    %c0_60 = arith.constant 0 : index
    %c0_61 = arith.constant 0 : index
    %183 = vector.load %arg2[%c0_59, %c1, %c0_60, %c0_61] : memref<1x4x16x16xf32, #tpu.memory_space<vmem>>, vector<1x1x16x16xf32>
    %184 = vector.shape_cast %183 : vector<1x1x16x16xf32> to vector<16x16xf32>
    %cst_62 = arith.constant dense<0.000000e+00> : vector<16xf32>
    %185 = vector.multi_reduction <add>, %184, %cst_62 [0] : vector<16x16xf32> to vector<16xf32>
    %186 = vector.shape_cast %185 : vector<16xf32> to vector<1x16xf32>
    %cst_63 = arith.constant 1.600000e+01 : f32
    %187 = vector.broadcast %cst_63 : f32 to vector<1x16xf32>
    %188 = arith.divf %186, %187 : vector<1x16xf32>
    %189 = vector.broadcast %188 : vector<1x16xf32> to vector<16x16xf32>
    %190 = arith.subf %184, %189 : vector<16x16xf32>
    %191 = arith.mulf %190, %190 : vector<16x16xf32>
    %cst_64 = arith.constant dense<0.000000e+00> : vector<16xf32>
    %192 = vector.multi_reduction <add>, %191, %cst_64 [0] : vector<16x16xf32> to vector<16xf32>
    %193 = vector.shape_cast %192 : vector<16xf32> to vector<1x16xf32>
    %cst_65 = arith.constant 1.600000e+01 : f32
    %194 = vector.broadcast %cst_65 : f32 to vector<1x16xf32>
    %195 = arith.divf %193, %194 : vector<1x16xf32>
    %cst_66 = arith.constant 9.99999974E-6 : f32
    %196 = vector.broadcast %cst_66 : f32 to vector<1x16xf32>
    %197 = arith.addf %195, %196 : vector<1x16xf32>
    %198 = math.rsqrt %197 : vector<1x16xf32>
    %199 = vector.broadcast %198 : vector<1x16xf32> to vector<16x16xf32>
    %200 = arith.mulf %190, %199 : vector<16x16xf32>
    %201 = arith.mulf %200, %38 : vector<16x16xf32>
    %202 = arith.addf %201, %40 : vector<16x16xf32>
    %cst_67 = arith.constant 0.707106769 : f32
    %203 = vector.broadcast %cst_67 : f32 to vector<16x16xf32>
    %204 = arith.mulf %202, %203 : vector<16x16xf32>
    %cst_68 = arith.constant 0.000000e+00 : f32
    %205 = vector.broadcast %cst_68 : f32 to vector<16x16xf32>
    %206 = arith.cmpf oge, %204, %205 : vector<16x16xf32>
    %cst_69 = arith.constant 1.000000e+00 : f32
    %cst_70 = arith.constant -1.000000e+00 : f32
    %207 = vector.broadcast %cst_69 : f32 to vector<16x16xf32>
    %208 = vector.broadcast %cst_70 : f32 to vector<16x16xf32>
    %209 = arith.select %206, %207, %208 : vector<16x16xi1>, vector<16x16xf32>
    %210 = math.absf %204 : vector<16x16xf32>
    %cst_71 = arith.constant 0.327591091 : f32
    %211 = vector.broadcast %cst_71 : f32 to vector<16x16xf32>
    %212 = arith.mulf %211, %210 : vector<16x16xf32>
    %cst_72 = arith.constant 1.000000e+00 : f32
    %213 = vector.broadcast %cst_72 : f32 to vector<16x16xf32>
    %214 = arith.addf %213, %212 : vector<16x16xf32>
    %215 = tpu.reciprocal %214 {approx = true} : vector<16x16xf32> -> vector<16x16xf32>
    %216 = arith.mulf %214, %215 : vector<16x16xf32>
    %cst_73 = arith.constant 2.000000e+00 : f32
    %217 = vector.broadcast %cst_73 : f32 to vector<16x16xf32>
    %218 = arith.subf %217, %216 : vector<16x16xf32>
    %219 = arith.mulf %215, %218 : vector<16x16xf32>
    %cst_74 = arith.constant 1.06140542 : f32
    %220 = vector.broadcast %cst_74 : f32 to vector<16x16xf32>
    %221 = arith.mulf %220, %219 : vector<16x16xf32>
    %cst_75 = arith.constant -1.45315206 : f32
    %222 = vector.broadcast %cst_75 : f32 to vector<16x16xf32>
    %223 = arith.addf %221, %222 : vector<16x16xf32>
    %224 = arith.mulf %223, %219 : vector<16x16xf32>
    %cst_76 = arith.constant 1.42141378 : f32
    %225 = vector.broadcast %cst_76 : f32 to vector<16x16xf32>
    %226 = arith.addf %224, %225 : vector<16x16xf32>
    %227 = arith.mulf %226, %219 : vector<16x16xf32>
    %cst_77 = arith.constant -0.284496725 : f32
    %228 = vector.broadcast %cst_77 : f32 to vector<16x16xf32>
    %229 = arith.addf %227, %228 : vector<16x16xf32>
    %230 = arith.mulf %229, %219 : vector<16x16xf32>
    %cst_78 = arith.constant 0.254829586 : f32
    %231 = vector.broadcast %cst_78 : f32 to vector<16x16xf32>
    %232 = arith.addf %230, %231 : vector<16x16xf32>
    %233 = arith.mulf %232, %219 : vector<16x16xf32>
    %cst_79 = arith.constant 0.000000e+00 : f32
    %234 = vector.broadcast %cst_79 : f32 to vector<16x16xf32>
    %235 = arith.subf %234, %210 : vector<16x16xf32>
    %236 = arith.mulf %235, %210 : vector<16x16xf32>
    %237 = math.exp %236 : vector<16x16xf32>
    %238 = arith.mulf %233, %237 : vector<16x16xf32>
    %cst_80 = arith.constant 1.000000e+00 : f32
    %239 = vector.broadcast %cst_80 : f32 to vector<16x16xf32>
    %240 = arith.subf %239, %238 : vector<16x16xf32>
    %241 = arith.mulf %209, %240 : vector<16x16xf32>
    %cst_81 = arith.constant 5.000000e-01 : f32
    %242 = vector.broadcast %cst_81 : f32 to vector<16x16xf32>
    %243 = arith.mulf %242, %202 : vector<16x16xf32>
    %cst_82 = arith.constant 1.000000e+00 : f32
    %244 = vector.broadcast %cst_82 : f32 to vector<16x16xf32>
    %245 = arith.addf %244, %241 : vector<16x16xf32>
    %246 = arith.mulf %243, %245 : vector<16x16xf32>
    %cst_83 = arith.constant 0.000000e+00 : f32
    %247 = vector.shape_cast %5 : vector<1x16xi1> to vector<1x16xi1>
    %248 = vector.broadcast %247 : vector<1x16xi1> to vector<16x16xi1>
    %249 = vector.broadcast %cst_83 : f32 to vector<16x16xf32>
    %250 = arith.select %248, %246, %249 : vector<16x16xi1>, vector<16x16xf32>
    %c0_84 = arith.constant 0 : index
    %c1_85 = arith.constant 1 : index
    %c0_86 = arith.constant 0 : index
    %c0_87 = arith.constant 0 : index
    %251 = vector.load %arg3[%c0_84, %c1_85, %c0_86, %c0_87] : memref<1x4x16x4xf32, #tpu.memory_space<vmem>>, vector<1x1x16x4xf32>
    %252 = vector.shape_cast %251 : vector<1x1x16x4xf32> to vector<16x4xf32>
    %cst_88 = arith.constant dense<0.000000e+00> : vector<4xf32>
    %253 = vector.multi_reduction <add>, %252, %cst_88 [0] : vector<16x4xf32> to vector<4xf32>
    %254 = vector.shape_cast %253 : vector<4xf32> to vector<1x4xf32>
    %cst_89 = arith.constant 1.600000e+01 : f32
    %255 = vector.broadcast %cst_89 : f32 to vector<1x4xf32>
    %256 = arith.divf %254, %255 : vector<1x4xf32>
    %257 = vector.broadcast %256 : vector<1x4xf32> to vector<16x4xf32>
    %258 = arith.subf %252, %257 : vector<16x4xf32>
    %259 = arith.mulf %258, %258 : vector<16x4xf32>
    %cst_90 = arith.constant dense<0.000000e+00> : vector<4xf32>
    %260 = vector.multi_reduction <add>, %259, %cst_90 [0] : vector<16x4xf32> to vector<4xf32>
    %261 = vector.shape_cast %260 : vector<4xf32> to vector<1x4xf32>
    %cst_91 = arith.constant 1.600000e+01 : f32
    %262 = vector.broadcast %cst_91 : f32 to vector<1x4xf32>
    %263 = arith.divf %261, %262 : vector<1x4xf32>
    %cst_92 = arith.constant 9.99999974E-6 : f32
    %264 = vector.broadcast %cst_92 : f32 to vector<1x4xf32>
    %265 = arith.addf %263, %264 : vector<1x4xf32>
    %266 = math.rsqrt %265 : vector<1x4xf32>
    %267 = vector.broadcast %266 : vector<1x4xf32> to vector<16x4xf32>
    %268 = arith.mulf %258, %267 : vector<16x4xf32>
    %269 = vector.broadcast %33 : vector<16x1xf32> to vector<16x4xf32>
    %270 = arith.mulf %268, %269 : vector<16x4xf32>
    %271 = vector.broadcast %34 : vector<16x1xf32> to vector<16x4xf32>
    %272 = arith.addf %270, %271 : vector<16x4xf32>
    %cst_93 = arith.constant 0.707106769 : f32
    %273 = vector.broadcast %cst_93 : f32 to vector<16x4xf32>
    %274 = arith.mulf %272, %273 : vector<16x4xf32>
    %cst_94 = arith.constant 0.000000e+00 : f32
    %275 = vector.broadcast %cst_94 : f32 to vector<16x4xf32>
    %276 = arith.cmpf oge, %274, %275 : vector<16x4xf32>
    %cst_95 = arith.constant 1.000000e+00 : f32
    %cst_96 = arith.constant -1.000000e+00 : f32
    %277 = vector.broadcast %cst_95 : f32 to vector<16x4xf32>
    %278 = vector.broadcast %cst_96 : f32 to vector<16x4xf32>
    %279 = arith.select %276, %277, %278 : vector<16x4xi1>, vector<16x4xf32>
    %280 = math.absf %274 : vector<16x4xf32>
    %cst_97 = arith.constant 0.327591091 : f32
    %281 = vector.broadcast %cst_97 : f32 to vector<16x4xf32>
    %282 = arith.mulf %281, %280 : vector<16x4xf32>
    %cst_98 = arith.constant 1.000000e+00 : f32
    %283 = vector.broadcast %cst_98 : f32 to vector<16x4xf32>
    %284 = arith.addf %283, %282 : vector<16x4xf32>
    %285 = tpu.reciprocal %284 {approx = true} : vector<16x4xf32> -> vector<16x4xf32>
    %286 = arith.mulf %284, %285 : vector<16x4xf32>
    %cst_99 = arith.constant 2.000000e+00 : f32
    %287 = vector.broadcast %cst_99 : f32 to vector<16x4xf32>
    %288 = arith.subf %287, %286 : vector<16x4xf32>
    %289 = arith.mulf %285, %288 : vector<16x4xf32>
    %cst_100 = arith.constant 1.06140542 : f32
    %290 = vector.broadcast %cst_100 : f32 to vector<16x4xf32>
    %291 = arith.mulf %290, %289 : vector<16x4xf32>
    %cst_101 = arith.constant -1.45315206 : f32
    %292 = vector.broadcast %cst_101 : f32 to vector<16x4xf32>
    %293 = arith.addf %291, %292 : vector<16x4xf32>
    %294 = arith.mulf %293, %289 : vector<16x4xf32>
    %cst_102 = arith.constant 1.42141378 : f32
    %295 = vector.broadcast %cst_102 : f32 to vector<16x4xf32>
    %296 = arith.addf %294, %295 : vector<16x4xf32>
    %297 = arith.mulf %296, %289 : vector<16x4xf32>
    %cst_103 = arith.constant -0.284496725 : f32
    %298 = vector.broadcast %cst_103 : f32 to vector<16x4xf32>
    %299 = arith.addf %297, %298 : vector<16x4xf32>
    %300 = arith.mulf %299, %289 : vector<16x4xf32>
    %cst_104 = arith.constant 0.254829586 : f32
    %301 = vector.broadcast %cst_104 : f32 to vector<16x4xf32>
    %302 = arith.addf %300, %301 : vector<16x4xf32>
    %303 = arith.mulf %302, %289 : vector<16x4xf32>
    %cst_105 = arith.constant 0.000000e+00 : f32
    %304 = vector.broadcast %cst_105 : f32 to vector<16x4xf32>
    %305 = arith.subf %304, %280 : vector<16x4xf32>
    %306 = arith.mulf %305, %280 : vector<16x4xf32>
    %307 = math.exp %306 : vector<16x4xf32>
    %308 = arith.mulf %303, %307 : vector<16x4xf32>
    %cst_106 = arith.constant 1.000000e+00 : f32
    %309 = vector.broadcast %cst_106 : f32 to vector<16x4xf32>
    %310 = arith.subf %309, %308 : vector<16x4xf32>
    %311 = arith.mulf %279, %310 : vector<16x4xf32>
    %cst_107 = arith.constant 5.000000e-01 : f32
    %312 = vector.broadcast %cst_107 : f32 to vector<16x4xf32>
    %313 = arith.mulf %312, %272 : vector<16x4xf32>
    %cst_108 = arith.constant 1.000000e+00 : f32
    %314 = vector.broadcast %cst_108 : f32 to vector<16x4xf32>
    %315 = arith.addf %314, %311 : vector<16x4xf32>
    %316 = arith.mulf %313, %315 : vector<16x4xf32>
    %cst_109 = arith.constant 0.000000e+00 : f32
    %317 = vector.shape_cast %22 : vector<1x4xi1> to vector<1x4xi1>
    %318 = vector.broadcast %317 : vector<1x4xi1> to vector<16x4xi1>
    %319 = vector.broadcast %cst_109 : f32 to vector<16x4xf32>
    %320 = arith.select %318, %316, %319 : vector<16x4xi1>, vector<16x4xf32>
    %c0_110 = arith.constant 0 : index
    %c2 = arith.constant 2 : index
    %c0_111 = arith.constant 0 : index
    %c0_112 = arith.constant 0 : index
    %321 = vector.load %arg2[%c0_110, %c2, %c0_111, %c0_112] : memref<1x4x16x16xf32, #tpu.memory_space<vmem>>, vector<1x1x16x16xf32>
    %322 = vector.shape_cast %321 : vector<1x1x16x16xf32> to vector<16x16xf32>
    %cst_113 = arith.constant dense<0.000000e+00> : vector<16xf32>
    %323 = vector.multi_reduction <add>, %322, %cst_113 [0] : vector<16x16xf32> to vector<16xf32>
    %324 = vector.shape_cast %323 : vector<16xf32> to vector<1x16xf32>
    %cst_114 = arith.constant 1.600000e+01 : f32
    %325 = vector.broadcast %cst_114 : f32 to vector<1x16xf32>
    %326 = arith.divf %324, %325 : vector<1x16xf32>
    %327 = vector.broadcast %326 : vector<1x16xf32> to vector<16x16xf32>
    %328 = arith.subf %322, %327 : vector<16x16xf32>
    %329 = arith.mulf %328, %328 : vector<16x16xf32>
    %cst_115 = arith.constant dense<0.000000e+00> : vector<16xf32>
    %330 = vector.multi_reduction <add>, %329, %cst_115 [0] : vector<16x16xf32> to vector<16xf32>
    %331 = vector.shape_cast %330 : vector<16xf32> to vector<1x16xf32>
    %cst_116 = arith.constant 1.600000e+01 : f32
    %332 = vector.broadcast %cst_116 : f32 to vector<1x16xf32>
    %333 = arith.divf %331, %332 : vector<1x16xf32>
    %cst_117 = arith.constant 9.99999974E-6 : f32
    %334 = vector.broadcast %cst_117 : f32 to vector<1x16xf32>
    %335 = arith.addf %333, %334 : vector<1x16xf32>
    %336 = math.rsqrt %335 : vector<1x16xf32>
    %337 = vector.broadcast %336 : vector<1x16xf32> to vector<16x16xf32>
    %338 = arith.mulf %328, %337 : vector<16x16xf32>
    %339 = arith.mulf %338, %38 : vector<16x16xf32>
    %340 = arith.addf %339, %40 : vector<16x16xf32>
    %cst_118 = arith.constant 0.707106769 : f32
    %341 = vector.broadcast %cst_118 : f32 to vector<16x16xf32>
    %342 = arith.mulf %340, %341 : vector<16x16xf32>
    %cst_119 = arith.constant 0.000000e+00 : f32
    %343 = vector.broadcast %cst_119 : f32 to vector<16x16xf32>
    %344 = arith.cmpf oge, %342, %343 : vector<16x16xf32>
    %cst_120 = arith.constant 1.000000e+00 : f32
    %cst_121 = arith.constant -1.000000e+00 : f32
    %345 = vector.broadcast %cst_120 : f32 to vector<16x16xf32>
    %346 = vector.broadcast %cst_121 : f32 to vector<16x16xf32>
    %347 = arith.select %344, %345, %346 : vector<16x16xi1>, vector<16x16xf32>
    %348 = math.absf %342 : vector<16x16xf32>
    %cst_122 = arith.constant 0.327591091 : f32
    %349 = vector.broadcast %cst_122 : f32 to vector<16x16xf32>
    %350 = arith.mulf %349, %348 : vector<16x16xf32>
    %cst_123 = arith.constant 1.000000e+00 : f32
    %351 = vector.broadcast %cst_123 : f32 to vector<16x16xf32>
    %352 = arith.addf %351, %350 : vector<16x16xf32>
    %353 = tpu.reciprocal %352 {approx = true} : vector<16x16xf32> -> vector<16x16xf32>
    %354 = arith.mulf %352, %353 : vector<16x16xf32>
    %cst_124 = arith.constant 2.000000e+00 : f32
    %355 = vector.broadcast %cst_124 : f32 to vector<16x16xf32>
    %356 = arith.subf %355, %354 : vector<16x16xf32>
    %357 = arith.mulf %353, %356 : vector<16x16xf32>
    %cst_125 = arith.constant 1.06140542 : f32
    %358 = vector.broadcast %cst_125 : f32 to vector<16x16xf32>
    %359 = arith.mulf %358, %357 : vector<16x16xf32>
    %cst_126 = arith.constant -1.45315206 : f32
    %360 = vector.broadcast %cst_126 : f32 to vector<16x16xf32>
    %361 = arith.addf %359, %360 : vector<16x16xf32>
    %362 = arith.mulf %361, %357 : vector<16x16xf32>
    %cst_127 = arith.constant 1.42141378 : f32
    %363 = vector.broadcast %cst_127 : f32 to vector<16x16xf32>
    %364 = arith.addf %362, %363 : vector<16x16xf32>
    %365 = arith.mulf %364, %357 : vector<16x16xf32>
    %cst_128 = arith.constant -0.284496725 : f32
    %366 = vector.broadcast %cst_128 : f32 to vector<16x16xf32>
    %367 = arith.addf %365, %366 : vector<16x16xf32>
    %368 = arith.mulf %367, %357 : vector<16x16xf32>
    %cst_129 = arith.constant 0.254829586 : f32
    %369 = vector.broadcast %cst_129 : f32 to vector<16x16xf32>
    %370 = arith.addf %368, %369 : vector<16x16xf32>
    %371 = arith.mulf %370, %357 : vector<16x16xf32>
    %cst_130 = arith.constant 0.000000e+00 : f32
    %372 = vector.broadcast %cst_130 : f32 to vector<16x16xf32>
    %373 = arith.subf %372, %348 : vector<16x16xf32>
    %374 = arith.mulf %373, %348 : vector<16x16xf32>
    %375 = math.exp %374 : vector<16x16xf32>
    %376 = arith.mulf %371, %375 : vector<16x16xf32>
    %cst_131 = arith.constant 1.000000e+00 : f32
    %377 = vector.broadcast %cst_131 : f32 to vector<16x16xf32>
    %378 = arith.subf %377, %376 : vector<16x16xf32>
    %379 = arith.mulf %347, %378 : vector<16x16xf32>
    %cst_132 = arith.constant 5.000000e-01 : f32
    %380 = vector.broadcast %cst_132 : f32 to vector<16x16xf32>
    %381 = arith.mulf %380, %340 : vector<16x16xf32>
    %cst_133 = arith.constant 1.000000e+00 : f32
    %382 = vector.broadcast %cst_133 : f32 to vector<16x16xf32>
    %383 = arith.addf %382, %379 : vector<16x16xf32>
    %384 = arith.mulf %381, %383 : vector<16x16xf32>
    %cst_134 = arith.constant 0.000000e+00 : f32
    %385 = vector.shape_cast %5 : vector<1x16xi1> to vector<1x16xi1>
    %386 = vector.broadcast %385 : vector<1x16xi1> to vector<16x16xi1>
    %387 = vector.broadcast %cst_134 : f32 to vector<16x16xf32>
    %388 = arith.select %386, %384, %387 : vector<16x16xi1>, vector<16x16xf32>
    %c0_135 = arith.constant 0 : index
    %c2_136 = arith.constant 2 : index
    %c0_137 = arith.constant 0 : index
    %c0_138 = arith.constant 0 : index
    %389 = vector.load %arg3[%c0_135, %c2_136, %c0_137, %c0_138] : memref<1x4x16x4xf32, #tpu.memory_space<vmem>>, vector<1x1x16x4xf32>
    %390 = vector.shape_cast %389 : vector<1x1x16x4xf32> to vector<16x4xf32>
    %cst_139 = arith.constant dense<0.000000e+00> : vector<4xf32>
    %391 = vector.multi_reduction <add>, %390, %cst_139 [0] : vector<16x4xf32> to vector<4xf32>
    %392 = vector.shape_cast %391 : vector<4xf32> to vector<1x4xf32>
    %cst_140 = arith.constant 1.600000e+01 : f32
    %393 = vector.broadcast %cst_140 : f32 to vector<1x4xf32>
    %394 = arith.divf %392, %393 : vector<1x4xf32>
    %395 = vector.broadcast %394 : vector<1x4xf32> to vector<16x4xf32>
    %396 = arith.subf %390, %395 : vector<16x4xf32>
    %397 = arith.mulf %396, %396 : vector<16x4xf32>
    %cst_141 = arith.constant dense<0.000000e+00> : vector<4xf32>
    %398 = vector.multi_reduction <add>, %397, %cst_141 [0] : vector<16x4xf32> to vector<4xf32>
    %399 = vector.shape_cast %398 : vector<4xf32> to vector<1x4xf32>
    %cst_142 = arith.constant 1.600000e+01 : f32
    %400 = vector.broadcast %cst_142 : f32 to vector<1x4xf32>
    %401 = arith.divf %399, %400 : vector<1x4xf32>
    %cst_143 = arith.constant 9.99999974E-6 : f32
    %402 = vector.broadcast %cst_143 : f32 to vector<1x4xf32>
    %403 = arith.addf %401, %402 : vector<1x4xf32>
    %404 = math.rsqrt %403 : vector<1x4xf32>
    %405 = vector.broadcast %404 : vector<1x4xf32> to vector<16x4xf32>
    %406 = arith.mulf %396, %405 : vector<16x4xf32>
    %407 = vector.broadcast %33 : vector<16x1xf32> to vector<16x4xf32>
    %408 = arith.mulf %406, %407 : vector<16x4xf32>
    %409 = vector.broadcast %34 : vector<16x1xf32> to vector<16x4xf32>
    %410 = arith.addf %408, %409 : vector<16x4xf32>
    %cst_144 = arith.constant 0.707106769 : f32
    %411 = vector.broadcast %cst_144 : f32 to vector<16x4xf32>
    %412 = arith.mulf %410, %411 : vector<16x4xf32>
    %cst_145 = arith.constant 0.000000e+00 : f32
    %413 = vector.broadcast %cst_145 : f32 to vector<16x4xf32>
    %414 = arith.cmpf oge, %412, %413 : vector<16x4xf32>
    %cst_146 = arith.constant 1.000000e+00 : f32
    %cst_147 = arith.constant -1.000000e+00 : f32
    %415 = vector.broadcast %cst_146 : f32 to vector<16x4xf32>
    %416 = vector.broadcast %cst_147 : f32 to vector<16x4xf32>
    %417 = arith.select %414, %415, %416 : vector<16x4xi1>, vector<16x4xf32>
    %418 = math.absf %412 : vector<16x4xf32>
    %cst_148 = arith.constant 0.327591091 : f32
    %419 = vector.broadcast %cst_148 : f32 to vector<16x4xf32>
    %420 = arith.mulf %419, %418 : vector<16x4xf32>
    %cst_149 = arith.constant 1.000000e+00 : f32
    %421 = vector.broadcast %cst_149 : f32 to vector<16x4xf32>
    %422 = arith.addf %421, %420 : vector<16x4xf32>
    %423 = tpu.reciprocal %422 {approx = true} : vector<16x4xf32> -> vector<16x4xf32>
    %424 = arith.mulf %422, %423 : vector<16x4xf32>
    %cst_150 = arith.constant 2.000000e+00 : f32
    %425 = vector.broadcast %cst_150 : f32 to vector<16x4xf32>
    %426 = arith.subf %425, %424 : vector<16x4xf32>
    %427 = arith.mulf %423, %426 : vector<16x4xf32>
    %cst_151 = arith.constant 1.06140542 : f32
    %428 = vector.broadcast %cst_151 : f32 to vector<16x4xf32>
    %429 = arith.mulf %428, %427 : vector<16x4xf32>
    %cst_152 = arith.constant -1.45315206 : f32
    %430 = vector.broadcast %cst_152 : f32 to vector<16x4xf32>
    %431 = arith.addf %429, %430 : vector<16x4xf32>
    %432 = arith.mulf %431, %427 : vector<16x4xf32>
    %cst_153 = arith.constant 1.42141378 : f32
    %433 = vector.broadcast %cst_153 : f32 to vector<16x4xf32>
    %434 = arith.addf %432, %433 : vector<16x4xf32>
    %435 = arith.mulf %434, %427 : vector<16x4xf32>
    %cst_154 = arith.constant -0.284496725 : f32
    %436 = vector.broadcast %cst_154 : f32 to vector<16x4xf32>
    %437 = arith.addf %435, %436 : vector<16x4xf32>
    %438 = arith.mulf %437, %427 : vector<16x4xf32>
    %cst_155 = arith.constant 0.254829586 : f32
    %439 = vector.broadcast %cst_155 : f32 to vector<16x4xf32>
    %440 = arith.addf %438, %439 : vector<16x4xf32>
    %441 = arith.mulf %440, %427 : vector<16x4xf32>
    %cst_156 = arith.constant 0.000000e+00 : f32
    %442 = vector.broadcast %cst_156 : f32 to vector<16x4xf32>
    %443 = arith.subf %442, %418 : vector<16x4xf32>
    %444 = arith.mulf %443, %418 : vector<16x4xf32>
    %445 = math.exp %444 : vector<16x4xf32>
    %446 = arith.mulf %441, %445 : vector<16x4xf32>
    %cst_157 = arith.constant 1.000000e+00 : f32
    %447 = vector.broadcast %cst_157 : f32 to vector<16x4xf32>
    %448 = arith.subf %447, %446 : vector<16x4xf32>
    %449 = arith.mulf %417, %448 : vector<16x4xf32>
    %cst_158 = arith.constant 5.000000e-01 : f32
    %450 = vector.broadcast %cst_158 : f32 to vector<16x4xf32>
    %451 = arith.mulf %450, %410 : vector<16x4xf32>
    %cst_159 = arith.constant 1.000000e+00 : f32
    %452 = vector.broadcast %cst_159 : f32 to vector<16x4xf32>
    %453 = arith.addf %452, %449 : vector<16x4xf32>
    %454 = arith.mulf %451, %453 : vector<16x4xf32>
    %cst_160 = arith.constant 0.000000e+00 : f32
    %455 = vector.shape_cast %22 : vector<1x4xi1> to vector<1x4xi1>
    %456 = vector.broadcast %455 : vector<1x4xi1> to vector<16x4xi1>
    %457 = vector.broadcast %cst_160 : f32 to vector<16x4xf32>
    %458 = arith.select %456, %454, %457 : vector<16x4xi1>, vector<16x4xf32>
    %c0_161 = arith.constant 0 : index
    %c3 = arith.constant 3 : index
    %c0_162 = arith.constant 0 : index
    %c0_163 = arith.constant 0 : index
    %459 = vector.load %arg2[%c0_161, %c3, %c0_162, %c0_163] : memref<1x4x16x16xf32, #tpu.memory_space<vmem>>, vector<1x1x16x16xf32>
    %460 = vector.shape_cast %459 : vector<1x1x16x16xf32> to vector<16x16xf32>
    %cst_164 = arith.constant dense<0.000000e+00> : vector<16xf32>
    %461 = vector.multi_reduction <add>, %460, %cst_164 [0] : vector<16x16xf32> to vector<16xf32>
    %462 = vector.shape_cast %461 : vector<16xf32> to vector<1x16xf32>
    %cst_165 = arith.constant 1.600000e+01 : f32
    %463 = vector.broadcast %cst_165 : f32 to vector<1x16xf32>
    %464 = arith.divf %462, %463 : vector<1x16xf32>
    %465 = vector.broadcast %464 : vector<1x16xf32> to vector<16x16xf32>
    %466 = arith.subf %460, %465 : vector<16x16xf32>
    %467 = arith.mulf %466, %466 : vector<16x16xf32>
    %cst_166 = arith.constant dense<0.000000e+00> : vector<16xf32>
    %468 = vector.multi_reduction <add>, %467, %cst_166 [0] : vector<16x16xf32> to vector<16xf32>
    %469 = vector.shape_cast %468 : vector<16xf32> to vector<1x16xf32>
    %cst_167 = arith.constant 1.600000e+01 : f32
    %470 = vector.broadcast %cst_167 : f32 to vector<1x16xf32>
    %471 = arith.divf %469, %470 : vector<1x16xf32>
    %cst_168 = arith.constant 9.99999974E-6 : f32
    %472 = vector.broadcast %cst_168 : f32 to vector<1x16xf32>
    %473 = arith.addf %471, %472 : vector<1x16xf32>
    %474 = math.rsqrt %473 : vector<1x16xf32>
    %475 = vector.broadcast %474 : vector<1x16xf32> to vector<16x16xf32>
    %476 = arith.mulf %466, %475 : vector<16x16xf32>
    %477 = arith.mulf %476, %38 : vector<16x16xf32>
    %478 = arith.addf %477, %40 : vector<16x16xf32>
    %cst_169 = arith.constant 0.707106769 : f32
    %479 = vector.broadcast %cst_169 : f32 to vector<16x16xf32>
    %480 = arith.mulf %478, %479 : vector<16x16xf32>
    %cst_170 = arith.constant 0.000000e+00 : f32
    %481 = vector.broadcast %cst_170 : f32 to vector<16x16xf32>
    %482 = arith.cmpf oge, %480, %481 : vector<16x16xf32>
    %cst_171 = arith.constant 1.000000e+00 : f32
    %cst_172 = arith.constant -1.000000e+00 : f32
    %483 = vector.broadcast %cst_171 : f32 to vector<16x16xf32>
    %484 = vector.broadcast %cst_172 : f32 to vector<16x16xf32>
    %485 = arith.select %482, %483, %484 : vector<16x16xi1>, vector<16x16xf32>
    %486 = math.absf %480 : vector<16x16xf32>
    %cst_173 = arith.constant 0.327591091 : f32
    %487 = vector.broadcast %cst_173 : f32 to vector<16x16xf32>
    %488 = arith.mulf %487, %486 : vector<16x16xf32>
    %cst_174 = arith.constant 1.000000e+00 : f32
    %489 = vector.broadcast %cst_174 : f32 to vector<16x16xf32>
    %490 = arith.addf %489, %488 : vector<16x16xf32>
    %491 = tpu.reciprocal %490 {approx = true} : vector<16x16xf32> -> vector<16x16xf32>
    %492 = arith.mulf %490, %491 : vector<16x16xf32>
    %cst_175 = arith.constant 2.000000e+00 : f32
    %493 = vector.broadcast %cst_175 : f32 to vector<16x16xf32>
    %494 = arith.subf %493, %492 : vector<16x16xf32>
    %495 = arith.mulf %491, %494 : vector<16x16xf32>
    %cst_176 = arith.constant 1.06140542 : f32
    %496 = vector.broadcast %cst_176 : f32 to vector<16x16xf32>
    %497 = arith.mulf %496, %495 : vector<16x16xf32>
    %cst_177 = arith.constant -1.45315206 : f32
    %498 = vector.broadcast %cst_177 : f32 to vector<16x16xf32>
    %499 = arith.addf %497, %498 : vector<16x16xf32>
    %500 = arith.mulf %499, %495 : vector<16x16xf32>
    %cst_178 = arith.constant 1.42141378 : f32
    %501 = vector.broadcast %cst_178 : f32 to vector<16x16xf32>
    %502 = arith.addf %500, %501 : vector<16x16xf32>
    %503 = arith.mulf %502, %495 : vector<16x16xf32>
    %cst_179 = arith.constant -0.284496725 : f32
    %504 = vector.broadcast %cst_179 : f32 to vector<16x16xf32>
    %505 = arith.addf %503, %504 : vector<16x16xf32>
    %506 = arith.mulf %505, %495 : vector<16x16xf32>
    %cst_180 = arith.constant 0.254829586 : f32
    %507 = vector.broadcast %cst_180 : f32 to vector<16x16xf32>
    %508 = arith.addf %506, %507 : vector<16x16xf32>
    %509 = arith.mulf %508, %495 : vector<16x16xf32>
    %cst_181 = arith.constant 0.000000e+00 : f32
    %510 = vector.broadcast %cst_181 : f32 to vector<16x16xf32>
    %511 = arith.subf %510, %486 : vector<16x16xf32>
    %512 = arith.mulf %511, %486 : vector<16x16xf32>
    %513 = math.exp %512 : vector<16x16xf32>
    %514 = arith.mulf %509, %513 : vector<16x16xf32>
    %cst_182 = arith.constant 1.000000e+00 : f32
    %515 = vector.broadcast %cst_182 : f32 to vector<16x16xf32>
    %516 = arith.subf %515, %514 : vector<16x16xf32>
    %517 = arith.mulf %485, %516 : vector<16x16xf32>
    %cst_183 = arith.constant 5.000000e-01 : f32
    %518 = vector.broadcast %cst_183 : f32 to vector<16x16xf32>
    %519 = arith.mulf %518, %478 : vector<16x16xf32>
    %cst_184 = arith.constant 1.000000e+00 : f32
    %520 = vector.broadcast %cst_184 : f32 to vector<16x16xf32>
    %521 = arith.addf %520, %517 : vector<16x16xf32>
    %522 = arith.mulf %519, %521 : vector<16x16xf32>
    %cst_185 = arith.constant 0.000000e+00 : f32
    %523 = vector.shape_cast %5 : vector<1x16xi1> to vector<1x16xi1>
    %524 = vector.broadcast %523 : vector<1x16xi1> to vector<16x16xi1>
    %525 = vector.broadcast %cst_185 : f32 to vector<16x16xf32>
    %526 = arith.select %524, %522, %525 : vector<16x16xi1>, vector<16x16xf32>
    %c0_186 = arith.constant 0 : index
    %c3_187 = arith.constant 3 : index
    %c0_188 = arith.constant 0 : index
    %c0_189 = arith.constant 0 : index
    %527 = vector.load %arg3[%c0_186, %c3_187, %c0_188, %c0_189] : memref<1x4x16x4xf32, #tpu.memory_space<vmem>>, vector<1x1x16x4xf32>
    %528 = vector.shape_cast %527 : vector<1x1x16x4xf32> to vector<16x4xf32>
    %cst_190 = arith.constant dense<0.000000e+00> : vector<4xf32>
    %529 = vector.multi_reduction <add>, %528, %cst_190 [0] : vector<16x4xf32> to vector<4xf32>
    %530 = vector.shape_cast %529 : vector<4xf32> to vector<1x4xf32>
    %cst_191 = arith.constant 1.600000e+01 : f32
    %531 = vector.broadcast %cst_191 : f32 to vector<1x4xf32>
    %532 = arith.divf %530, %531 : vector<1x4xf32>
    %533 = vector.broadcast %532 : vector<1x4xf32> to vector<16x4xf32>
    %534 = arith.subf %528, %533 : vector<16x4xf32>
    %535 = arith.mulf %534, %534 : vector<16x4xf32>
    %cst_192 = arith.constant dense<0.000000e+00> : vector<4xf32>
    %536 = vector.multi_reduction <add>, %535, %cst_192 [0] : vector<16x4xf32> to vector<4xf32>
    %537 = vector.shape_cast %536 : vector<4xf32> to vector<1x4xf32>
    %cst_193 = arith.constant 1.600000e+01 : f32
    %538 = vector.broadcast %cst_193 : f32 to vector<1x4xf32>
    %539 = arith.divf %537, %538 : vector<1x4xf32>
    %cst_194 = arith.constant 9.99999974E-6 : f32
    %540 = vector.broadcast %cst_194 : f32 to vector<1x4xf32>
    %541 = arith.addf %539, %540 : vector<1x4xf32>
    %542 = math.rsqrt %541 : vector<1x4xf32>
    %543 = vector.broadcast %542 : vector<1x4xf32> to vector<16x4xf32>
    %544 = arith.mulf %534, %543 : vector<16x4xf32>
    %545 = vector.broadcast %33 : vector<16x1xf32> to vector<16x4xf32>
    %546 = arith.mulf %544, %545 : vector<16x4xf32>
    %547 = vector.broadcast %34 : vector<16x1xf32> to vector<16x4xf32>
    %548 = arith.addf %546, %547 : vector<16x4xf32>
    %cst_195 = arith.constant 0.707106769 : f32
    %549 = vector.broadcast %cst_195 : f32 to vector<16x4xf32>
    %550 = arith.mulf %548, %549 : vector<16x4xf32>
    %cst_196 = arith.constant 0.000000e+00 : f32
    %551 = vector.broadcast %cst_196 : f32 to vector<16x4xf32>
    %552 = arith.cmpf oge, %550, %551 : vector<16x4xf32>
    %cst_197 = arith.constant 1.000000e+00 : f32
    %cst_198 = arith.constant -1.000000e+00 : f32
    %553 = vector.broadcast %cst_197 : f32 to vector<16x4xf32>
    %554 = vector.broadcast %cst_198 : f32 to vector<16x4xf32>
    %555 = arith.select %552, %553, %554 : vector<16x4xi1>, vector<16x4xf32>
    %556 = math.absf %550 : vector<16x4xf32>
    %cst_199 = arith.constant 0.327591091 : f32
    %557 = vector.broadcast %cst_199 : f32 to vector<16x4xf32>
    %558 = arith.mulf %557, %556 : vector<16x4xf32>
    %cst_200 = arith.constant 1.000000e+00 : f32
    %559 = vector.broadcast %cst_200 : f32 to vector<16x4xf32>
    %560 = arith.addf %559, %558 : vector<16x4xf32>
    %561 = tpu.reciprocal %560 {approx = true} : vector<16x4xf32> -> vector<16x4xf32>
    %562 = arith.mulf %560, %561 : vector<16x4xf32>
    %cst_201 = arith.constant 2.000000e+00 : f32
    %563 = vector.broadcast %cst_201 : f32 to vector<16x4xf32>
    %564 = arith.subf %563, %562 : vector<16x4xf32>
    %565 = arith.mulf %561, %564 : vector<16x4xf32>
    %cst_202 = arith.constant 1.06140542 : f32
    %566 = vector.broadcast %cst_202 : f32 to vector<16x4xf32>
    %567 = arith.mulf %566, %565 : vector<16x4xf32>
    %cst_203 = arith.constant -1.45315206 : f32
    %568 = vector.broadcast %cst_203 : f32 to vector<16x4xf32>
    %569 = arith.addf %567, %568 : vector<16x4xf32>
    %570 = arith.mulf %569, %565 : vector<16x4xf32>
    %cst_204 = arith.constant 1.42141378 : f32
    %571 = vector.broadcast %cst_204 : f32 to vector<16x4xf32>
    %572 = arith.addf %570, %571 : vector<16x4xf32>
    %573 = arith.mulf %572, %565 : vector<16x4xf32>
    %cst_205 = arith.constant -0.284496725 : f32
    %574 = vector.broadcast %cst_205 : f32 to vector<16x4xf32>
    %575 = arith.addf %573, %574 : vector<16x4xf32>
    %576 = arith.mulf %575, %565 : vector<16x4xf32>
    %cst_206 = arith.constant 0.254829586 : f32
    %577 = vector.broadcast %cst_206 : f32 to vector<16x4xf32>
    %578 = arith.addf %576, %577 : vector<16x4xf32>
    %579 = arith.mulf %578, %565 : vector<16x4xf32>
    %cst_207 = arith.constant 0.000000e+00 : f32
    %580 = vector.broadcast %cst_207 : f32 to vector<16x4xf32>
    %581 = arith.subf %580, %556 : vector<16x4xf32>
    %582 = arith.mulf %581, %556 : vector<16x4xf32>
    %583 = math.exp %582 : vector<16x4xf32>
    %584 = arith.mulf %579, %583 : vector<16x4xf32>
    %cst_208 = arith.constant 1.000000e+00 : f32
    %585 = vector.broadcast %cst_208 : f32 to vector<16x4xf32>
    %586 = arith.subf %585, %584 : vector<16x4xf32>
    %587 = arith.mulf %555, %586 : vector<16x4xf32>
    %cst_209 = arith.constant 5.000000e-01 : f32
    %588 = vector.broadcast %cst_209 : f32 to vector<16x4xf32>
    %589 = arith.mulf %588, %548 : vector<16x4xf32>
    %cst_210 = arith.constant 1.000000e+00 : f32
    %590 = vector.broadcast %cst_210 : f32 to vector<16x4xf32>
    %591 = arith.addf %590, %587 : vector<16x4xf32>
    %592 = arith.mulf %589, %591 : vector<16x4xf32>
    %cst_211 = arith.constant 0.000000e+00 : f32
    %593 = vector.shape_cast %22 : vector<1x4xi1> to vector<1x4xi1>
    %594 = vector.broadcast %593 : vector<1x4xi1> to vector<16x4xi1>
    %595 = vector.broadcast %cst_211 : f32 to vector<16x4xf32>
    %596 = arith.select %594, %592, %595 : vector<16x4xi1>, vector<16x4xf32>
    %597 = vector.extract_strided_slice %182 {offsets = [0, 0], sizes = [16, 2], strides = [1, 1]} : vector<16x4xf32> to vector<16x2xf32>
    %598 = tpu.concatenate %597, %112 in 1 : vector<16x2xf32>, vector<16x16xf32> -> vector<16x18xf32>
    %599 = vector.extract_strided_slice %182 {offsets = [0, 1], sizes = [16, 1], strides = [1, 1]} : vector<16x4xf32> to vector<16x1xf32>
    %600 = vector.extract_strided_slice %182 {offsets = [0, 2], sizes = [16, 1], strides = [1, 1]} : vector<16x4xf32> to vector<16x1xf32>
    %601 = tpu.concatenate %599, %112, %600 in 1 : vector<16x1xf32>, vector<16x16xf32>, vector<16x1xf32> -> vector<16x18xf32>
    %602 = vector.extract_strided_slice %182 {offsets = [0, 2], sizes = [16, 2], strides = [1, 1]} : vector<16x4xf32> to vector<16x2xf32>
    %603 = tpu.concatenate %112, %602 in 1 : vector<16x16xf32>, vector<16x2xf32> -> vector<16x18xf32>
    %604 = vector.extract_strided_slice %320 {offsets = [0, 0], sizes = [16, 2], strides = [1, 1]} : vector<16x4xf32> to vector<16x2xf32>
    %605 = tpu.concatenate %604, %250 in 1 : vector<16x2xf32>, vector<16x16xf32> -> vector<16x18xf32>
    %606 = vector.extract_strided_slice %320 {offsets = [0, 1], sizes = [16, 1], strides = [1, 1]} : vector<16x4xf32> to vector<16x1xf32>
    %607 = vector.extract_strided_slice %320 {offsets = [0, 2], sizes = [16, 1], strides = [1, 1]} : vector<16x4xf32> to vector<16x1xf32>
    %608 = tpu.concatenate %606, %250, %607 in 1 : vector<16x1xf32>, vector<16x16xf32>, vector<16x1xf32> -> vector<16x18xf32>
    %609 = vector.extract_strided_slice %320 {offsets = [0, 2], sizes = [16, 2], strides = [1, 1]} : vector<16x4xf32> to vector<16x2xf32>
    %610 = tpu.concatenate %250, %609 in 1 : vector<16x16xf32>, vector<16x2xf32> -> vector<16x18xf32>
    %611 = vector.extract_strided_slice %458 {offsets = [0, 0], sizes = [16, 2], strides = [1, 1]} : vector<16x4xf32> to vector<16x2xf32>
    %612 = tpu.concatenate %611, %388 in 1 : vector<16x2xf32>, vector<16x16xf32> -> vector<16x18xf32>
    %613 = vector.extract_strided_slice %458 {offsets = [0, 1], sizes = [16, 1], strides = [1, 1]} : vector<16x4xf32> to vector<16x1xf32>
    %614 = vector.extract_strided_slice %458 {offsets = [0, 2], sizes = [16, 1], strides = [1, 1]} : vector<16x4xf32> to vector<16x1xf32>
    %615 = tpu.concatenate %613, %388, %614 in 1 : vector<16x1xf32>, vector<16x16xf32>, vector<16x1xf32> -> vector<16x18xf32>
    %616 = vector.extract_strided_slice %458 {offsets = [0, 2], sizes = [16, 2], strides = [1, 1]} : vector<16x4xf32> to vector<16x2xf32>
    %617 = tpu.concatenate %388, %616 in 1 : vector<16x16xf32>, vector<16x2xf32> -> vector<16x18xf32>
    %618 = vector.extract_strided_slice %596 {offsets = [0, 0], sizes = [16, 2], strides = [1, 1]} : vector<16x4xf32> to vector<16x2xf32>
    %619 = tpu.concatenate %618, %526 in 1 : vector<16x2xf32>, vector<16x16xf32> -> vector<16x18xf32>
    %620 = vector.extract_strided_slice %596 {offsets = [0, 1], sizes = [16, 1], strides = [1, 1]} : vector<16x4xf32> to vector<16x1xf32>
    %621 = vector.extract_strided_slice %596 {offsets = [0, 2], sizes = [16, 1], strides = [1, 1]} : vector<16x4xf32> to vector<16x1xf32>
    %622 = tpu.concatenate %620, %526, %621 in 1 : vector<16x1xf32>, vector<16x16xf32>, vector<16x1xf32> -> vector<16x18xf32>
    %623 = vector.extract_strided_slice %596 {offsets = [0, 2], sizes = [16, 2], strides = [1, 1]} : vector<16x4xf32> to vector<16x2xf32>
    %624 = tpu.concatenate %526, %623 in 1 : vector<16x16xf32>, vector<16x2xf32> -> vector<16x18xf32>
    %cst_212 = arith.constant 0.000000e+00 : f32
    %625 = vector.broadcast %cst_212 : f32 to vector<1x18xf32>
    %c0_213 = arith.constant 0 : index
    %626 = memref.load %arg5[%c0_213] : memref<144xf32, #tpu.memory_space<smem>>
    %627 = vector.broadcast %626 : f32 to vector<16x18xf32>
    %628 = arith.mulf %627, %598 : vector<16x18xf32>
    %c1_214 = arith.constant 1 : index
    %629 = memref.load %arg5[%c1_214] : memref<144xf32, #tpu.memory_space<smem>>
    %630 = vector.broadcast %629 : f32 to vector<16x18xf32>
    %631 = arith.mulf %630, %601 : vector<16x18xf32>
    %632 = arith.addf %628, %631 : vector<16x18xf32>
    %c2_215 = arith.constant 2 : index
    %633 = memref.load %arg5[%c2_215] : memref<144xf32, #tpu.memory_space<smem>>
    %634 = vector.broadcast %633 : f32 to vector<16x18xf32>
    %635 = arith.mulf %634, %603 : vector<16x18xf32>
    %636 = arith.addf %632, %635 : vector<16x18xf32>
    %c9 = arith.constant 9 : index
    %637 = memref.load %arg5[%c9] : memref<144xf32, #tpu.memory_space<smem>>
    %638 = vector.broadcast %637 : f32 to vector<16x18xf32>
    %639 = arith.mulf %638, %605 : vector<16x18xf32>
    %640 = arith.addf %636, %639 : vector<16x18xf32>
    %c10 = arith.constant 10 : index
    %641 = memref.load %arg5[%c10] : memref<144xf32, #tpu.memory_space<smem>>
    %642 = vector.broadcast %641 : f32 to vector<16x18xf32>
    %643 = arith.mulf %642, %608 : vector<16x18xf32>
    %644 = arith.addf %640, %643 : vector<16x18xf32>
    %c11 = arith.constant 11 : index
    %645 = memref.load %arg5[%c11] : memref<144xf32, #tpu.memory_space<smem>>
    %646 = vector.broadcast %645 : f32 to vector<16x18xf32>
    %647 = arith.mulf %646, %610 : vector<16x18xf32>
    %648 = arith.addf %644, %647 : vector<16x18xf32>
    %c18 = arith.constant 18 : index
    %649 = memref.load %arg5[%c18] : memref<144xf32, #tpu.memory_space<smem>>
    %650 = vector.broadcast %649 : f32 to vector<16x18xf32>
    %651 = arith.mulf %650, %612 : vector<16x18xf32>
    %652 = arith.addf %648, %651 : vector<16x18xf32>
    %c19 = arith.constant 19 : index
    %653 = memref.load %arg5[%c19] : memref<144xf32, #tpu.memory_space<smem>>
    %654 = vector.broadcast %653 : f32 to vector<16x18xf32>
    %655 = arith.mulf %654, %615 : vector<16x18xf32>
    %656 = arith.addf %652, %655 : vector<16x18xf32>
    %c20 = arith.constant 20 : index
    %657 = memref.load %arg5[%c20] : memref<144xf32, #tpu.memory_space<smem>>
    %658 = vector.broadcast %657 : f32 to vector<16x18xf32>
    %659 = arith.mulf %658, %617 : vector<16x18xf32>
    %660 = arith.addf %656, %659 : vector<16x18xf32>
    %c27 = arith.constant 27 : index
    %661 = memref.load %arg5[%c27] : memref<144xf32, #tpu.memory_space<smem>>
    %662 = vector.broadcast %661 : f32 to vector<16x18xf32>
    %663 = arith.mulf %662, %619 : vector<16x18xf32>
    %664 = arith.addf %660, %663 : vector<16x18xf32>
    %c28 = arith.constant 28 : index
    %665 = memref.load %arg5[%c28] : memref<144xf32, #tpu.memory_space<smem>>
    %666 = vector.broadcast %665 : f32 to vector<16x18xf32>
    %667 = arith.mulf %666, %622 : vector<16x18xf32>
    %668 = arith.addf %664, %667 : vector<16x18xf32>
    %c29 = arith.constant 29 : index
    %669 = memref.load %arg5[%c29] : memref<144xf32, #tpu.memory_space<smem>>
    %670 = vector.broadcast %669 : f32 to vector<16x18xf32>
    %671 = arith.mulf %670, %624 : vector<16x18xf32>
    %672 = arith.addf %668, %671 : vector<16x18xf32>
    %673 = vector.extract_strided_slice %672 {offsets = [0, 0], sizes = [15, 18], strides = [1, 1]} : vector<16x18xf32> to vector<15x18xf32>
    %674 = tpu.concatenate %625, %673 in 0 : vector<1x18xf32>, vector<15x18xf32> -> vector<16x18xf32>
    %c3_216 = arith.constant 3 : index
    %675 = memref.load %arg5[%c3_216] : memref<144xf32, #tpu.memory_space<smem>>
    %676 = vector.broadcast %675 : f32 to vector<16x18xf32>
    %677 = arith.mulf %676, %598 : vector<16x18xf32>
    %c4 = arith.constant 4 : index
    %678 = memref.load %arg5[%c4] : memref<144xf32, #tpu.memory_space<smem>>
    %679 = vector.broadcast %678 : f32 to vector<16x18xf32>
    %680 = arith.mulf %679, %601 : vector<16x18xf32>
    %681 = arith.addf %677, %680 : vector<16x18xf32>
    %c5 = arith.constant 5 : index
    %682 = memref.load %arg5[%c5] : memref<144xf32, #tpu.memory_space<smem>>
    %683 = vector.broadcast %682 : f32 to vector<16x18xf32>
    %684 = arith.mulf %683, %603 : vector<16x18xf32>
    %685 = arith.addf %681, %684 : vector<16x18xf32>
    %c12 = arith.constant 12 : index
    %686 = memref.load %arg5[%c12] : memref<144xf32, #tpu.memory_space<smem>>
    %687 = vector.broadcast %686 : f32 to vector<16x18xf32>
    %688 = arith.mulf %687, %605 : vector<16x18xf32>
    %689 = arith.addf %685, %688 : vector<16x18xf32>
    %c13 = arith.constant 13 : index
    %690 = memref.load %arg5[%c13] : memref<144xf32, #tpu.memory_space<smem>>
    %691 = vector.broadcast %690 : f32 to vector<16x18xf32>
    %692 = arith.mulf %691, %608 : vector<16x18xf32>
    %693 = arith.addf %689, %692 : vector<16x18xf32>
    %c14 = arith.constant 14 : index
    %694 = memref.load %arg5[%c14] : memref<144xf32, #tpu.memory_space<smem>>
    %695 = vector.broadcast %694 : f32 to vector<16x18xf32>
    %696 = arith.mulf %695, %610 : vector<16x18xf32>
    %697 = arith.addf %693, %696 : vector<16x18xf32>
    %c21 = arith.constant 21 : index
    %698 = memref.load %arg5[%c21] : memref<144xf32, #tpu.memory_space<smem>>
    %699 = vector.broadcast %698 : f32 to vector<16x18xf32>
    %700 = arith.mulf %699, %612 : vector<16x18xf32>
    %701 = arith.addf %697, %700 : vector<16x18xf32>
    %c22 = arith.constant 22 : index
    %702 = memref.load %arg5[%c22] : memref<144xf32, #tpu.memory_space<smem>>
    %703 = vector.broadcast %702 : f32 to vector<16x18xf32>
    %704 = arith.mulf %703, %615 : vector<16x18xf32>
    %705 = arith.addf %701, %704 : vector<16x18xf32>
    %c23 = arith.constant 23 : index
    %706 = memref.load %arg5[%c23] : memref<144xf32, #tpu.memory_space<smem>>
    %707 = vector.broadcast %706 : f32 to vector<16x18xf32>
    %708 = arith.mulf %707, %617 : vector<16x18xf32>
    %709 = arith.addf %705, %708 : vector<16x18xf32>
    %c30 = arith.constant 30 : index
    %710 = memref.load %arg5[%c30] : memref<144xf32, #tpu.memory_space<smem>>
    %711 = vector.broadcast %710 : f32 to vector<16x18xf32>
    %712 = arith.mulf %711, %619 : vector<16x18xf32>
    %713 = arith.addf %709, %712 : vector<16x18xf32>
    %c31 = arith.constant 31 : index
    %714 = memref.load %arg5[%c31] : memref<144xf32, #tpu.memory_space<smem>>
    %715 = vector.broadcast %714 : f32 to vector<16x18xf32>
    %716 = arith.mulf %715, %622 : vector<16x18xf32>
    %717 = arith.addf %713, %716 : vector<16x18xf32>
    %c32 = arith.constant 32 : index
    %718 = memref.load %arg5[%c32] : memref<144xf32, #tpu.memory_space<smem>>
    %719 = vector.broadcast %718 : f32 to vector<16x18xf32>
    %720 = arith.mulf %719, %624 : vector<16x18xf32>
    %721 = arith.addf %717, %720 : vector<16x18xf32>
    %722 = arith.addf %674, %721 : vector<16x18xf32>
    %c6 = arith.constant 6 : index
    %723 = memref.load %arg5[%c6] : memref<144xf32, #tpu.memory_space<smem>>
    %724 = vector.broadcast %723 : f32 to vector<16x18xf32>
    %725 = arith.mulf %724, %598 : vector<16x18xf32>
    %c7 = arith.constant 7 : index
    %726 = memref.load %arg5[%c7] : memref<144xf32, #tpu.memory_space<smem>>
    %727 = vector.broadcast %726 : f32 to vector<16x18xf32>
    %728 = arith.mulf %727, %601 : vector<16x18xf32>
    %729 = arith.addf %725, %728 : vector<16x18xf32>
    %c8 = arith.constant 8 : index
    %730 = memref.load %arg5[%c8] : memref<144xf32, #tpu.memory_space<smem>>
    %731 = vector.broadcast %730 : f32 to vector<16x18xf32>
    %732 = arith.mulf %731, %603 : vector<16x18xf32>
    %733 = arith.addf %729, %732 : vector<16x18xf32>
    %c15 = arith.constant 15 : index
    %734 = memref.load %arg5[%c15] : memref<144xf32, #tpu.memory_space<smem>>
    %735 = vector.broadcast %734 : f32 to vector<16x18xf32>
    %736 = arith.mulf %735, %605 : vector<16x18xf32>
    %737 = arith.addf %733, %736 : vector<16x18xf32>
    %c16 = arith.constant 16 : index
    %738 = memref.load %arg5[%c16] : memref<144xf32, #tpu.memory_space<smem>>
    %739 = vector.broadcast %738 : f32 to vector<16x18xf32>
    %740 = arith.mulf %739, %608 : vector<16x18xf32>
    %741 = arith.addf %737, %740 : vector<16x18xf32>
    %c17 = arith.constant 17 : index
    %742 = memref.load %arg5[%c17] : memref<144xf32, #tpu.memory_space<smem>>
    %743 = vector.broadcast %742 : f32 to vector<16x18xf32>
    %744 = arith.mulf %743, %610 : vector<16x18xf32>
    %745 = arith.addf %741, %744 : vector<16x18xf32>
    %c24 = arith.constant 24 : index
    %746 = memref.load %arg5[%c24] : memref<144xf32, #tpu.memory_space<smem>>
    %747 = vector.broadcast %746 : f32 to vector<16x18xf32>
    %748 = arith.mulf %747, %612 : vector<16x18xf32>
    %749 = arith.addf %745, %748 : vector<16x18xf32>
    %c25 = arith.constant 25 : index
    %750 = memref.load %arg5[%c25] : memref<144xf32, #tpu.memory_space<smem>>
    %751 = vector.broadcast %750 : f32 to vector<16x18xf32>
    %752 = arith.mulf %751, %615 : vector<16x18xf32>
    %753 = arith.addf %749, %752 : vector<16x18xf32>
    %c26 = arith.constant 26 : index
    %754 = memref.load %arg5[%c26] : memref<144xf32, #tpu.memory_space<smem>>
    %755 = vector.broadcast %754 : f32 to vector<16x18xf32>
    %756 = arith.mulf %755, %617 : vector<16x18xf32>
    %757 = arith.addf %753, %756 : vector<16x18xf32>
    %c33 = arith.constant 33 : index
    %758 = memref.load %arg5[%c33] : memref<144xf32, #tpu.memory_space<smem>>
    %759 = vector.broadcast %758 : f32 to vector<16x18xf32>
    %760 = arith.mulf %759, %619 : vector<16x18xf32>
    %761 = arith.addf %757, %760 : vector<16x18xf32>
    %c34 = arith.constant 34 : index
    %762 = memref.load %arg5[%c34] : memref<144xf32, #tpu.memory_space<smem>>
    %763 = vector.broadcast %762 : f32 to vector<16x18xf32>
    %764 = arith.mulf %763, %622 : vector<16x18xf32>
    %765 = arith.addf %761, %764 : vector<16x18xf32>
    %c35 = arith.constant 35 : index
    %766 = memref.load %arg5[%c35] : memref<144xf32, #tpu.memory_space<smem>>
    %767 = vector.broadcast %766 : f32 to vector<16x18xf32>
    %768 = arith.mulf %767, %624 : vector<16x18xf32>
    %769 = arith.addf %765, %768 : vector<16x18xf32>
    %770 = vector.extract_strided_slice %769 {offsets = [1, 0], sizes = [15, 18], strides = [1, 1]} : vector<16x18xf32> to vector<15x18xf32>
    %771 = tpu.concatenate %770, %625 in 0 : vector<15x18xf32>, vector<1x18xf32> -> vector<16x18xf32>
    %772 = arith.addf %722, %771 : vector<16x18xf32>
    %c0_217 = arith.constant 0 : index
    %773 = memref.load %arg6[%c0_217] : memref<4xf32, #tpu.memory_space<smem>>
    %774 = vector.broadcast %773 : f32 to vector<16x18xf32>
    %775 = arith.addf %772, %774 : vector<16x18xf32>
    %c36 = arith.constant 36 : index
    %776 = memref.load %arg5[%c36] : memref<144xf32, #tpu.memory_space<smem>>
    %777 = vector.broadcast %776 : f32 to vector<16x18xf32>
    %778 = arith.mulf %777, %598 : vector<16x18xf32>
    %c37 = arith.constant 37 : index
    %779 = memref.load %arg5[%c37] : memref<144xf32, #tpu.memory_space<smem>>
    %780 = vector.broadcast %779 : f32 to vector<16x18xf32>
    %781 = arith.mulf %780, %601 : vector<16x18xf32>
    %782 = arith.addf %778, %781 : vector<16x18xf32>
    %c38 = arith.constant 38 : index
    %783 = memref.load %arg5[%c38] : memref<144xf32, #tpu.memory_space<smem>>
    %784 = vector.broadcast %783 : f32 to vector<16x18xf32>
    %785 = arith.mulf %784, %603 : vector<16x18xf32>
    %786 = arith.addf %782, %785 : vector<16x18xf32>
    %c45 = arith.constant 45 : index
    %787 = memref.load %arg5[%c45] : memref<144xf32, #tpu.memory_space<smem>>
    %788 = vector.broadcast %787 : f32 to vector<16x18xf32>
    %789 = arith.mulf %788, %605 : vector<16x18xf32>
    %790 = arith.addf %786, %789 : vector<16x18xf32>
    %c46 = arith.constant 46 : index
    %791 = memref.load %arg5[%c46] : memref<144xf32, #tpu.memory_space<smem>>
    %792 = vector.broadcast %791 : f32 to vector<16x18xf32>
    %793 = arith.mulf %792, %608 : vector<16x18xf32>
    %794 = arith.addf %790, %793 : vector<16x18xf32>
    %c47 = arith.constant 47 : index
    %795 = memref.load %arg5[%c47] : memref<144xf32, #tpu.memory_space<smem>>
    %796 = vector.broadcast %795 : f32 to vector<16x18xf32>
    %797 = arith.mulf %796, %610 : vector<16x18xf32>
    %798 = arith.addf %794, %797 : vector<16x18xf32>
    %c54 = arith.constant 54 : index
    %799 = memref.load %arg5[%c54] : memref<144xf32, #tpu.memory_space<smem>>
    %800 = vector.broadcast %799 : f32 to vector<16x18xf32>
    %801 = arith.mulf %800, %612 : vector<16x18xf32>
    %802 = arith.addf %798, %801 : vector<16x18xf32>
    %c55 = arith.constant 55 : index
    %803 = memref.load %arg5[%c55] : memref<144xf32, #tpu.memory_space<smem>>
    %804 = vector.broadcast %803 : f32 to vector<16x18xf32>
    %805 = arith.mulf %804, %615 : vector<16x18xf32>
    %806 = arith.addf %802, %805 : vector<16x18xf32>
    %c56 = arith.constant 56 : index
    %807 = memref.load %arg5[%c56] : memref<144xf32, #tpu.memory_space<smem>>
    %808 = vector.broadcast %807 : f32 to vector<16x18xf32>
    %809 = arith.mulf %808, %617 : vector<16x18xf32>
    %810 = arith.addf %806, %809 : vector<16x18xf32>
    %c63 = arith.constant 63 : index
    %811 = memref.load %arg5[%c63] : memref<144xf32, #tpu.memory_space<smem>>
    %812 = vector.broadcast %811 : f32 to vector<16x18xf32>
    %813 = arith.mulf %812, %619 : vector<16x18xf32>
    %814 = arith.addf %810, %813 : vector<16x18xf32>
    %c64 = arith.constant 64 : index
    %815 = memref.load %arg5[%c64] : memref<144xf32, #tpu.memory_space<smem>>
    %816 = vector.broadcast %815 : f32 to vector<16x18xf32>
    %817 = arith.mulf %816, %622 : vector<16x18xf32>
    %818 = arith.addf %814, %817 : vector<16x18xf32>
    %c65 = arith.constant 65 : index
    %819 = memref.load %arg5[%c65] : memref<144xf32, #tpu.memory_space<smem>>
    %820 = vector.broadcast %819 : f32 to vector<16x18xf32>
    %821 = arith.mulf %820, %624 : vector<16x18xf32>
    %822 = arith.addf %818, %821 : vector<16x18xf32>
    %823 = vector.extract_strided_slice %822 {offsets = [0, 0], sizes = [15, 18], strides = [1, 1]} : vector<16x18xf32> to vector<15x18xf32>
    %824 = tpu.concatenate %625, %823 in 0 : vector<1x18xf32>, vector<15x18xf32> -> vector<16x18xf32>
    %c39 = arith.constant 39 : index
    %825 = memref.load %arg5[%c39] : memref<144xf32, #tpu.memory_space<smem>>
    %826 = vector.broadcast %825 : f32 to vector<16x18xf32>
    %827 = arith.mulf %826, %598 : vector<16x18xf32>
    %c40 = arith.constant 40 : index
    %828 = memref.load %arg5[%c40] : memref<144xf32, #tpu.memory_space<smem>>
    %829 = vector.broadcast %828 : f32 to vector<16x18xf32>
    %830 = arith.mulf %829, %601 : vector<16x18xf32>
    %831 = arith.addf %827, %830 : vector<16x18xf32>
    %c41 = arith.constant 41 : index
    %832 = memref.load %arg5[%c41] : memref<144xf32, #tpu.memory_space<smem>>
    %833 = vector.broadcast %832 : f32 to vector<16x18xf32>
    %834 = arith.mulf %833, %603 : vector<16x18xf32>
    %835 = arith.addf %831, %834 : vector<16x18xf32>
    %c48 = arith.constant 48 : index
    %836 = memref.load %arg5[%c48] : memref<144xf32, #tpu.memory_space<smem>>
    %837 = vector.broadcast %836 : f32 to vector<16x18xf32>
    %838 = arith.mulf %837, %605 : vector<16x18xf32>
    %839 = arith.addf %835, %838 : vector<16x18xf32>
    %c49 = arith.constant 49 : index
    %840 = memref.load %arg5[%c49] : memref<144xf32, #tpu.memory_space<smem>>
    %841 = vector.broadcast %840 : f32 to vector<16x18xf32>
    %842 = arith.mulf %841, %608 : vector<16x18xf32>
    %843 = arith.addf %839, %842 : vector<16x18xf32>
    %c50 = arith.constant 50 : index
    %844 = memref.load %arg5[%c50] : memref<144xf32, #tpu.memory_space<smem>>
    %845 = vector.broadcast %844 : f32 to vector<16x18xf32>
    %846 = arith.mulf %845, %610 : vector<16x18xf32>
    %847 = arith.addf %843, %846 : vector<16x18xf32>
    %c57 = arith.constant 57 : index
    %848 = memref.load %arg5[%c57] : memref<144xf32, #tpu.memory_space<smem>>
    %849 = vector.broadcast %848 : f32 to vector<16x18xf32>
    %850 = arith.mulf %849, %612 : vector<16x18xf32>
    %851 = arith.addf %847, %850 : vector<16x18xf32>
    %c58 = arith.constant 58 : index
    %852 = memref.load %arg5[%c58] : memref<144xf32, #tpu.memory_space<smem>>
    %853 = vector.broadcast %852 : f32 to vector<16x18xf32>
    %854 = arith.mulf %853, %615 : vector<16x18xf32>
    %855 = arith.addf %851, %854 : vector<16x18xf32>
    %c59 = arith.constant 59 : index
    %856 = memref.load %arg5[%c59] : memref<144xf32, #tpu.memory_space<smem>>
    %857 = vector.broadcast %856 : f32 to vector<16x18xf32>
    %858 = arith.mulf %857, %617 : vector<16x18xf32>
    %859 = arith.addf %855, %858 : vector<16x18xf32>
    %c66 = arith.constant 66 : index
    %860 = memref.load %arg5[%c66] : memref<144xf32, #tpu.memory_space<smem>>
    %861 = vector.broadcast %860 : f32 to vector<16x18xf32>
    %862 = arith.mulf %861, %619 : vector<16x18xf32>
    %863 = arith.addf %859, %862 : vector<16x18xf32>
    %c67 = arith.constant 67 : index
    %864 = memref.load %arg5[%c67] : memref<144xf32, #tpu.memory_space<smem>>
    %865 = vector.broadcast %864 : f32 to vector<16x18xf32>
    %866 = arith.mulf %865, %622 : vector<16x18xf32>
    %867 = arith.addf %863, %866 : vector<16x18xf32>
    %c68 = arith.constant 68 : index
    %868 = memref.load %arg5[%c68] : memref<144xf32, #tpu.memory_space<smem>>
    %869 = vector.broadcast %868 : f32 to vector<16x18xf32>
    %870 = arith.mulf %869, %624 : vector<16x18xf32>
    %871 = arith.addf %867, %870 : vector<16x18xf32>
    %872 = arith.addf %824, %871 : vector<16x18xf32>
    %c42 = arith.constant 42 : index
    %873 = memref.load %arg5[%c42] : memref<144xf32, #tpu.memory_space<smem>>
    %874 = vector.broadcast %873 : f32 to vector<16x18xf32>
    %875 = arith.mulf %874, %598 : vector<16x18xf32>
    %c43 = arith.constant 43 : index
    %876 = memref.load %arg5[%c43] : memref<144xf32, #tpu.memory_space<smem>>
    %877 = vector.broadcast %876 : f32 to vector<16x18xf32>
    %878 = arith.mulf %877, %601 : vector<16x18xf32>
    %879 = arith.addf %875, %878 : vector<16x18xf32>
    %c44 = arith.constant 44 : index
    %880 = memref.load %arg5[%c44] : memref<144xf32, #tpu.memory_space<smem>>
    %881 = vector.broadcast %880 : f32 to vector<16x18xf32>
    %882 = arith.mulf %881, %603 : vector<16x18xf32>
    %883 = arith.addf %879, %882 : vector<16x18xf32>
    %c51 = arith.constant 51 : index
    %884 = memref.load %arg5[%c51] : memref<144xf32, #tpu.memory_space<smem>>
    %885 = vector.broadcast %884 : f32 to vector<16x18xf32>
    %886 = arith.mulf %885, %605 : vector<16x18xf32>
    %887 = arith.addf %883, %886 : vector<16x18xf32>
    %c52 = arith.constant 52 : index
    %888 = memref.load %arg5[%c52] : memref<144xf32, #tpu.memory_space<smem>>
    %889 = vector.broadcast %888 : f32 to vector<16x18xf32>
    %890 = arith.mulf %889, %608 : vector<16x18xf32>
    %891 = arith.addf %887, %890 : vector<16x18xf32>
    %c53 = arith.constant 53 : index
    %892 = memref.load %arg5[%c53] : memref<144xf32, #tpu.memory_space<smem>>
    %893 = vector.broadcast %892 : f32 to vector<16x18xf32>
    %894 = arith.mulf %893, %610 : vector<16x18xf32>
    %895 = arith.addf %891, %894 : vector<16x18xf32>
    %c60 = arith.constant 60 : index
    %896 = memref.load %arg5[%c60] : memref<144xf32, #tpu.memory_space<smem>>
    %897 = vector.broadcast %896 : f32 to vector<16x18xf32>
    %898 = arith.mulf %897, %612 : vector<16x18xf32>
    %899 = arith.addf %895, %898 : vector<16x18xf32>
    %c61 = arith.constant 61 : index
    %900 = memref.load %arg5[%c61] : memref<144xf32, #tpu.memory_space<smem>>
    %901 = vector.broadcast %900 : f32 to vector<16x18xf32>
    %902 = arith.mulf %901, %615 : vector<16x18xf32>
    %903 = arith.addf %899, %902 : vector<16x18xf32>
    %c62 = arith.constant 62 : index
    %904 = memref.load %arg5[%c62] : memref<144xf32, #tpu.memory_space<smem>>
    %905 = vector.broadcast %904 : f32 to vector<16x18xf32>
    %906 = arith.mulf %905, %617 : vector<16x18xf32>
    %907 = arith.addf %903, %906 : vector<16x18xf32>
    %c69 = arith.constant 69 : index
    %908 = memref.load %arg5[%c69] : memref<144xf32, #tpu.memory_space<smem>>
    %909 = vector.broadcast %908 : f32 to vector<16x18xf32>
    %910 = arith.mulf %909, %619 : vector<16x18xf32>
    %911 = arith.addf %907, %910 : vector<16x18xf32>
    %c70 = arith.constant 70 : index
    %912 = memref.load %arg5[%c70] : memref<144xf32, #tpu.memory_space<smem>>
    %913 = vector.broadcast %912 : f32 to vector<16x18xf32>
    %914 = arith.mulf %913, %622 : vector<16x18xf32>
    %915 = arith.addf %911, %914 : vector<16x18xf32>
    %c71 = arith.constant 71 : index
    %916 = memref.load %arg5[%c71] : memref<144xf32, #tpu.memory_space<smem>>
    %917 = vector.broadcast %916 : f32 to vector<16x18xf32>
    %918 = arith.mulf %917, %624 : vector<16x18xf32>
    %919 = arith.addf %915, %918 : vector<16x18xf32>
    %920 = vector.extract_strided_slice %919 {offsets = [1, 0], sizes = [15, 18], strides = [1, 1]} : vector<16x18xf32> to vector<15x18xf32>
    %921 = tpu.concatenate %920, %625 in 0 : vector<15x18xf32>, vector<1x18xf32> -> vector<16x18xf32>
    %922 = arith.addf %872, %921 : vector<16x18xf32>
    %c1_218 = arith.constant 1 : index
    %923 = memref.load %arg6[%c1_218] : memref<4xf32, #tpu.memory_space<smem>>
    %924 = vector.broadcast %923 : f32 to vector<16x18xf32>
    %925 = arith.addf %922, %924 : vector<16x18xf32>
    %c72 = arith.constant 72 : index
    %926 = memref.load %arg5[%c72] : memref<144xf32, #tpu.memory_space<smem>>
    %927 = vector.broadcast %926 : f32 to vector<16x18xf32>
    %928 = arith.mulf %927, %598 : vector<16x18xf32>
    %c73 = arith.constant 73 : index
    %929 = memref.load %arg5[%c73] : memref<144xf32, #tpu.memory_space<smem>>
    %930 = vector.broadcast %929 : f32 to vector<16x18xf32>
    %931 = arith.mulf %930, %601 : vector<16x18xf32>
    %932 = arith.addf %928, %931 : vector<16x18xf32>
    %c74 = arith.constant 74 : index
    %933 = memref.load %arg5[%c74] : memref<144xf32, #tpu.memory_space<smem>>
    %934 = vector.broadcast %933 : f32 to vector<16x18xf32>
    %935 = arith.mulf %934, %603 : vector<16x18xf32>
    %936 = arith.addf %932, %935 : vector<16x18xf32>
    %c81 = arith.constant 81 : index
    %937 = memref.load %arg5[%c81] : memref<144xf32, #tpu.memory_space<smem>>
    %938 = vector.broadcast %937 : f32 to vector<16x18xf32>
    %939 = arith.mulf %938, %605 : vector<16x18xf32>
    %940 = arith.addf %936, %939 : vector<16x18xf32>
    %c82 = arith.constant 82 : index
    %941 = memref.load %arg5[%c82] : memref<144xf32, #tpu.memory_space<smem>>
    %942 = vector.broadcast %941 : f32 to vector<16x18xf32>
    %943 = arith.mulf %942, %608 : vector<16x18xf32>
    %944 = arith.addf %940, %943 : vector<16x18xf32>
    %c83 = arith.constant 83 : index
    %945 = memref.load %arg5[%c83] : memref<144xf32, #tpu.memory_space<smem>>
    %946 = vector.broadcast %945 : f32 to vector<16x18xf32>
    %947 = arith.mulf %946, %610 : vector<16x18xf32>
    %948 = arith.addf %944, %947 : vector<16x18xf32>
    %c90 = arith.constant 90 : index
    %949 = memref.load %arg5[%c90] : memref<144xf32, #tpu.memory_space<smem>>
    %950 = vector.broadcast %949 : f32 to vector<16x18xf32>
    %951 = arith.mulf %950, %612 : vector<16x18xf32>
    %952 = arith.addf %948, %951 : vector<16x18xf32>
    %c91 = arith.constant 91 : index
    %953 = memref.load %arg5[%c91] : memref<144xf32, #tpu.memory_space<smem>>
    %954 = vector.broadcast %953 : f32 to vector<16x18xf32>
    %955 = arith.mulf %954, %615 : vector<16x18xf32>
    %956 = arith.addf %952, %955 : vector<16x18xf32>
    %c92 = arith.constant 92 : index
    %957 = memref.load %arg5[%c92] : memref<144xf32, #tpu.memory_space<smem>>
    %958 = vector.broadcast %957 : f32 to vector<16x18xf32>
    %959 = arith.mulf %958, %617 : vector<16x18xf32>
    %960 = arith.addf %956, %959 : vector<16x18xf32>
    %c99 = arith.constant 99 : index
    %961 = memref.load %arg5[%c99] : memref<144xf32, #tpu.memory_space<smem>>
    %962 = vector.broadcast %961 : f32 to vector<16x18xf32>
    %963 = arith.mulf %962, %619 : vector<16x18xf32>
    %964 = arith.addf %960, %963 : vector<16x18xf32>
    %c100 = arith.constant 100 : index
    %965 = memref.load %arg5[%c100] : memref<144xf32, #tpu.memory_space<smem>>
    %966 = vector.broadcast %965 : f32 to vector<16x18xf32>
    %967 = arith.mulf %966, %622 : vector<16x18xf32>
    %968 = arith.addf %964, %967 : vector<16x18xf32>
    %c101 = arith.constant 101 : index
    %969 = memref.load %arg5[%c101] : memref<144xf32, #tpu.memory_space<smem>>
    %970 = vector.broadcast %969 : f32 to vector<16x18xf32>
    %971 = arith.mulf %970, %624 : vector<16x18xf32>
    %972 = arith.addf %968, %971 : vector<16x18xf32>
    %973 = vector.extract_strided_slice %972 {offsets = [0, 0], sizes = [15, 18], strides = [1, 1]} : vector<16x18xf32> to vector<15x18xf32>
    %974 = tpu.concatenate %625, %973 in 0 : vector<1x18xf32>, vector<15x18xf32> -> vector<16x18xf32>
    %c75 = arith.constant 75 : index
    %975 = memref.load %arg5[%c75] : memref<144xf32, #tpu.memory_space<smem>>
    %976 = vector.broadcast %975 : f32 to vector<16x18xf32>
    %977 = arith.mulf %976, %598 : vector<16x18xf32>
    %c76 = arith.constant 76 : index
    %978 = memref.load %arg5[%c76] : memref<144xf32, #tpu.memory_space<smem>>
    %979 = vector.broadcast %978 : f32 to vector<16x18xf32>
    %980 = arith.mulf %979, %601 : vector<16x18xf32>
    %981 = arith.addf %977, %980 : vector<16x18xf32>
    %c77 = arith.constant 77 : index
    %982 = memref.load %arg5[%c77] : memref<144xf32, #tpu.memory_space<smem>>
    %983 = vector.broadcast %982 : f32 to vector<16x18xf32>
    %984 = arith.mulf %983, %603 : vector<16x18xf32>
    %985 = arith.addf %981, %984 : vector<16x18xf32>
    %c84 = arith.constant 84 : index
    %986 = memref.load %arg5[%c84] : memref<144xf32, #tpu.memory_space<smem>>
    %987 = vector.broadcast %986 : f32 to vector<16x18xf32>
    %988 = arith.mulf %987, %605 : vector<16x18xf32>
    %989 = arith.addf %985, %988 : vector<16x18xf32>
    %c85 = arith.constant 85 : index
    %990 = memref.load %arg5[%c85] : memref<144xf32, #tpu.memory_space<smem>>
    %991 = vector.broadcast %990 : f32 to vector<16x18xf32>
    %992 = arith.mulf %991, %608 : vector<16x18xf32>
    %993 = arith.addf %989, %992 : vector<16x18xf32>
    %c86 = arith.constant 86 : index
    %994 = memref.load %arg5[%c86] : memref<144xf32, #tpu.memory_space<smem>>
    %995 = vector.broadcast %994 : f32 to vector<16x18xf32>
    %996 = arith.mulf %995, %610 : vector<16x18xf32>
    %997 = arith.addf %993, %996 : vector<16x18xf32>
    %c93 = arith.constant 93 : index
    %998 = memref.load %arg5[%c93] : memref<144xf32, #tpu.memory_space<smem>>
    %999 = vector.broadcast %998 : f32 to vector<16x18xf32>
    %1000 = arith.mulf %999, %612 : vector<16x18xf32>
    %1001 = arith.addf %997, %1000 : vector<16x18xf32>
    %c94 = arith.constant 94 : index
    %1002 = memref.load %arg5[%c94] : memref<144xf32, #tpu.memory_space<smem>>
    %1003 = vector.broadcast %1002 : f32 to vector<16x18xf32>
    %1004 = arith.mulf %1003, %615 : vector<16x18xf32>
    %1005 = arith.addf %1001, %1004 : vector<16x18xf32>
    %c95 = arith.constant 95 : index
    %1006 = memref.load %arg5[%c95] : memref<144xf32, #tpu.memory_space<smem>>
    %1007 = vector.broadcast %1006 : f32 to vector<16x18xf32>
    %1008 = arith.mulf %1007, %617 : vector<16x18xf32>
    %1009 = arith.addf %1005, %1008 : vector<16x18xf32>
    %c102 = arith.constant 102 : index
    %1010 = memref.load %arg5[%c102] : memref<144xf32, #tpu.memory_space<smem>>
    %1011 = vector.broadcast %1010 : f32 to vector<16x18xf32>
    %1012 = arith.mulf %1011, %619 : vector<16x18xf32>
    %1013 = arith.addf %1009, %1012 : vector<16x18xf32>
    %c103 = arith.constant 103 : index
    %1014 = memref.load %arg5[%c103] : memref<144xf32, #tpu.memory_space<smem>>
    %1015 = vector.broadcast %1014 : f32 to vector<16x18xf32>
    %1016 = arith.mulf %1015, %622 : vector<16x18xf32>
    %1017 = arith.addf %1013, %1016 : vector<16x18xf32>
    %c104 = arith.constant 104 : index
    %1018 = memref.load %arg5[%c104] : memref<144xf32, #tpu.memory_space<smem>>
    %1019 = vector.broadcast %1018 : f32 to vector<16x18xf32>
    %1020 = arith.mulf %1019, %624 : vector<16x18xf32>
    %1021 = arith.addf %1017, %1020 : vector<16x18xf32>
    %1022 = arith.addf %974, %1021 : vector<16x18xf32>
    %c78 = arith.constant 78 : index
    %1023 = memref.load %arg5[%c78] : memref<144xf32, #tpu.memory_space<smem>>
    %1024 = vector.broadcast %1023 : f32 to vector<16x18xf32>
    %1025 = arith.mulf %1024, %598 : vector<16x18xf32>
    %c79 = arith.constant 79 : index
    %1026 = memref.load %arg5[%c79] : memref<144xf32, #tpu.memory_space<smem>>
    %1027 = vector.broadcast %1026 : f32 to vector<16x18xf32>
    %1028 = arith.mulf %1027, %601 : vector<16x18xf32>
    %1029 = arith.addf %1025, %1028 : vector<16x18xf32>
    %c80 = arith.constant 80 : index
    %1030 = memref.load %arg5[%c80] : memref<144xf32, #tpu.memory_space<smem>>
    %1031 = vector.broadcast %1030 : f32 to vector<16x18xf32>
    %1032 = arith.mulf %1031, %603 : vector<16x18xf32>
    %1033 = arith.addf %1029, %1032 : vector<16x18xf32>
    %c87 = arith.constant 87 : index
    %1034 = memref.load %arg5[%c87] : memref<144xf32, #tpu.memory_space<smem>>
    %1035 = vector.broadcast %1034 : f32 to vector<16x18xf32>
    %1036 = arith.mulf %1035, %605 : vector<16x18xf32>
    %1037 = arith.addf %1033, %1036 : vector<16x18xf32>
    %c88 = arith.constant 88 : index
    %1038 = memref.load %arg5[%c88] : memref<144xf32, #tpu.memory_space<smem>>
    %1039 = vector.broadcast %1038 : f32 to vector<16x18xf32>
    %1040 = arith.mulf %1039, %608 : vector<16x18xf32>
    %1041 = arith.addf %1037, %1040 : vector<16x18xf32>
    %c89 = arith.constant 89 : index
    %1042 = memref.load %arg5[%c89] : memref<144xf32, #tpu.memory_space<smem>>
    %1043 = vector.broadcast %1042 : f32 to vector<16x18xf32>
    %1044 = arith.mulf %1043, %610 : vector<16x18xf32>
    %1045 = arith.addf %1041, %1044 : vector<16x18xf32>
    %c96 = arith.constant 96 : index
    %1046 = memref.load %arg5[%c96] : memref<144xf32, #tpu.memory_space<smem>>
    %1047 = vector.broadcast %1046 : f32 to vector<16x18xf32>
    %1048 = arith.mulf %1047, %612 : vector<16x18xf32>
    %1049 = arith.addf %1045, %1048 : vector<16x18xf32>
    %c97 = arith.constant 97 : index
    %1050 = memref.load %arg5[%c97] : memref<144xf32, #tpu.memory_space<smem>>
    %1051 = vector.broadcast %1050 : f32 to vector<16x18xf32>
    %1052 = arith.mulf %1051, %615 : vector<16x18xf32>
    %1053 = arith.addf %1049, %1052 : vector<16x18xf32>
    %c98 = arith.constant 98 : index
    %1054 = memref.load %arg5[%c98] : memref<144xf32, #tpu.memory_space<smem>>
    %1055 = vector.broadcast %1054 : f32 to vector<16x18xf32>
    %1056 = arith.mulf %1055, %617 : vector<16x18xf32>
    %1057 = arith.addf %1053, %1056 : vector<16x18xf32>
    %c105 = arith.constant 105 : index
    %1058 = memref.load %arg5[%c105] : memref<144xf32, #tpu.memory_space<smem>>
    %1059 = vector.broadcast %1058 : f32 to vector<16x18xf32>
    %1060 = arith.mulf %1059, %619 : vector<16x18xf32>
    %1061 = arith.addf %1057, %1060 : vector<16x18xf32>
    %c106 = arith.constant 106 : index
    %1062 = memref.load %arg5[%c106] : memref<144xf32, #tpu.memory_space<smem>>
    %1063 = vector.broadcast %1062 : f32 to vector<16x18xf32>
    %1064 = arith.mulf %1063, %622 : vector<16x18xf32>
    %1065 = arith.addf %1061, %1064 : vector<16x18xf32>
    %c107 = arith.constant 107 : index
    %1066 = memref.load %arg5[%c107] : memref<144xf32, #tpu.memory_space<smem>>
    %1067 = vector.broadcast %1066 : f32 to vector<16x18xf32>
    %1068 = arith.mulf %1067, %624 : vector<16x18xf32>
    %1069 = arith.addf %1065, %1068 : vector<16x18xf32>
    %1070 = vector.extract_strided_slice %1069 {offsets = [1, 0], sizes = [15, 18], strides = [1, 1]} : vector<16x18xf32> to vector<15x18xf32>
    %1071 = tpu.concatenate %1070, %625 in 0 : vector<15x18xf32>, vector<1x18xf32> -> vector<16x18xf32>
    %1072 = arith.addf %1022, %1071 : vector<16x18xf32>
    %c2_219 = arith.constant 2 : index
    %1073 = memref.load %arg6[%c2_219] : memref<4xf32, #tpu.memory_space<smem>>
    %1074 = vector.broadcast %1073 : f32 to vector<16x18xf32>
    %1075 = arith.addf %1072, %1074 : vector<16x18xf32>
    %c108 = arith.constant 108 : index
    %1076 = memref.load %arg5[%c108] : memref<144xf32, #tpu.memory_space<smem>>
    %1077 = vector.broadcast %1076 : f32 to vector<16x18xf32>
    %1078 = arith.mulf %1077, %598 : vector<16x18xf32>
    %c109 = arith.constant 109 : index
    %1079 = memref.load %arg5[%c109] : memref<144xf32, #tpu.memory_space<smem>>
    %1080 = vector.broadcast %1079 : f32 to vector<16x18xf32>
    %1081 = arith.mulf %1080, %601 : vector<16x18xf32>
    %1082 = arith.addf %1078, %1081 : vector<16x18xf32>
    %c110 = arith.constant 110 : index
    %1083 = memref.load %arg5[%c110] : memref<144xf32, #tpu.memory_space<smem>>
    %1084 = vector.broadcast %1083 : f32 to vector<16x18xf32>
    %1085 = arith.mulf %1084, %603 : vector<16x18xf32>
    %1086 = arith.addf %1082, %1085 : vector<16x18xf32>
    %c117 = arith.constant 117 : index
    %1087 = memref.load %arg5[%c117] : memref<144xf32, #tpu.memory_space<smem>>
    %1088 = vector.broadcast %1087 : f32 to vector<16x18xf32>
    %1089 = arith.mulf %1088, %605 : vector<16x18xf32>
    %1090 = arith.addf %1086, %1089 : vector<16x18xf32>
    %c118 = arith.constant 118 : index
    %1091 = memref.load %arg5[%c118] : memref<144xf32, #tpu.memory_space<smem>>
    %1092 = vector.broadcast %1091 : f32 to vector<16x18xf32>
    %1093 = arith.mulf %1092, %608 : vector<16x18xf32>
    %1094 = arith.addf %1090, %1093 : vector<16x18xf32>
    %c119 = arith.constant 119 : index
    %1095 = memref.load %arg5[%c119] : memref<144xf32, #tpu.memory_space<smem>>
    %1096 = vector.broadcast %1095 : f32 to vector<16x18xf32>
    %1097 = arith.mulf %1096, %610 : vector<16x18xf32>
    %1098 = arith.addf %1094, %1097 : vector<16x18xf32>
    %c126 = arith.constant 126 : index
    %1099 = memref.load %arg5[%c126] : memref<144xf32, #tpu.memory_space<smem>>
    %1100 = vector.broadcast %1099 : f32 to vector<16x18xf32>
    %1101 = arith.mulf %1100, %612 : vector<16x18xf32>
    %1102 = arith.addf %1098, %1101 : vector<16x18xf32>
    %c127 = arith.constant 127 : index
    %1103 = memref.load %arg5[%c127] : memref<144xf32, #tpu.memory_space<smem>>
    %1104 = vector.broadcast %1103 : f32 to vector<16x18xf32>
    %1105 = arith.mulf %1104, %615 : vector<16x18xf32>
    %1106 = arith.addf %1102, %1105 : vector<16x18xf32>
    %c128 = arith.constant 128 : index
    %1107 = memref.load %arg5[%c128] : memref<144xf32, #tpu.memory_space<smem>>
    %1108 = vector.broadcast %1107 : f32 to vector<16x18xf32>
    %1109 = arith.mulf %1108, %617 : vector<16x18xf32>
    %1110 = arith.addf %1106, %1109 : vector<16x18xf32>
    %c135 = arith.constant 135 : index
    %1111 = memref.load %arg5[%c135] : memref<144xf32, #tpu.memory_space<smem>>
    %1112 = vector.broadcast %1111 : f32 to vector<16x18xf32>
    %1113 = arith.mulf %1112, %619 : vector<16x18xf32>
    %1114 = arith.addf %1110, %1113 : vector<16x18xf32>
    %c136 = arith.constant 136 : index
    %1115 = memref.load %arg5[%c136] : memref<144xf32, #tpu.memory_space<smem>>
    %1116 = vector.broadcast %1115 : f32 to vector<16x18xf32>
    %1117 = arith.mulf %1116, %622 : vector<16x18xf32>
    %1118 = arith.addf %1114, %1117 : vector<16x18xf32>
    %c137 = arith.constant 137 : index
    %1119 = memref.load %arg5[%c137] : memref<144xf32, #tpu.memory_space<smem>>
    %1120 = vector.broadcast %1119 : f32 to vector<16x18xf32>
    %1121 = arith.mulf %1120, %624 : vector<16x18xf32>
    %1122 = arith.addf %1118, %1121 : vector<16x18xf32>
    %1123 = vector.extract_strided_slice %1122 {offsets = [0, 0], sizes = [15, 18], strides = [1, 1]} : vector<16x18xf32> to vector<15x18xf32>
    %1124 = tpu.concatenate %625, %1123 in 0 : vector<1x18xf32>, vector<15x18xf32> -> vector<16x18xf32>
    %c111 = arith.constant 111 : index
    %1125 = memref.load %arg5[%c111] : memref<144xf32, #tpu.memory_space<smem>>
    %1126 = vector.broadcast %1125 : f32 to vector<16x18xf32>
    %1127 = arith.mulf %1126, %598 : vector<16x18xf32>
    %c112 = arith.constant 112 : index
    %1128 = memref.load %arg5[%c112] : memref<144xf32, #tpu.memory_space<smem>>
    %1129 = vector.broadcast %1128 : f32 to vector<16x18xf32>
    %1130 = arith.mulf %1129, %601 : vector<16x18xf32>
    %1131 = arith.addf %1127, %1130 : vector<16x18xf32>
    %c113 = arith.constant 113 : index
    %1132 = memref.load %arg5[%c113] : memref<144xf32, #tpu.memory_space<smem>>
    %1133 = vector.broadcast %1132 : f32 to vector<16x18xf32>
    %1134 = arith.mulf %1133, %603 : vector<16x18xf32>
    %1135 = arith.addf %1131, %1134 : vector<16x18xf32>
    %c120 = arith.constant 120 : index
    %1136 = memref.load %arg5[%c120] : memref<144xf32, #tpu.memory_space<smem>>
    %1137 = vector.broadcast %1136 : f32 to vector<16x18xf32>
    %1138 = arith.mulf %1137, %605 : vector<16x18xf32>
    %1139 = arith.addf %1135, %1138 : vector<16x18xf32>
    %c121 = arith.constant 121 : index
    %1140 = memref.load %arg5[%c121] : memref<144xf32, #tpu.memory_space<smem>>
    %1141 = vector.broadcast %1140 : f32 to vector<16x18xf32>
    %1142 = arith.mulf %1141, %608 : vector<16x18xf32>
    %1143 = arith.addf %1139, %1142 : vector<16x18xf32>
    %c122 = arith.constant 122 : index
    %1144 = memref.load %arg5[%c122] : memref<144xf32, #tpu.memory_space<smem>>
    %1145 = vector.broadcast %1144 : f32 to vector<16x18xf32>
    %1146 = arith.mulf %1145, %610 : vector<16x18xf32>
    %1147 = arith.addf %1143, %1146 : vector<16x18xf32>
    %c129 = arith.constant 129 : index
    %1148 = memref.load %arg5[%c129] : memref<144xf32, #tpu.memory_space<smem>>
    %1149 = vector.broadcast %1148 : f32 to vector<16x18xf32>
    %1150 = arith.mulf %1149, %612 : vector<16x18xf32>
    %1151 = arith.addf %1147, %1150 : vector<16x18xf32>
    %c130 = arith.constant 130 : index
    %1152 = memref.load %arg5[%c130] : memref<144xf32, #tpu.memory_space<smem>>
    %1153 = vector.broadcast %1152 : f32 to vector<16x18xf32>
    %1154 = arith.mulf %1153, %615 : vector<16x18xf32>
    %1155 = arith.addf %1151, %1154 : vector<16x18xf32>
    %c131 = arith.constant 131 : index
    %1156 = memref.load %arg5[%c131] : memref<144xf32, #tpu.memory_space<smem>>
    %1157 = vector.broadcast %1156 : f32 to vector<16x18xf32>
    %1158 = arith.mulf %1157, %617 : vector<16x18xf32>
    %1159 = arith.addf %1155, %1158 : vector<16x18xf32>
    %c138 = arith.constant 138 : index
    %1160 = memref.load %arg5[%c138] : memref<144xf32, #tpu.memory_space<smem>>
    %1161 = vector.broadcast %1160 : f32 to vector<16x18xf32>
    %1162 = arith.mulf %1161, %619 : vector<16x18xf32>
    %1163 = arith.addf %1159, %1162 : vector<16x18xf32>
    %c139 = arith.constant 139 : index
    %1164 = memref.load %arg5[%c139] : memref<144xf32, #tpu.memory_space<smem>>
    %1165 = vector.broadcast %1164 : f32 to vector<16x18xf32>
    %1166 = arith.mulf %1165, %622 : vector<16x18xf32>
    %1167 = arith.addf %1163, %1166 : vector<16x18xf32>
    %c140 = arith.constant 140 : index
    %1168 = memref.load %arg5[%c140] : memref<144xf32, #tpu.memory_space<smem>>
    %1169 = vector.broadcast %1168 : f32 to vector<16x18xf32>
    %1170 = arith.mulf %1169, %624 : vector<16x18xf32>
    %1171 = arith.addf %1167, %1170 : vector<16x18xf32>
    %1172 = arith.addf %1124, %1171 : vector<16x18xf32>
    %c114 = arith.constant 114 : index
    %1173 = memref.load %arg5[%c114] : memref<144xf32, #tpu.memory_space<smem>>
    %1174 = vector.broadcast %1173 : f32 to vector<16x18xf32>
    %1175 = arith.mulf %1174, %598 : vector<16x18xf32>
    %c115 = arith.constant 115 : index
    %1176 = memref.load %arg5[%c115] : memref<144xf32, #tpu.memory_space<smem>>
    %1177 = vector.broadcast %1176 : f32 to vector<16x18xf32>
    %1178 = arith.mulf %1177, %601 : vector<16x18xf32>
    %1179 = arith.addf %1175, %1178 : vector<16x18xf32>
    %c116 = arith.constant 116 : index
    %1180 = memref.load %arg5[%c116] : memref<144xf32, #tpu.memory_space<smem>>
    %1181 = vector.broadcast %1180 : f32 to vector<16x18xf32>
    %1182 = arith.mulf %1181, %603 : vector<16x18xf32>
    %1183 = arith.addf %1179, %1182 : vector<16x18xf32>
    %c123 = arith.constant 123 : index
    %1184 = memref.load %arg5[%c123] : memref<144xf32, #tpu.memory_space<smem>>
    %1185 = vector.broadcast %1184 : f32 to vector<16x18xf32>
    %1186 = arith.mulf %1185, %605 : vector<16x18xf32>
    %1187 = arith.addf %1183, %1186 : vector<16x18xf32>
    %c124 = arith.constant 124 : index
    %1188 = memref.load %arg5[%c124] : memref<144xf32, #tpu.memory_space<smem>>
    %1189 = vector.broadcast %1188 : f32 to vector<16x18xf32>
    %1190 = arith.mulf %1189, %608 : vector<16x18xf32>
    %1191 = arith.addf %1187, %1190 : vector<16x18xf32>
    %c125 = arith.constant 125 : index
    %1192 = memref.load %arg5[%c125] : memref<144xf32, #tpu.memory_space<smem>>
    %1193 = vector.broadcast %1192 : f32 to vector<16x18xf32>
    %1194 = arith.mulf %1193, %610 : vector<16x18xf32>
    %1195 = arith.addf %1191, %1194 : vector<16x18xf32>
    %c132 = arith.constant 132 : index
    %1196 = memref.load %arg5[%c132] : memref<144xf32, #tpu.memory_space<smem>>
    %1197 = vector.broadcast %1196 : f32 to vector<16x18xf32>
    %1198 = arith.mulf %1197, %612 : vector<16x18xf32>
    %1199 = arith.addf %1195, %1198 : vector<16x18xf32>
    %c133 = arith.constant 133 : index
    %1200 = memref.load %arg5[%c133] : memref<144xf32, #tpu.memory_space<smem>>
    %1201 = vector.broadcast %1200 : f32 to vector<16x18xf32>
    %1202 = arith.mulf %1201, %615 : vector<16x18xf32>
    %1203 = arith.addf %1199, %1202 : vector<16x18xf32>
    %c134 = arith.constant 134 : index
    %1204 = memref.load %arg5[%c134] : memref<144xf32, #tpu.memory_space<smem>>
    %1205 = vector.broadcast %1204 : f32 to vector<16x18xf32>
    %1206 = arith.mulf %1205, %617 : vector<16x18xf32>
    %1207 = arith.addf %1203, %1206 : vector<16x18xf32>
    %c141 = arith.constant 141 : index
    %1208 = memref.load %arg5[%c141] : memref<144xf32, #tpu.memory_space<smem>>
    %1209 = vector.broadcast %1208 : f32 to vector<16x18xf32>
    %1210 = arith.mulf %1209, %619 : vector<16x18xf32>
    %1211 = arith.addf %1207, %1210 : vector<16x18xf32>
    %c142 = arith.constant 142 : index
    %1212 = memref.load %arg5[%c142] : memref<144xf32, #tpu.memory_space<smem>>
    %1213 = vector.broadcast %1212 : f32 to vector<16x18xf32>
    %1214 = arith.mulf %1213, %622 : vector<16x18xf32>
    %1215 = arith.addf %1211, %1214 : vector<16x18xf32>
    %c143 = arith.constant 143 : index
    %1216 = memref.load %arg5[%c143] : memref<144xf32, #tpu.memory_space<smem>>
    %1217 = vector.broadcast %1216 : f32 to vector<16x18xf32>
    %1218 = arith.mulf %1217, %624 : vector<16x18xf32>
    %1219 = arith.addf %1215, %1218 : vector<16x18xf32>
    %1220 = vector.extract_strided_slice %1219 {offsets = [1, 0], sizes = [15, 18], strides = [1, 1]} : vector<16x18xf32> to vector<15x18xf32>
    %1221 = tpu.concatenate %1220, %625 in 0 : vector<15x18xf32>, vector<1x18xf32> -> vector<16x18xf32>
    %1222 = arith.addf %1172, %1221 : vector<16x18xf32>
    %c3_220 = arith.constant 3 : index
    %1223 = memref.load %arg6[%c3_220] : memref<4xf32, #tpu.memory_space<smem>>
    %1224 = vector.broadcast %1223 : f32 to vector<16x18xf32>
    %1225 = arith.addf %1222, %1224 : vector<16x18xf32>
    %cst_221 = arith.constant dense<0.000000e+00> : vector<18xf32>
    %1226 = vector.multi_reduction <add>, %775, %cst_221 [0] : vector<16x18xf32> to vector<18xf32>
    %1227 = vector.shape_cast %1226 : vector<18xf32> to vector<1x18xf32>
    %cst_222 = arith.constant 1.600000e+01 : f32
    %1228 = vector.broadcast %cst_222 : f32 to vector<1x18xf32>
    %1229 = arith.divf %1227, %1228 : vector<1x18xf32>
    %1230 = vector.broadcast %1229 : vector<1x18xf32> to vector<16x18xf32>
    %1231 = arith.subf %775, %1230 : vector<16x18xf32>
    %1232 = arith.mulf %1231, %1231 : vector<16x18xf32>
    %cst_223 = arith.constant dense<0.000000e+00> : vector<18xf32>
    %1233 = vector.multi_reduction <add>, %1232, %cst_223 [0] : vector<16x18xf32> to vector<18xf32>
    %1234 = vector.shape_cast %1233 : vector<18xf32> to vector<1x18xf32>
    %cst_224 = arith.constant 1.600000e+01 : f32
    %1235 = vector.broadcast %cst_224 : f32 to vector<1x18xf32>
    %1236 = arith.divf %1234, %1235 : vector<1x18xf32>
    %cst_225 = arith.constant 9.99999974E-6 : f32
    %1237 = vector.broadcast %cst_225 : f32 to vector<1x18xf32>
    %1238 = arith.addf %1236, %1237 : vector<1x18xf32>
    %1239 = math.rsqrt %1238 : vector<1x18xf32>
    %1240 = vector.broadcast %1239 : vector<1x18xf32> to vector<16x18xf32>
    %1241 = arith.mulf %1231, %1240 : vector<16x18xf32>
    %1242 = arith.mulf %1241, %42 : vector<16x18xf32>
    %1243 = arith.addf %1242, %44 : vector<16x18xf32>
    %cst_226 = arith.constant 0.707106769 : f32
    %1244 = vector.broadcast %cst_226 : f32 to vector<16x18xf32>
    %1245 = arith.mulf %1243, %1244 : vector<16x18xf32>
    %cst_227 = arith.constant 0.000000e+00 : f32
    %1246 = vector.broadcast %cst_227 : f32 to vector<16x18xf32>
    %1247 = arith.cmpf oge, %1245, %1246 : vector<16x18xf32>
    %cst_228 = arith.constant 1.000000e+00 : f32
    %cst_229 = arith.constant -1.000000e+00 : f32
    %1248 = vector.broadcast %cst_228 : f32 to vector<16x18xf32>
    %1249 = vector.broadcast %cst_229 : f32 to vector<16x18xf32>
    %1250 = arith.select %1247, %1248, %1249 : vector<16x18xi1>, vector<16x18xf32>
    %1251 = math.absf %1245 : vector<16x18xf32>
    %cst_230 = arith.constant 0.327591091 : f32
    %1252 = vector.broadcast %cst_230 : f32 to vector<16x18xf32>
    %1253 = arith.mulf %1252, %1251 : vector<16x18xf32>
    %cst_231 = arith.constant 1.000000e+00 : f32
    %1254 = vector.broadcast %cst_231 : f32 to vector<16x18xf32>
    %1255 = arith.addf %1254, %1253 : vector<16x18xf32>
    %1256 = tpu.reciprocal %1255 {approx = true} : vector<16x18xf32> -> vector<16x18xf32>
    %1257 = arith.mulf %1255, %1256 : vector<16x18xf32>
    %cst_232 = arith.constant 2.000000e+00 : f32
    %1258 = vector.broadcast %cst_232 : f32 to vector<16x18xf32>
    %1259 = arith.subf %1258, %1257 : vector<16x18xf32>
    %1260 = arith.mulf %1256, %1259 : vector<16x18xf32>
    %cst_233 = arith.constant 1.06140542 : f32
    %1261 = vector.broadcast %cst_233 : f32 to vector<16x18xf32>
    %1262 = arith.mulf %1261, %1260 : vector<16x18xf32>
    %cst_234 = arith.constant -1.45315206 : f32
    %1263 = vector.broadcast %cst_234 : f32 to vector<16x18xf32>
    %1264 = arith.addf %1262, %1263 : vector<16x18xf32>
    %1265 = arith.mulf %1264, %1260 : vector<16x18xf32>
    %cst_235 = arith.constant 1.42141378 : f32
    %1266 = vector.broadcast %cst_235 : f32 to vector<16x18xf32>
    %1267 = arith.addf %1265, %1266 : vector<16x18xf32>
    %1268 = arith.mulf %1267, %1260 : vector<16x18xf32>
    %cst_236 = arith.constant -0.284496725 : f32
    %1269 = vector.broadcast %cst_236 : f32 to vector<16x18xf32>
    %1270 = arith.addf %1268, %1269 : vector<16x18xf32>
    %1271 = arith.mulf %1270, %1260 : vector<16x18xf32>
    %cst_237 = arith.constant 0.254829586 : f32
    %1272 = vector.broadcast %cst_237 : f32 to vector<16x18xf32>
    %1273 = arith.addf %1271, %1272 : vector<16x18xf32>
    %1274 = arith.mulf %1273, %1260 : vector<16x18xf32>
    %cst_238 = arith.constant 0.000000e+00 : f32
    %1275 = vector.broadcast %cst_238 : f32 to vector<16x18xf32>
    %1276 = arith.subf %1275, %1251 : vector<16x18xf32>
    %1277 = arith.mulf %1276, %1251 : vector<16x18xf32>
    %1278 = math.exp %1277 : vector<16x18xf32>
    %1279 = arith.mulf %1274, %1278 : vector<16x18xf32>
    %cst_239 = arith.constant 1.000000e+00 : f32
    %1280 = vector.broadcast %cst_239 : f32 to vector<16x18xf32>
    %1281 = arith.subf %1280, %1279 : vector<16x18xf32>
    %1282 = arith.mulf %1250, %1281 : vector<16x18xf32>
    %cst_240 = arith.constant 5.000000e-01 : f32
    %1283 = vector.broadcast %cst_240 : f32 to vector<16x18xf32>
    %1284 = arith.mulf %1283, %1243 : vector<16x18xf32>
    %cst_241 = arith.constant 1.000000e+00 : f32
    %1285 = vector.broadcast %cst_241 : f32 to vector<16x18xf32>
    %1286 = arith.addf %1285, %1282 : vector<16x18xf32>
    %1287 = arith.mulf %1284, %1286 : vector<16x18xf32>
    %cst_242 = arith.constant 0.000000e+00 : f32
    %1288 = vector.shape_cast %31 : vector<1x18xi1> to vector<1x18xi1>
    %1289 = vector.broadcast %1288 : vector<1x18xi1> to vector<16x18xi1>
    %1290 = vector.broadcast %cst_242 : f32 to vector<16x18xf32>
    %1291 = arith.select %1289, %1287, %1290 : vector<16x18xi1>, vector<16x18xf32>
    %cst_243 = arith.constant dense<0.000000e+00> : vector<18xf32>
    %1292 = vector.multi_reduction <add>, %925, %cst_243 [0] : vector<16x18xf32> to vector<18xf32>
    %1293 = vector.shape_cast %1292 : vector<18xf32> to vector<1x18xf32>
    %cst_244 = arith.constant 1.600000e+01 : f32
    %1294 = vector.broadcast %cst_244 : f32 to vector<1x18xf32>
    %1295 = arith.divf %1293, %1294 : vector<1x18xf32>
    %1296 = vector.broadcast %1295 : vector<1x18xf32> to vector<16x18xf32>
    %1297 = arith.subf %925, %1296 : vector<16x18xf32>
    %1298 = arith.mulf %1297, %1297 : vector<16x18xf32>
    %cst_245 = arith.constant dense<0.000000e+00> : vector<18xf32>
    %1299 = vector.multi_reduction <add>, %1298, %cst_245 [0] : vector<16x18xf32> to vector<18xf32>
    %1300 = vector.shape_cast %1299 : vector<18xf32> to vector<1x18xf32>
    %cst_246 = arith.constant 1.600000e+01 : f32
    %1301 = vector.broadcast %cst_246 : f32 to vector<1x18xf32>
    %1302 = arith.divf %1300, %1301 : vector<1x18xf32>
    %cst_247 = arith.constant 9.99999974E-6 : f32
    %1303 = vector.broadcast %cst_247 : f32 to vector<1x18xf32>
    %1304 = arith.addf %1302, %1303 : vector<1x18xf32>
    %1305 = math.rsqrt %1304 : vector<1x18xf32>
    %1306 = vector.broadcast %1305 : vector<1x18xf32> to vector<16x18xf32>
    %1307 = arith.mulf %1297, %1306 : vector<16x18xf32>
    %1308 = arith.mulf %1307, %42 : vector<16x18xf32>
    %1309 = arith.addf %1308, %44 : vector<16x18xf32>
    %cst_248 = arith.constant 0.707106769 : f32
    %1310 = vector.broadcast %cst_248 : f32 to vector<16x18xf32>
    %1311 = arith.mulf %1309, %1310 : vector<16x18xf32>
    %cst_249 = arith.constant 0.000000e+00 : f32
    %1312 = vector.broadcast %cst_249 : f32 to vector<16x18xf32>
    %1313 = arith.cmpf oge, %1311, %1312 : vector<16x18xf32>
    %cst_250 = arith.constant 1.000000e+00 : f32
    %cst_251 = arith.constant -1.000000e+00 : f32
    %1314 = vector.broadcast %cst_250 : f32 to vector<16x18xf32>
    %1315 = vector.broadcast %cst_251 : f32 to vector<16x18xf32>
    %1316 = arith.select %1313, %1314, %1315 : vector<16x18xi1>, vector<16x18xf32>
    %1317 = math.absf %1311 : vector<16x18xf32>
    %cst_252 = arith.constant 0.327591091 : f32
    %1318 = vector.broadcast %cst_252 : f32 to vector<16x18xf32>
    %1319 = arith.mulf %1318, %1317 : vector<16x18xf32>
    %cst_253 = arith.constant 1.000000e+00 : f32
    %1320 = vector.broadcast %cst_253 : f32 to vector<16x18xf32>
    %1321 = arith.addf %1320, %1319 : vector<16x18xf32>
    %1322 = tpu.reciprocal %1321 {approx = true} : vector<16x18xf32> -> vector<16x18xf32>
    %1323 = arith.mulf %1321, %1322 : vector<16x18xf32>
    %cst_254 = arith.constant 2.000000e+00 : f32
    %1324 = vector.broadcast %cst_254 : f32 to vector<16x18xf32>
    %1325 = arith.subf %1324, %1323 : vector<16x18xf32>
    %1326 = arith.mulf %1322, %1325 : vector<16x18xf32>
    %cst_255 = arith.constant 1.06140542 : f32
    %1327 = vector.broadcast %cst_255 : f32 to vector<16x18xf32>
    %1328 = arith.mulf %1327, %1326 : vector<16x18xf32>
    %cst_256 = arith.constant -1.45315206 : f32
    %1329 = vector.broadcast %cst_256 : f32 to vector<16x18xf32>
    %1330 = arith.addf %1328, %1329 : vector<16x18xf32>
    %1331 = arith.mulf %1330, %1326 : vector<16x18xf32>
    %cst_257 = arith.constant 1.42141378 : f32
    %1332 = vector.broadcast %cst_257 : f32 to vector<16x18xf32>
    %1333 = arith.addf %1331, %1332 : vector<16x18xf32>
    %1334 = arith.mulf %1333, %1326 : vector<16x18xf32>
    %cst_258 = arith.constant -0.284496725 : f32
    %1335 = vector.broadcast %cst_258 : f32 to vector<16x18xf32>
    %1336 = arith.addf %1334, %1335 : vector<16x18xf32>
    %1337 = arith.mulf %1336, %1326 : vector<16x18xf32>
    %cst_259 = arith.constant 0.254829586 : f32
    %1338 = vector.broadcast %cst_259 : f32 to vector<16x18xf32>
    %1339 = arith.addf %1337, %1338 : vector<16x18xf32>
    %1340 = arith.mulf %1339, %1326 : vector<16x18xf32>
    %cst_260 = arith.constant 0.000000e+00 : f32
    %1341 = vector.broadcast %cst_260 : f32 to vector<16x18xf32>
    %1342 = arith.subf %1341, %1317 : vector<16x18xf32>
    %1343 = arith.mulf %1342, %1317 : vector<16x18xf32>
    %1344 = math.exp %1343 : vector<16x18xf32>
    %1345 = arith.mulf %1340, %1344 : vector<16x18xf32>
    %cst_261 = arith.constant 1.000000e+00 : f32
    %1346 = vector.broadcast %cst_261 : f32 to vector<16x18xf32>
    %1347 = arith.subf %1346, %1345 : vector<16x18xf32>
    %1348 = arith.mulf %1316, %1347 : vector<16x18xf32>
    %cst_262 = arith.constant 5.000000e-01 : f32
    %1349 = vector.broadcast %cst_262 : f32 to vector<16x18xf32>
    %1350 = arith.mulf %1349, %1309 : vector<16x18xf32>
    %cst_263 = arith.constant 1.000000e+00 : f32
    %1351 = vector.broadcast %cst_263 : f32 to vector<16x18xf32>
    %1352 = arith.addf %1351, %1348 : vector<16x18xf32>
    %1353 = arith.mulf %1350, %1352 : vector<16x18xf32>
    %cst_264 = arith.constant 0.000000e+00 : f32
    %1354 = vector.shape_cast %31 : vector<1x18xi1> to vector<1x18xi1>
    %1355 = vector.broadcast %1354 : vector<1x18xi1> to vector<16x18xi1>
    %1356 = vector.broadcast %cst_264 : f32 to vector<16x18xf32>
    %1357 = arith.select %1355, %1353, %1356 : vector<16x18xi1>, vector<16x18xf32>
    %cst_265 = arith.constant dense<0.000000e+00> : vector<18xf32>
    %1358 = vector.multi_reduction <add>, %1075, %cst_265 [0] : vector<16x18xf32> to vector<18xf32>
    %1359 = vector.shape_cast %1358 : vector<18xf32> to vector<1x18xf32>
    %cst_266 = arith.constant 1.600000e+01 : f32
    %1360 = vector.broadcast %cst_266 : f32 to vector<1x18xf32>
    %1361 = arith.divf %1359, %1360 : vector<1x18xf32>
    %1362 = vector.broadcast %1361 : vector<1x18xf32> to vector<16x18xf32>
    %1363 = arith.subf %1075, %1362 : vector<16x18xf32>
    %1364 = arith.mulf %1363, %1363 : vector<16x18xf32>
    %cst_267 = arith.constant dense<0.000000e+00> : vector<18xf32>
    %1365 = vector.multi_reduction <add>, %1364, %cst_267 [0] : vector<16x18xf32> to vector<18xf32>
    %1366 = vector.shape_cast %1365 : vector<18xf32> to vector<1x18xf32>
    %cst_268 = arith.constant 1.600000e+01 : f32
    %1367 = vector.broadcast %cst_268 : f32 to vector<1x18xf32>
    %1368 = arith.divf %1366, %1367 : vector<1x18xf32>
    %cst_269 = arith.constant 9.99999974E-6 : f32
    %1369 = vector.broadcast %cst_269 : f32 to vector<1x18xf32>
    %1370 = arith.addf %1368, %1369 : vector<1x18xf32>
    %1371 = math.rsqrt %1370 : vector<1x18xf32>
    %1372 = vector.broadcast %1371 : vector<1x18xf32> to vector<16x18xf32>
    %1373 = arith.mulf %1363, %1372 : vector<16x18xf32>
    %1374 = arith.mulf %1373, %42 : vector<16x18xf32>
    %1375 = arith.addf %1374, %44 : vector<16x18xf32>
    %cst_270 = arith.constant 0.707106769 : f32
    %1376 = vector.broadcast %cst_270 : f32 to vector<16x18xf32>
    %1377 = arith.mulf %1375, %1376 : vector<16x18xf32>
    %cst_271 = arith.constant 0.000000e+00 : f32
    %1378 = vector.broadcast %cst_271 : f32 to vector<16x18xf32>
    %1379 = arith.cmpf oge, %1377, %1378 : vector<16x18xf32>
    %cst_272 = arith.constant 1.000000e+00 : f32
    %cst_273 = arith.constant -1.000000e+00 : f32
    %1380 = vector.broadcast %cst_272 : f32 to vector<16x18xf32>
    %1381 = vector.broadcast %cst_273 : f32 to vector<16x18xf32>
    %1382 = arith.select %1379, %1380, %1381 : vector<16x18xi1>, vector<16x18xf32>
    %1383 = math.absf %1377 : vector<16x18xf32>
    %cst_274 = arith.constant 0.327591091 : f32
    %1384 = vector.broadcast %cst_274 : f32 to vector<16x18xf32>
    %1385 = arith.mulf %1384, %1383 : vector<16x18xf32>
    %cst_275 = arith.constant 1.000000e+00 : f32
    %1386 = vector.broadcast %cst_275 : f32 to vector<16x18xf32>
    %1387 = arith.addf %1386, %1385 : vector<16x18xf32>
    %1388 = tpu.reciprocal %1387 {approx = true} : vector<16x18xf32> -> vector<16x18xf32>
    %1389 = arith.mulf %1387, %1388 : vector<16x18xf32>
    %cst_276 = arith.constant 2.000000e+00 : f32
    %1390 = vector.broadcast %cst_276 : f32 to vector<16x18xf32>
    %1391 = arith.subf %1390, %1389 : vector<16x18xf32>
    %1392 = arith.mulf %1388, %1391 : vector<16x18xf32>
    %cst_277 = arith.constant 1.06140542 : f32
    %1393 = vector.broadcast %cst_277 : f32 to vector<16x18xf32>
    %1394 = arith.mulf %1393, %1392 : vector<16x18xf32>
    %cst_278 = arith.constant -1.45315206 : f32
    %1395 = vector.broadcast %cst_278 : f32 to vector<16x18xf32>
    %1396 = arith.addf %1394, %1395 : vector<16x18xf32>
    %1397 = arith.mulf %1396, %1392 : vector<16x18xf32>
    %cst_279 = arith.constant 1.42141378 : f32
    %1398 = vector.broadcast %cst_279 : f32 to vector<16x18xf32>
    %1399 = arith.addf %1397, %1398 : vector<16x18xf32>
    %1400 = arith.mulf %1399, %1392 : vector<16x18xf32>
    %cst_280 = arith.constant -0.284496725 : f32
    %1401 = vector.broadcast %cst_280 : f32 to vector<16x18xf32>
    %1402 = arith.addf %1400, %1401 : vector<16x18xf32>
    %1403 = arith.mulf %1402, %1392 : vector<16x18xf32>
    %cst_281 = arith.constant 0.254829586 : f32
    %1404 = vector.broadcast %cst_281 : f32 to vector<16x18xf32>
    %1405 = arith.addf %1403, %1404 : vector<16x18xf32>
    %1406 = arith.mulf %1405, %1392 : vector<16x18xf32>
    %cst_282 = arith.constant 0.000000e+00 : f32
    %1407 = vector.broadcast %cst_282 : f32 to vector<16x18xf32>
    %1408 = arith.subf %1407, %1383 : vector<16x18xf32>
    %1409 = arith.mulf %1408, %1383 : vector<16x18xf32>
    %1410 = math.exp %1409 : vector<16x18xf32>
    %1411 = arith.mulf %1406, %1410 : vector<16x18xf32>
    %cst_283 = arith.constant 1.000000e+00 : f32
    %1412 = vector.broadcast %cst_283 : f32 to vector<16x18xf32>
    %1413 = arith.subf %1412, %1411 : vector<16x18xf32>
    %1414 = arith.mulf %1382, %1413 : vector<16x18xf32>
    %cst_284 = arith.constant 5.000000e-01 : f32
    %1415 = vector.broadcast %cst_284 : f32 to vector<16x18xf32>
    %1416 = arith.mulf %1415, %1375 : vector<16x18xf32>
    %cst_285 = arith.constant 1.000000e+00 : f32
    %1417 = vector.broadcast %cst_285 : f32 to vector<16x18xf32>
    %1418 = arith.addf %1417, %1414 : vector<16x18xf32>
    %1419 = arith.mulf %1416, %1418 : vector<16x18xf32>
    %cst_286 = arith.constant 0.000000e+00 : f32
    %1420 = vector.shape_cast %31 : vector<1x18xi1> to vector<1x18xi1>
    %1421 = vector.broadcast %1420 : vector<1x18xi1> to vector<16x18xi1>
    %1422 = vector.broadcast %cst_286 : f32 to vector<16x18xf32>
    %1423 = arith.select %1421, %1419, %1422 : vector<16x18xi1>, vector<16x18xf32>
    %cst_287 = arith.constant dense<0.000000e+00> : vector<18xf32>
    %1424 = vector.multi_reduction <add>, %1225, %cst_287 [0] : vector<16x18xf32> to vector<18xf32>
    %1425 = vector.shape_cast %1424 : vector<18xf32> to vector<1x18xf32>
    %cst_288 = arith.constant 1.600000e+01 : f32
    %1426 = vector.broadcast %cst_288 : f32 to vector<1x18xf32>
    %1427 = arith.divf %1425, %1426 : vector<1x18xf32>
    %1428 = vector.broadcast %1427 : vector<1x18xf32> to vector<16x18xf32>
    %1429 = arith.subf %1225, %1428 : vector<16x18xf32>
    %1430 = arith.mulf %1429, %1429 : vector<16x18xf32>
    %cst_289 = arith.constant dense<0.000000e+00> : vector<18xf32>
    %1431 = vector.multi_reduction <add>, %1430, %cst_289 [0] : vector<16x18xf32> to vector<18xf32>
    %1432 = vector.shape_cast %1431 : vector<18xf32> to vector<1x18xf32>
    %cst_290 = arith.constant 1.600000e+01 : f32
    %1433 = vector.broadcast %cst_290 : f32 to vector<1x18xf32>
    %1434 = arith.divf %1432, %1433 : vector<1x18xf32>
    %cst_291 = arith.constant 9.99999974E-6 : f32
    %1435 = vector.broadcast %cst_291 : f32 to vector<1x18xf32>
    %1436 = arith.addf %1434, %1435 : vector<1x18xf32>
    %1437 = math.rsqrt %1436 : vector<1x18xf32>
    %1438 = vector.broadcast %1437 : vector<1x18xf32> to vector<16x18xf32>
    %1439 = arith.mulf %1429, %1438 : vector<16x18xf32>
    %1440 = arith.mulf %1439, %42 : vector<16x18xf32>
    %1441 = arith.addf %1440, %44 : vector<16x18xf32>
    %cst_292 = arith.constant 0.707106769 : f32
    %1442 = vector.broadcast %cst_292 : f32 to vector<16x18xf32>
    %1443 = arith.mulf %1441, %1442 : vector<16x18xf32>
    %cst_293 = arith.constant 0.000000e+00 : f32
    %1444 = vector.broadcast %cst_293 : f32 to vector<16x18xf32>
    %1445 = arith.cmpf oge, %1443, %1444 : vector<16x18xf32>
    %cst_294 = arith.constant 1.000000e+00 : f32
    %cst_295 = arith.constant -1.000000e+00 : f32
    %1446 = vector.broadcast %cst_294 : f32 to vector<16x18xf32>
    %1447 = vector.broadcast %cst_295 : f32 to vector<16x18xf32>
    %1448 = arith.select %1445, %1446, %1447 : vector<16x18xi1>, vector<16x18xf32>
    %1449 = math.absf %1443 : vector<16x18xf32>
    %cst_296 = arith.constant 0.327591091 : f32
    %1450 = vector.broadcast %cst_296 : f32 to vector<16x18xf32>
    %1451 = arith.mulf %1450, %1449 : vector<16x18xf32>
    %cst_297 = arith.constant 1.000000e+00 : f32
    %1452 = vector.broadcast %cst_297 : f32 to vector<16x18xf32>
    %1453 = arith.addf %1452, %1451 : vector<16x18xf32>
    %1454 = tpu.reciprocal %1453 {approx = true} : vector<16x18xf32> -> vector<16x18xf32>
    %1455 = arith.mulf %1453, %1454 : vector<16x18xf32>
    %cst_298 = arith.constant 2.000000e+00 : f32
    %1456 = vector.broadcast %cst_298 : f32 to vector<16x18xf32>
    %1457 = arith.subf %1456, %1455 : vector<16x18xf32>
    %1458 = arith.mulf %1454, %1457 : vector<16x18xf32>
    %cst_299 = arith.constant 1.06140542 : f32
    %1459 = vector.broadcast %cst_299 : f32 to vector<16x18xf32>
    %1460 = arith.mulf %1459, %1458 : vector<16x18xf32>
    %cst_300 = arith.constant -1.45315206 : f32
    %1461 = vector.broadcast %cst_300 : f32 to vector<16x18xf32>
    %1462 = arith.addf %1460, %1461 : vector<16x18xf32>
    %1463 = arith.mulf %1462, %1458 : vector<16x18xf32>
    %cst_301 = arith.constant 1.42141378 : f32
    %1464 = vector.broadcast %cst_301 : f32 to vector<16x18xf32>
    %1465 = arith.addf %1463, %1464 : vector<16x18xf32>
    %1466 = arith.mulf %1465, %1458 : vector<16x18xf32>
    %cst_302 = arith.constant -0.284496725 : f32
    %1467 = vector.broadcast %cst_302 : f32 to vector<16x18xf32>
    %1468 = arith.addf %1466, %1467 : vector<16x18xf32>
    %1469 = arith.mulf %1468, %1458 : vector<16x18xf32>
    %cst_303 = arith.constant 0.254829586 : f32
    %1470 = vector.broadcast %cst_303 : f32 to vector<16x18xf32>
    %1471 = arith.addf %1469, %1470 : vector<16x18xf32>
    %1472 = arith.mulf %1471, %1458 : vector<16x18xf32>
    %cst_304 = arith.constant 0.000000e+00 : f32
    %1473 = vector.broadcast %cst_304 : f32 to vector<16x18xf32>
    %1474 = arith.subf %1473, %1449 : vector<16x18xf32>
    %1475 = arith.mulf %1474, %1449 : vector<16x18xf32>
    %1476 = math.exp %1475 : vector<16x18xf32>
    %1477 = arith.mulf %1472, %1476 : vector<16x18xf32>
    %cst_305 = arith.constant 1.000000e+00 : f32
    %1478 = vector.broadcast %cst_305 : f32 to vector<16x18xf32>
    %1479 = arith.subf %1478, %1477 : vector<16x18xf32>
    %1480 = arith.mulf %1448, %1479 : vector<16x18xf32>
    %cst_306 = arith.constant 5.000000e-01 : f32
    %1481 = vector.broadcast %cst_306 : f32 to vector<16x18xf32>
    %1482 = arith.mulf %1481, %1441 : vector<16x18xf32>
    %cst_307 = arith.constant 1.000000e+00 : f32
    %1483 = vector.broadcast %cst_307 : f32 to vector<16x18xf32>
    %1484 = arith.addf %1483, %1480 : vector<16x18xf32>
    %1485 = arith.mulf %1482, %1484 : vector<16x18xf32>
    %cst_308 = arith.constant 0.000000e+00 : f32
    %1486 = vector.shape_cast %31 : vector<1x18xi1> to vector<1x18xi1>
    %1487 = vector.broadcast %1486 : vector<1x18xi1> to vector<16x18xi1>
    %1488 = vector.broadcast %cst_308 : f32 to vector<16x18xf32>
    %1489 = arith.select %1487, %1485, %1488 : vector<16x18xi1>, vector<16x18xf32>
    %1490 = vector.extract_strided_slice %1291 {offsets = [0, 0], sizes = [16, 16], strides = [1, 1]} : vector<16x18xf32> to vector<16x16xf32>
    %1491 = vector.extract_strided_slice %1291 {offsets = [0, 1], sizes = [16, 16], strides = [1, 1]} : vector<16x18xf32> to vector<16x16xf32>
    %1492 = vector.extract_strided_slice %1291 {offsets = [0, 2], sizes = [16, 16], strides = [1, 1]} : vector<16x18xf32> to vector<16x16xf32>
    %1493 = vector.extract_strided_slice %1357 {offsets = [0, 0], sizes = [16, 16], strides = [1, 1]} : vector<16x18xf32> to vector<16x16xf32>
    %1494 = vector.extract_strided_slice %1357 {offsets = [0, 1], sizes = [16, 16], strides = [1, 1]} : vector<16x18xf32> to vector<16x16xf32>
    %1495 = vector.extract_strided_slice %1357 {offsets = [0, 2], sizes = [16, 16], strides = [1, 1]} : vector<16x18xf32> to vector<16x16xf32>
    %1496 = vector.extract_strided_slice %1423 {offsets = [0, 0], sizes = [16, 16], strides = [1, 1]} : vector<16x18xf32> to vector<16x16xf32>
    %1497 = vector.extract_strided_slice %1423 {offsets = [0, 1], sizes = [16, 16], strides = [1, 1]} : vector<16x18xf32> to vector<16x16xf32>
    %1498 = vector.extract_strided_slice %1423 {offsets = [0, 2], sizes = [16, 16], strides = [1, 1]} : vector<16x18xf32> to vector<16x16xf32>
    %1499 = vector.extract_strided_slice %1489 {offsets = [0, 0], sizes = [16, 16], strides = [1, 1]} : vector<16x18xf32> to vector<16x16xf32>
    %1500 = vector.extract_strided_slice %1489 {offsets = [0, 1], sizes = [16, 16], strides = [1, 1]} : vector<16x18xf32> to vector<16x16xf32>
    %1501 = vector.extract_strided_slice %1489 {offsets = [0, 2], sizes = [16, 16], strides = [1, 1]} : vector<16x18xf32> to vector<16x16xf32>
    %cst_309 = arith.constant 0.000000e+00 : f32
    %1502 = vector.broadcast %cst_309 : f32 to vector<1x16xf32>
    %c0_310 = arith.constant 0 : index
    %1503 = memref.load %arg7[%c0_310] : memref<144xf32, #tpu.memory_space<smem>>
    %1504 = vector.broadcast %1503 : f32 to vector<16x16xf32>
    %1505 = arith.mulf %1504, %1490 : vector<16x16xf32>
    %c1_311 = arith.constant 1 : index
    %1506 = memref.load %arg7[%c1_311] : memref<144xf32, #tpu.memory_space<smem>>
    %1507 = vector.broadcast %1506 : f32 to vector<16x16xf32>
    %1508 = arith.mulf %1507, %1491 : vector<16x16xf32>
    %1509 = arith.addf %1505, %1508 : vector<16x16xf32>
    %c2_312 = arith.constant 2 : index
    %1510 = memref.load %arg7[%c2_312] : memref<144xf32, #tpu.memory_space<smem>>
    %1511 = vector.broadcast %1510 : f32 to vector<16x16xf32>
    %1512 = arith.mulf %1511, %1492 : vector<16x16xf32>
    %1513 = arith.addf %1509, %1512 : vector<16x16xf32>
    %c9_313 = arith.constant 9 : index
    %1514 = memref.load %arg7[%c9_313] : memref<144xf32, #tpu.memory_space<smem>>
    %1515 = vector.broadcast %1514 : f32 to vector<16x16xf32>
    %1516 = arith.mulf %1515, %1493 : vector<16x16xf32>
    %1517 = arith.addf %1513, %1516 : vector<16x16xf32>
    %c10_314 = arith.constant 10 : index
    %1518 = memref.load %arg7[%c10_314] : memref<144xf32, #tpu.memory_space<smem>>
    %1519 = vector.broadcast %1518 : f32 to vector<16x16xf32>
    %1520 = arith.mulf %1519, %1494 : vector<16x16xf32>
    %1521 = arith.addf %1517, %1520 : vector<16x16xf32>
    %c11_315 = arith.constant 11 : index
    %1522 = memref.load %arg7[%c11_315] : memref<144xf32, #tpu.memory_space<smem>>
    %1523 = vector.broadcast %1522 : f32 to vector<16x16xf32>
    %1524 = arith.mulf %1523, %1495 : vector<16x16xf32>
    %1525 = arith.addf %1521, %1524 : vector<16x16xf32>
    %c18_316 = arith.constant 18 : index
    %1526 = memref.load %arg7[%c18_316] : memref<144xf32, #tpu.memory_space<smem>>
    %1527 = vector.broadcast %1526 : f32 to vector<16x16xf32>
    %1528 = arith.mulf %1527, %1496 : vector<16x16xf32>
    %1529 = arith.addf %1525, %1528 : vector<16x16xf32>
    %c19_317 = arith.constant 19 : index
    %1530 = memref.load %arg7[%c19_317] : memref<144xf32, #tpu.memory_space<smem>>
    %1531 = vector.broadcast %1530 : f32 to vector<16x16xf32>
    %1532 = arith.mulf %1531, %1497 : vector<16x16xf32>
    %1533 = arith.addf %1529, %1532 : vector<16x16xf32>
    %c20_318 = arith.constant 20 : index
    %1534 = memref.load %arg7[%c20_318] : memref<144xf32, #tpu.memory_space<smem>>
    %1535 = vector.broadcast %1534 : f32 to vector<16x16xf32>
    %1536 = arith.mulf %1535, %1498 : vector<16x16xf32>
    %1537 = arith.addf %1533, %1536 : vector<16x16xf32>
    %c27_319 = arith.constant 27 : index
    %1538 = memref.load %arg7[%c27_319] : memref<144xf32, #tpu.memory_space<smem>>
    %1539 = vector.broadcast %1538 : f32 to vector<16x16xf32>
    %1540 = arith.mulf %1539, %1499 : vector<16x16xf32>
    %1541 = arith.addf %1537, %1540 : vector<16x16xf32>
    %c28_320 = arith.constant 28 : index
    %1542 = memref.load %arg7[%c28_320] : memref<144xf32, #tpu.memory_space<smem>>
    %1543 = vector.broadcast %1542 : f32 to vector<16x16xf32>
    %1544 = arith.mulf %1543, %1500 : vector<16x16xf32>
    %1545 = arith.addf %1541, %1544 : vector<16x16xf32>
    %c29_321 = arith.constant 29 : index
    %1546 = memref.load %arg7[%c29_321] : memref<144xf32, #tpu.memory_space<smem>>
    %1547 = vector.broadcast %1546 : f32 to vector<16x16xf32>
    %1548 = arith.mulf %1547, %1501 : vector<16x16xf32>
    %1549 = arith.addf %1545, %1548 : vector<16x16xf32>
    %1550 = vector.extract_strided_slice %1549 {offsets = [0, 0], sizes = [15, 16], strides = [1, 1]} : vector<16x16xf32> to vector<15x16xf32>
    %1551 = tpu.concatenate %1502, %1550 in 0 : vector<1x16xf32>, vector<15x16xf32> -> vector<16x16xf32>
    %c3_322 = arith.constant 3 : index
    %1552 = memref.load %arg7[%c3_322] : memref<144xf32, #tpu.memory_space<smem>>
    %1553 = vector.broadcast %1552 : f32 to vector<16x16xf32>
    %1554 = arith.mulf %1553, %1490 : vector<16x16xf32>
    %c4_323 = arith.constant 4 : index
    %1555 = memref.load %arg7[%c4_323] : memref<144xf32, #tpu.memory_space<smem>>
    %1556 = vector.broadcast %1555 : f32 to vector<16x16xf32>
    %1557 = arith.mulf %1556, %1491 : vector<16x16xf32>
    %1558 = arith.addf %1554, %1557 : vector<16x16xf32>
    %c5_324 = arith.constant 5 : index
    %1559 = memref.load %arg7[%c5_324] : memref<144xf32, #tpu.memory_space<smem>>
    %1560 = vector.broadcast %1559 : f32 to vector<16x16xf32>
    %1561 = arith.mulf %1560, %1492 : vector<16x16xf32>
    %1562 = arith.addf %1558, %1561 : vector<16x16xf32>
    %c12_325 = arith.constant 12 : index
    %1563 = memref.load %arg7[%c12_325] : memref<144xf32, #tpu.memory_space<smem>>
    %1564 = vector.broadcast %1563 : f32 to vector<16x16xf32>
    %1565 = arith.mulf %1564, %1493 : vector<16x16xf32>
    %1566 = arith.addf %1562, %1565 : vector<16x16xf32>
    %c13_326 = arith.constant 13 : index
    %1567 = memref.load %arg7[%c13_326] : memref<144xf32, #tpu.memory_space<smem>>
    %1568 = vector.broadcast %1567 : f32 to vector<16x16xf32>
    %1569 = arith.mulf %1568, %1494 : vector<16x16xf32>
    %1570 = arith.addf %1566, %1569 : vector<16x16xf32>
    %c14_327 = arith.constant 14 : index
    %1571 = memref.load %arg7[%c14_327] : memref<144xf32, #tpu.memory_space<smem>>
    %1572 = vector.broadcast %1571 : f32 to vector<16x16xf32>
    %1573 = arith.mulf %1572, %1495 : vector<16x16xf32>
    %1574 = arith.addf %1570, %1573 : vector<16x16xf32>
    %c21_328 = arith.constant 21 : index
    %1575 = memref.load %arg7[%c21_328] : memref<144xf32, #tpu.memory_space<smem>>
    %1576 = vector.broadcast %1575 : f32 to vector<16x16xf32>
    %1577 = arith.mulf %1576, %1496 : vector<16x16xf32>
    %1578 = arith.addf %1574, %1577 : vector<16x16xf32>
    %c22_329 = arith.constant 22 : index
    %1579 = memref.load %arg7[%c22_329] : memref<144xf32, #tpu.memory_space<smem>>
    %1580 = vector.broadcast %1579 : f32 to vector<16x16xf32>
    %1581 = arith.mulf %1580, %1497 : vector<16x16xf32>
    %1582 = arith.addf %1578, %1581 : vector<16x16xf32>
    %c23_330 = arith.constant 23 : index
    %1583 = memref.load %arg7[%c23_330] : memref<144xf32, #tpu.memory_space<smem>>
    %1584 = vector.broadcast %1583 : f32 to vector<16x16xf32>
    %1585 = arith.mulf %1584, %1498 : vector<16x16xf32>
    %1586 = arith.addf %1582, %1585 : vector<16x16xf32>
    %c30_331 = arith.constant 30 : index
    %1587 = memref.load %arg7[%c30_331] : memref<144xf32, #tpu.memory_space<smem>>
    %1588 = vector.broadcast %1587 : f32 to vector<16x16xf32>
    %1589 = arith.mulf %1588, %1499 : vector<16x16xf32>
    %1590 = arith.addf %1586, %1589 : vector<16x16xf32>
    %c31_332 = arith.constant 31 : index
    %1591 = memref.load %arg7[%c31_332] : memref<144xf32, #tpu.memory_space<smem>>
    %1592 = vector.broadcast %1591 : f32 to vector<16x16xf32>
    %1593 = arith.mulf %1592, %1500 : vector<16x16xf32>
    %1594 = arith.addf %1590, %1593 : vector<16x16xf32>
    %c32_333 = arith.constant 32 : index
    %1595 = memref.load %arg7[%c32_333] : memref<144xf32, #tpu.memory_space<smem>>
    %1596 = vector.broadcast %1595 : f32 to vector<16x16xf32>
    %1597 = arith.mulf %1596, %1501 : vector<16x16xf32>
    %1598 = arith.addf %1594, %1597 : vector<16x16xf32>
    %1599 = arith.addf %1551, %1598 : vector<16x16xf32>
    %c6_334 = arith.constant 6 : index
    %1600 = memref.load %arg7[%c6_334] : memref<144xf32, #tpu.memory_space<smem>>
    %1601 = vector.broadcast %1600 : f32 to vector<16x16xf32>
    %1602 = arith.mulf %1601, %1490 : vector<16x16xf32>
    %c7_335 = arith.constant 7 : index
    %1603 = memref.load %arg7[%c7_335] : memref<144xf32, #tpu.memory_space<smem>>
    %1604 = vector.broadcast %1603 : f32 to vector<16x16xf32>
    %1605 = arith.mulf %1604, %1491 : vector<16x16xf32>
    %1606 = arith.addf %1602, %1605 : vector<16x16xf32>
    %c8_336 = arith.constant 8 : index
    %1607 = memref.load %arg7[%c8_336] : memref<144xf32, #tpu.memory_space<smem>>
    %1608 = vector.broadcast %1607 : f32 to vector<16x16xf32>
    %1609 = arith.mulf %1608, %1492 : vector<16x16xf32>
    %1610 = arith.addf %1606, %1609 : vector<16x16xf32>
    %c15_337 = arith.constant 15 : index
    %1611 = memref.load %arg7[%c15_337] : memref<144xf32, #tpu.memory_space<smem>>
    %1612 = vector.broadcast %1611 : f32 to vector<16x16xf32>
    %1613 = arith.mulf %1612, %1493 : vector<16x16xf32>
    %1614 = arith.addf %1610, %1613 : vector<16x16xf32>
    %c16_338 = arith.constant 16 : index
    %1615 = memref.load %arg7[%c16_338] : memref<144xf32, #tpu.memory_space<smem>>
    %1616 = vector.broadcast %1615 : f32 to vector<16x16xf32>
    %1617 = arith.mulf %1616, %1494 : vector<16x16xf32>
    %1618 = arith.addf %1614, %1617 : vector<16x16xf32>
    %c17_339 = arith.constant 17 : index
    %1619 = memref.load %arg7[%c17_339] : memref<144xf32, #tpu.memory_space<smem>>
    %1620 = vector.broadcast %1619 : f32 to vector<16x16xf32>
    %1621 = arith.mulf %1620, %1495 : vector<16x16xf32>
    %1622 = arith.addf %1618, %1621 : vector<16x16xf32>
    %c24_340 = arith.constant 24 : index
    %1623 = memref.load %arg7[%c24_340] : memref<144xf32, #tpu.memory_space<smem>>
    %1624 = vector.broadcast %1623 : f32 to vector<16x16xf32>
    %1625 = arith.mulf %1624, %1496 : vector<16x16xf32>
    %1626 = arith.addf %1622, %1625 : vector<16x16xf32>
    %c25_341 = arith.constant 25 : index
    %1627 = memref.load %arg7[%c25_341] : memref<144xf32, #tpu.memory_space<smem>>
    %1628 = vector.broadcast %1627 : f32 to vector<16x16xf32>
    %1629 = arith.mulf %1628, %1497 : vector<16x16xf32>
    %1630 = arith.addf %1626, %1629 : vector<16x16xf32>
    %c26_342 = arith.constant 26 : index
    %1631 = memref.load %arg7[%c26_342] : memref<144xf32, #tpu.memory_space<smem>>
    %1632 = vector.broadcast %1631 : f32 to vector<16x16xf32>
    %1633 = arith.mulf %1632, %1498 : vector<16x16xf32>
    %1634 = arith.addf %1630, %1633 : vector<16x16xf32>
    %c33_343 = arith.constant 33 : index
    %1635 = memref.load %arg7[%c33_343] : memref<144xf32, #tpu.memory_space<smem>>
    %1636 = vector.broadcast %1635 : f32 to vector<16x16xf32>
    %1637 = arith.mulf %1636, %1499 : vector<16x16xf32>
    %1638 = arith.addf %1634, %1637 : vector<16x16xf32>
    %c34_344 = arith.constant 34 : index
    %1639 = memref.load %arg7[%c34_344] : memref<144xf32, #tpu.memory_space<smem>>
    %1640 = vector.broadcast %1639 : f32 to vector<16x16xf32>
    %1641 = arith.mulf %1640, %1500 : vector<16x16xf32>
    %1642 = arith.addf %1638, %1641 : vector<16x16xf32>
    %c35_345 = arith.constant 35 : index
    %1643 = memref.load %arg7[%c35_345] : memref<144xf32, #tpu.memory_space<smem>>
    %1644 = vector.broadcast %1643 : f32 to vector<16x16xf32>
    %1645 = arith.mulf %1644, %1501 : vector<16x16xf32>
    %1646 = arith.addf %1642, %1645 : vector<16x16xf32>
    %1647 = vector.extract_strided_slice %1646 {offsets = [1, 0], sizes = [15, 16], strides = [1, 1]} : vector<16x16xf32> to vector<15x16xf32>
    %1648 = tpu.concatenate %1647, %1502 in 0 : vector<15x16xf32>, vector<1x16xf32> -> vector<16x16xf32>
    %1649 = arith.addf %1599, %1648 : vector<16x16xf32>
    %c0_346 = arith.constant 0 : index
    %1650 = memref.load %arg8[%c0_346] : memref<4xf32, #tpu.memory_space<smem>>
    %1651 = vector.broadcast %1650 : f32 to vector<16x16xf32>
    %1652 = arith.addf %1649, %1651 : vector<16x16xf32>
    %c36_347 = arith.constant 36 : index
    %1653 = memref.load %arg7[%c36_347] : memref<144xf32, #tpu.memory_space<smem>>
    %1654 = vector.broadcast %1653 : f32 to vector<16x16xf32>
    %1655 = arith.mulf %1654, %1490 : vector<16x16xf32>
    %c37_348 = arith.constant 37 : index
    %1656 = memref.load %arg7[%c37_348] : memref<144xf32, #tpu.memory_space<smem>>
    %1657 = vector.broadcast %1656 : f32 to vector<16x16xf32>
    %1658 = arith.mulf %1657, %1491 : vector<16x16xf32>
    %1659 = arith.addf %1655, %1658 : vector<16x16xf32>
    %c38_349 = arith.constant 38 : index
    %1660 = memref.load %arg7[%c38_349] : memref<144xf32, #tpu.memory_space<smem>>
    %1661 = vector.broadcast %1660 : f32 to vector<16x16xf32>
    %1662 = arith.mulf %1661, %1492 : vector<16x16xf32>
    %1663 = arith.addf %1659, %1662 : vector<16x16xf32>
    %c45_350 = arith.constant 45 : index
    %1664 = memref.load %arg7[%c45_350] : memref<144xf32, #tpu.memory_space<smem>>
    %1665 = vector.broadcast %1664 : f32 to vector<16x16xf32>
    %1666 = arith.mulf %1665, %1493 : vector<16x16xf32>
    %1667 = arith.addf %1663, %1666 : vector<16x16xf32>
    %c46_351 = arith.constant 46 : index
    %1668 = memref.load %arg7[%c46_351] : memref<144xf32, #tpu.memory_space<smem>>
    %1669 = vector.broadcast %1668 : f32 to vector<16x16xf32>
    %1670 = arith.mulf %1669, %1494 : vector<16x16xf32>
    %1671 = arith.addf %1667, %1670 : vector<16x16xf32>
    %c47_352 = arith.constant 47 : index
    %1672 = memref.load %arg7[%c47_352] : memref<144xf32, #tpu.memory_space<smem>>
    %1673 = vector.broadcast %1672 : f32 to vector<16x16xf32>
    %1674 = arith.mulf %1673, %1495 : vector<16x16xf32>
    %1675 = arith.addf %1671, %1674 : vector<16x16xf32>
    %c54_353 = arith.constant 54 : index
    %1676 = memref.load %arg7[%c54_353] : memref<144xf32, #tpu.memory_space<smem>>
    %1677 = vector.broadcast %1676 : f32 to vector<16x16xf32>
    %1678 = arith.mulf %1677, %1496 : vector<16x16xf32>
    %1679 = arith.addf %1675, %1678 : vector<16x16xf32>
    %c55_354 = arith.constant 55 : index
    %1680 = memref.load %arg7[%c55_354] : memref<144xf32, #tpu.memory_space<smem>>
    %1681 = vector.broadcast %1680 : f32 to vector<16x16xf32>
    %1682 = arith.mulf %1681, %1497 : vector<16x16xf32>
    %1683 = arith.addf %1679, %1682 : vector<16x16xf32>
    %c56_355 = arith.constant 56 : index
    %1684 = memref.load %arg7[%c56_355] : memref<144xf32, #tpu.memory_space<smem>>
    %1685 = vector.broadcast %1684 : f32 to vector<16x16xf32>
    %1686 = arith.mulf %1685, %1498 : vector<16x16xf32>
    %1687 = arith.addf %1683, %1686 : vector<16x16xf32>
    %c63_356 = arith.constant 63 : index
    %1688 = memref.load %arg7[%c63_356] : memref<144xf32, #tpu.memory_space<smem>>
    %1689 = vector.broadcast %1688 : f32 to vector<16x16xf32>
    %1690 = arith.mulf %1689, %1499 : vector<16x16xf32>
    %1691 = arith.addf %1687, %1690 : vector<16x16xf32>
    %c64_357 = arith.constant 64 : index
    %1692 = memref.load %arg7[%c64_357] : memref<144xf32, #tpu.memory_space<smem>>
    %1693 = vector.broadcast %1692 : f32 to vector<16x16xf32>
    %1694 = arith.mulf %1693, %1500 : vector<16x16xf32>
    %1695 = arith.addf %1691, %1694 : vector<16x16xf32>
    %c65_358 = arith.constant 65 : index
    %1696 = memref.load %arg7[%c65_358] : memref<144xf32, #tpu.memory_space<smem>>
    %1697 = vector.broadcast %1696 : f32 to vector<16x16xf32>
    %1698 = arith.mulf %1697, %1501 : vector<16x16xf32>
    %1699 = arith.addf %1695, %1698 : vector<16x16xf32>
    %1700 = vector.extract_strided_slice %1699 {offsets = [0, 0], sizes = [15, 16], strides = [1, 1]} : vector<16x16xf32> to vector<15x16xf32>
    %1701 = tpu.concatenate %1502, %1700 in 0 : vector<1x16xf32>, vector<15x16xf32> -> vector<16x16xf32>
    %c39_359 = arith.constant 39 : index
    %1702 = memref.load %arg7[%c39_359] : memref<144xf32, #tpu.memory_space<smem>>
    %1703 = vector.broadcast %1702 : f32 to vector<16x16xf32>
    %1704 = arith.mulf %1703, %1490 : vector<16x16xf32>
    %c40_360 = arith.constant 40 : index
    %1705 = memref.load %arg7[%c40_360] : memref<144xf32, #tpu.memory_space<smem>>
    %1706 = vector.broadcast %1705 : f32 to vector<16x16xf32>
    %1707 = arith.mulf %1706, %1491 : vector<16x16xf32>
    %1708 = arith.addf %1704, %1707 : vector<16x16xf32>
    %c41_361 = arith.constant 41 : index
    %1709 = memref.load %arg7[%c41_361] : memref<144xf32, #tpu.memory_space<smem>>
    %1710 = vector.broadcast %1709 : f32 to vector<16x16xf32>
    %1711 = arith.mulf %1710, %1492 : vector<16x16xf32>
    %1712 = arith.addf %1708, %1711 : vector<16x16xf32>
    %c48_362 = arith.constant 48 : index
    %1713 = memref.load %arg7[%c48_362] : memref<144xf32, #tpu.memory_space<smem>>
    %1714 = vector.broadcast %1713 : f32 to vector<16x16xf32>
    %1715 = arith.mulf %1714, %1493 : vector<16x16xf32>
    %1716 = arith.addf %1712, %1715 : vector<16x16xf32>
    %c49_363 = arith.constant 49 : index
    %1717 = memref.load %arg7[%c49_363] : memref<144xf32, #tpu.memory_space<smem>>
    %1718 = vector.broadcast %1717 : f32 to vector<16x16xf32>
    %1719 = arith.mulf %1718, %1494 : vector<16x16xf32>
    %1720 = arith.addf %1716, %1719 : vector<16x16xf32>
    %c50_364 = arith.constant 50 : index
    %1721 = memref.load %arg7[%c50_364] : memref<144xf32, #tpu.memory_space<smem>>
    %1722 = vector.broadcast %1721 : f32 to vector<16x16xf32>
    %1723 = arith.mulf %1722, %1495 : vector<16x16xf32>
    %1724 = arith.addf %1720, %1723 : vector<16x16xf32>
    %c57_365 = arith.constant 57 : index
    %1725 = memref.load %arg7[%c57_365] : memref<144xf32, #tpu.memory_space<smem>>
    %1726 = vector.broadcast %1725 : f32 to vector<16x16xf32>
    %1727 = arith.mulf %1726, %1496 : vector<16x16xf32>
    %1728 = arith.addf %1724, %1727 : vector<16x16xf32>
    %c58_366 = arith.constant 58 : index
    %1729 = memref.load %arg7[%c58_366] : memref<144xf32, #tpu.memory_space<smem>>
    %1730 = vector.broadcast %1729 : f32 to vector<16x16xf32>
    %1731 = arith.mulf %1730, %1497 : vector<16x16xf32>
    %1732 = arith.addf %1728, %1731 : vector<16x16xf32>
    %c59_367 = arith.constant 59 : index
    %1733 = memref.load %arg7[%c59_367] : memref<144xf32, #tpu.memory_space<smem>>
    %1734 = vector.broadcast %1733 : f32 to vector<16x16xf32>
    %1735 = arith.mulf %1734, %1498 : vector<16x16xf32>
    %1736 = arith.addf %1732, %1735 : vector<16x16xf32>
    %c66_368 = arith.constant 66 : index
    %1737 = memref.load %arg7[%c66_368] : memref<144xf32, #tpu.memory_space<smem>>
    %1738 = vector.broadcast %1737 : f32 to vector<16x16xf32>
    %1739 = arith.mulf %1738, %1499 : vector<16x16xf32>
    %1740 = arith.addf %1736, %1739 : vector<16x16xf32>
    %c67_369 = arith.constant 67 : index
    %1741 = memref.load %arg7[%c67_369] : memref<144xf32, #tpu.memory_space<smem>>
    %1742 = vector.broadcast %1741 : f32 to vector<16x16xf32>
    %1743 = arith.mulf %1742, %1500 : vector<16x16xf32>
    %1744 = arith.addf %1740, %1743 : vector<16x16xf32>
    %c68_370 = arith.constant 68 : index
    %1745 = memref.load %arg7[%c68_370] : memref<144xf32, #tpu.memory_space<smem>>
    %1746 = vector.broadcast %1745 : f32 to vector<16x16xf32>
    %1747 = arith.mulf %1746, %1501 : vector<16x16xf32>
    %1748 = arith.addf %1744, %1747 : vector<16x16xf32>
    %1749 = arith.addf %1701, %1748 : vector<16x16xf32>
    %c42_371 = arith.constant 42 : index
    %1750 = memref.load %arg7[%c42_371] : memref<144xf32, #tpu.memory_space<smem>>
    %1751 = vector.broadcast %1750 : f32 to vector<16x16xf32>
    %1752 = arith.mulf %1751, %1490 : vector<16x16xf32>
    %c43_372 = arith.constant 43 : index
    %1753 = memref.load %arg7[%c43_372] : memref<144xf32, #tpu.memory_space<smem>>
    %1754 = vector.broadcast %1753 : f32 to vector<16x16xf32>
    %1755 = arith.mulf %1754, %1491 : vector<16x16xf32>
    %1756 = arith.addf %1752, %1755 : vector<16x16xf32>
    %c44_373 = arith.constant 44 : index
    %1757 = memref.load %arg7[%c44_373] : memref<144xf32, #tpu.memory_space<smem>>
    %1758 = vector.broadcast %1757 : f32 to vector<16x16xf32>
    %1759 = arith.mulf %1758, %1492 : vector<16x16xf32>
    %1760 = arith.addf %1756, %1759 : vector<16x16xf32>
    %c51_374 = arith.constant 51 : index
    %1761 = memref.load %arg7[%c51_374] : memref<144xf32, #tpu.memory_space<smem>>
    %1762 = vector.broadcast %1761 : f32 to vector<16x16xf32>
    %1763 = arith.mulf %1762, %1493 : vector<16x16xf32>
    %1764 = arith.addf %1760, %1763 : vector<16x16xf32>
    %c52_375 = arith.constant 52 : index
    %1765 = memref.load %arg7[%c52_375] : memref<144xf32, #tpu.memory_space<smem>>
    %1766 = vector.broadcast %1765 : f32 to vector<16x16xf32>
    %1767 = arith.mulf %1766, %1494 : vector<16x16xf32>
    %1768 = arith.addf %1764, %1767 : vector<16x16xf32>
    %c53_376 = arith.constant 53 : index
    %1769 = memref.load %arg7[%c53_376] : memref<144xf32, #tpu.memory_space<smem>>
    %1770 = vector.broadcast %1769 : f32 to vector<16x16xf32>
    %1771 = arith.mulf %1770, %1495 : vector<16x16xf32>
    %1772 = arith.addf %1768, %1771 : vector<16x16xf32>
    %c60_377 = arith.constant 60 : index
    %1773 = memref.load %arg7[%c60_377] : memref<144xf32, #tpu.memory_space<smem>>
    %1774 = vector.broadcast %1773 : f32 to vector<16x16xf32>
    %1775 = arith.mulf %1774, %1496 : vector<16x16xf32>
    %1776 = arith.addf %1772, %1775 : vector<16x16xf32>
    %c61_378 = arith.constant 61 : index
    %1777 = memref.load %arg7[%c61_378] : memref<144xf32, #tpu.memory_space<smem>>
    %1778 = vector.broadcast %1777 : f32 to vector<16x16xf32>
    %1779 = arith.mulf %1778, %1497 : vector<16x16xf32>
    %1780 = arith.addf %1776, %1779 : vector<16x16xf32>
    %c62_379 = arith.constant 62 : index
    %1781 = memref.load %arg7[%c62_379] : memref<144xf32, #tpu.memory_space<smem>>
    %1782 = vector.broadcast %1781 : f32 to vector<16x16xf32>
    %1783 = arith.mulf %1782, %1498 : vector<16x16xf32>
    %1784 = arith.addf %1780, %1783 : vector<16x16xf32>
    %c69_380 = arith.constant 69 : index
    %1785 = memref.load %arg7[%c69_380] : memref<144xf32, #tpu.memory_space<smem>>
    %1786 = vector.broadcast %1785 : f32 to vector<16x16xf32>
    %1787 = arith.mulf %1786, %1499 : vector<16x16xf32>
    %1788 = arith.addf %1784, %1787 : vector<16x16xf32>
    %c70_381 = arith.constant 70 : index
    %1789 = memref.load %arg7[%c70_381] : memref<144xf32, #tpu.memory_space<smem>>
    %1790 = vector.broadcast %1789 : f32 to vector<16x16xf32>
    %1791 = arith.mulf %1790, %1500 : vector<16x16xf32>
    %1792 = arith.addf %1788, %1791 : vector<16x16xf32>
    %c71_382 = arith.constant 71 : index
    %1793 = memref.load %arg7[%c71_382] : memref<144xf32, #tpu.memory_space<smem>>
    %1794 = vector.broadcast %1793 : f32 to vector<16x16xf32>
    %1795 = arith.mulf %1794, %1501 : vector<16x16xf32>
    %1796 = arith.addf %1792, %1795 : vector<16x16xf32>
    %1797 = vector.extract_strided_slice %1796 {offsets = [1, 0], sizes = [15, 16], strides = [1, 1]} : vector<16x16xf32> to vector<15x16xf32>
    %1798 = tpu.concatenate %1797, %1502 in 0 : vector<15x16xf32>, vector<1x16xf32> -> vector<16x16xf32>
    %1799 = arith.addf %1749, %1798 : vector<16x16xf32>
    %c1_383 = arith.constant 1 : index
    %1800 = memref.load %arg8[%c1_383] : memref<4xf32, #tpu.memory_space<smem>>
    %1801 = vector.broadcast %1800 : f32 to vector<16x16xf32>
    %1802 = arith.addf %1799, %1801 : vector<16x16xf32>
    %c72_384 = arith.constant 72 : index
    %1803 = memref.load %arg7[%c72_384] : memref<144xf32, #tpu.memory_space<smem>>
    %1804 = vector.broadcast %1803 : f32 to vector<16x16xf32>
    %1805 = arith.mulf %1804, %1490 : vector<16x16xf32>
    %c73_385 = arith.constant 73 : index
    %1806 = memref.load %arg7[%c73_385] : memref<144xf32, #tpu.memory_space<smem>>
    %1807 = vector.broadcast %1806 : f32 to vector<16x16xf32>
    %1808 = arith.mulf %1807, %1491 : vector<16x16xf32>
    %1809 = arith.addf %1805, %1808 : vector<16x16xf32>
    %c74_386 = arith.constant 74 : index
    %1810 = memref.load %arg7[%c74_386] : memref<144xf32, #tpu.memory_space<smem>>
    %1811 = vector.broadcast %1810 : f32 to vector<16x16xf32>
    %1812 = arith.mulf %1811, %1492 : vector<16x16xf32>
    %1813 = arith.addf %1809, %1812 : vector<16x16xf32>
    %c81_387 = arith.constant 81 : index
    %1814 = memref.load %arg7[%c81_387] : memref<144xf32, #tpu.memory_space<smem>>
    %1815 = vector.broadcast %1814 : f32 to vector<16x16xf32>
    %1816 = arith.mulf %1815, %1493 : vector<16x16xf32>
    %1817 = arith.addf %1813, %1816 : vector<16x16xf32>
    %c82_388 = arith.constant 82 : index
    %1818 = memref.load %arg7[%c82_388] : memref<144xf32, #tpu.memory_space<smem>>
    %1819 = vector.broadcast %1818 : f32 to vector<16x16xf32>
    %1820 = arith.mulf %1819, %1494 : vector<16x16xf32>
    %1821 = arith.addf %1817, %1820 : vector<16x16xf32>
    %c83_389 = arith.constant 83 : index
    %1822 = memref.load %arg7[%c83_389] : memref<144xf32, #tpu.memory_space<smem>>
    %1823 = vector.broadcast %1822 : f32 to vector<16x16xf32>
    %1824 = arith.mulf %1823, %1495 : vector<16x16xf32>
    %1825 = arith.addf %1821, %1824 : vector<16x16xf32>
    %c90_390 = arith.constant 90 : index
    %1826 = memref.load %arg7[%c90_390] : memref<144xf32, #tpu.memory_space<smem>>
    %1827 = vector.broadcast %1826 : f32 to vector<16x16xf32>
    %1828 = arith.mulf %1827, %1496 : vector<16x16xf32>
    %1829 = arith.addf %1825, %1828 : vector<16x16xf32>
    %c91_391 = arith.constant 91 : index
    %1830 = memref.load %arg7[%c91_391] : memref<144xf32, #tpu.memory_space<smem>>
    %1831 = vector.broadcast %1830 : f32 to vector<16x16xf32>
    %1832 = arith.mulf %1831, %1497 : vector<16x16xf32>
    %1833 = arith.addf %1829, %1832 : vector<16x16xf32>
    %c92_392 = arith.constant 92 : index
    %1834 = memref.load %arg7[%c92_392] : memref<144xf32, #tpu.memory_space<smem>>
    %1835 = vector.broadcast %1834 : f32 to vector<16x16xf32>
    %1836 = arith.mulf %1835, %1498 : vector<16x16xf32>
    %1837 = arith.addf %1833, %1836 : vector<16x16xf32>
    %c99_393 = arith.constant 99 : index
    %1838 = memref.load %arg7[%c99_393] : memref<144xf32, #tpu.memory_space<smem>>
    %1839 = vector.broadcast %1838 : f32 to vector<16x16xf32>
    %1840 = arith.mulf %1839, %1499 : vector<16x16xf32>
    %1841 = arith.addf %1837, %1840 : vector<16x16xf32>
    %c100_394 = arith.constant 100 : index
    %1842 = memref.load %arg7[%c100_394] : memref<144xf32, #tpu.memory_space<smem>>
    %1843 = vector.broadcast %1842 : f32 to vector<16x16xf32>
    %1844 = arith.mulf %1843, %1500 : vector<16x16xf32>
    %1845 = arith.addf %1841, %1844 : vector<16x16xf32>
    %c101_395 = arith.constant 101 : index
    %1846 = memref.load %arg7[%c101_395] : memref<144xf32, #tpu.memory_space<smem>>
    %1847 = vector.broadcast %1846 : f32 to vector<16x16xf32>
    %1848 = arith.mulf %1847, %1501 : vector<16x16xf32>
    %1849 = arith.addf %1845, %1848 : vector<16x16xf32>
    %1850 = vector.extract_strided_slice %1849 {offsets = [0, 0], sizes = [15, 16], strides = [1, 1]} : vector<16x16xf32> to vector<15x16xf32>
    %1851 = tpu.concatenate %1502, %1850 in 0 : vector<1x16xf32>, vector<15x16xf32> -> vector<16x16xf32>
    %c75_396 = arith.constant 75 : index
    %1852 = memref.load %arg7[%c75_396] : memref<144xf32, #tpu.memory_space<smem>>
    %1853 = vector.broadcast %1852 : f32 to vector<16x16xf32>
    %1854 = arith.mulf %1853, %1490 : vector<16x16xf32>
    %c76_397 = arith.constant 76 : index
    %1855 = memref.load %arg7[%c76_397] : memref<144xf32, #tpu.memory_space<smem>>
    %1856 = vector.broadcast %1855 : f32 to vector<16x16xf32>
    %1857 = arith.mulf %1856, %1491 : vector<16x16xf32>
    %1858 = arith.addf %1854, %1857 : vector<16x16xf32>
    %c77_398 = arith.constant 77 : index
    %1859 = memref.load %arg7[%c77_398] : memref<144xf32, #tpu.memory_space<smem>>
    %1860 = vector.broadcast %1859 : f32 to vector<16x16xf32>
    %1861 = arith.mulf %1860, %1492 : vector<16x16xf32>
    %1862 = arith.addf %1858, %1861 : vector<16x16xf32>
    %c84_399 = arith.constant 84 : index
    %1863 = memref.load %arg7[%c84_399] : memref<144xf32, #tpu.memory_space<smem>>
    %1864 = vector.broadcast %1863 : f32 to vector<16x16xf32>
    %1865 = arith.mulf %1864, %1493 : vector<16x16xf32>
    %1866 = arith.addf %1862, %1865 : vector<16x16xf32>
    %c85_400 = arith.constant 85 : index
    %1867 = memref.load %arg7[%c85_400] : memref<144xf32, #tpu.memory_space<smem>>
    %1868 = vector.broadcast %1867 : f32 to vector<16x16xf32>
    %1869 = arith.mulf %1868, %1494 : vector<16x16xf32>
    %1870 = arith.addf %1866, %1869 : vector<16x16xf32>
    %c86_401 = arith.constant 86 : index
    %1871 = memref.load %arg7[%c86_401] : memref<144xf32, #tpu.memory_space<smem>>
    %1872 = vector.broadcast %1871 : f32 to vector<16x16xf32>
    %1873 = arith.mulf %1872, %1495 : vector<16x16xf32>
    %1874 = arith.addf %1870, %1873 : vector<16x16xf32>
    %c93_402 = arith.constant 93 : index
    %1875 = memref.load %arg7[%c93_402] : memref<144xf32, #tpu.memory_space<smem>>
    %1876 = vector.broadcast %1875 : f32 to vector<16x16xf32>
    %1877 = arith.mulf %1876, %1496 : vector<16x16xf32>
    %1878 = arith.addf %1874, %1877 : vector<16x16xf32>
    %c94_403 = arith.constant 94 : index
    %1879 = memref.load %arg7[%c94_403] : memref<144xf32, #tpu.memory_space<smem>>
    %1880 = vector.broadcast %1879 : f32 to vector<16x16xf32>
    %1881 = arith.mulf %1880, %1497 : vector<16x16xf32>
    %1882 = arith.addf %1878, %1881 : vector<16x16xf32>
    %c95_404 = arith.constant 95 : index
    %1883 = memref.load %arg7[%c95_404] : memref<144xf32, #tpu.memory_space<smem>>
    %1884 = vector.broadcast %1883 : f32 to vector<16x16xf32>
    %1885 = arith.mulf %1884, %1498 : vector<16x16xf32>
    %1886 = arith.addf %1882, %1885 : vector<16x16xf32>
    %c102_405 = arith.constant 102 : index
    %1887 = memref.load %arg7[%c102_405] : memref<144xf32, #tpu.memory_space<smem>>
    %1888 = vector.broadcast %1887 : f32 to vector<16x16xf32>
    %1889 = arith.mulf %1888, %1499 : vector<16x16xf32>
    %1890 = arith.addf %1886, %1889 : vector<16x16xf32>
    %c103_406 = arith.constant 103 : index
    %1891 = memref.load %arg7[%c103_406] : memref<144xf32, #tpu.memory_space<smem>>
    %1892 = vector.broadcast %1891 : f32 to vector<16x16xf32>
    %1893 = arith.mulf %1892, %1500 : vector<16x16xf32>
    %1894 = arith.addf %1890, %1893 : vector<16x16xf32>
    %c104_407 = arith.constant 104 : index
    %1895 = memref.load %arg7[%c104_407] : memref<144xf32, #tpu.memory_space<smem>>
    %1896 = vector.broadcast %1895 : f32 to vector<16x16xf32>
    %1897 = arith.mulf %1896, %1501 : vector<16x16xf32>
    %1898 = arith.addf %1894, %1897 : vector<16x16xf32>
    %1899 = arith.addf %1851, %1898 : vector<16x16xf32>
    %c78_408 = arith.constant 78 : index
    %1900 = memref.load %arg7[%c78_408] : memref<144xf32, #tpu.memory_space<smem>>
    %1901 = vector.broadcast %1900 : f32 to vector<16x16xf32>
    %1902 = arith.mulf %1901, %1490 : vector<16x16xf32>
    %c79_409 = arith.constant 79 : index
    %1903 = memref.load %arg7[%c79_409] : memref<144xf32, #tpu.memory_space<smem>>
    %1904 = vector.broadcast %1903 : f32 to vector<16x16xf32>
    %1905 = arith.mulf %1904, %1491 : vector<16x16xf32>
    %1906 = arith.addf %1902, %1905 : vector<16x16xf32>
    %c80_410 = arith.constant 80 : index
    %1907 = memref.load %arg7[%c80_410] : memref<144xf32, #tpu.memory_space<smem>>
    %1908 = vector.broadcast %1907 : f32 to vector<16x16xf32>
    %1909 = arith.mulf %1908, %1492 : vector<16x16xf32>
    %1910 = arith.addf %1906, %1909 : vector<16x16xf32>
    %c87_411 = arith.constant 87 : index
    %1911 = memref.load %arg7[%c87_411] : memref<144xf32, #tpu.memory_space<smem>>
    %1912 = vector.broadcast %1911 : f32 to vector<16x16xf32>
    %1913 = arith.mulf %1912, %1493 : vector<16x16xf32>
    %1914 = arith.addf %1910, %1913 : vector<16x16xf32>
    %c88_412 = arith.constant 88 : index
    %1915 = memref.load %arg7[%c88_412] : memref<144xf32, #tpu.memory_space<smem>>
    %1916 = vector.broadcast %1915 : f32 to vector<16x16xf32>
    %1917 = arith.mulf %1916, %1494 : vector<16x16xf32>
    %1918 = arith.addf %1914, %1917 : vector<16x16xf32>
    %c89_413 = arith.constant 89 : index
    %1919 = memref.load %arg7[%c89_413] : memref<144xf32, #tpu.memory_space<smem>>
    %1920 = vector.broadcast %1919 : f32 to vector<16x16xf32>
    %1921 = arith.mulf %1920, %1495 : vector<16x16xf32>
    %1922 = arith.addf %1918, %1921 : vector<16x16xf32>
    %c96_414 = arith.constant 96 : index
    %1923 = memref.load %arg7[%c96_414] : memref<144xf32, #tpu.memory_space<smem>>
    %1924 = vector.broadcast %1923 : f32 to vector<16x16xf32>
    %1925 = arith.mulf %1924, %1496 : vector<16x16xf32>
    %1926 = arith.addf %1922, %1925 : vector<16x16xf32>
    %c97_415 = arith.constant 97 : index
    %1927 = memref.load %arg7[%c97_415] : memref<144xf32, #tpu.memory_space<smem>>
    %1928 = vector.broadcast %1927 : f32 to vector<16x16xf32>
    %1929 = arith.mulf %1928, %1497 : vector<16x16xf32>
    %1930 = arith.addf %1926, %1929 : vector<16x16xf32>
    %c98_416 = arith.constant 98 : index
    %1931 = memref.load %arg7[%c98_416] : memref<144xf32, #tpu.memory_space<smem>>
    %1932 = vector.broadcast %1931 : f32 to vector<16x16xf32>
    %1933 = arith.mulf %1932, %1498 : vector<16x16xf32>
    %1934 = arith.addf %1930, %1933 : vector<16x16xf32>
    %c105_417 = arith.constant 105 : index
    %1935 = memref.load %arg7[%c105_417] : memref<144xf32, #tpu.memory_space<smem>>
    %1936 = vector.broadcast %1935 : f32 to vector<16x16xf32>
    %1937 = arith.mulf %1936, %1499 : vector<16x16xf32>
    %1938 = arith.addf %1934, %1937 : vector<16x16xf32>
    %c106_418 = arith.constant 106 : index
    %1939 = memref.load %arg7[%c106_418] : memref<144xf32, #tpu.memory_space<smem>>
    %1940 = vector.broadcast %1939 : f32 to vector<16x16xf32>
    %1941 = arith.mulf %1940, %1500 : vector<16x16xf32>
    %1942 = arith.addf %1938, %1941 : vector<16x16xf32>
    %c107_419 = arith.constant 107 : index
    %1943 = memref.load %arg7[%c107_419] : memref<144xf32, #tpu.memory_space<smem>>
    %1944 = vector.broadcast %1943 : f32 to vector<16x16xf32>
    %1945 = arith.mulf %1944, %1501 : vector<16x16xf32>
    %1946 = arith.addf %1942, %1945 : vector<16x16xf32>
    %1947 = vector.extract_strided_slice %1946 {offsets = [1, 0], sizes = [15, 16], strides = [1, 1]} : vector<16x16xf32> to vector<15x16xf32>
    %1948 = tpu.concatenate %1947, %1502 in 0 : vector<15x16xf32>, vector<1x16xf32> -> vector<16x16xf32>
    %1949 = arith.addf %1899, %1948 : vector<16x16xf32>
    %c2_420 = arith.constant 2 : index
    %1950 = memref.load %arg8[%c2_420] : memref<4xf32, #tpu.memory_space<smem>>
    %1951 = vector.broadcast %1950 : f32 to vector<16x16xf32>
    %1952 = arith.addf %1949, %1951 : vector<16x16xf32>
    %c108_421 = arith.constant 108 : index
    %1953 = memref.load %arg7[%c108_421] : memref<144xf32, #tpu.memory_space<smem>>
    %1954 = vector.broadcast %1953 : f32 to vector<16x16xf32>
    %1955 = arith.mulf %1954, %1490 : vector<16x16xf32>
    %c109_422 = arith.constant 109 : index
    %1956 = memref.load %arg7[%c109_422] : memref<144xf32, #tpu.memory_space<smem>>
    %1957 = vector.broadcast %1956 : f32 to vector<16x16xf32>
    %1958 = arith.mulf %1957, %1491 : vector<16x16xf32>
    %1959 = arith.addf %1955, %1958 : vector<16x16xf32>
    %c110_423 = arith.constant 110 : index
    %1960 = memref.load %arg7[%c110_423] : memref<144xf32, #tpu.memory_space<smem>>
    %1961 = vector.broadcast %1960 : f32 to vector<16x16xf32>
    %1962 = arith.mulf %1961, %1492 : vector<16x16xf32>
    %1963 = arith.addf %1959, %1962 : vector<16x16xf32>
    %c117_424 = arith.constant 117 : index
    %1964 = memref.load %arg7[%c117_424] : memref<144xf32, #tpu.memory_space<smem>>
    %1965 = vector.broadcast %1964 : f32 to vector<16x16xf32>
    %1966 = arith.mulf %1965, %1493 : vector<16x16xf32>
    %1967 = arith.addf %1963, %1966 : vector<16x16xf32>
    %c118_425 = arith.constant 118 : index
    %1968 = memref.load %arg7[%c118_425] : memref<144xf32, #tpu.memory_space<smem>>
    %1969 = vector.broadcast %1968 : f32 to vector<16x16xf32>
    %1970 = arith.mulf %1969, %1494 : vector<16x16xf32>
    %1971 = arith.addf %1967, %1970 : vector<16x16xf32>
    %c119_426 = arith.constant 119 : index
    %1972 = memref.load %arg7[%c119_426] : memref<144xf32, #tpu.memory_space<smem>>
    %1973 = vector.broadcast %1972 : f32 to vector<16x16xf32>
    %1974 = arith.mulf %1973, %1495 : vector<16x16xf32>
    %1975 = arith.addf %1971, %1974 : vector<16x16xf32>
    %c126_427 = arith.constant 126 : index
    %1976 = memref.load %arg7[%c126_427] : memref<144xf32, #tpu.memory_space<smem>>
    %1977 = vector.broadcast %1976 : f32 to vector<16x16xf32>
    %1978 = arith.mulf %1977, %1496 : vector<16x16xf32>
    %1979 = arith.addf %1975, %1978 : vector<16x16xf32>
    %c127_428 = arith.constant 127 : index
    %1980 = memref.load %arg7[%c127_428] : memref<144xf32, #tpu.memory_space<smem>>
    %1981 = vector.broadcast %1980 : f32 to vector<16x16xf32>
    %1982 = arith.mulf %1981, %1497 : vector<16x16xf32>
    %1983 = arith.addf %1979, %1982 : vector<16x16xf32>
    %c128_429 = arith.constant 128 : index
    %1984 = memref.load %arg7[%c128_429] : memref<144xf32, #tpu.memory_space<smem>>
    %1985 = vector.broadcast %1984 : f32 to vector<16x16xf32>
    %1986 = arith.mulf %1985, %1498 : vector<16x16xf32>
    %1987 = arith.addf %1983, %1986 : vector<16x16xf32>
    %c135_430 = arith.constant 135 : index
    %1988 = memref.load %arg7[%c135_430] : memref<144xf32, #tpu.memory_space<smem>>
    %1989 = vector.broadcast %1988 : f32 to vector<16x16xf32>
    %1990 = arith.mulf %1989, %1499 : vector<16x16xf32>
    %1991 = arith.addf %1987, %1990 : vector<16x16xf32>
    %c136_431 = arith.constant 136 : index
    %1992 = memref.load %arg7[%c136_431] : memref<144xf32, #tpu.memory_space<smem>>
    %1993 = vector.broadcast %1992 : f32 to vector<16x16xf32>
    %1994 = arith.mulf %1993, %1500 : vector<16x16xf32>
    %1995 = arith.addf %1991, %1994 : vector<16x16xf32>
    %c137_432 = arith.constant 137 : index
    %1996 = memref.load %arg7[%c137_432] : memref<144xf32, #tpu.memory_space<smem>>
    %1997 = vector.broadcast %1996 : f32 to vector<16x16xf32>
    %1998 = arith.mulf %1997, %1501 : vector<16x16xf32>
    %1999 = arith.addf %1995, %1998 : vector<16x16xf32>
    %2000 = vector.extract_strided_slice %1999 {offsets = [0, 0], sizes = [15, 16], strides = [1, 1]} : vector<16x16xf32> to vector<15x16xf32>
    %2001 = tpu.concatenate %1502, %2000 in 0 : vector<1x16xf32>, vector<15x16xf32> -> vector<16x16xf32>
    %c111_433 = arith.constant 111 : index
    %2002 = memref.load %arg7[%c111_433] : memref<144xf32, #tpu.memory_space<smem>>
    %2003 = vector.broadcast %2002 : f32 to vector<16x16xf32>
    %2004 = arith.mulf %2003, %1490 : vector<16x16xf32>
    %c112_434 = arith.constant 112 : index
    %2005 = memref.load %arg7[%c112_434] : memref<144xf32, #tpu.memory_space<smem>>
    %2006 = vector.broadcast %2005 : f32 to vector<16x16xf32>
    %2007 = arith.mulf %2006, %1491 : vector<16x16xf32>
    %2008 = arith.addf %2004, %2007 : vector<16x16xf32>
    %c113_435 = arith.constant 113 : index
    %2009 = memref.load %arg7[%c113_435] : memref<144xf32, #tpu.memory_space<smem>>
    %2010 = vector.broadcast %2009 : f32 to vector<16x16xf32>
    %2011 = arith.mulf %2010, %1492 : vector<16x16xf32>
    %2012 = arith.addf %2008, %2011 : vector<16x16xf32>
    %c120_436 = arith.constant 120 : index
    %2013 = memref.load %arg7[%c120_436] : memref<144xf32, #tpu.memory_space<smem>>
    %2014 = vector.broadcast %2013 : f32 to vector<16x16xf32>
    %2015 = arith.mulf %2014, %1493 : vector<16x16xf32>
    %2016 = arith.addf %2012, %2015 : vector<16x16xf32>
    %c121_437 = arith.constant 121 : index
    %2017 = memref.load %arg7[%c121_437] : memref<144xf32, #tpu.memory_space<smem>>
    %2018 = vector.broadcast %2017 : f32 to vector<16x16xf32>
    %2019 = arith.mulf %2018, %1494 : vector<16x16xf32>
    %2020 = arith.addf %2016, %2019 : vector<16x16xf32>
    %c122_438 = arith.constant 122 : index
    %2021 = memref.load %arg7[%c122_438] : memref<144xf32, #tpu.memory_space<smem>>
    %2022 = vector.broadcast %2021 : f32 to vector<16x16xf32>
    %2023 = arith.mulf %2022, %1495 : vector<16x16xf32>
    %2024 = arith.addf %2020, %2023 : vector<16x16xf32>
    %c129_439 = arith.constant 129 : index
    %2025 = memref.load %arg7[%c129_439] : memref<144xf32, #tpu.memory_space<smem>>
    %2026 = vector.broadcast %2025 : f32 to vector<16x16xf32>
    %2027 = arith.mulf %2026, %1496 : vector<16x16xf32>
    %2028 = arith.addf %2024, %2027 : vector<16x16xf32>
    %c130_440 = arith.constant 130 : index
    %2029 = memref.load %arg7[%c130_440] : memref<144xf32, #tpu.memory_space<smem>>
    %2030 = vector.broadcast %2029 : f32 to vector<16x16xf32>
    %2031 = arith.mulf %2030, %1497 : vector<16x16xf32>
    %2032 = arith.addf %2028, %2031 : vector<16x16xf32>
    %c131_441 = arith.constant 131 : index
    %2033 = memref.load %arg7[%c131_441] : memref<144xf32, #tpu.memory_space<smem>>
    %2034 = vector.broadcast %2033 : f32 to vector<16x16xf32>
    %2035 = arith.mulf %2034, %1498 : vector<16x16xf32>
    %2036 = arith.addf %2032, %2035 : vector<16x16xf32>
    %c138_442 = arith.constant 138 : index
    %2037 = memref.load %arg7[%c138_442] : memref<144xf32, #tpu.memory_space<smem>>
    %2038 = vector.broadcast %2037 : f32 to vector<16x16xf32>
    %2039 = arith.mulf %2038, %1499 : vector<16x16xf32>
    %2040 = arith.addf %2036, %2039 : vector<16x16xf32>
    %c139_443 = arith.constant 139 : index
    %2041 = memref.load %arg7[%c139_443] : memref<144xf32, #tpu.memory_space<smem>>
    %2042 = vector.broadcast %2041 : f32 to vector<16x16xf32>
    %2043 = arith.mulf %2042, %1500 : vector<16x16xf32>
    %2044 = arith.addf %2040, %2043 : vector<16x16xf32>
    %c140_444 = arith.constant 140 : index
    %2045 = memref.load %arg7[%c140_444] : memref<144xf32, #tpu.memory_space<smem>>
    %2046 = vector.broadcast %2045 : f32 to vector<16x16xf32>
    %2047 = arith.mulf %2046, %1501 : vector<16x16xf32>
    %2048 = arith.addf %2044, %2047 : vector<16x16xf32>
    %2049 = arith.addf %2001, %2048 : vector<16x16xf32>
    %c114_445 = arith.constant 114 : index
    %2050 = memref.load %arg7[%c114_445] : memref<144xf32, #tpu.memory_space<smem>>
    %2051 = vector.broadcast %2050 : f32 to vector<16x16xf32>
    %2052 = arith.mulf %2051, %1490 : vector<16x16xf32>
    %c115_446 = arith.constant 115 : index
    %2053 = memref.load %arg7[%c115_446] : memref<144xf32, #tpu.memory_space<smem>>
    %2054 = vector.broadcast %2053 : f32 to vector<16x16xf32>
    %2055 = arith.mulf %2054, %1491 : vector<16x16xf32>
    %2056 = arith.addf %2052, %2055 : vector<16x16xf32>
    %c116_447 = arith.constant 116 : index
    %2057 = memref.load %arg7[%c116_447] : memref<144xf32, #tpu.memory_space<smem>>
    %2058 = vector.broadcast %2057 : f32 to vector<16x16xf32>
    %2059 = arith.mulf %2058, %1492 : vector<16x16xf32>
    %2060 = arith.addf %2056, %2059 : vector<16x16xf32>
    %c123_448 = arith.constant 123 : index
    %2061 = memref.load %arg7[%c123_448] : memref<144xf32, #tpu.memory_space<smem>>
    %2062 = vector.broadcast %2061 : f32 to vector<16x16xf32>
    %2063 = arith.mulf %2062, %1493 : vector<16x16xf32>
    %2064 = arith.addf %2060, %2063 : vector<16x16xf32>
    %c124_449 = arith.constant 124 : index
    %2065 = memref.load %arg7[%c124_449] : memref<144xf32, #tpu.memory_space<smem>>
    %2066 = vector.broadcast %2065 : f32 to vector<16x16xf32>
    %2067 = arith.mulf %2066, %1494 : vector<16x16xf32>
    %2068 = arith.addf %2064, %2067 : vector<16x16xf32>
    %c125_450 = arith.constant 125 : index
    %2069 = memref.load %arg7[%c125_450] : memref<144xf32, #tpu.memory_space<smem>>
    %2070 = vector.broadcast %2069 : f32 to vector<16x16xf32>
    %2071 = arith.mulf %2070, %1495 : vector<16x16xf32>
    %2072 = arith.addf %2068, %2071 : vector<16x16xf32>
    %c132_451 = arith.constant 132 : index
    %2073 = memref.load %arg7[%c132_451] : memref<144xf32, #tpu.memory_space<smem>>
    %2074 = vector.broadcast %2073 : f32 to vector<16x16xf32>
    %2075 = arith.mulf %2074, %1496 : vector<16x16xf32>
    %2076 = arith.addf %2072, %2075 : vector<16x16xf32>
    %c133_452 = arith.constant 133 : index
    %2077 = memref.load %arg7[%c133_452] : memref<144xf32, #tpu.memory_space<smem>>
    %2078 = vector.broadcast %2077 : f32 to vector<16x16xf32>
    %2079 = arith.mulf %2078, %1497 : vector<16x16xf32>
    %2080 = arith.addf %2076, %2079 : vector<16x16xf32>
    %c134_453 = arith.constant 134 : index
    %2081 = memref.load %arg7[%c134_453] : memref<144xf32, #tpu.memory_space<smem>>
    %2082 = vector.broadcast %2081 : f32 to vector<16x16xf32>
    %2083 = arith.mulf %2082, %1498 : vector<16x16xf32>
    %2084 = arith.addf %2080, %2083 : vector<16x16xf32>
    %c141_454 = arith.constant 141 : index
    %2085 = memref.load %arg7[%c141_454] : memref<144xf32, #tpu.memory_space<smem>>
    %2086 = vector.broadcast %2085 : f32 to vector<16x16xf32>
    %2087 = arith.mulf %2086, %1499 : vector<16x16xf32>
    %2088 = arith.addf %2084, %2087 : vector<16x16xf32>
    %c142_455 = arith.constant 142 : index
    %2089 = memref.load %arg7[%c142_455] : memref<144xf32, #tpu.memory_space<smem>>
    %2090 = vector.broadcast %2089 : f32 to vector<16x16xf32>
    %2091 = arith.mulf %2090, %1500 : vector<16x16xf32>
    %2092 = arith.addf %2088, %2091 : vector<16x16xf32>
    %c143_456 = arith.constant 143 : index
    %2093 = memref.load %arg7[%c143_456] : memref<144xf32, #tpu.memory_space<smem>>
    %2094 = vector.broadcast %2093 : f32 to vector<16x16xf32>
    %2095 = arith.mulf %2094, %1501 : vector<16x16xf32>
    %2096 = arith.addf %2092, %2095 : vector<16x16xf32>
    %2097 = vector.extract_strided_slice %2096 {offsets = [1, 0], sizes = [15, 16], strides = [1, 1]} : vector<16x16xf32> to vector<15x16xf32>
    %2098 = tpu.concatenate %2097, %1502 in 0 : vector<15x16xf32>, vector<1x16xf32> -> vector<16x16xf32>
    %2099 = arith.addf %2049, %2098 : vector<16x16xf32>
    %c3_457 = arith.constant 3 : index
    %2100 = memref.load %arg8[%c3_457] : memref<4xf32, #tpu.memory_space<smem>>
    %2101 = vector.broadcast %2100 : f32 to vector<16x16xf32>
    %2102 = arith.addf %2099, %2101 : vector<16x16xf32>
    %c0_458 = arith.constant 0 : index
    %c0_459 = arith.constant 0 : index
    %c0_460 = arith.constant 0 : index
    %c0_461 = arith.constant 0 : index
    %2103 = vector.load %arg2[%c0_458, %c0_459, %c0_460, %c0_461] : memref<1x4x16x16xf32, #tpu.memory_space<vmem>>, vector<1x1x16x16xf32>
    %2104 = vector.shape_cast %2103 : vector<1x1x16x16xf32> to vector<16x16xf32>
    %2105 = arith.addf %1652, %2104 : vector<16x16xf32>
    %c0_462 = arith.constant 0 : index
    %c0_463 = arith.constant 0 : index
    %c0_464 = arith.constant 0 : index
    %c0_465 = arith.constant 0 : index
    %2106 = vector.load %arg9[%c0_462, %c0_463, %c0_464, %c0_465] : memref<1x4x16x16xf32, #tpu.memory_space<vmem>>, vector<1x1x16x16xf32>
    %2107 = vector.shape_cast %2106 : vector<1x1x16x16xf32> to vector<16x16xf32>
    %2108 = vector.shape_cast %2105 : vector<16x16xf32> to vector<1x1x16x16xf32>
    tpu.vector_store %arg9[%c0_462, %c0_463, %c0_464, %c0_465], %2108 {strides = array<i32>} : memref<1x4x16x16xf32, #tpu.memory_space<vmem>>, vector<1x1x16x16xf32>,
    %c0_466 = arith.constant 0 : index
    %c1_467 = arith.constant 1 : index
    %c0_468 = arith.constant 0 : index
    %c0_469 = arith.constant 0 : index
    %2109 = vector.load %arg2[%c0_466, %c1_467, %c0_468, %c0_469] : memref<1x4x16x16xf32, #tpu.memory_space<vmem>>, vector<1x1x16x16xf32>
    %2110 = vector.shape_cast %2109 : vector<1x1x16x16xf32> to vector<16x16xf32>
    %2111 = arith.addf %1802, %2110 : vector<16x16xf32>
    %c0_470 = arith.constant 0 : index
    %c1_471 = arith.constant 1 : index
    %c0_472 = arith.constant 0 : index
    %c0_473 = arith.constant 0 : index
    %2112 = vector.load %arg9[%c0_470, %c1_471, %c0_472, %c0_473] : memref<1x4x16x16xf32, #tpu.memory_space<vmem>>, vector<1x1x16x16xf32>
    %2113 = vector.shape_cast %2112 : vector<1x1x16x16xf32> to vector<16x16xf32>
    %2114 = vector.shape_cast %2111 : vector<16x16xf32> to vector<1x1x16x16xf32>
    tpu.vector_store %arg9[%c0_470, %c1_471, %c0_472, %c0_473], %2114 {strides = array<i32>} : memref<1x4x16x16xf32, #tpu.memory_space<vmem>>, vector<1x1x16x16xf32>,
    %c0_474 = arith.constant 0 : index
    %c2_475 = arith.constant 2 : index
    %c0_476 = arith.constant 0 : index
    %c0_477 = arith.constant 0 : index
    %2115 = vector.load %arg2[%c0_474, %c2_475, %c0_476, %c0_477] : memref<1x4x16x16xf32, #tpu.memory_space<vmem>>, vector<1x1x16x16xf32>
    %2116 = vector.shape_cast %2115 : vector<1x1x16x16xf32> to vector<16x16xf32>
    %2117 = arith.addf %1952, %2116 : vector<16x16xf32>
    %c0_478 = arith.constant 0 : index
    %c2_479 = arith.constant 2 : index
    %c0_480 = arith.constant 0 : index
    %c0_481 = arith.constant 0 : index
    %2118 = vector.load %arg9[%c0_478, %c2_479, %c0_480, %c0_481] : memref<1x4x16x16xf32, #tpu.memory_space<vmem>>, vector<1x1x16x16xf32>
    %2119 = vector.shape_cast %2118 : vector<1x1x16x16xf32> to vector<16x16xf32>
    %2120 = vector.shape_cast %2117 : vector<16x16xf32> to vector<1x1x16x16xf32>
    tpu.vector_store %arg9[%c0_478, %c2_479, %c0_480, %c0_481], %2120 {strides = array<i32>} : memref<1x4x16x16xf32, #tpu.memory_space<vmem>>, vector<1x1x16x16xf32>,
    %c0_482 = arith.constant 0 : index
    %c3_483 = arith.constant 3 : index
    %c0_484 = arith.constant 0 : index
    %c0_485 = arith.constant 0 : index
    %2121 = vector.load %arg2[%c0_482, %c3_483, %c0_484, %c0_485] : memref<1x4x16x16xf32, #tpu.memory_space<vmem>>, vector<1x1x16x16xf32>
    %2122 = vector.shape_cast %2121 : vector<1x1x16x16xf32> to vector<16x16xf32>
    %2123 = arith.addf %2102, %2122 : vector<16x16xf32>
    %c0_486 = arith.constant 0 : index
    %c3_487 = arith.constant 3 : index
    %c0_488 = arith.constant 0 : index
    %c0_489 = arith.constant 0 : index
    %2124 = vector.load %arg9[%c0_486, %c3_487, %c0_488, %c0_489] : memref<1x4x16x16xf32, #tpu.memory_space<vmem>>, vector<1x1x16x16xf32>
    %2125 = vector.shape_cast %2124 : vector<1x1x16x16xf32> to vector<16x16xf32>
    %2126 = vector.shape_cast %2123 : vector<16x16xf32> to vector<1x1x16x16xf32>
    tpu.vector_store %arg9[%c0_486, %c3_487, %c0_488, %c0_489], %2126 {strides = array<i32>} : memref<1x4x16x16xf32, #tpu.memory_space<vmem>>, vector<1x1x16x16xf32>,
    return
  }
  func.func @transform_0(%arg0: i32, %arg1: i32) -> (i32, i32, i32, i32) {
    %c0_i32 = arith.constant 0 : i32
    %c0_i32_0 = arith.constant 0 : i32
    %c0_i32_1 = arith.constant 0 : i32
    return %arg0, %c0_i32, %c0_i32_0, %arg1 : i32, i32, i32, i32
  }
  func.func @transform_1(%arg0: i32, %arg1: i32) -> (i32, i32, i32, i32) {
    %c1_i32 = arith.constant 1 : i32
    %0 = arith.muli %arg0, %c1_i32 : i32
    %1 = arith.addi %0, %arg1 : i32
    %c0_i32 = arith.constant 0 : i32
    %c0_i32_0 = arith.constant 0 : i32
    %c0_i32_1 = arith.constant 0 : i32
    %c0_i32_2 = arith.constant 0 : i32
    return %1, %c0_i32, %c0_i32_0, %c0_i32_1 : i32, i32, i32, i32
  }
  func.func @transform_2(%arg0: i32, %arg1: i32) -> (i32, i32) {
    %c0_i32 = arith.constant 0 : i32
    %c0_i32_0 = arith.constant 0 : i32
    %c0_i32_1 = arith.constant 0 : i32
    return %c0_i32, %c0_i32_0 : i32, i32
  }
  func.func @transform_3(%arg0: i32, %arg1: i32) -> i32 {
    %c0_i32 = arith.constant 0 : i32
    %c0_i32_0 = arith.constant 0 : i32
    return %c0_i32 : i32
  }
  func.func @transform_4(%arg0: i32, %arg1: i32) -> i32 {
    %c0_i32 = arith.constant 0 : i32
    %c0_i32_0 = arith.constant 0 : i32
    return %c0_i32 : i32
  }
  func.func @transform_5(%arg0: i32, %arg1: i32) -> i32 {
    %c0_i32 = arith.constant 0 : i32
    %c0_i32_0 = arith.constant 0 : i32
    return %c0_i32 : i32
  }
  func.func @transform_6(%arg0: i32, %arg1: i32) -> i32 {
    %c0_i32 = arith.constant 0 : i32
    %c0_i32_0 = arith.constant 0 : i32
    return %c0_i32 : i32
  }
  func.func @transform_7(%arg0: i32, %arg1: i32) -> (i32, i32, i32, i32) {
    %c0_i32 = arith.constant 0 : i32
    %c0_i32_0 = arith.constant 0 : i32
    %c0_i32_1 = arith.constant 0 : i32
    return %arg0, %c0_i32, %c0_i32_0, %arg1 : i32, i32, i32, i32
  }
}

</mosaic_0001>

<bundles_post_ra>
// kernel: tpu_custom_call.1
= control target key start
LH: loop header
LB: loop body
LE: loop exit
PB: predicated region body
PF: predicated region fallthrough
CT: control target
= control target key end

     0   :  { %s9283_s0 = inlined_call_operand.vmem [shape: f32[2,4,16,16], index: 0, kind: input, shape index: {}]   ;;  %s9284_s1 = inlined_call_operand.vmem [shape: f32[2,4,16,4], index: 1, kind: input, shape index: {}]   ;;  %s9285_s2 = inlined_call_operand.vmem [shape: f32[16,4], index: 2, kind: input, shape index: {}]   ;;  %s9286_s3 = inlined_call_operand.vmem [shape: f32[144], index: 3, kind: input, shape index: {}]   ;;  %s9287_s4 = inlined_call_operand.vmem [shape: f32[4], index: 4, kind: input, shape index: {}]   ;;  %s9288_s5 = inlined_call_operand.vmem [shape: f32[144], index: 5, kind: input, shape index: {}]   ;;  %s9289_s6 = inlined_call_operand.vmem [shape: f32[4], index: 6, kind: input, shape index: {}]   ;;  %s9290_s7 = inlined_call_operand.hbm [shape: f32[2,4,16,16], index: 7, kind: output, shape index: {}]  }
   0x1   :  { %9511 = sst [smem:[#allocation145_spill]] %s9283_s0 }
   0x2   :  { %9512 = sst [smem:[#allocation146_spill]] %s9284_s1 }
   0x3   :  { %9513 = sst [smem:[#allocation147_spill]] %s9285_s2 }
   0x4   :  { %9514 = sst [smem:[#allocation148_spill]] %s9286_s3 }
   0x5   :  { %9515 = sst [smem:[#allocation149_spill]] %s9287_s4 }
   0x6   :  { %9516 = sst [smem:[#allocation150_spill]] %s9288_s5 }
   0x7   :  { %9517 = sst [smem:[#allocation151_spill]] %s9289_s6 }
   0x8   :  { %9518 = sst [smem:[#allocation152_spill]] %s9290_s7 }
   0x9   :  { %12 = vsyncpa [#allocation4], 0 }
   0xa   :  { %13 = vsyncpa [#allocation6], 0 }
   0xb   :  { %14 = vsyncpa [#allocation9], 0 }
   0xc   :  { %15 = vsyncpa [#allocation3], 0 }
   0xd   :  { %17 = vsyncpa [#allocation3 + $0x1], 0  ;;  %s5347_s24 = smov 0   ;;  %s5349_s25 = smov 0  }
   0xe   :  { %s5351_s26 = smov 0   ;;  %s5353_s27 = smov 0  }
   0xf   :  { %s5355_s28 = smov 0   ;;  %s5357_s29 = smov 0  }
  0x10 LB: > { %9519 = sst [smem:[#allocation15_spill]] %s5267_s24  ;;  %s4558_s30 = sadd.s32 4294967295, %s5287_s29   ;;  %s5287_s29 = sphi %s5357_s29, %s23_s29   ;;  %s5283_s28 = sphi %s5355_s28, %s10124_s28   ;;  %s5279_s27 = sphi %s5353_s27, %s10123_s27   ;;  %s5275_s26 = sphi %s5351_s26, %s10122_s26   ;;  %s5271_s25 = sphi %s5349_s25, %s10121_s25   ;;  %s5267_s24 = sphi %s5347_s24, %s10120_s24  }
  0x11   : > { %9520 = sst [smem:[#allocation16_spill]] %s5271_s25  ;;  %s4559_s8 = sadd.s32 4294967294, %s5287_s29  }
  0x12   : > { %9521 = sst [smem:[#allocation17_spill]] %s5275_s26  ;;  %s35_s9 = sadd.s32 1, %s5283_s28 }
  0x13   : > { %9522 = sst [smem:[#allocation18_spill]] %s5279_s27  ;;  %s205_s10 = sadd.s32 1, %s5275_s26 }
  0x14   : > { %9523 = sst [smem:[#allocation19_spill]] %s5283_s28  ;;  %p37_p0 = scmp.ge.s32.totalorder %s35_s9, 2 }
  0x15   : > { %9524 = sst [smem:[#allocation20_spill]] %s5287_s29  ;;  %p215_p1 = scmp.ne.s32.totalorder %s5275_s26, %s5271_s25 }
  0x16   : > { %p216_p2 = scmp.eq.s32.totalorder %s4558_s30, 1  ;;  %p221_p3 = scmp.ne.s32.totalorder %s5271_s25, %s5267_s24 }
  0x17   : > { %s10126_s9 = smov (%p37_p0, %s35_s9), 0  ;;  %p222_p5 = scmp.eq.s32.totalorder %s4559_s8, 1 }
  0x18   : > { %9525 = sst [smem:[#allocation21_spill]] %s10126_s9  ;;  %p5387_p4 = por %p216_p2, %p215_p1 }
  0x19   : > { %s200_s12 = ssub.s32 %s5283_s28, %s10126_s9  ;;  %p4560_p6 = scmp.ge.s32.totalorder %s5287_s29, 1 }
  0x1a   : > { %s9526_s11 = scalar_select %p5387_p4, 1, 0 }
  0x1b   : > { %p203_p7 = scmp.eq.s32.totalorder %s200_s12, 0  ;;  %p5394_p8 = por %p222_p5, %p221_p3 }
  0x1c   : > { %9527 = sst [smem:[#allocation22_spill]] %s9526_s11  ;;  %p229_p9 = scmp.lt.s32.totalorder %s5287_s29, 3 }
  0x1d   : > { %s9528_s13 = scalar_select %p5394_p8, 1, 0 }
  0x1e   : > { %s5400_s14 = scalar_select %p203_p7, %s5275_s26, %s205_s10  }
  0x1f   : > { %9529 = sst [smem:[#allocation23_spill]] %s9528_s13  ;;  %p5402_p10 = pnand %p4560_p6, %p229_p9 }
  0x20   : > { %9530 = sst [smem:[#allocation24_spill]] %s5400_s14  ;;  %p5406_p11 = scmp.eq.s32.totalorder %s4558_s30, 0 }
  0x21   : > { %s9531_s15 = scalar_select %p5402_p10, 1, 0 }
  0x22   : > { %s9532_s16 = scalar_select %p5406_p11, 1, 0 }
  0x23   : > { %s9533_s4 = sld [smem:[#allocation149_spill]]  ;;  %p4920_p12 = pneg %p5402_p10 }
  0x24   : > { %s9534_s3 = sld [smem:[#allocation148_spill]] }
  0x25   : > { %p5420_p13 = pnand %p5406_p11, %p4920_p12  ;;  %s9536_s5 = sld [smem:[#allocation150_spill]] }
  0x27   : > { %p5141_p1 = pneg %p5420_p13 }
  0x29   : > { %s256_s19 = sshll.u32 %s9533_s4, 4  ;;  %s257_s19 = int_to_ptr.vmem [resolvable:$true] %s256_s19 }
  0x2a   : > { %s245_s22 = sshll.u32 %s9534_s3, 4  ;;  %s5139_s12 = scalar_lea.vmem %s257_s19, 16  ;;  %s246_s22 = int_to_ptr.vmem [resolvable:$true] %s245_s22 }
  0x2b   : > { %s267_s10 = sshll.u32 %s9536_s5, 4  ;;  %p5140_p0 = scmp.ne.s32.totalorder %s257_s19, %s5139_s12  ;;  %s268_s10 = int_to_ptr.vmem [resolvable:$true] %s267_s10 }
  0x2c   : > { %p5147_p5 = scmp.lt.s32.totalorder %s257_s19, %s257_s19  ;;  %p5148_p6 = scmp.lt.s32.totalorder %s5139_s12, %s5139_s12 }
  0x2d   : > { %p5142_p2 = pnand %p5141_p1, %p5140_p0 }
  0x2e   : > { %p5149_p7 = por %p5148_p6, %p5147_p5 }
  0x2f   : > { %p5143_p3 = pneg %p5142_p2 }
  0x31   : > { %p5150_p9 = pnand %p5149_p7, %p5143_p3 }
  0x33   : > { %5153 = shalt.err (!%p5150_p9)
}
  0x34   : > { %s5289_s17 = smov [#allocation5]   ;;  %s5154_s18 = scalar_lea.vmem %s246_s22, 32 }
  0x35   : > { %4926 = dma.vmem_to_smem (!%p5420_p13), %s257_s19, 16, %s5289_s17, [#allocation6]  }
  0x36   : > { %p5155_p12 = scmp.ne.s32.totalorder %s246_s22, %s5154_s18  ;;  %p5162_p11 = scmp.lt.s32.totalorder %s246_s22, %s246_s22 }
  0x37   : > { %p5163_p10 = scmp.lt.s32.totalorder %s5154_s18, %s5154_s18 }
  0x38   : > { %p5157_p8 = pnand %p5155_p12, %p5141_p1 }
  0x39   : > { %p5164_p0 = por %p5163_p10, %p5162_p11 }
  0x3a   : > { %p5158_p4 = pneg %p5157_p8 }
  0x3c   : > { %p5165_p2 = pnand %p5164_p0, %p5158_p4 }
  0x3e   : > { %5168 = shalt.err (!%p5165_p2)
}
  0x3f   : > { %s5290_s20 = smov [#allocation2]   ;;  %s5169_s21 = scalar_lea.vmem %s268_s10, 32 }
  0x40   : > { %4923 = dma.vmem_to_smem (!%p5420_p13), %s246_s22, 32, %s5290_s20, [#allocation4]  }
  0x41   : > { %p5170_p3 = scmp.ne.s32.totalorder %s268_s10, %s5169_s21  ;;  %p5177_p7 = scmp.lt.s32.totalorder %s268_s10, %s268_s10 }
  0x42   : > { %p5178_p9 = scmp.lt.s32.totalorder %s5169_s21, %s5169_s21 }
  0x43   : > { %p5172_p5 = pnand %p5170_p3, %p5141_p1 }
  0x44   : > { %p5179_p8 = por %p5178_p9, %p5177_p7 }
  0x45   : > { %p5173_p6 = pneg %p5172_p5 }
  0x47   : > { %p5180_p12 = pnand %p5179_p8, %p5173_p6 }
  0x49   : > { %5183 = shalt.err (!%p5180_p12)
}
  0x4a   : > { %s5291_s19 = smov [#allocation7]   ;;  %s9537_s6 = sld [smem:[#allocation151_spill]] }
  0x4b   : > { %4929 = dma.vmem_to_smem (!%p5420_p13), %s268_s10, 32, %s5291_s19, [#allocation6]  }
  0x50   : > { %s278_s22 = sshll.u32 %s9537_s6, 4  ;;  %s279_s22 = int_to_ptr.vmem [resolvable:$true] %s278_s22 }
  0x51   : > { %s5184_s12 = scalar_lea.vmem %s279_s22, 16  ;;  %p5192_p0 = scmp.lt.s32.totalorder %s279_s22, %s279_s22 }
  0x52   : > { %p5185_p4 = scmp.ne.s32.totalorder %s279_s22, %s5184_s12  ;;  %p5193_p2 = scmp.lt.s32.totalorder %s5184_s12, %s5184_s12 }
  0x54   : > { %p5187_p10 = pnand %p5185_p4, %p5141_p1  ;;  %p5194_p3 = por %p5193_p2, %p5192_p0 }
  0x56   : > { %p5188_p11 = pneg %p5187_p10 }
  0x58   : > { %p5195_p5 = pnand %p5194_p3, %p5188_p11 }
  0x5a   : > { %5198 = shalt.err (!%p5195_p5)
}
  0x5b   : > { %s5292_s17 = smov [#allocation8]   ;;  %p9538_p6 = scmp.ne.s32.totalorder %s9531_s15, 0 }
  0x5c   : > { %4932 = dma.vmem_to_smem (!%p5420_p13), %s279_s22, 16, %s5292_s17, [#allocation9]  }
  0x5d   : > { %312 = sbr.rel (%p9538_p6) target bundleno = 1272 (0x4f8), region = 48 }
  0x62   : > { %p9539_p7 = scmp.ne.s32.totalorder %s9532_s16, 0 }
  0x64   : > { %5250 = dma.done.wait (%p9539_p7), [#allocation4], 32  }
  0x65   : > { %5252 = vsyncadd (%p9539_p7), [#allocation4], 4294967264 }
  0x66   : > { %5254 = dma.done.wait (%p9539_p7), [#allocation6], 48  }
  0x67   : > { %5256 = vsyncadd (%p9539_p7), [#allocation6], 4294967248 }
  0x68   : > { %5258 = dma.done.wait (%p9539_p7), [#allocation9], 16  }
  0x69   : > { %5260 = vsyncadd (%p9539_p7), [#allocation9], 4294967280 }
  0x6a   : > { %330 = sfence }
  0x6b   : > { %s9540_s2 = sld [smem:[#allocation147_spill]]  ;;  %v5293_v1 = vmov 1   ;;  %v5294_v2 = vmov 0   ;;  %p366_p13 = scmp.lt.s32.totalorder %s5279_s27, 1  ;;  %v5295_v4 = vmov 2   ;;  %v5296_v5 = vmov 3  }
  0x6c   : > { %5012 = vset.pattern.permute.xlu1 %v5293_v1  ;;  %5011 = vset.pattern.permute.xlu0 %v5294_v2  ;;  %s9541_s1 = sld [smem:[#allocation146_spill]]  ;;  %vm538_vm0 = vcmask 31744   ;;  %vm440_vm1 = vcmask 130048   ;;  %s9308_s10 = smov 127  }
  0x6d   : > { %s367_s16 = scalar_select %p366_p13, %s5279_s27, 1 }
  0x6e   : > { %s9542_s0 = sld [smem:[#allocation145_spill]]  ;;  %s9312_s4 = smov 14  }
  0x6f   : > { %s4899_s20 = sshll.u32 %s367_s16, 6  ;;  %s5918_s17 = sld [smem:[#allocation2]] }
  0x70   : > { %s5922_s15 = sld [smem:[#allocation2 + $0x3]]  ;;  %s9304_s16 = smov 2  }
  0x71   : > { %v402_v0 = vld [vmem:[%s9540_s2] sm:$0xff]  ;;  %v403_v3 = vld [vmem:[%s9540_s2 + $0x8] sm:$0xff]  ;;  %s5929_s23 = sld [smem:[#allocation2 + $0x6]]  ;;  %s9572_s6 = smov 1  }
  0x72   : > { %415 = vperm.xlu1 %5012, %v402_v0   ;;  %406 = vperm.xlu0 %5011, %v402_v0   ;;  %s5477_s30 = scalar_lea.vmem %s9541_s1, %s4899_s20  ;;  %s5939_s18 = sld [smem:[#allocation2 + $0x24]] }
  0x73   : > { %v5485_v6 = vld [vmem:[%s5477_s30] sm:$0xff]  ;;  %v5488_v7 = vld [vmem:[%s5477_s30 + $0x8] sm:$0xff]  ;;  %v5491_v8 = vld [vmem:[%s5477_s30 + $0x30] sm:$0xff]  ;;  %s5953_s21 = sld [smem:[#allocation2 + $0x2a]]  ;;  %s9566_s1 = smov 127  }
  0x74   : > { %s5482_s12 = scalar_lea.vmem %s9542_s0, %s4899_s20  ;;  %v5500_v11 = vld [vmem:[%s5477_s30 + $0x38] sm:$0xff]  ;;  %v539_v12 = vsel %vm538_vm0, %v5485_v6, 0.0  ;;  %v540_v13 = vsel %vm538_vm0, %v5488_v7, 0.0  ;;  %v1111_v16 = vsel %vm538_vm0, %v5491_v8, 0.0  ;;  %v5525_v23 = vld [vmem:[%s5477_s30 + $0x10] sm:$0xff]  ;;  %v5541_v32 = vld [vmem:[%s5477_s30 + $0x20] sm:$0xff] }
  0x75   : > { %9543 = sst [smem:[#allocation25_spill]] %s5482_s12  ;;  %v5494_v9 = vld [vmem:[%s5482_s12] sm:$0xff]  ;;  %v5497_v10 = vld [vmem:[%s5482_s12 + $0x8] sm:$0xff]  ;;  %v5507_v14 = vld [vmem:[%s5482_s12 + $0x10] sm:$0xff]  ;;  %v1112_v19 = vsel %vm538_vm0, %v5500_v11, 0.0  ;;  %v541_v20 = vadd.f32 %v540_v13, %v539_v12  ;;  %v731_v30 = vsel %vm538_vm0, %v5525_v23, 0.0 }
  0x76   : > { %419 = vperm.xlu1 %5012, %v403_v3   ;;  %411 = vperm.xlu0 %5011, %v403_v3   ;;  %v5510_v15 = vld [vmem:[%s5482_s12 + $0x18] sm:$0xff]  ;;  %v441_v17 = vsel %vm440_vm1, %v5494_v9, 0.0  ;;  %v442_v18 = vsel %vm440_vm1, %v5497_v10, 0.0  ;;  %v636_v21 = vsel %vm440_vm1, %v5507_v14, 0.0  ;;  %v5531_v26 = vld [vmem:[%s5482_s12 + $0x20] sm:$0xff]  ;;  %v5534_v27 = vld [vmem:[%s5482_s12 + $0x28] sm:$0xff] }
  0x77   : > { %v637_v22 = vsel %vm440_vm1, %v5510_v15, 0.0  ;;  %v5528_v24 = vld [vmem:[%s5477_s30 + $0x18] sm:$0xff]  ;;  %v443_v25 = vadd.f32 %v442_v18, %v441_v17  ;;  %v542_v29 = vrot.slane %v541_v20, 4  ;;  %v5544_v33 = vld [vmem:[%s5477_s30 + $0x28] sm:$0xff]  ;;  %v826_v34 = vsel %vm440_vm1, %v5531_v26, 0.0  ;;  %v5555_v47 = vld [vmem:[%s5482_s12 + $0x30] sm:$0xff] }
  0x78   : > { %v638_v28 = vadd.f32 %v637_v22, %v636_v21  ;;  %v732_v31 = vsel %vm538_vm0, %v5528_v24, 0.0  ;;  %v827_v35 = vsel %vm440_vm1, %v5534_v27, 0.0  ;;  %v921_v39 = vsel %vm538_vm0, %v5541_v32, 0.0  ;;  %v5558_v48 = vld [vmem:[%s5482_s12 + $0x38] sm:$0xff]  ;;  %9554 = sst [smem:[#allocation34_spill]] %s5918_s17  ;;  %s9306_s30 = smov 1  }
  0x79   : > { %v444_v36 = vrot.slane %v443_v25, 4  ;;  %v733_v38 = vadd.f32 %v732_v31, %v731_v30  ;;  %v922_v40 = vsel %vm538_vm0, %v5544_v33, 0.0  ;;  %v543_v41 = vadd.f32 %v542_v29, %v541_v20  ;;  %9555 = sst [smem:[#allocation35_spill]] %s5922_s15  ;;  %s9575_s28 = smov 2  }
  0x7a   : > { %5014 = vset.pattern.permute.xlu1 %v5295_v4  ;;  %5013 = vset.pattern.permute.xlu0 %v5295_v4  ;;  %v639_v37 = vrot.slane %v638_v28, 4  ;;  %v828_v42 = vadd.f32 %v827_v35, %v826_v34  ;;  %v923_v44 = vadd.f32 %v922_v40, %v921_v39  ;;  %v1016_v53 = vsel %vm440_vm1, %v5555_v47, 0.0  ;;  %9556 = sst [smem:[#allocation36_spill]] %s5929_s23  ;;  %s9577_s26 = smov 15  }
  0x7b   : > { %427 = vperm.xlu1 %5014, %v403_v3   ;;  %423 = vperm.xlu0 %5013, %v402_v0   ;;  %v445_v43 = vadd.f32 %v444_v36, %v443_v25  ;;  %v734_v46 = vrot.slane %v733_v38, 4  ;;  %v544_v49 = vrot.slane %v543_v41, 2  ;;  %v1017_v54 = vsel %vm440_vm1, %v5558_v48, 0.0  ;;  %9557 = sst [smem:[#allocation37_spill]] %s5939_s18  ;;  %s9581_s7 = smov 14  }
  0x7c   : > { %v640_v45 = vadd.f32 %v639_v37, %v638_v28  ;;  %v829_v50 = vrot.slane %v828_v42, 4  ;;  %v924_v52 = vrot.slane %v923_v44, 4  ;;  %v1018_v59 = vadd.f32 %v1017_v54, %v1016_v53  ;;  %s5946_s20 = sld [smem:[#allocation2 + $0x27]] }
  0x7d   : > { %v446_v51 = vrot.slane %v445_v43, 2  ;;  %v735_v56 = vadd.f32 %v734_v46, %v733_v38  ;;  %v545_v57 = vadd.f32 %v544_v49, %v543_v41  ;;  %v1113_v20 = vadd.f32 %v1112_v19, %v1111_v16  ;;  %9559 = sst [smem:[#allocation39_spill]] %s5953_s21 }
  0x7e   : > { %v641_v55 = vrot.slane %v640_v45, 2  ;;  %v830_v58 = vadd.f32 %v829_v50, %v828_v42  ;;  %v925_v61 = vadd.f32 %v924_v52, %v923_v44  ;;  %v1019_v2 = vrot.slane %v1018_v59, 4  ;;  %s5957_s19 = sld [smem:[#allocation2 + $0x48]] }
  0x7f   : > { %5015 = vset.pattern.permute.xlu1 %v5296_v5  ;;  %5016 = vset.pattern.permute.xlu0 %v5296_v5  ;;  %v447_v60 = vadd.f32 %v446_v51, %v445_v43  ;;  %v736_v63 = vrot.slane %v735_v56, 2  ;;  %v1114_v29 = vrot.slane %v1113_v20, 4  ;;  %s5967_s8 = sld [smem:[#allocation2 + $0x4b]] }
  0x80   : > { %431 = vperm.xlu1 %5015, %v402_v0   ;;  %435 = vperm.xlu0 %5016, %v403_v3   ;;  %v642_v62 = vadd.f32 %v641_v55, %v640_v45  ;;  %v546_v0 = vrot.slane %v545_v57, 1  ;;  %v831_v1 = vrot.slane %v830_v58, 2  ;;  %v926_v4 = vrot.slane %v925_v61, 2  ;;  %s5977_s22 = sld [smem:[#allocation2 + $0x4e]] }
  0x81   : > { %v448_v3 = vrot.slane %v447_v60, 1  ;;  %v737_v12 = vadd.f32 %v736_v63, %v735_v56  ;;  %v1020_v18 = vadd.f32 %v1019_v2, %v1018_v59  ;;  %v1115_v35 = vadd.f32 %v1114_v29, %v1113_v20  ;;  %s6003_s0 = sld [smem:[#allocation2 + $0x72]] }
  0x82   : > { %v643_v5 = vrot.slane %v642_v62, 1  ;;  %v547_v13 = vadd.f32 %v546_v0, %v545_v57  ;;  %v832_v17 = vadd.f32 %v831_v1, %v830_v58  ;;  %v927_v22 = vadd.f32 %v926_v4, %v925_v61  ;;  %9558 = sst [smem:[#allocation38_spill]] %s5946_s20 }
  0x83   : > { %v449_v21 = vadd.f32 %v448_v3, %v447_v60  ;;  %v738_v28 = vrot.slane %v737_v12, 1  ;;  %v1021_v34 = vrot.slane %v1020_v18, 2  ;;  %v1116_v40 = vrot.slane %v1115_v35, 2  ;;  %s6015_s2 = sld [smem:[#allocation2 + $0x4]] }
  0x84   : > { %v644_v25 = vadd.f32 %v643_v5, %v642_v62  ;;  %v548_v30 = vmul.f32 0.0625, %v547_v13  ;;  %v833_v31 = vrot.slane %v832_v17, 1  ;;  %v928_v37 = vrot.slane %v927_v22, 1  ;;  %9560 = sst [smem:[#allocation40_spill]] %s5957_s19 }
  0x85   : > { %v451_v36 = vmul.f32 0.0625, %v449_v21  ;;  %v739_v39 = vadd.f32 %v738_v28, %v737_v12  ;;  %v1022_v19 = vadd.f32 %v1021_v34, %v1020_v18  ;;  %v1117_v43 = vadd.f32 %v1116_v40, %v1115_v35  ;;  %9561 = sst [smem:[#allocation41_spill]] %s5967_s8 }
  0x86   : > { %v645_v38 = vmul.f32 0.0625, %v644_v25  ;;  %v5565_v41 = vsub.f32 %v5485_v6, %v548_v30  ;;  %v5568_v42 = vsub.f32 %v5488_v7, %v548_v30  ;;  %v834_v16 = vadd.f32 %v833_v31, %v832_v17  ;;  %9562 = sst [smem:[#allocation42_spill]] %s5977_s22 }
  0x87   : > { %v5571_v44 = vsub.f32 %v5494_v9, %v451_v36  ;;  %v5574_v45 = vsub.f32 %v5497_v10, %v451_v36  ;;  %v929_v46 = vadd.f32 %v928_v37, %v927_v22  ;;  %v740_v6 = vmul.f32 0.0625, %v739_v39  ;;  %9565 = sst [smem:[#allocation45_spill]] %s6003_s0 }
  0x88   : > { %v5577_v49 = vsub.f32 %v5507_v14, %v645_v38  ;;  %v5580_v50 = vsub.f32 %v5510_v15, %v645_v38  ;;  %v1118_v51 = vrot.slane %v1117_v43, 1  ;;  %v551_v7 = vmul.f32 %v5565_v41, %v5565_v41  ;;  %s6022_s3 = sld [smem:[#allocation2 + $0x7]] }
  0x89   : > { %v552_v52 = vmul.f32 %v5568_v42, %v5568_v42  ;;  %v835_v9 = vmul.f32 0.0625, %v834_v16  ;;  %v1023_v53 = vrot.slane %v1022_v19, 1  ;;  %v454_v10 = vmul.f32 %v5571_v44, %v5571_v44  ;;  %9569 = sst [smem:[#allocation47_spill]] %s6015_s2 }
  0x8a   : > { %v1119_v54 = vadd.f32 %v1118_v51, %v1117_v43  ;;  %v455_v14 = vmul.f32 %v5574_v45, %v5574_v45  ;;  %v930_v55 = vmul.f32 0.0625, %v929_v46  ;;  %v648_v15 = vmul.f32 %v5577_v49, %v5577_v49  ;;  %s6035_s5 = sld [smem:[#allocation2 + $0x25]] }
  0x8b   : > { %v649_v56 = vmul.f32 %v5580_v50, %v5580_v50  ;;  %v5595_v57 = vsub.f32 %v5525_v23, %v740_v6  ;;  %v553_v59 = vsel %vm538_vm0, %v551_v7, 0.0  ;;  %v554_v60 = vsel %vm538_vm0, %v552_v52, 0.0  ;;  %s6056_s9 = sld [smem:[#allocation2 + $0x2b]] }
  0x8c   : > { %v1120_v58 = vmul.f32 0.0625, %v1119_v54  ;;  %v5600_v61 = vsub.f32 %v5528_v24, %v740_v6  ;;  %v5603_v62 = vsub.f32 %v5531_v26, %v835_v9  ;;  %v5606_v63 = vsub.f32 %v5534_v27, %v835_v9  ;;  %s6066_s14 = sld [smem:[#allocation2 + $0x49]] }
  0x8d   : > { %v1024_v0 = vadd.f32 %v1023_v53, %v1022_v19  ;;  %v456_v2 = vsel %vm440_vm1, %v454_v10, 0.0  ;;  %v457_v3 = vsel %vm440_vm1, %v455_v14, 0.0  ;;  %v5617_v24 = vsub.f32 %v5541_v32, %v930_v55  ;;  %s6075_s13 = sld [smem:[#allocation2 + $0x4c]] }
  0x8e   : > { %v5609_v1 = vsub.f32 %v5491_v8, %v1120_v58  ;;  %v5612_v23 = vsub.f32 %v5500_v11, %v1120_v58  ;;  %v5620_v26 = vsub.f32 %v5544_v33, %v930_v55  ;;  %v555_v4 = vadd.f32 %v554_v60, %v553_v59  ;;  %9570 = sst [smem:[#allocation48_spill]] %s6022_s3 }
  0x8f   : > { %v650_v27 = vsel %vm440_vm1, %v648_v15, 0.0  ;;  %v651_v5 = vsel %vm440_vm1, %v649_v56, 0.0  ;;  %v743_v12 = vmul.f32 %v5595_v57, %v5595_v57  ;;  %v744_v32 = vmul.f32 %v5600_v61, %v5600_v61  ;;  %s6080_s24 = sld [smem:[#allocation2 + $0x4f]] }
  0x90   : > { %v1123_v8 = vmul.f32 %v5609_v1, %v5609_v1  ;;  %v1124_v11 = vmul.f32 %v5612_v23, %v5612_v23  ;;  %v838_v33 = vmul.f32 %v5603_v62, %v5603_v62  ;;  %v839_v13 = vmul.f32 %v5606_v63, %v5606_v63  ;;  %9571 = sst [smem:[#allocation49_spill]] %s6035_s5 }
  0x91   : > { %v1025_v17 = vmul.f32 0.0625, %v1024_v0  ;;  %v458_v21 = vadd.f32 %v457_v3, %v456_v2  ;;  %v933_v22 = vmul.f32 %v5617_v24, %v5617_v24  ;;  %v934_v25 = vmul.f32 %v5620_v26, %v5620_v26  ;;  %9574 = sst [smem:[#allocation51_spill]] %s6056_s9 }
  0x92   : > { %v1125_v18 = vsel %vm538_vm0, %v1123_v8, 0.0  ;;  %v1126_v20 = vsel %vm538_vm0, %v1124_v11, 0.0  ;;  %v652_v29 = vadd.f32 %v651_v5, %v650_v27  ;;  %v556_v30 = vrot.slane %v555_v4, 4  ;;  %9576 = sst [smem:[#allocation52_spill]] %s6066_s14 }
  0x93   : > { %v1127_v28 = vadd.f32 %v1126_v20, %v1125_v18  ;;  %v745_v31 = vsel %vm538_vm0, %v743_v12, 0.0  ;;  %v746_v34 = vsel %vm538_vm0, %v744_v32, 0.0  ;;  %v840_v36 = vsel %vm440_vm1, %v838_v33, 0.0  ;;  %9578 = sst [smem:[#allocation53_spill]] %s6075_s13 }
  0x94   : > { %v841_v37 = vsel %vm440_vm1, %v839_v13, 0.0  ;;  %v5647_v38 = vsub.f32 %v5555_v47, %v1025_v17  ;;  %v5650_v39 = vsub.f32 %v5558_v48, %v1025_v17  ;;  %v459_v40 = vrot.slane %v458_v21, 4  ;;  %s6088_s29 = sld [smem:[#allocation2 + $0x6d]] }
  0x95   : > { %v1128_v35 = vrot.slane %v1127_v28, 4  ;;  %v935_v16 = vsel %vm538_vm0, %v933_v22, 0.0  ;;  %v936_v19 = vsel %vm538_vm0, %v934_v25, 0.0  ;;  %v747_v46 = vadd.f32 %v746_v34, %v745_v31  ;;  %9579 = sst [smem:[#allocation54_spill]] %s6080_s24 }
  0x96   : > { %9544 = vst [vmem:[#allocation26_spill] sm:$0xff] %v5650_v39  ;;  %v842_v6 = vadd.f32 %v841_v37, %v840_v36  ;;  %v557_v7 = vadd.f32 %v556_v30, %v555_v4  ;;  %v937_v52 = vadd.f32 %v936_v19, %v935_v16  ;;  %v1028_v9 = vmul.f32 %v5647_v38, %v5647_v38  ;;  %s6104_s11 = sld [smem:[#allocation2 + $0x70]] }
  0x97   : > { %v1129_v43 = vadd.f32 %v1128_v35, %v1127_v28  ;;  %v1029_v47 = vmul.f32 %v5650_v39, %v5650_v39  ;;  %v460_v53 = vadd.f32 %v459_v40, %v458_v21  ;;  %v653_v48 = vrot.slane %v652_v29, 4  ;;  %s6110_s27 = sld [smem:[#allocation2 + $0x73]] }
  0x98   : > { %v748_v10 = vrot.slane %v747_v46, 4  ;;  %v843_v14 = vrot.slane %v842_v6, 4  ;;  %v558_v15 = vrot.slane %v557_v7, 2  ;;  %v938_v56 = vrot.slane %v937_v52, 4  ;;  %s6118_s12 = sld [smem:[#allocation2 + $0x2]] }
  0x99   : > { %v1130_v51 = vrot.slane %v1129_v43, 2  ;;  %v1030_v58 = vsel %vm440_vm1, %v1028_v9, 0.0  ;;  %v1031_v59 = vsel %vm440_vm1, %v1029_v47, 0.0  ;;  %v461_v60 = vrot.slane %v460_v53, 2  ;;  %s6129_s25 = sld [smem:[#allocation2 + $0x5]] }
  0x9a   : > { %v654_v0 = vadd.f32 %v653_v48, %v652_v29  ;;  %v749_v3 = vadd.f32 %v748_v10, %v747_v46  ;;  %v844_v4 = vadd.f32 %v843_v14, %v842_v6  ;;  %v1032_v27 = vadd.f32 %v1031_v59, %v1030_v58  ;;  %9580 = sst [smem:[#allocation55_spill]] %s6088_s29 }
  0x9b   : > { %v1131_v54 = vadd.f32 %v1130_v51, %v1129_v43  ;;  %v559_v11 = vadd.f32 %v558_v15, %v557_v7  ;;  %v939_v5 = vadd.f32 %v938_v56, %v937_v52  ;;  %v462_v12 = vadd.f32 %v461_v60, %v460_v53  ;;  %s6540_s24 = sld [smem:[#allocation2 + $0x38]] }
  0x9c   : > { %v655_v32 = vrot.slane %v654_v0, 2  ;;  %v750_v13 = vrot.slane %v749_v3, 2  ;;  %v845_v17 = vrot.slane %v844_v4, 2  ;;  %v1033_v18 = vrot.slane %v1032_v27, 4  ;;  %9584 = sst [smem:[#allocation56_spill]] %s6104_s11 }
  0x9d   : > { %v1132_v55 = vrot.slane %v1131_v54, 1  ;;  %v560_v20 = vrot.slane %v559_v11, 1  ;;  %v940_v21 = vrot.slane %v939_v5, 2  ;;  %v463_v22 = vrot.slane %v462_v12, 1  ;;  %9585 = sst [smem:[#allocation57_spill]] %s6110_s27 }
  0x9e   : > { %v656_v25 = vadd.f32 %v655_v32, %v654_v0  ;;  %v751_v28 = vadd.f32 %v750_v13, %v749_v3  ;;  %v846_v29 = vadd.f32 %v845_v17, %v844_v4  ;;  %v1034_v30 = vadd.f32 %v1033_v18, %v1032_v27  ;;  %9587 = sst [smem:[#allocation58_spill]] %s6118_s12 }
  0x9f   : > { %v1133_v2 = vadd.f32 %v1132_v55, %v1131_v54  ;;  %v561_v31 = vadd.f32 %v560_v20, %v559_v11  ;;  %v941_v34 = vadd.f32 %v940_v21, %v939_v5  ;;  %v464_v35 = vadd.f32 %v463_v22, %v462_v12  ;;  %9588 = sst [smem:[#allocation59_spill]] %s6129_s25 }
  0xa0   : > { %v657_v36 = vrot.slane %v656_v25, 1  ;;  %v752_v37 = vrot.slane %v751_v28, 1  ;;  %v847_v40 = vrot.slane %v846_v29, 1  ;;  %v1035_v16 = vrot.slane %v1034_v30, 2  ;;  %s6134_s12 = sld [smem:[#allocation2 + $0x8]] }
  0xa1   : > { %v1134_v8 = vmul.f32 0.0625, %v1133_v2  ;;  %v562_v19 = vmul.f32 0.0625, %v561_v31  ;;  %v942_v43 = vrot.slane %v941_v34, 1  ;;  %v465_v46 = vmul.f32 0.0625, %v464_v35  ;;  %s6139_s27 = sld [smem:[#allocation2 + $0x26]] }
  0xa2   : > { %v658_v6 = vadd.f32 %v657_v36, %v656_v25  ;;  %v753_v51 = vadd.f32 %v752_v37, %v751_v28  ;;  %v848_v7 = vadd.f32 %v847_v40, %v846_v29  ;;  %v1036_v52 = vadd.f32 %v1035_v16, %v1034_v30  ;;  %s6144_s25 = sld [smem:[#allocation2 + $0x29]] }
  0xa3   : > { %v1135_v33 = vadd.f32 1e-05, %v1134_v8  ;;  %v563_v47 = vadd.f32 1e-05, %v562_v19  ;;  %v943_v53 = vadd.f32 %v942_v43, %v941_v34  ;;  %v466_v48 = vadd.f32 1e-05, %v465_v46 }
  0xa4   : > { %v659_v54 = vmul.f32 0.0625, %v658_v6  ;;  %v754_v55 = vmul.f32 0.0625, %v753_v51  ;;  %v849_v15 = vmul.f32 0.0625, %v848_v7  ;;  %v1037_v56 = vrot.slane %v1036_v52, 1  ;;  %s6388_s11 = sld [smem:[#allocation2 + $0x7d]] }
  0xa5   : > { %5017 = vrsqrt.f32 %v1135_v33  ;;  %v944_v58 = vmul.f32 0.0625, %v943_v53  ;;  %9701 = sst [smem:[#allocation133_spill]] %s6540_s24 }
  0xa6   : > { %5019 = vrsqrt.f32 %v563_v47  ;;  %v660_v59 = vadd.f32 1e-05, %v659_v54  ;;  %v755_v60 = vadd.f32 1e-05, %v754_v55  ;;  %v850_v0 = vadd.f32 1e-05, %v849_v15 }
  0xa7   : > { %5021 = vrsqrt.f32 %v466_v48  ;;  %v1038_v2 = vadd.f32 %v1037_v56, %v1036_v52  ;;  %v945_v3 = vadd.f32 1e-05, %v944_v58  ;;  %9589 = sst [smem:[#allocation60_spill]] %s6134_s12 }
  0xa8   : > { %5023 = vrsqrt.f32 %v660_v59  ;;  %9590 = sst [smem:[#allocation61_spill]] %s6139_s27 }
  0xa9   : > { %5025 = vrsqrt.f32 %v755_v60  ;;  %v1039_v4 = vmul.f32 0.0625, %v1038_v2  ;;  %9591 = sst [smem:[#allocation62_spill]] %s6144_s25 }
  0xaa   : > { %5027 = vrsqrt.f32 %v850_v0  ;;  %s6158_s27 = sld [smem:[#allocation2 + $0x2c]] }
  0xab   : > { %5029 = vrsqrt.f32 %v945_v3  ;;  %v1040_v27 = vadd.f32 1e-05, %v1039_v4  ;;  %s6163_s25 = sld [smem:[#allocation2 + $0x4a]] }
  0xac   : > { %s6169_s12 = sld [smem:[#allocation2 + $0x4d]] }
  0xad   : > { %5031 = vrsqrt.f32 %v1040_v27  ;;  %9638 = sst [smem:[#allocation105_spill]] %s6388_s11 }
  0xae   : > { %s6402_s11 = sld [smem:[#allocation2 + $0x15]] }
  0xaf   : > { %s6581_s29 = sld [smem:[#allocation2 + $0x80]] }
  0xb0   : > { %9593 = sst [smem:[#allocation63_spill]] %s6158_s27 }
  0xb1   : > { %9595 = sst [smem:[#allocation64_spill]] %s6163_s25 }
  0xb2   : > { %v5018_v9 = vpop.eup %5017  ;;  %9596 = sst [smem:[#allocation65_spill]] %s6169_s12 }
  0xb3   : > { %v5661_v10 = vmul.f32 %v5018_v9, %v5609_v1  ;;  %v5664_v14 = vmul.f32 %v5018_v9, %v5612_v23  ;;  %v382_v1 = vlaneseq  ;;  %v5020_v23 = vpop.eup %5019  ;;  %s6176_s27 = sld [smem:[#allocation2 + $0x50]] }
  0xb4   : > { %v5022_v8 = vpop.eup %5021  ;;  %v565_v5 = vmul.f32 %v5020_v23, %v5565_v41  ;;  %v566_v30 = vmul.f32 %v5020_v23, %v5568_v42  ;;  %s6184_s12 = sld [smem:[#allocation2 + $0x6e]] }
  0xb5   : > { %9545 = vst [vmem:[#allocation27_spill] sm:$0xff] %v5664_v14  ;;  %v5666_v11 = vand.u32 127, %v382_v1  ;;  %v468_v12 = vmul.f32 %v5022_v8, %v5571_v44  ;;  %v5024_v32 = vpop.eup %5023  ;;  %v469_v44 = vmul.f32 %v5022_v8, %v5574_v45  ;;  %s6194_s25 = sld [smem:[#allocation2 + $0x74]] }
  0xb6   : > { %v5026_v13 = vpop.eup %5025  ;;  %v662_v28 = vmul.f32 %v5024_v32, %v5577_v49  ;;  %v663_v46 = vmul.f32 %v5024_v32, %v5580_v50  ;;  %9640 = sst [smem:[#allocation107_spill]] %s6402_s11 }
  0xb7   : > { %9546 = vst [vmem:[#allocation28_spill] sm:$0xff] %v5666_v11  ;;  %v389_v33 = vadd.s32 16, %v5666_v11  ;;  %v5028_v17 = vpop.eup %5027  ;;  %v4576_v41 = vadd.s32 4294967294, %v5666_v11  ;;  %vm387_vm2 = vcmp.lt.s32.totalorder %v5666_v11, 2  ;;  %v757_v35 = vmul.f32 %v5026_v13, %v5595_v57  ;;  %s6430_s11 = sld [smem:[#allocation2 + $0x60]] }
  0xb8   : > { %v5030_v20 = vpop.eup %5029  ;;  %v852_v37 = vmul.f32 %v5028_v17, %v5603_v62  ;;  %v5709_v55 = vmul.f32 %v5028_v17, %v5606_v63  ;;  %vm386_vm11 = vcmp.lt.s32.totalorder %v5666_v11, 16  ;;  %9731 = sst [smem:[#allocation139_spill]] %s6581_s29 }
  0xb9   : > { %v4577_v29 = vadd.s32 4294967294, %v389_v33  ;;  %v947_v49 = vmul.f32 %v5030_v20, %v5617_v24  ;;  %v5699_v24 = vmul.f32 %v5026_v13, %v5600_v61  ;;  %v5712_v58 = vmul.f32 %v5030_v20, %v5620_v26  ;;  %9597 = sst [smem:[#allocation66_spill]] %s6176_s27 }
  0xba   : > { %v5701_v7 = vpop.eup %5031  ;;  %v9295_v33 = vmov -1.0   ;;  %9598 = sst [smem:[#allocation67_spill]] %s6184_s12 }
  0xbb   : > { %v5690_v19 = vsel %vm387_vm2, %v4576_v41, %v4577_v29  ;;  %9547 = vst [vmem:[#allocation29_spill] sm:$0xff] %v5701_v7  ;;  %v5723_v2 = vmul.f32 %v5701_v7, %v5647_v38  ;;  %s6191_s27 = sld [smem:[#allocation2 + $0x71]] }
  0xbc   : > { %vm393_vm9 = vcmp.ge.s32.totalorder %v5690_v19, 0  ;;  %vm394_vm10 = vcmp.lt.s32.totalorder %v5690_v19, 16  ;;  %9600 = sst [smem:[#allocation69_spill]] %s6194_s25 }
  0xbd   : > { %vm5909_vm12 = vmand %vm393_vm9, %vm394_vm10  ;;  %s6206_s12 = sld [smem:[#allocation2 + $0x9]]  ;;  %vm1234_vm9 = vcmask 7168   ;;  %vm1237_vm10 = vcmask 138240  }
  0xbe   : > { %s6215_s25 = sld [smem:[#allocation2 + $0xc]] }
  0xbf   : > { %9647 = sst [smem:[#allocation114_spill]] %s6430_s11 }
  0xc0   : > { %s6441_s11 = sld [smem:[#allocation2 + $0x84]] }
  0xc1   : > { %9599 = sst [smem:[#allocation68_spill]] %s6191_s27 }
  0xc2   : > { %s6224_s27 = sld [smem:[#allocation2 + $0x2d]] }
  0xc3   : > { %9601 = sst [smem:[#allocation70_spill]] %s6206_s12 }
  0xc4   : > { %9602 = sst [smem:[#allocation71_spill]] %s6215_s25 }
  0xc5   : > { %s6221_s12 = sld [smem:[#allocation2 + $0xf]] }
  0xc6   : > { %s6229_s25 = sld [smem:[#allocation2 + $0x30]] }
  0xc7   : > { %9650 = sst [smem:[#allocation117_spill]] %s6441_s11 }
  0xc8   : > { %9604 = sst [smem:[#allocation73_spill]] %s6224_s27 }
  0xc9   : > { %s6246_s27 = sld [smem:[#allocation2 + $0x54]] }
  0xca   : > { %s6455_s11 = sld [smem:[#allocation2 + $0x19]] }
  0xcb   : > { %9603 = sst [smem:[#allocation72_spill]] %s6221_s12 }
  0xcc   : > { %9606 = sst [smem:[#allocation74_spill]] %s6229_s25 }
  0xcd   : > { %s6235_s12 = sld [smem:[#allocation2 + $0x33]] }
  0xce   : > { %s6243_s25 = sld [smem:[#allocation2 + $0x51]] }
  0xcf   : > { %9609 = sst [smem:[#allocation77_spill]] %s6246_s27 }
  0xd0   : > { %s6260_s27 = sld [smem:[#allocation2 + $0x78]] }
  0xd1   : > { %9653 = sst [smem:[#allocation120_spill]] %s6455_s11 }
  0xd2   : > { %s6603_s24 = sld [smem:[#allocation2 + $0x1b]] }
  0xd3   : > { %9607 = sst [smem:[#allocation75_spill]] %s6235_s12 }
  0xd4   : > { %9608 = sst [smem:[#allocation76_spill]] %s6243_s25 }
  0xd5   : > { %s6251_s12 = sld [smem:[#allocation2 + $0x57]] }
  0xd6   : > { %s6256_s25 = sld [smem:[#allocation2 + $0x75]] }
  0xd7   : > { %9612 = sst [smem:[#allocation80_spill]] %s6260_s27 }
  0xd8   : > { %s6274_s27 = sld [smem:[#allocation2 + $0xd]] }
  0xd9   : > { %9744 = sst [smem:[#allocation142_spill]] %s6603_s24 }
  0xda   : > { %s6658_s24 = sld [smem:[#allocation2 + $0x45]] }
  0xdb   : > { %9610 = sst [smem:[#allocation78_spill]] %s6251_s12 }
  0xdc   : > { %9611 = sst [smem:[#allocation79_spill]] %s6256_s25 }
  0xdd   : > { %s6264_s12 = sld [smem:[#allocation2 + $0x7b]] }
  0xde   : > { %s6268_s25 = sld [smem:[#allocation2 + $0xa]] }
  0xdf   : > { %9616 = sst [smem:[#allocation83_spill]] %s6274_s27 }
  0xe0   : > { %s6306_s27 = sld [smem:[#allocation2 + $0x52]] }
  0xe1   : > { %9768 = sst [smem:[#allocation36_spill]] %s6658_s24 }
  0xe2   : > { %s9770_s29 = sld [smem:[#allocation47_spill]] }
  0xe3   : > { %9613 = sst [smem:[#allocation81_spill]] %s6264_s12 }
  0xe4   : > { %9615 = sst [smem:[#allocation82_spill]] %s6268_s25 }
  0xe5   : > { %s6279_s25 = sld [smem:[#allocation2 + $0x10]] }
  0xe6   : > { %s6285_s12 = sld [smem:[#allocation2 + $0x2e]] }
  0xe7   : > { %9621 = sst [smem:[#allocation88_spill]] %s6306_s27 }
  0xe8   : > { %s6319_s27 = sld [smem:[#allocation2 + $0x76]] }
  0xe9   : > { %s9785_s11 = sld [smem:[#allocation59_spill]] }
  0xea   : > { %s9786_s13 = sld [smem:[#allocation60_spill]] }
  0xeb   : > { %9617 = sst [smem:[#allocation84_spill]] %s6279_s25 }
  0xec   : > { %9618 = sst [smem:[#allocation85_spill]] %s6285_s12 }
  0xed   : > { %v5671_v18 = vpop.permute.xlu0 %406  ;;  %v5673_v21 = vpop.permute.xlu1 %415  ;;  %s6296_s25 = sld [smem:[#allocation2 + $0x31]] }
  0xee   : > { %v567_v22 = vmul.f32 %v565_v5, %v5671_v18  ;;  %v470_v25 = vmul.f32 %v468_v12, %v5671_v18  ;;  %v664_v45 = vmul.f32 %v662_v28, %v5671_v18  ;;  %v759_v62 = vmul.f32 %v757_v35, %v5671_v18  ;;  %s6301_s12 = sld [smem:[#allocation2 + $0x34]] }
  0xef   : > { %v854_v47 = vmul.f32 %v852_v37, %v5671_v18  ;;  %v949_v53 = vmul.f32 %v947_v49, %v5671_v18  ;;  %9624 = sst [smem:[#allocation91_spill]] %s6319_s27 }
  0xf0   : > { %v569_v31 = vadd.f32 %v567_v22, %v5673_v21  ;;  %v472_v34 = vadd.f32 %v470_v25, %v5673_v21  ;;  %v666_v54 = vadd.f32 %v664_v45, %v5673_v21  ;;  %v5719_v0 = vadd.f32 %v759_v62, %v5673_v21  ;;  %s6343_s27 = sld [smem:[#allocation2 + $0x11]] }
  0xf1   : > { %v5685_v36 = vpop.permute.xlu0 %411  ;;  %v5695_v6 = vpop.permute.xlu1 %419  ;;  %v5726_v4 = vadd.f32 %v854_v47, %v5673_v21  ;;  %v5729_v1 = vadd.f32 %v949_v53, %v5673_v21  ;;  %s9793_s24 = sld [smem:[#allocation63_spill]] }
  0xf2   : > { %v571_v40 = vmul.f32 0.70710677, %v569_v31  ;;  %v474_v16 = vmul.f32 0.70710677, %v472_v34  ;;  %v471_v42 = vmul.f32 %v469_v44, %v5685_v36  ;;  %v568_v43 = vmul.f32 %v566_v30, %v5685_v36 }
  0xf3   : > { %9548 = vst [vmem:[#allocation30_spill] sm:$0xff] %v5726_v4  ;;  %9549 = vst [vmem:[#allocation31_spill] sm:$0xff] %v5729_v1  ;;  %v5732_v27 = vmul.f32 0.70710677, %v666_v54  ;;  %v5734_v8 = vmul.f32 0.5, %v569_v31  ;;  %v5737_v5 = vmul.f32 0.5, %v472_v34  ;;  %v665_v31 = vmul.f32 %v663_v46, %v5685_v36 }
  0xf4   : > { %v577_v57 = vand.u32 2147483647, %v571_v40  ;;  %v480_v51 = vand.u32 2147483647, %v474_v16  ;;  %v473_v52 = vadd.f32 %v471_v42, %v5695_v6  ;;  %v570_v9 = vadd.f32 %v568_v43, %v5695_v6  ;;  %9619 = sst [smem:[#allocation86_spill]] %s6296_s25 }
  0xf5   : > { %vm573_vm3 = vcmp.ge.f32.partialorder %v571_v40, 0.0  ;;  %vm476_vm4 = vcmp.ge.f32.partialorder %v474_v16, 0.0  ;;  %v5744_v22 = vmul.f32 0.5, %v666_v54  ;;  %v674_v41 = vand.u32 2147483647, %v5732_v27  ;;  %9620 = sst [smem:[#allocation87_spill]] %s6301_s12 }
  0xf6   : > { %v579_v50 = vmul.f32 0.3275911, %v577_v57  ;;  %v482_v48 = vmul.f32 0.3275911, %v480_v51  ;;  %v609_v15 = vsub.f32 0.0, %v577_v57  ;;  %v512_v26 = vsub.f32 0.0, %v480_v51 }
  0xf7   : > { %v475_v61 = vmul.f32 0.70710677, %v473_v52  ;;  %v572_v56 = vmul.f32 0.70710677, %v570_v9  ;;  %v5740_v13 = vsel %vm573_vm3, 1.0, %v9295_v33  ;;  %v5751_v30 = vsel %vm476_vm4, 1.0, %v9295_v33 }
  0xf8   : > { %v5714_v59 = vadd.f32 1.0, %v579_v50  ;;  %v5716_v60 = vadd.f32 1.0, %v482_v48  ;;  %v611_v23 = vmul.f32 %v609_v15, %v577_v57  ;;  %v514_v25 = vmul.f32 %v512_v26, %v480_v51  ;;  %s6310_s25 = sld [smem:[#allocation2 + $0x55]] }
  0xf9   : > { %v481_v3 = vand.u32 2147483647, %v475_v61  ;;  %v578_v63 = vand.u32 2147483647, %v572_v56  ;;  %v763_v29 = vmul.f32 0.70710677, %v5719_v0  ;;  %v5757_v40 = vadd.f32 %v665_v31, %v5695_v6 }
  0xfa   : > { %5033 = vrcp.f32 %v5714_v59  ;;  %v613_v44 = vmul.f32 1.442695, %v611_v23  ;;  %vm477_vm5 = vcmp.ge.f32.partialorder %v475_v61, 0.0  ;;  %v676_v35 = vmul.f32 0.3275911, %v674_v41  ;;  %s6314_s12 = sld [smem:[#allocation2 + $0x58]] }
  0xfb   : > { %5035 = vrcp.f32 %v5716_v60  ;;  %v483_v38 = vmul.f32 0.3275911, %v481_v3  ;;  %v513_v12 = vsub.f32 0.0, %v481_v3  ;;  %v580_v32 = vmul.f32 0.3275911, %v578_v63  ;;  %9629 = sst [smem:[#allocation96_spill]] %s6343_s27 }
  0xfc   : > { %v610_v20 = vsub.f32 0.0, %v578_v63  ;;  %vm574_vm6 = vcmp.ge.f32.partialorder %v572_v56, 0.0  ;;  %v769_v49 = vand.u32 2147483647, %v763_v29  ;;  %v516_v16 = vmul.f32 1.442695, %v514_v25 }
  0xfd   : > { %v5742_v17 = vadd.f32 1.0, %v483_v38  ;;  %v5746_v28 = vadd.f32 1.0, %v580_v32  ;;  %v515_v34 = vmul.f32 %v513_v12, %v481_v3  ;;  %v5759_v45 = vmul.f32 0.5, %v473_v52  ;;  %s6358_s27 = sld [smem:[#allocation2 + $0x32]] }
  0xfe   : > { %v612_v37 = vmul.f32 %v610_v20, %v578_v63  ;;  %v5761_v42 = vmul.f32 0.5, %v570_v9  ;;  %v5763_v43 = vadd.f32 1.0, %v676_v35  ;;  %v5766_v46 = vsel %vm477_vm5, 1.0, %v9295_v33  ;;  %9622 = sst [smem:[#allocation89_spill]] %s6310_s25 }
  0xff   : > { %5037 = vrcp.f32 %v5742_v17  ;;  %v771_v57 = vmul.f32 0.3275911, %v769_v49  ;;  %v5769_v51 = vmul.f32 0.70710677, %v5757_v40  ;;  %v518_v62 = vmul.f32 1.442695, %v515_v34 }
 0x100   : > { %5039 = vrcp.f32 %v5746_v28  ;;  %v5772_v47 = vsel %vm574_vm6, 1.0, %v9295_v33  ;;  %v760_v52 = vmul.f32 %v5699_v24, %v5685_v36  ;;  %v615_v9 = vmul.f32 1.442695, %v612_v37  ;;  %9623 = sst [smem:[#allocation90_spill]] %s6314_s12 }
 0x101   : > { %5041 = vpow2.f32 %v613_v44  ;;  %v706_v53 = vsub.f32 0.0, %v674_v41  ;;  %v5777_v50 = vadd.f32 1.0, %v771_v57  ;;  %v675_v48 = vand.u32 2147483647, %v5769_v51  ;;  %s6324_s25 = sld [smem:[#allocation2 + $0x79]] }
 0x102   : > { %5043 = vrcp.f32 %v5763_v43  ;;  %v801_v54 = vsub.f32 0.0, %v769_v49  ;;  %v5781_v15 = vadd.f32 %v760_v52, %v5695_v6  ;;  %v5784_v61 = vmul.f32 0.70710677, %v5726_v4  ;;  %s6326_s12 = sld [smem:[#allocation2 + $0x7c]] }
 0x103   : > { %5045 = vpow2.f32 %v516_v16  ;;  %vm670_vm7 = vcmp.ge.f32.partialorder %v5732_v27, 0.0  ;;  %v677_v24 = vmul.f32 0.3275911, %v675_v48  ;;  %v707_v3 = vsub.f32 0.0, %v675_v48  ;;  %9631 = sst [smem:[#allocation98_spill]] %s6358_s27 }
 0x104   : > { %9550 = vst [vmem:[#allocation32_spill] sm:$0xff] %v5784_v61  ;;  %5047 = vrcp.f32 %v5777_v50  ;;  %vm765_vm8 = vcmp.ge.f32.partialorder %v763_v29, 0.0  ;;  %v5790_v23 = vmul.f32 0.70710677, %v5781_v15  ;;  %v708_v12 = vmul.f32 %v706_v53, %v674_v41  ;;  %s6370_s27 = sld [smem:[#allocation2 + $0x56]] }
 0x105   : > { %5049 = vpow2.f32 %v518_v62  ;;  %v5793_v32 = vadd.f32 1.0, %v677_v24  ;;  %v803_v25 = vmul.f32 %v801_v54, %v769_v49  ;;  %v864_v31 = vand.u32 2147483647, %v5784_v61 }
 0x106   : > { %5051 = vpow2.f32 %v615_v9  ;;  %v770_v44 = vand.u32 2147483647, %v5790_v23  ;;  %v709_v35 = vmul.f32 %v707_v3, %v675_v48  ;;  %v5807_v41 = vsel %vm765_vm8, 1.0, %v9295_v33 }
 0x107   : > { %v5034_v56 = vpop.eup %5033  ;;  %5053 = vrcp.f32 %v5793_v32  ;;  %v710_v27 = vmul.f32 1.442695, %v708_v12  ;;  %v866_v9 = vmul.f32 0.3275911, %v864_v31  ;;  %v805_v54 = vmul.f32 1.442695, %v803_v25 }
 0x108   : > { %v5036_v63 = vpop.eup %5035  ;;  %v585_v26 = vmul.f32 %v5034_v56, %v5714_v59  ;;  %v5800_v59 = vsel %vm670_vm7, 1.0, %v9295_v33  ;;  %v772_v49 = vmul.f32 0.3275911, %v770_v44  ;;  %v802_v16 = vsub.f32 0.0, %v770_v44  ;;  %9625 = sst [smem:[#allocation92_spill]] %s6324_s25 }
 0x109   : > { %v488_v38 = vmul.f32 %v5036_v63, %v5716_v60  ;;  %v712_v3 = vmul.f32 1.442695, %v709_v35  ;;  %vm671_vm13 = vcmp.ge.f32.partialorder %v5769_v51, 0.0  ;;  %vm766_vm14 = vcmp.ge.f32.partialorder %v5790_v23, 0.0  ;;  %9626 = sst [smem:[#allocation93_spill]] %s6326_s12 }
 0x10a   : > { %v587_v20 = vsub.f32 2.0, %v585_v26  ;;  %v804_v26 = vmul.f32 %v802_v16, %v770_v44  ;;  %s6334_s25 = sld [smem:[#allocation2 + $0xb]]  ;;  %vm1211_vm8 = vcmask 15360  }
 0x10b   : > { %v490_v34 = vsub.f32 2.0, %v488_v38  ;;  %s6340_s12 = sld [smem:[#allocation2 + $0xe]] }
 0x10c   : > { %v5038_v60 = vpop.eup %5037  ;;  %v5803_v37 = vmul.f32 %v5034_v56, %v587_v20  ;;  %v5814_v56 = vadd.f32 1.0, %v772_v49  ;;  %9634 = sst [smem:[#allocation101_spill]] %s6370_s27 }
 0x10d   : > { %v5040_v57 = vpop.eup %5039  ;;  %v5809_v62 = vmul.f32 %v5036_v63, %v490_v34  ;;  %v489_v52 = vmul.f32 %v5038_v60, %v5742_v17  ;;  %v896_v17 = vsub.f32 0.0, %v864_v31  ;;  %s6385_s27 = sld [smem:[#allocation2 + $0x7a]] }
 0x10e   : > { %v591_v53 = vmul.f32 1.0614054, %v5803_v37  ;;  %v586_v48 = vmul.f32 %v5040_v57, %v5746_v28  ;;  %v5817_v38 = vpop.eup %5041  ;;  %5055 = vrcp.f32 %v5814_v56  ;;  %v5822_v28 = vadd.f32 1.0, %v866_v9 }
 0x10f   : > { %v494_v29 = vmul.f32 1.0614054, %v5809_v62  ;;  %v491_v24 = vsub.f32 2.0, %v489_v52  ;;  %v5044_v12 = vpop.eup %5043  ;;  %5057 = vpow2.f32 %v710_v27 }
 0x110   : > { %v593_v63 = vadd.f32 -1.4531521, %v591_v53  ;;  %v588_v20 = vsub.f32 2.0, %v586_v48  ;;  %v682_v44 = vmul.f32 %v5044_v12, %v5763_v43  ;;  %5059 = vpow2.f32 %v805_v54  ;;  %v5828_v35 = vpop.eup %5045  ;;  %9627 = sst [smem:[#allocation94_spill]] %s6334_s25 }
 0x111   : > { %v496_v34 = vadd.f32 -1.4531521, %v494_v29  ;;  %v5820_v33 = vmul.f32 %v5038_v60, %v491_v24  ;;  %5061 = vpow2.f32 %v712_v3  ;;  %v807_v53 = vmul.f32 1.442695, %v804_v26  ;;  %v5048_v60 = vpop.eup %5047  ;;  %9628 = sst [smem:[#allocation95_spill]] %s6340_s12 }
 0x112   : > { %v595_v25 = vmul.f32 %v593_v63, %v5803_v37  ;;  %v5825_v49 = vmul.f32 %v5040_v57, %v588_v20  ;;  %v684_v9 = vsub.f32 2.0, %v682_v44  ;;  %v5833_v29 = vmul.f32 %v896_v17, %v864_v31  ;;  %v5835_v57 = vpop.eup %5049  ;;  %s6352_s25 = sld [smem:[#allocation2 + $0x2f]] }
 0x113   : > { %v498_v16 = vmul.f32 %v496_v34, %v5809_v62  ;;  %v495_v52 = vmul.f32 1.0614054, %v5820_v33  ;;  %v777_v54 = vmul.f32 %v5048_v60, %v5777_v50  ;;  %5063 = vrcp.f32 %v5822_v28  ;;  %v5839_v63 = vpop.eup %5051  ;;  %s6366_s12 = sld [smem:[#allocation2 + $0x53]] }
 0x114   : > { %v597_v48 = vadd.f32 1.4214138, %v595_v25  ;;  %v592_v27 = vmul.f32 1.0614054, %v5825_v49  ;;  %v5842_v20 = vmul.f32 %v5044_v12, %v684_v9  ;;  %v5845_v34 = vmul.f32 0.70710677, %v5729_v1  ;;  %v5054_v44 = vpop.eup %5053 }
 0x115   : > { %v500_v24 = vadd.f32 1.4214138, %v498_v16  ;;  %v497_v43 = vadd.f32 -1.4531521, %v495_v52  ;;  %v779_v25 = vsub.f32 2.0, %v777_v54  ;;  %5065 = vpow2.f32 %v807_v53  ;;  %9637 = sst [smem:[#allocation104_spill]] %s6385_s27 }
 0x116   : > { %v599_v3 = vmul.f32 %v597_v48, %v5803_v37  ;;  %v594_v26 = vadd.f32 -1.4531521, %v592_v27  ;;  %9551 = vst [vmem:[#allocation33_spill] sm:$0xff] %v5845_v34  ;;  %v688_v52 = vmul.f32 1.0614054, %v5842_v20  ;;  %v5853_v48 = vmul.f32 %v5709_v55, %v5685_v36  ;;  %s6405_s27 = sld [smem:[#allocation2 + $0x18]] }
 0x117   : > { %v502_v31 = vmul.f32 %v500_v24, %v5809_v62  ;;  %v499_v17 = vmul.f32 %v497_v43, %v5820_v33  ;;  %v5855_v9 = vmul.f32 %v5048_v60, %v779_v25  ;;  %v683_v24 = vmul.f32 %v5054_v44, %v5793_v32 }
 0x118   : > { %v601_v50 = vadd.f32 -0.28449672, %v599_v3  ;;  %v596_v16 = vmul.f32 %v594_v26, %v5825_v49  ;;  %v690_v53 = vadd.f32 -1.4531521, %v688_v52  ;;  %v5860_v3 = vand.u32 2147483647, %v5845_v34 }
 0x119   : > { %v504_v12 = vadd.f32 -0.28449672, %v502_v31  ;;  %v501_v27 = vadd.f32 1.4214138, %v499_v17  ;;  %v783_v55 = vmul.f32 1.0614054, %v5855_v9 }
 0x11a   : > { %v603_v43 = vmul.f32 %v601_v50, %v5803_v37  ;;  %v598_v54 = vadd.f32 1.4214138, %v596_v16  ;;  %v685_v4 = vsub.f32 2.0, %v683_v24  ;;  %v692_v31 = vmul.f32 %v690_v53, %v5842_v20  ;;  %9630 = sst [smem:[#allocation97_spill]] %s6352_s25 }
 0x11b   : > { %v506_v26 = vmul.f32 %v504_v12, %v5809_v62  ;;  %v503_v1 = vmul.f32 %v501_v27, %v5820_v33  ;;  %v5870_v17 = vmul.f32 0.3275911, %v5860_v3  ;;  %v5056_v25 = vpop.eup %5055  ;;  %v785_v52 = vadd.f32 -1.4531521, %v783_v55  ;;  %s6364_s25 = sld [smem:[#allocation2 + $0x35]] }
 0x11c   : > { %v605_v60 = vadd.f32 0.2548296, %v603_v43  ;;  %v600_v32 = vmul.f32 %v598_v54, %v5825_v49  ;;  %v5872_v12 = vmul.f32 %v5054_v44, %v685_v4  ;;  %v5058_v27 = vpop.eup %5057  ;;  %v694_v14 = vadd.f32 1.4214138, %v692_v31  ;;  %9633 = sst [smem:[#allocation100_spill]] %s6366_s12 }
 0x11d   : > { %v508_v50 = vadd.f32 0.2548296, %v506_v26  ;;  %v505_v16 = vadd.f32 -0.28449672, %v503_v1  ;;  %v778_v43 = vmul.f32 %v5056_v25, %v5814_v56  ;;  %v5876_v61 = vpop.eup %5059  ;;  %v787_v7 = vmul.f32 %v785_v52, %v5855_v9  ;;  %s6382_s12 = sld [smem:[#allocation2 + $0x77]] }
 0x11e   : > { %v607_v24 = vmul.f32 %v605_v60, %v5803_v37  ;;  %v602_v34 = vadd.f32 -0.28449672, %v600_v32  ;;  %v689_v1 = vmul.f32 1.0614054, %v5872_v12  ;;  %v5882_v26 = vpop.eup %5061  ;;  %v696_v56 = vmul.f32 %v694_v14, %v5842_v20  ;;  %9641 = sst [smem:[#allocation108_spill]] %s6405_s27 }
 0x11f   : > { %v510_v54 = vmul.f32 %v508_v50, %v5809_v62  ;;  %v507_v53 = vmul.f32 %v505_v16, %v5820_v33  ;;  %v780_v44 = vsub.f32 2.0, %v778_v43  ;;  %v789_v60 = vadd.f32 1.4214138, %v787_v7  ;;  %s6420_s27 = sld [smem:[#allocation2 + $0x3c]] }
 0x120   : > { %v617_v4 = vmul.f32 %v5817_v38, %v607_v24  ;;  %v604_v37 = vmul.f32 %v602_v34, %v5825_v49  ;;  %v691_v32 = vadd.f32 -1.4531521, %v689_v1  ;;  %v5889_v31 = vpop.eup %5063  ;;  %v698_v52 = vadd.f32 -0.28449672, %v696_v56 }
 0x121   : > { %v520_v55 = vmul.f32 %v5828_v35, %v510_v54  ;;  %v509_v62 = vadd.f32 0.2548296, %v507_v53  ;;  %v5891_v39 = vmul.f32 %v5056_v25, %v780_v44  ;;  %v791_v34 = vmul.f32 %v789_v60, %v5855_v9  ;;  %9632 = sst [smem:[#allocation99_spill]] %s6364_s25 }
 0x122   : > { %v619_v50 = vsub.f32 1.0, %v617_v4  ;;  %v606_v16 = vadd.f32 0.2548296, %v604_v37  ;;  %v693_v14 = vmul.f32 %v691_v32, %v5872_v12  ;;  %v5896_v43 = vpop.eup %5065  ;;  %v700_v54 = vmul.f32 %v698_v52, %v5842_v20  ;;  %s6378_s25 = sld [smem:[#allocation2 + $0x59]] }
 0x123   : > { %v522_v38 = vsub.f32 1.0, %v520_v55  ;;  %v511_v24 = vmul.f32 %v509_v62, %v5820_v33  ;;  %v784_v53 = vmul.f32 1.0614054, %v5891_v39  ;;  %v793_v4 = vadd.f32 -0.28449672, %v791_v34  ;;  %9636 = sst [smem:[#allocation103_spill]] %s6382_s12 }
 0x124   : > { %v621_v35 = vmul.f32 %v619_v50, %v5740_v13  ;;  %v608_v7 = vmul.f32 %v606_v16, %v5825_v49  ;;  %v695_v33 = vadd.f32 1.4214138, %v693_v14  ;;  %v702_v44 = vadd.f32 0.2548296, %v700_v54  ;;  %s6410_s12 = sld [smem:[#allocation2 + $0x39]] }
 0x125   : > { %v524_v25 = vmul.f32 %v522_v38, %v5751_v30  ;;  %v521_v1 = vmul.f32 %v5835_v57, %v511_v24  ;;  %v786_v55 = vadd.f32 -1.4531521, %v784_v53  ;;  %v795_v30 = vmul.f32 %v793_v4, %v5855_v9  ;;  %9644 = sst [smem:[#allocation111_spill]] %s6420_s27 }
 0x126   : > { %v625_v37 = vadd.f32 1.0, %v621_v35  ;;  %v618_v56 = vmul.f32 %v5839_v63, %v608_v7  ;;  %v697_v57 = vmul.f32 %v695_v33, %v5872_v12  ;;  %v704_v63 = vmul.f32 %v702_v44, %v5842_v20  ;;  %s6434_s27 = sld [smem:[#allocation2 + $0x7e]] }
 0x127   : > { %v528_v49 = vadd.f32 1.0, %v524_v25  ;;  %v523_v62 = vsub.f32 1.0, %v521_v1  ;;  %v788_v50 = vmul.f32 %v786_v55, %v5891_v39  ;;  %v797_v52 = vadd.f32 0.2548296, %v795_v30 }
 0x128   : > { %v627_v60 = vmul.f32 %v625_v37, %v5734_v8  ;;  %v620_v32 = vsub.f32 1.0, %v618_v56  ;;  %v699_v38 = vadd.f32 -0.28449672, %v697_v57  ;;  %v714_v34 = vmul.f32 %v5058_v27, %v704_v63  ;;  %9635 = sst [smem:[#allocation102_spill]] %s6378_s25 }
 0x129   : > { %v530_v19 = vmul.f32 %v528_v49, %v5737_v5  ;;  %v525_v16 = vmul.f32 %v523_v62, %v5766_v46  ;;  %v790_v20 = vadd.f32 1.4214138, %v788_v50  ;;  %v799_v14 = vmul.f32 %v797_v52, %v5855_v9  ;;  %s6395_s25 = sld [smem:[#allocation2 + $0x12]] }
 0x12a   : > { %v5926_v24 = vsel %vm5909_vm12, %v627_v60, 0.0  ;;  %v622_v8 = vmul.f32 %v620_v32, %v5772_v47  ;;  %v701_v35 = vmul.f32 %v699_v38, %v5872_v12  ;;  %v716_v27 = vsub.f32 1.0, %v714_v34  ;;  %9643 = sst [smem:[#allocation110_spill]] %s6410_s12 }
 0x12b   : > { %1216 = vrot.lane.b32.xlu0 %v5926_v24, %s9308_s10  ;;  %v5935_v5 = vsel %vm386_vm11, %v530_v19, 0.0  ;;  %v529_v46 = vadd.f32 1.0, %v525_v16  ;;  %v792_v7 = vmul.f32 %v790_v20, %v5891_v39  ;;  %v872_v54 = vmul.f32 %v5889_v31, %v5822_v28  ;;  %s9310_s10 = smov 15   ;;  %s6426_s12 = sld [smem:[#allocation2 + $0x5d]] }
 0x12c   : > { %1205 = vrot.lane.b32.xlu1 %v5935_v5, %s9304_s16  ;;  %v626_v47 = vadd.f32 1.0, %v622_v8  ;;  %v809_v9 = vmul.f32 %v5876_v61, %v799_v14  ;;  %v703_v25 = vadd.f32 0.2548296, %v701_v35  ;;  %v5951_v1 = vadd.f32 1.0, %v5870_v17  ;;  %9648 = sst [smem:[#allocation115_spill]] %s6434_s27 }
 0x12d   : > { %v531_v53 = vmul.f32 %v529_v46, %v5759_v45  ;;  %v718_v33 = vmul.f32 %v716_v27, %v5800_v59  ;;  %v794_v37 = vadd.f32 -0.28449672, %v792_v7  ;;  %v874_v56 = vsub.f32 2.0, %v872_v54  ;;  %s6447_s27 = sld [smem:[#allocation2 + $0x13]] }
 0x12e   : > { %v628_v4 = vmul.f32 %v626_v47, %v5761_v42  ;;  %v811_v61 = vsub.f32 1.0, %v809_v9  ;;  %v705_v28 = vmul.f32 %v703_v25, %v5872_v12  ;;  %5067 = vrcp.f32 %v5951_v1 }
 0x12f   : > { %1222 = vrot.lane.b32.xlu0 %v5935_v5, %s9306_s30  ;;  %v5963_v45 = vsel %vm386_vm11, %v531_v53, 0.0  ;;  %v796_v42 = vmul.f32 %v794_v37, %v5891_v39  ;;  %v5974_v59 = vmul.f32 %v5889_v31, %v874_v56  ;;  %v900_v17 = vmul.f32 1.442695, %v5833_v29  ;;  %s5990_s30 = sld [smem:[#allocation2 + $0x6f]] }
 0x130   : > { %1207 = vrot.lane.b32.xlu1 %v5963_v45, %s9304_s16  ;;  %v722_v44 = vadd.f32 1.0, %v718_v33  ;;  %v813_v12 = vmul.f32 %v811_v61, %v5807_v41  ;;  %v715_v55 = vmul.f32 %v5882_v26, %v705_v28  ;;  %v5983_v49 = vadd.f32 %v5853_v48, %v5695_v6  ;;  %s5985_s16 = sld [smem:[#allocation2 + $0x6c]] }
 0x131   : > { %v798_v62 = vadd.f32 0.2548296, %v796_v42  ;;  %v878_v30 = vmul.f32 1.0614054, %v5974_v59  ;;  %v1044_v31 = vmul.f32 %v5723_v2, %v5671_v18  ;;  %v5996_v41 = vsel %vm5909_vm12, %v628_v4, 0.0  ;;  %9639 = sst [smem:[#allocation106_spill]] %s6395_s25 }
 0x132   : > { %v717_v29 = vsub.f32 1.0, %v715_v55  ;;  %v5999_v48 = vmul.f32 0.70710677, %v5983_v49  ;;  %v950_v26 = vmul.f32 %v5712_v58, %v5685_v36  ;;  %v9567_v2 = vmov -1.0   ;;  %s6408_s25 = sld [smem:[#allocation2 + $0x36]] }
 0x133   : > { %1228 = vrot.lane.b32.xlu0 %v5926_v24, %s9310_s10  ;;  %v673_v57 = vsel %vm671_vm13, 1.0, %v9567_v2  ;;  %v800_v60 = vmul.f32 %v798_v62, %v5891_v39  ;;  %v880_v32 = vadd.f32 -1.4531521, %v878_v30  ;;  %s6011_s10 = sld [smem:[#allocation2 + $0x1]]  ;;  %v724_v63 = vmul.f32 %v722_v44, %v5744_v22  ;;  %v9582_v44 = vld [vmem:[#allocation26_spill] sm:$0xff] }
 0x134   : > { %1218 = vrot.lane.b32.xlu1 %v5996_v41, %s9566_s1  ;;  %v817_v50 = vadd.f32 1.0, %v813_v12  ;;  %5069 = vpow2.f32 %v900_v17  ;;  %v719_v58 = vmul.f32 %v717_v29, %v673_v57  ;;  %v6020_v51 = vand.u32 2147483647, %v5999_v48  ;;  %v9583_v12 = vld [vmem:[#allocation29_spill] sm:$0xff]  ;;  %9646 = sst [smem:[#allocation113_spill]] %s6426_s12 }
 0x135   : > { %9564 = sst [smem:[#allocation44_spill]] %s5990_s30  ;;  %v810_v19 = vmul.f32 %v5896_v43, %v800_v60  ;;  %v882_v16 = vmul.f32 %v880_v32, %v5974_v59  ;;  %v815_v39 = vmul.f32 0.5, %v5719_v0  ;;  %v6028_v22 = vadd.f32 %v950_v26, %v5695_v6  ;;  %v9586_v26 = vld [vmem:[#allocation32_spill] sm:$0xff] }
 0x136   : > { %9563 = sst [smem:[#allocation43_spill]] %s5985_s16  ;;  %v6031_v52 = vadd.f32 %v1044_v31, %v5673_v21  ;;  %v1139_v43 = vmul.f32 %v5661_v10, %v5671_v18  ;;  %v768_v38 = vsel %vm766_vm14, 1.0, %v9567_v2  ;;  %v867_v34 = vmul.f32 0.3275911, %v6020_v51 }
 0x137   : > { %1240 = vrot.lane.b32.xlu0 %v5926_v24, %s9312_s4  ;;  %v812_v8 = vsub.f32 1.0, %v810_v19  ;;  %v884_v0 = vadd.f32 1.4214138, %v882_v16  ;;  %v6045_v20 = vsel %vm386_vm11, %v724_v63, 0.0  ;;  %v991_v46 = vsub.f32 0.0, %v5860_v3  ;;  %s6051_s4 = sld [smem:[#allocation2 + $0x28]] }
 0x138   : > { %1224 = vrot.lane.b32.xlu1 %v5963_v45, %s9572_s6  ;;  %v6049_v10 = vmul.f32 0.70710677, %v6028_v22  ;;  %v819_v18 = vmul.f32 %v817_v50, %v815_v39  ;;  %v723_v14 = vadd.f32 1.0, %v719_v58  ;;  %v6054_v35 = vadd.f32 1.0, %v867_v34  ;;  %9642 = sst [smem:[#allocation109_spill]] %s6408_s25 }
 0x139   : > { %9568 = sst [smem:[#allocation46_spill]] %s6011_s10  ;;  %v886_v23 = vmul.f32 %v884_v0, %v5974_v59  ;;  %v814_v47 = vmul.f32 %v812_v8, %v768_v38  ;;  %v6064_v7 = vmul.f32 0.70710677, %v6031_v52  ;;  %v721_v53 = vmul.f32 0.5, %v5757_v40 }
 0x13a   : > { %v6061_v27 = vand.u32 2147483647, %v6049_v10  ;;  %5071 = vrcp.f32 %v6054_v35  ;;  %v6073_v25 = vadd.f32 %v1139_v43, %v5673_v21  ;;  %v993_v33 = vmul.f32 %v991_v46, %v5860_v3  ;;  %s6424_s25 = sld [smem:[#allocation2 + $0x5a]] }
 0x13b   : > { %1250 = vrot.lane.b32.xlu0 %v6045_v20, %s9575_s28  ;;  %v5068_v54 = vpop.eup %5067  ;;  %v888_v9 = vadd.f32 -0.28449672, %v886_v23  ;;  %v6084_v56 = vsel %vm5909_vm12, %v819_v18, 0.0  ;;  %v725_v40 = vmul.f32 %v723_v14, %v721_v53  ;;  %v816_v61 = vmul.f32 0.5, %v5781_v15  ;;  %v9592_v23 = vld [vmem:[#allocation27_spill] sm:$0xff]  ;;  %s6438_s12 = sld [smem:[#allocation2 + $0x81]] }
 0x13c   : > { %1230 = vrot.lane.b32.xlu1 %v5996_v41, %s9577_s26  ;;  %v967_v4 = vmul.f32 %v5068_v54, %v5951_v1  ;;  %v962_v37 = vmul.f32 0.3275911, %v6061_v27  ;;  %v818_v1 = vadd.f32 1.0, %v814_v47  ;;  %v6095_v42 = vand.u32 2147483647, %v6064_v7  ;;  %9651 = sst [smem:[#allocation118_spill]] %s6447_s27 }
 0x13d   : > { %9573 = sst [smem:[#allocation50_spill]] %s6051_s4  ;;  %v890_v21 = vmul.f32 %v888_v9, %v5974_v59  ;;  %v6100_v15 = vmul.f32 0.70710677, %v6073_v25  ;;  %v1043_v55 = vmul.f32 %v9583_v12, %v9582_v44  ;;  %v995_v30 = vmul.f32 1.442695, %v993_v33 }
 0x13e   : > { %v969_v3 = vsub.f32 2.0, %v967_v4  ;;  %v6092_v28 = vadd.f32 1.0, %v962_v37  ;;  %v1056_v31 = vmul.f32 0.3275911, %v6095_v42  ;;  %vm860_vm15 = vcmp.ge.f32.partialorder %v9586_v26, 0.0  ;;  %s6461_s27 = sld [smem:[#allocation2 + $0x37]] }
 0x13f   : > { %1260 = vrot.lane.b32.xlu0 %v6084_v56, %s9566_s1  ;;  %v892_v17 = vadd.f32 0.2548296, %v890_v21  ;;  %v897_v60 = vsub.f32 0.0, %v6020_v51  ;;  %v6116_v32 = vand.u32 2147483647, %v6100_v15  ;;  %v6124_v63 = vsel %vm386_vm11, %v725_v40, 0.0 }
 0x140   : > { %1242 = vrot.lane.b32.xlu1 %v5996_v41, %s9581_s7  ;;  %v6106_v62 = vmul.f32 %v5068_v54, %v969_v3  ;;  %5073 = vrcp.f32 %v6092_v28  ;;  %v820_v50 = vmul.f32 %v818_v1, %v816_v61  ;;  %v6127_v19 = vadd.f32 1.0, %v1056_v31  ;;  %v9594_v54 = vld [vmem:[#allocation30_spill] sm:$0xff]  ;;  %9645 = sst [smem:[#allocation112_spill]] %s6424_s25 }
 0x141   : > { %v5070_v29 = vpop.eup %5069  ;;  %v894_v57 = vmul.f32 %v892_v17, %v5974_v59  ;;  %v1151_v16 = vmul.f32 0.3275911, %v6116_v32  ;;  %v862_v39 = vsel %vm860_vm15, 1.0, %v9567_v2  ;;  %v1045_v38 = vmul.f32 %v1043_v55, %v5685_v36  ;;  %9649 = sst [smem:[#allocation116_spill]] %s6438_s12 }
 0x142   : > { %v973_v58 = vmul.f32 1.0614054, %v6106_v62  ;;  %5075 = vrcp.f32 %v6127_v19  ;;  %v899_v0 = vmul.f32 %v897_v60, %v6020_v51  ;;  %v6150_v46 = vsel %vm5909_vm12, %v820_v50, 0.0  ;;  %s6451_s12 = sld [smem:[#allocation2 + $0x16]] }
 0x143   : > { %1266 = vrot.lane.b32.xlu0 %v6045_v20, %s9572_s6  ;;  %v904_v59 = vmul.f32 %v5070_v29, %v894_v57  ;;  %5077 = vpow2.f32 %v995_v30  ;;  %v6142_v34 = vadd.f32 1.0, %v1151_v16  ;;  %v6154_v14 = vadd.f32 %v1045_v38, %v5695_v6  ;;  %s6638_s25 = sld [smem:[#allocation2 + $0x3f]] }
 0x144   : > { %1252 = vrot.lane.b32.xlu1 %v6124_v63, %s9575_s28  ;;  %v975_v43 = vadd.f32 -1.4531521, %v973_v58  ;;  %v1140_v47 = vmul.f32 %v9592_v23, %v5685_v36  ;;  %v910_v53 = vmul.f32 0.5, %v9594_v54  ;;  %v992_v40 = vsub.f32 0.0, %v6061_v27  ;;  %9654 = sst [smem:[#allocation121_spill]] %s6461_s27 }
 0x145   : > { %v906_v8 = vsub.f32 1.0, %v904_v59  ;;  %5079 = vrcp.f32 %v6142_v34  ;;  %v6167_v33 = vmul.f32 0.70710677, %v6154_v14  ;;  %v902_v1 = vmul.f32 1.442695, %v899_v0  ;;  %s9781_s27 = sld [smem:[#allocation56_spill]] }
 0x146   : > { %v977_v18 = vmul.f32 %v975_v43, %v6106_v62  ;;  %v6174_v61 = vadd.f32 %v1140_v47, %v5695_v6  ;;  %v994_v29 = vmul.f32 %v992_v40, %v6061_v27  ;;  %v1086_v50 = vsub.f32 0.0, %v6095_v42  ;;  %v9605_v43 = vld [vmem:[#allocation33_spill] sm:$0xff] }
 0x147   : > { %1272 = vrot.lane.b32.xlu0 %v6084_v56, %s9577_s26  ;;  %v908_v51 = vmul.f32 %v906_v8, %v862_v39  ;;  %v5072_v9 = vpop.eup %5071  ;;  %v6182_v3 = vand.u32 2147483647, %v6167_v33  ;;  %vm955_vm0 = vcmp.ge.f32.partialorder %v9605_v43, 0.0  ;;  %vm861_vm2 = vcmp.ge.f32.partialorder %v5999_v48, 0.0 }
 0x148   : > { %1262 = vrot.lane.b32.xlu1 %v6150_v46, %s9566_s1  ;;  %v979_v4 = vadd.f32 1.4214138, %v977_v18  ;;  %v873_v37 = vmul.f32 %v5072_v9, %v6054_v35  ;;  %v6189_v6 = vmul.f32 0.70710677, %v6174_v61  ;;  %v997_v47 = vmul.f32 1.442695, %v994_v29 }
 0x149   : > { %v912_v36 = vadd.f32 1.0, %v908_v51  ;;  %v1057_v12 = vmul.f32 0.3275911, %v6182_v3  ;;  %vm956_vm3 = vcmp.ge.f32.partialorder %v6049_v10, 0.0  ;;  %vm1050_vm4 = vcmp.ge.f32.partialorder %v6064_v7, 0.0  ;;  %9652 = sst [smem:[#allocation119_spill]] %s6451_s12 }
 0x14a   : > { %v981_v21 = vmul.f32 %v979_v4, %v6106_v62  ;;  %v875_v17 = vsub.f32 2.0, %v873_v37  ;;  %v6204_v26 = vand.u32 2147483647, %v6189_v6  ;;  %v957_v37 = vsel %vm955_vm0, 1.0, %v9567_v2  ;;  %s6619_s12 = sld [smem:[#allocation2 + $0x21]] }
 0x14b   : > { %1282 = vrot.lane.b32.xlu0 %v6084_v56, %s9581_s7  ;;  %v914_v35 = vmul.f32 %v912_v36, %v910_v53  ;;  %v6213_v58 = vadd.f32 1.0, %v1057_v12  ;;  %v1088_v53 = vmul.f32 %v1086_v50, %v6095_v42  ;;  %v9614_v50 = vld [vmem:[#allocation31_spill] sm:$0xff]  ;;  %vm1145_vm5 = vcmp.ge.f32.partialorder %v6100_v15, 0.0  ;;  %9765 = sst [smem:[#allocation34_spill]] %s6638_s25 }
 0x14c   : > { %1268 = vrot.lane.b32.xlu1 %v6124_v63, %s9572_s6  ;;  %v983_v44 = vadd.f32 -0.28449672, %v981_v21  ;;  %v6200_v31 = vmul.f32 %v5072_v9, %v875_v17  ;;  %v1152_v59 = vmul.f32 0.3275911, %v6204_v26  ;;  %v1181_v9 = vsub.f32 0.0, %v6116_v32  ;;  %s9794_s25 = sld [smem:[#allocation64_spill]] }
 0x14d   : > { %v5074_v55 = vpop.eup %5073  ;;  %v6198_v30 = vsel %vm386_vm11, %v914_v35, 0.0  ;;  %5081 = vrcp.f32 %v6213_v58  ;;  %vm1051_vm6 = vcmp.ge.f32.partialorder %v6167_v33, 0.0  ;;  %vm1146_vm7 = vcmp.ge.f32.partialorder %v6189_v6, 0.0 }
 0x14e   : > { %v985_v57 = vmul.f32 %v983_v44, %v6106_v62  ;;  %v968_v60 = vmul.f32 %v5074_v55, %v6092_v28  ;;  %v879_v27 = vmul.f32 1.0614054, %v6200_v31  ;;  %5083 = vpow2.f32 %v902_v1 }
 0x14f   : > { %1292 = vrot.lane.b32.xlu0 %v6198_v30, %s9575_s28  ;;  %v5076_v28 = vpop.eup %5075  ;;  %v6227_v8 = vadd.f32 1.0, %v1152_v59  ;;  %v1090_v44 = vmul.f32 1.442695, %v1088_v53  ;;  %v1183_v12 = vmul.f32 %v1181_v9, %v6116_v32  ;;  %v863_v53 = vsel %vm861_vm2, 1.0, %v9567_v2 }
 0x150   : > { %1274 = vrot.lane.b32.xlu1 %v6150_v46, %s9577_s26  ;;  %v987_v16 = vadd.f32 0.2548296, %v985_v57  ;;  %v970_v39 = vsub.f32 2.0, %v968_v60  ;;  %v881_v38 = vadd.f32 -1.4531521, %v879_v27  ;;  %v5078_v0 = vpop.eup %5077  ;;  %v1062_v51 = vmul.f32 %v5076_v28, %v6127_v19  ;;  %9753 = sst [smem:[#allocation144_spill]] %s6619_s12 }
 0x151   : > { %5085 = vrcp.f32 %v6227_v8  ;;  %v1185_v43 = vmul.f32 1.442695, %v1183_v12  ;;  %v1053_v33 = vsel %vm1051_vm6, 1.0, %v9567_v2  ;;  %v2079_v13 = vstv %s5985_s16  ;;  %s6521_s16 = sld [smem:[#allocation2 + $0x14]] }
 0x152   : > { %v989_v18 = vmul.f32 %v987_v16, %v6106_v62  ;;  %v6232_v23 = vmul.f32 %v5074_v55, %v970_v39  ;;  %v883_v54 = vmul.f32 %v881_v38, %v6200_v31  ;;  %v1064_v36 = vsub.f32 2.0, %v1062_v51  ;;  %v5080_v19 = vpop.eup %5079  ;;  %s6713_s12 = sld [smem:[#allocation2 + $0x66]] }
 0x153   : > { %v1157_v35 = vmul.f32 %v5080_v19, %v6142_v34  ;;  %5087 = vpow2.f32 %v997_v47  ;;  %v1005_v34 = vmul.f32 0.5, %v9614_v50  ;;  %v1087_v38 = vsub.f32 0.0, %v6182_v3 }
 0x154   : > { %1284 = vrot.lane.b32.xlu1 %v6150_v46, %s9581_s7  ;;  %v999_v62 = vmul.f32 %v5078_v0, %v989_v18  ;;  %v974_v4 = vmul.f32 1.0614054, %v6232_v23  ;;  %v885_v40 = vadd.f32 1.4214138, %v883_v54  ;;  %v6253_v1 = vmul.f32 %v5076_v28, %v1064_v36 }
 0x155   : > { %v1159_v60 = vsub.f32 2.0, %v1157_v35  ;;  %5089 = vpow2.f32 %v1090_v44  ;;  %v1089_v12 = vmul.f32 %v1087_v38, %v6182_v3  ;;  %vm2312_vm13 = vcmask 146432  }
 0x156   : > { %v1001_v42 = vsub.f32 1.0, %v999_v62  ;;  %v976_v21 = vadd.f32 -1.4531521, %v974_v4  ;;  %v887_v17 = vmul.f32 %v885_v40, %v6200_v31  ;;  %v1068_v57 = vmul.f32 1.0614054, %v6253_v1 }
 0x157   : > { %v6270_v39 = vmul.f32 %v5080_v19, %v1159_v60  ;;  %v1182_v62 = vsub.f32 0.0, %v6204_v26  ;;  %5091 = vpow2.f32 %v1185_v43  ;;  %9688 = sst [smem:[#allocation130_spill]] %s6521_s16 }
 0x158   : > { %v1003_v55 = vmul.f32 %v1001_v42, %v957_v37  ;;  %v978_v29 = vmul.f32 %v976_v21, %v6232_v23  ;;  %v889_v27 = vadd.f32 -0.28449672, %v887_v17  ;;  %v1070_v32 = vadd.f32 -1.4531521, %v1068_v57  ;;  %9778 = sst [smem:[#allocation38_spill]] %s6713_s12 }
 0x159   : > { %v1163_v51 = vmul.f32 1.0614054, %v6270_v39  ;;  %s9804_s16 = sld [smem:[#allocation68_spill]] }
 0x15a   : > { %v1007_v59 = vadd.f32 1.0, %v1003_v55  ;;  %v980_v16 = vadd.f32 1.4214138, %v978_v29  ;;  %v891_v28 = vmul.f32 %v889_v27, %v6200_v31  ;;  %v1072_v47 = vmul.f32 %v1070_v32, %v6253_v1  ;;  %v5082_v54 = vpop.eup %5081  ;;  %s9807_s12 = sld [smem:[#allocation69_spill]] }
 0x15b   : > { %v5084_v4 = vpop.eup %5083  ;;  %v1063_v40 = vmul.f32 %v5082_v54, %v6213_v58  ;;  %v1165_v42 = vadd.f32 -1.4531521, %v1163_v51  ;;  %v1184_v29 = vmul.f32 %v1182_v62, %v6204_v26  ;;  %v1092_v32 = vmul.f32 1.442695, %v1089_v12 }
 0x15c   : > { %v1009_v0 = vmul.f32 %v1007_v59, %v1005_v34  ;;  %v982_v18 = vmul.f32 %v980_v16, %v6232_v23  ;;  %v893_v9 = vadd.f32 0.2548296, %v891_v28  ;;  %v1074_v37 = vadd.f32 1.4214138, %v1072_v47 }
 0x15d   : > { %v1065_v44 = vsub.f32 2.0, %v1063_v40  ;;  %v1167_v55 = vmul.f32 %v1165_v42, %v6270_v39  ;;  %5093 = vpow2.f32 %v1092_v32 }
 0x15e   : > { %v6289_v36 = vsel %vm5909_vm12, %v1009_v0, 0.0  ;;  %v984_v19 = vadd.f32 -0.28449672, %v982_v18  ;;  %v895_v48 = vmul.f32 %v893_v9, %v6200_v31  ;;  %v5086_v21 = vpop.eup %5085  ;;  %v1076_v17 = vmul.f32 %v1074_v37, %v6253_v1 }
 0x15f   : > { %1302 = vrot.lane.b32.xlu0 %v6289_v36, %s9566_s1  ;;  %v1158_v31 = vmul.f32 %v5086_v21, %v6227_v8  ;;  %v6308_v50 = vmul.f32 %v5082_v54, %v1065_v44  ;;  %v1169_v34 = vadd.f32 1.4214138, %v1167_v55  ;;  %v1187_v0 = vmul.f32 1.442695, %v1184_v29 }
 0x160   : > { %v986_v35 = vmul.f32 %v984_v19, %v6232_v23  ;;  %v905_v58 = vmul.f32 %v5084_v4, %v895_v48  ;;  %v1078_v60 = vadd.f32 -0.28449672, %v1076_v17  ;;  %v5088_v59 = vpop.eup %5087 }
 0x161   : > { %v1160_v27 = vsub.f32 2.0, %v1158_v31  ;;  %v1069_v16 = vmul.f32 1.0614054, %v6308_v50  ;;  %v1171_v43 = vmul.f32 %v1169_v34, %v6270_v39  ;;  %5095 = vpow2.f32 %v1187_v0 }
 0x162   : > { %v988_v57 = vadd.f32 0.2548296, %v986_v35  ;;  %v907_v3 = vsub.f32 1.0, %v905_v58  ;;  %v1080_v26 = vmul.f32 %v1078_v60, %v6253_v1  ;;  %v5090_v62 = vpop.eup %5089  ;;  %v1006_v58 = vmul.f32 0.5, %v6028_v22 }
 0x163   : > { %1308 = vrot.lane.b32.xlu0 %v6198_v30, %s9572_s6  ;;  %v6322_v38 = vmul.f32 %v5086_v21, %v1160_v27  ;;  %v1071_v51 = vadd.f32 -1.4531521, %v1069_v16  ;;  %v1173_v9 = vadd.f32 -0.28449672, %v1171_v43  ;;  %v1147_v43 = vsel %vm1145_vm5, 1.0, %v9567_v2 }
 0x164   : > { %v990_v8 = vmul.f32 %v988_v57, %v6232_v23  ;;  %v909_v28 = vmul.f32 %v907_v3, %v863_v53  ;;  %v1082_v47 = vadd.f32 0.2548296, %v1080_v26  ;;  %v911_v23 = vmul.f32 0.5, %v5983_v49  ;;  %v5092_v12 = vpop.eup %5091 }
 0x165   : > { %v1164_v53 = vmul.f32 1.0614054, %v6322_v38  ;;  %v1073_v37 = vmul.f32 %v1071_v51, %v6308_v50  ;;  %v958_v49 = vsel %vm956_vm3, 1.0, %v9567_v2  ;;  %v1175_v48 = vmul.f32 %v1173_v9, %v6270_v39 }
 0x166   : > { %v1000_v18 = vmul.f32 %v5088_v59, %v990_v8  ;;  %v913_v54 = vadd.f32 1.0, %v909_v28  ;;  %v1084_v19 = vmul.f32 %v1082_v47, %v6253_v1  ;;  %v1052_v57 = vsel %vm1050_vm4, 1.0, %v9567_v2 }
 0x167   : > { %1314 = vrot.lane.b32.xlu0 %v6289_v36, %s9577_s26  ;;  %v1166_v42 = vadd.f32 -1.4531521, %v1164_v53  ;;  %v1075_v1 = vadd.f32 1.4214138, %v1073_v37  ;;  %v1177_v10 = vadd.f32 0.2548296, %v1175_v48 }
 0x168   : > { %v1002_v4 = vsub.f32 1.0, %v1000_v18  ;;  %v915_v40 = vmul.f32 %v913_v54, %v911_v23  ;;  %v1094_v35 = vmul.f32 %v5090_v62, %v1084_v19  ;;  %v1195_v54 = vmul.f32 0.5, %v6073_v25 }
 0x169   : > { %v1168_v44 = vmul.f32 %v1166_v42, %v6322_v38  ;;  %v1077_v29 = vmul.f32 %v1075_v1, %v6308_v50  ;;  %v1179_v60 = vmul.f32 %v1177_v10, %v6270_v39  ;;  %v1100_v39 = vmul.f32 0.5, %v6031_v52 }
 0x16a   : > { %v1004_v21 = vmul.f32 %v1002_v4, %v958_v49  ;;  %v6347_v17 = vsel %vm386_vm11, %v915_v40, 0.0  ;;  %v1096_v31 = vsub.f32 1.0, %v1094_v35  ;;  %v5094_v23 = vpop.eup %5093  ;;  %v1101_v48 = vmul.f32 0.5, %v6154_v14 }
 0x16b   : > { %1324 = vrot.lane.b32.xlu0 %v6289_v36, %s9581_s7  ;;  %1294 = vrot.lane.b32.xlu1 %v6347_v17, %s9575_s28  ;;  %v1170_v3 = vadd.f32 1.4214138, %v1168_v44  ;;  %v1079_v59 = vadd.f32 -0.28449672, %v1077_v29  ;;  %v1189_v22 = vmul.f32 %v5092_v12, %v1179_v60  ;;  %v1196_v14 = vmul.f32 0.5, %v6174_v61 }
 0x16c   : > { %v1008_v55 = vadd.f32 1.0, %v1004_v21  ;;  %v1098_v27 = vmul.f32 %v1096_v31, %v1052_v57  ;;  %v1148_v21 = vsel %vm1146_vm7, 1.0, %v9567_v2  ;;  %v1375_v61 = vstv %s5918_s17  ;;  %s6557_s17 = sld [smem:[#allocation2 + $0x3e]] }
 0x16d   : > { %v1172_v8 = vmul.f32 %v1170_v3, %v6322_v38  ;;  %v1081_v16 = vmul.f32 %v1079_v59, %v6308_v50  ;;  %v1191_v15 = vsub.f32 1.0, %v1189_v22  ;;  %v1454_v12 = vstv %s5922_s15  ;;  %s9818_s15 = sld [smem:[#allocation75_spill]] }
 0x16e   : > { %v1010_v34 = vmul.f32 %v1008_v55, %v1006_v58  ;;  %v1102_v26 = vadd.f32 1.0, %v1098_v27  ;;  %v5096_v19 = vpop.eup %5095  ;;  %v1526_v58 = vstv %s5929_s23  ;;  %v1611_v55 = vstv %s5939_s18  ;;  %s6477_s18 = sld [smem:[#allocation2 + $0x3d]] }
 0x16f   : > { %v1174_v32 = vadd.f32 -0.28449672, %v1172_v8  ;;  %v1083_v0 = vadd.f32 0.2548296, %v1081_v16  ;;  %v1193_v18 = vmul.f32 %v1191_v15, %v1147_v43  ;;  %v1689_v29 = vstv %s5946_s20  ;;  %s6484_s20 = sld [smem:[#allocation2 + $0x5b]] }
 0x170   : > { %v6374_v7 = vsel %vm5909_vm12, %v1010_v34, 0.0  ;;  %v1104_v28 = vmul.f32 %v1102_v26, %v1100_v39  ;;  %v1761_v57 = vstv %s5953_s21  ;;  %v1845_v60 = vstv %s5957_s19  ;;  %s6490_s23 = sld [smem:[#allocation2 + $0x5e]] }
 0x171   : > { %1304 = vrot.lane.b32.xlu1 %v6374_v7, %s9566_s1  ;;  %v1176_v52 = vmul.f32 %v1174_v32, %v6322_v38  ;;  %v1085_v51 = vmul.f32 %v1083_v0, %v6308_v50  ;;  %v1197_v9 = vadd.f32 1.0, %v1193_v18  ;;  %v1923_v3 = vstv %s5967_s8  ;;  %s6515_s21 = sld [smem:[#allocation2 + $0x85]] }
 0x172   : > { %v6392_v47 = vsel %vm386_vm11, %v1104_v28, 0.0  ;;  %v1995_v34 = vstv %s5977_s22  ;;  %v2157_v27 = vstv %s5990_s30  ;;  %v2229_v59 = vstv %s6003_s0  ;;  %9714 = sst [smem:[#allocation135_spill]] %s6557_s17 }
 0x173   : > { %1334 = vrot.lane.b32.xlu0 %v6392_v47, %s9575_s28  ;;  %v1178_v53 = vadd.f32 0.2548296, %v1176_v52  ;;  %v1095_v62 = vmul.f32 %v5094_v23, %v1085_v51  ;;  %v1199_v50 = vmul.f32 %v1197_v9, %v1195_v54  ;;  %v9479_v22 = vstv %s6011_s10  ;;  %s6496_s10 = sld [smem:[#allocation2 + $0x61]] }
 0x174   : > { %9656 = sst [smem:[#allocation123_spill]] %s6477_s18  ;;  %v9478_v8 = vstv %s6015_s2  ;;  %v9480_v39 = vstv %s6022_s3  ;;  %v9482_v26 = vstv %s6035_s5  ;;  %v9484_v16 = vstv %s6051_s4 }
 0x175   : > { %1310 = vrot.lane.b32.xlu1 %v6347_v17, %s9572_s6  ;;  %v1180_v4 = vmul.f32 %v1178_v53, %v6322_v38  ;;  %v1097_v37 = vsub.f32 1.0, %v1095_v62  ;;  %v6416_v25 = vsel %vm5909_vm12, %v1199_v50, 0.0  ;;  %9659 = sst [smem:[#allocation124_spill]] %s6484_s20  ;;  %v9485_v15 = vstv %s6056_s9 }
 0x176   : > { %9664 = sst [smem:[#allocation125_spill]] %s6490_s23  ;;  %v9487_v32 = vstv %s6066_s14 }
 0x177   : > { %v1190_v40 = vmul.f32 %v5096_v19, %v1180_v4  ;;  %1344 = vrot.lane.b32.xlu0 %v6416_v25, %s9566_s1  ;;  %v1099_v38 = vmul.f32 %v1097_v37, %v1053_v33  ;;  %s6503_s23 = sld [smem:[#allocation2 + $0x7f]] }
 0x178   : > { %s6509_s9 = sld [smem:[#allocation2 + $0x82]] }
 0x179   : > { %1316 = vrot.lane.b32.xlu1 %v6374_v7, %s9577_s26  ;;  %v1192_v49 = vsub.f32 1.0, %v1190_v40  ;;  %v1103_v42 = vadd.f32 1.0, %v1099_v38  ;;  %9669 = sst [smem:[#allocation126_spill]] %s6496_s10 }
 0x17a   : > { %9683 = sst [smem:[#allocation129_spill]] %s6515_s21 }
 0x17b   : > { %v1194_v6 = vmul.f32 %v1192_v49, %v1148_v21  ;;  %1350 = vrot.lane.b32.xlu0 %v6392_v47, %s9572_s6  ;;  %v1105_v35 = vmul.f32 %v1103_v42, %v1101_v48  ;;  %s6528_s21 = sld [smem:[#allocation2 + $0x17]]  ;;  %v6542_v48 = vpop.permute.xlu0 %423  ;;  %v6552_v49 = vpop.permute.xlu1 %427 }
 0x17c   : > { %s6534_s3 = sld [smem:[#allocation2 + $0x1a]]  ;;  %9703 = vst [vmem:[#allocation26_spill] sm:$0xff] %v6542_v48  ;;  %9709 = vst [vmem:[#allocation29_spill] sm:$0xff] %v6552_v49 }
 0x17d   : > { %1326 = vrot.lane.b32.xlu1 %v6374_v7, %s9581_s7  ;;  %v1198_v1 = vadd.f32 1.0, %v1194_v6  ;;  %v6445_v10 = vsel %vm386_vm11, %v1105_v35, 0.0  ;;  %9674 = sst [smem:[#allocation127_spill]] %s6503_s23  ;;  %vm1446_vm11 = vcmask 1040384  }
 0x17e   : > { %9678 = sst [smem:[#allocation128_spill]] %s6509_s9 }
 0x17f   : > { %v1200_v44 = vmul.f32 %v1198_v1, %v1196_v14  ;;  %1356 = vrot.lane.b32.xlu0 %v6416_v25, %s9577_s26  ;;  %s6548_s10 = sld [smem:[#allocation2 + $0x3b]]  ;;  %v6583_v21 = vpop.permute.xlu0 %435 }
 0x180   : > { %s6569_s17 = sld [smem:[#allocation2 + $0x5f]]  ;;  %9733 = vst [vmem:[#allocation32_spill] sm:$0xff] %v6583_v21 }
 0x181   : > { %1336 = vrot.lane.b32.xlu1 %v6445_v10, %s9575_s28  ;;  %v6465_v31 = vsel %vm5909_vm12, %v1200_v44, 0.0  ;;  %s6470_s28 = sld [smem:[#allocation2 + $0x3a]]  ;;  %v6591_v44 = vpop.permute.xlu1 %431  ;;  %vm1597_vm12 = vcmask 1046528  }
 0x182   : > { %9693 = sst [smem:[#allocation131_spill]] %s6528_s21  ;;  %9739 = vst [vmem:[#allocation27_spill] sm:$0xff] %v6591_v44 }
 0x183   : > { %1366 = vrot.lane.b32.xlu0 %v6416_v25, %s9581_s7  ;;  %9696 = sst [smem:[#allocation132_spill]] %s6534_s3 }
 0x184   : > { %s6597_s5 = sld [smem:[#allocation2 + $0x86]] }
 0x185   : > { %1346 = vrot.lane.b32.xlu1 %v6465_v31, %s9566_s1  ;;  %9707 = sst [smem:[#allocation134_spill]] %s6548_s10 }
 0x186   : > { %9724 = sst [smem:[#allocation137_spill]] %s6569_s17 }
 0x187   : > { %9655 = sst [smem:[#allocation122_spill]] %s6470_s28 }
 0x188   : > { %s6613_s8 = sld [smem:[#allocation2 + $0x1e]] }
 0x189   : > { %1352 = vrot.lane.b32.xlu1 %v6445_v10, %s9572_s6  ;;  %s6589_s6 = sld [smem:[#allocation2 + $0x83]] }
 0x18a   : > { %9740 = sst [smem:[#allocation141_spill]] %s6597_s5 }
 0x18b   : > { %s9769_s5 = sld [smem:[#allocation46_spill]] }
 0x18c   : > { %s9772_s17 = sld [smem:[#allocation49_spill]] }
 0x18d   : > { %1358 = vrot.lane.b32.xlu1 %v6465_v31, %s9577_s26  ;;  %s6575_s26 = sld [smem:[#allocation2 + $0x62]] }
 0x18e   : > { %9750 = sst [smem:[#allocation143_spill]] %s6613_s8 }
 0x18f   : > { %9738 = sst [smem:[#allocation140_spill]] %s6589_s6 }
 0x190   : > { %s6648_s6 = sld [smem:[#allocation2 + $0x42]] }
 0x191   : > { %1368 = vrot.lane.b32.xlu1 %v6465_v31, %s9581_s7  ;;  %s6563_s7 = sld [smem:[#allocation2 + $0x5c]] }
 0x192   : > { %s6695_s8 = sld [smem:[#allocation2 + $0x63]] }
 0x193   : > { %9728 = sst [smem:[#allocation138_spill]] %s6575_s26 }
 0x194   : > { %s9771_s26 = sld [smem:[#allocation48_spill]] }
 0x195   : > { %s9774_s18 = sld [smem:[#allocation50_spill]] }
 0x196   : > { %9767 = sst [smem:[#allocation35_spill]] %s6648_s6 }
 0x197   : > { %9719 = sst [smem:[#allocation136_spill]] %s6563_s7 }
 0x198   : > { %9773 = sst [smem:[#allocation37_spill]] %s6695_s8 }
 0x199   : > { %s9775_s28 = sld [smem:[#allocation51_spill]] }
 0x19a   : > { %s9776_s20 = sld [smem:[#allocation52_spill]] }
 0x19b   : > { %s9777_s3 = sld [smem:[#allocation53_spill]] }
 0x19c   : > { %s9779_s2 = sld [smem:[#allocation54_spill]] }
 0x19d   : > { %v1217_v19 = vpop.permute.xlu0 %1216  ;;  %s9780_s4 = sld [smem:[#allocation55_spill]] }
 0x19e   : > { %v1206_v42 = vpop.permute.xlu1 %1205  ;;  %s9783_s9 = sld [smem:[#allocation57_spill]] }
 0x19f   : > { %v1212_v4 = vsel %vm1211_vm8, %v5926_v24, %v1206_v42  ;;  %s9784_s1 = sld [smem:[#allocation58_spill]] }
 0x1a0   : > { %v1376_v38 = vmul.f32 %v1375_v61, %v1212_v4  ;;  %v1455_v24 = vmul.f32 %v1454_v12, %v1212_v4  ;;  %v1527_v42 = vmul.f32 %v1526_v58, %v1212_v4  ;;  %v1612_v14 = vmul.f32 %v1611_v55, %v1212_v4  ;;  %s9788_s22 = sld [smem:[#allocation61_spill]] }
 0x1a1   : > { %v1223_v37 = vpop.permute.xlu0 %1222  ;;  %v1690_v1 = vmul.f32 %v1689_v29, %v1212_v4  ;;  %v1762_v62 = vmul.f32 %v1761_v57, %v1212_v4  ;;  %v1846_v33 = vmul.f32 %v1845_v60, %v1212_v4  ;;  %v1924_v35 = vmul.f32 %v1923_v3, %v1212_v4  ;;  %s9791_s6 = sld [smem:[#allocation62_spill]] }
 0x1a2   : > { %v1208_v50 = vpop.permute.xlu1 %1207  ;;  %v1996_v6 = vmul.f32 %v1995_v34, %v1212_v4  ;;  %v6664_v40 = vmul.f32 %v2079_v13, %v1212_v4  ;;  %v6668_v53 = vmul.f32 %v2157_v27, %v1212_v4  ;;  %v6674_v54 = vmul.f32 %v2229_v59, %v1212_v4  ;;  %s6761_s23 = sld [smem:[#allocation2 + $0x69]] }
 0x1a3   : > { %v1213_v9 = vsel %vm1211_vm8, %v5996_v41, %v1208_v50  ;;  %v1235_v23 = vsel %vm1234_vm9, %v1217_v19, %v1223_v37  ;;  %v9787_v44 = vstv %s9779_s2  ;;  %s9796_s19 = sld [smem:[#allocation65_spill]] }
 0x1a4   : > { %v6681_v18 = vmul.f32 %v1375_v61, %v1213_v9  ;;  %v6685_v0 = vmul.f32 %v1454_v12, %v1213_v9  ;;  %v6689_v41 = vmul.f32 %v1526_v58, %v1213_v9  ;;  %v6693_v50 = vmul.f32 %v1611_v55, %v1213_v9  ;;  %s9801_s7 = sld [smem:[#allocation66_spill]] }
 0x1a5   : > { %v1229_v4 = vpop.permute.xlu0 %1228  ;;  %v6699_v61 = vmul.f32 %v1689_v29, %v1213_v9  ;;  %v6703_v12 = vmul.f32 %v1761_v57, %v1213_v9  ;;  %v6707_v58 = vmul.f32 %v1845_v60, %v1213_v9  ;;  %v6711_v55 = vmul.f32 %v1923_v3, %v1213_v9  ;;  %s9802_s21 = sld [smem:[#allocation67_spill]] }
 0x1a6   : > { %v1219_v19 = vpop.permute.xlu1 %1218  ;;  %v6717_v37 = vmul.f32 %v1995_v34, %v1213_v9  ;;  %v6721_v29 = vmul.f32 %v2079_v13, %v1213_v9  ;;  %v6725_v57 = vmul.f32 %v2157_v27, %v1213_v9  ;;  %v1238_v60 = vsel %vm1237_vm10, %v1235_v23, %v1229_v4  ;;  %s9809_s8 = sld [smem:[#allocation70_spill]] }
 0x1a7   : > { %v1380_v3 = vmul.f32 %v9479_v22, %v1238_v60  ;;  %v1459_v52 = vmul.f32 %v9478_v8, %v1238_v60  ;;  %v1531_v51 = vmul.f32 %v9480_v39, %v1238_v60  ;;  %v1616_v43 = vmul.f32 %v9482_v26, %v1238_v60  ;;  %s9810_s30 = sld [smem:[#allocation71_spill]] }
 0x1a8   : > { %v6738_v34 = vmul.f32 %v2229_v59, %v1213_v9  ;;  %v1694_v13 = vmul.f32 %v9484_v16, %v1238_v60  ;;  %v1766_v28 = vmul.f32 %v9485_v15, %v1238_v60  ;;  %v1850_v27 = vmul.f32 %v9487_v32, %v1238_v60  ;;  %9795 = sst [smem:[#allocation39_spill]] %s6761_s23 }
 0x1a9   : > { %v1241_v23 = vpop.permute.xlu0 %1240  ;;  %v9782_v4 = vstv %s9777_s3  ;;  %v1382_v11 = vadd.f32 %v1380_v3, %v1376_v38  ;;  %v1461_v59 = vadd.f32 %v1459_v52, %v1455_v24  ;;  %v1533_v9 = vadd.f32 %v1531_v51, %v1527_v42  ;;  %s9811_s14 = sld [smem:[#allocation72_spill]] }
 0x1aa   : > { %v1928_v8 = vmul.f32 %v9782_v4, %v1238_v60  ;;  %v1225_v22 = vpop.permute.xlu1 %1224  ;;  %v1618_v16 = vadd.f32 %v1616_v43, %v1612_v14  ;;  %v1696_v15 = vadd.f32 %v1694_v13, %v1690_v1  ;;  %v1768_v21 = vadd.f32 %v1766_v28, %v1762_v62  ;;  %s9813_s10 = sld [smem:[#allocation73_spill]] }
 0x1ab   : > { %v1852_v32 = vadd.f32 %v1850_v27, %v1846_v33  ;;  %v2000_v49 = vmul.f32 %v9787_v44, %v1238_v60  ;;  %v9789_v4 = vstv %s9780_s4  ;;  %v9790_v39 = vstv %s9781_s27  ;;  %s9816_s0 = sld [smem:[#allocation74_spill]] }
 0x1ac   : > { %v2084_v48 = vmul.f32 %v9789_v4, %v1238_v60  ;;  %v2162_v26 = vmul.f32 %v9790_v39, %v1238_v60  ;;  %v9792_v38 = vstv %s9783_s9  ;;  %v1246_v43 = vsel %vm440_vm1, %v5935_v5, %v1241_v23 }
 0x1ad   : > { %v2234_v52 = vmul.f32 %v9792_v38, %v1238_v60  ;;  %v1251_v51 = vpop.permute.xlu0 %1250  ;;  %v1930_v28 = vadd.f32 %v1928_v8, %v1924_v35  ;;  %v1236_v62 = vsel %vm1234_vm9, %v1219_v19, %v1225_v22  ;;  %v9797_v44 = vstv %s9784_s1 }
 0x1ae   : > { %v1231_v33 = vpop.permute.xlu1 %1230  ;;  %v1386_v24 = vmul.f32 %v9797_v44, %v1246_v43  ;;  %v9798_v39 = vstv %s9785_s11  ;;  %v9799_v3 = vstv %s9786_s13  ;;  %v9800_v13 = vstv %s9788_s22 }
 0x1af   : > { %v1465_v42 = vmul.f32 %v9798_v39, %v1246_v43  ;;  %v1537_v60 = vmul.f32 %v9799_v3, %v1246_v43  ;;  %v1622_v27 = vmul.f32 %v9800_v13, %v1246_v43  ;;  %v2002_v5 = vadd.f32 %v2000_v49, %v1996_v6 }
 0x1b0   : > { %v9803_v23 = vstv %s9791_s6  ;;  %v9805_v35 = vstv %s9793_s24  ;;  %v9806_v22 = vstv %s9794_s25  ;;  %v2086_v38 = vadd.f32 %v2084_v48, %v6664_v40  ;;  %s9820_s25 = sld [smem:[#allocation77_spill]] }
 0x1b1   : > { %v1700_v8 = vmul.f32 %v9803_v23, %v1246_v43  ;;  %v1772_v4 = vmul.f32 %v9805_v35, %v1246_v43  ;;  %v1856_v19 = vmul.f32 %v9806_v22, %v1246_v43  ;;  %v2164_v44 = vadd.f32 %v2162_v26, %v6668_v53 }
 0x1b2   : > { %v2236_v39 = vadd.f32 %v2234_v52, %v6674_v54  ;;  %v9808_v3 = vstv %s9796_s19  ;;  %v1388_v14 = vadd.f32 %v1386_v24, %v1382_v11  ;;  %v1467_v13 = vadd.f32 %v1465_v42, %v1461_v59  ;;  %v1243_v23 = vpop.permute.xlu1 %1242  ;;  %v6791_v54 = vpop.permute.xlu0 %1260  ;;  %s9819_s19 = sld [smem:[#allocation76_spill]] }
 0x1b3   : > { %v1934_v1 = vmul.f32 %v9808_v3, %v1246_v43  ;;  %v1539_v49 = vadd.f32 %v1537_v60, %v1533_v9  ;;  %v1624_v6 = vadd.f32 %v1622_v27, %v1618_v16  ;;  %v1702_v35 = vadd.f32 %v1700_v8, %v1696_v15 }
 0x1b4   : > { %v9812_v22 = vstv %s9801_s7  ;;  %v9814_v48 = vstv %s9802_s21  ;;  %v9815_v26 = vstv %s9804_s16  ;;  %v1774_v11 = vadd.f32 %v1772_v4, %v1768_v21  ;;  %s9826_s16 = sld [smem:[#allocation79_spill]] }
 0x1b5   : > { %v2006_v40 = vmul.f32 %v9812_v22, %v1246_v43  ;;  %v2090_v2 = vmul.f32 %v9814_v48, %v1246_v43  ;;  %v2168_v53 = vmul.f32 %v9815_v26, %v1246_v43  ;;  %v1858_v59 = vadd.f32 %v1856_v19, %v1852_v32  ;;  %s9827_s21 = sld [smem:[#allocation80_spill]] }
 0x1b6   : > { %v9817_v52 = vstv %s9807_s12  ;;  %v1256_v16 = vsel %vm1211_vm8, %v6084_v56, %v1251_v51  ;;  %v1936_v15 = vadd.f32 %v1934_v1, %v1930_v28  ;;  %v1239_v24 = vsel %vm1237_vm10, %v1236_v62, %v1231_v33  ;;  %s9825_s12 = sld [smem:[#allocation78_spill]] }
 0x1b7   : > { %v2240_v9 = vmul.f32 %v9817_v52, %v1246_v43  ;;  %v6800_v42 = vsel %vm440_vm1, %v5963_v45, %v1243_v23  ;;  %v2047_v60 = vstv %s6761_s23  ;;  %v9821_v27 = vstv %s9809_s8  ;;  %s9828_s7 = sld [smem:[#allocation81_spill]] }
 0x1b8   : > { %v1392_v8 = vmul.f32 %v9821_v27, %v1256_v16  ;;  %v9822_v21 = vstv %s9810_s30  ;;  %v9823_v4 = vstv %s9811_s14  ;;  %v9824_v43 = vstv %s9813_s10  ;;  %s9933_s23 = sld [smem:[#allocation112_spill]] }
 0x1b9   : > { %v1471_v32 = vmul.f32 %v9822_v21, %v1256_v16  ;;  %v1543_v19 = vmul.f32 %v9823_v4, %v1256_v16  ;;  %v1628_v3 = vmul.f32 %v9824_v43, %v1256_v16  ;;  %v2008_v56 = vadd.f32 %v2006_v40, %v2002_v5 }
 0x1ba   : > { %v2092_v51 = vadd.f32 %v2090_v2, %v2086_v38  ;;  %v2170_v28 = vadd.f32 %v2168_v53, %v2164_v44  ;;  %v9829_v62 = vstv %s9816_s0  ;;  %v2242_v45 = vadd.f32 %v2240_v9, %v2236_v39  ;;  %v6827_v38 = vpop.permute.xlu0 %1266  ;;  %v1253_v44 = vpop.permute.xlu1 %1252 }
 0x1bb   : > { %v1706_v33 = vmul.f32 %v9829_v62, %v1256_v16  ;;  %v9830_v1 = vstv %s9818_s15  ;;  %v9831_v22 = vstv %s9819_s19  ;;  %v9832_v26 = vstv %s9820_s25 }
 0x1bc   : > { %v1778_v23 = vmul.f32 %v9830_v1, %v1256_v16  ;;  %v1862_v48 = vmul.f32 %v9831_v22, %v1256_v16  ;;  %v1940_v52 = vmul.f32 %v9832_v26, %v1256_v16  ;;  %v6819_v27 = vadd.f32 %v1392_v8, %v1388_v14 }
 0x1bd   : > { %v6821_v21 = vadd.f32 %v1471_v32, %v1467_v13  ;;  %v6823_v2 = vadd.f32 %v1543_v19, %v1539_v49  ;;  %v6825_v5 = vadd.f32 %v1628_v3, %v1624_v6  ;;  %v9833_v39 = vstv %s9825_s12 }
 0x1be   : > { %v2012_v40 = vmul.f32 %v9833_v39, %v1256_v16  ;;  %v9834_v53 = vstv %s9826_s16  ;;  %v9835_v4 = vstv %s9827_s21  ;;  %v9836_v14 = vstv %s9828_s7 }
 0x1bf   : > { %v2096_v9 = vmul.f32 %v9834_v53, %v1256_v16  ;;  %v2174_v43 = vmul.f32 %v9835_v4, %v1256_v16  ;;  %v2246_v13 = vmul.f32 %v9836_v14, %v1256_v16  ;;  %v6837_v8 = vadd.f32 %v1706_v33, %v1702_v35 }
 0x1c0   : > { %v9837_v49 = vstv %s9769_s5  ;;  %v9838_v32 = vstv %s9770_s29  ;;  %v9839_v3 = vstv %s9771_s26  ;;  %v6845_v1 = vadd.f32 %v1778_v23, %v1774_v11  ;;  %s9846_s5 = sld [smem:[#allocation64_spill]] }
 0x1c1   : > { %v1381_v6 = vmul.f32 %v9837_v49, %v1239_v24  ;;  %v1460_v19 = vmul.f32 %v9838_v32, %v1239_v24  ;;  %v1532_v62 = vmul.f32 %v9839_v3, %v1239_v24  ;;  %v6847_v22 = vadd.f32 %v1862_v48, %v1858_v59  ;;  %s9850_s29 = sld [smem:[#allocation65_spill]] }
 0x1c2   : > { %v6849_v26 = vadd.f32 %v1940_v52, %v1936_v15  ;;  %v9840_v39 = vstv %s9772_s17  ;;  %v6853_v16 = vadd.f32 %v2012_v40, %v2008_v56  ;;  %v6855_v35 = vadd.f32 %v2096_v9, %v2092_v51  ;;  %v6874_v9 = vpop.permute.xlu0 %1272  ;;  %s9857_s17 = sld [smem:[#allocation66_spill]] }
 0x1c3   : > { %v1617_v53 = vmul.f32 %v9840_v39, %v1239_v24  ;;  %v6857_v33 = vadd.f32 %v2174_v43, %v2170_v28  ;;  %v6859_v4 = vadd.f32 %v2246_v13, %v2242_v45  ;;  %v9841_v14 = vstv %s9774_s18  ;;  %v1263_v43 = vpop.permute.xlu1 %1262  ;;  %s9859_s26 = sld [smem:[#allocation67_spill]] }
 0x1c4   : > { %v1695_v11 = vmul.f32 %v9841_v14, %v1239_v24  ;;  %v9842_v23 = vstv %s9775_s28  ;;  %v9843_v48 = vstv %s9776_s20  ;;  %v9844_v52 = vstv %s9777_s3  ;;  %s9860_s18 = sld [smem:[#allocation68_spill]] }
 0x1c5   : > { %v1767_v59 = vmul.f32 %v9842_v23, %v1239_v24  ;;  %v1851_v15 = vmul.f32 %v9843_v48, %v1239_v24  ;;  %v1929_v49 = vmul.f32 %v9844_v52, %v1239_v24  ;;  %v1383_v56 = vadd.f32 %v1381_v6, %v6681_v18  ;;  %s9861_s28 = sld [smem:[#allocation69_spill]] }
 0x1c6   : > { %v1462_v51 = vadd.f32 %v1460_v19, %v6685_v0  ;;  %v1534_v28 = vadd.f32 %v1532_v62, %v6689_v41  ;;  %v9845_v45 = vstv %s9779_s2  ;;  %v1619_v13 = vadd.f32 %v1617_v53, %v6693_v50  ;;  %s9887_s20 = sld [smem:[#allocation89_spill]] }
 0x1c7   : > { %v2001_v40 = vmul.f32 %v9845_v45, %v1239_v24  ;;  %v9847_v32 = vstv %s9780_s4  ;;  %v9848_v39 = vstv %s9781_s27  ;;  %v9849_v6 = vstv %s9783_s9  ;;  %s9905_s3 = sld [smem:[#allocation97_spill]] }
 0x1c8   : > { %v2085_v3 = vmul.f32 %v9847_v32, %v1239_v24  ;;  %v2163_v18 = vmul.f32 %v9848_v39, %v1239_v24  ;;  %v2235_v14 = vmul.f32 %v9849_v6, %v1239_v24  ;;  %v1697_v0 = vadd.f32 %v1695_v11, %v6699_v61  ;;  %s9906_s2 = sld [smem:[#allocation98_spill]] }
 0x1c9   : > { %v1769_v41 = vadd.f32 %v1767_v59, %v6703_v12  ;;  %v1853_v19 = vadd.f32 %v1851_v15, %v6707_v58  ;;  %v1931_v62 = vadd.f32 %v1929_v49, %v6711_v55  ;;  %v9851_v23 = vstv %s9784_s1  ;;  %s9907_s4 = sld [smem:[#allocation99_spill]] }
 0x1ca   : > { %v1387_v48 = vmul.f32 %v9851_v23, %v6800_v42  ;;  %v9852_v50 = vstv %s9785_s11  ;;  %v9853_v52 = vstv %s9786_s13  ;;  %v9854_v24 = vstv %s9788_s22  ;;  %s9908_s27 = sld [smem:[#allocation100_spill]] }
 0x1cb   : > { %v1466_v53 = vmul.f32 %v9852_v50, %v6800_v42  ;;  %v1538_v45 = vmul.f32 %v9853_v52, %v6800_v42  ;;  %v1623_v32 = vmul.f32 %v9854_v24, %v6800_v42  ;;  %v2003_v61 = vadd.f32 %v2001_v40, %v6717_v37  ;;  %s9910_s9 = sld [smem:[#allocation101_spill]] }
 0x1cc   : > { %v9855_v12 = vstv %s9791_s6  ;;  %v9856_v58 = vstv %s9793_s24  ;;  %v9858_v59 = vstv %s9846_s5  ;;  %v2087_v49 = vadd.f32 %v2085_v3, %v6721_v29  ;;  %s9874_s24 = sld [smem:[#allocation94_spill]] }
 0x1cd   : > { %v1701_v11 = vmul.f32 %v9855_v12, %v6800_v42  ;;  %v1773_v55 = vmul.f32 %v9856_v58, %v6800_v42  ;;  %v1857_v15 = vmul.f32 %v9858_v59, %v6800_v42  ;;  %v2165_v39 = vadd.f32 %v2163_v18, %v6725_v57  ;;  %v1283_v12 = vpop.permute.xlu0 %1282  ;;  %v1269_v58 = vpop.permute.xlu1 %1268  ;;  %s9885_s6 = sld [smem:[#allocation88_spill]] }
 0x1ce   : > { %v2237_v6 = vadd.f32 %v2235_v14, %v6738_v34  ;;  %v9862_v37 = vstv %s9850_s29  ;;  %v1389_v23 = vadd.f32 %v1387_v48, %v1383_v56  ;;  %v1468_v50 = vadd.f32 %v1466_v53, %v1462_v51  ;;  %s9912_s1 = sld [smem:[#allocation102_spill]] }
 0x1cf   : > { %v1935_v40 = vmul.f32 %v9862_v37, %v6800_v42  ;;  %v1540_v52 = vadd.f32 %v1538_v45, %v1534_v28  ;;  %v1625_v24 = vadd.f32 %v1623_v32, %v1619_v13  ;;  %v1703_v59 = vadd.f32 %v1701_v11, %v1697_v0  ;;  %s9913_s11 = sld [smem:[#allocation103_spill]] }
 0x1d0   : > { %v1775_v29 = vadd.f32 %v1773_v55, %v1769_v41  ;;  %v1859_v3 = vadd.f32 %v1857_v15, %v1853_v19  ;;  %v9863_v57 = vstv %s9857_s17  ;;  %v9864_v18 = vstv %s9859_s26  ;;  %s9916_s13 = sld [smem:[#allocation104_spill]] }
 0x1d1   : > { %v2007_v34 = vmul.f32 %v9863_v57, %v6800_v42  ;;  %v2091_v56 = vmul.f32 %v9864_v18, %v6800_v42  ;;  %v9865_v51 = vstv %s9860_s18  ;;  %v9866_v13 = vstv %s9861_s28  ;;  %s9917_s22 = sld [smem:[#allocation105_spill]] }
 0x1d2   : > { %v2169_v28 = vmul.f32 %v9865_v51, %v6800_v42  ;;  %v2241_v14 = vmul.f32 %v9866_v13, %v6800_v42  ;;  %v1257_v0 = vsel %vm1211_vm8, %v6150_v46, %v1253_v44  ;;  %v1937_v41 = vadd.f32 %v1935_v40, %v1931_v62  ;;  %s9925_s5 = sld [smem:[#allocation106_spill]] }
 0x1d3   : > { %v1278_v19 = vsel %vm1234_vm9, %v6791_v54, %v6827_v38  ;;  %v6934_v48 = vsel %vm440_vm1, %v6045_v20, %v1283_v12  ;;  %v6937_v53 = vsel %vm1234_vm9, %v1263_v43, %v1269_v58  ;;  %v9867_v45 = vstv %s9809_s8  ;;  %s9882_s8 = sld [smem:[#allocation86_spill]] }
 0x1d4   : > { %v1393_v32 = vmul.f32 %v9867_v45, %v1257_v0  ;;  %v9868_v11 = vstv %s9810_s30  ;;  %v9869_v55 = vstv %s9811_s14  ;;  %v9870_v46 = vstv %s9813_s10  ;;  %s9876_s14 = sld [smem:[#allocation95_spill]] }
 0x1d5   : > { %v1472_v42 = vmul.f32 %v9868_v11, %v1257_v0  ;;  %v1544_v15 = vmul.f32 %v9869_v55, %v1257_v0  ;;  %v1629_v44 = vmul.f32 %v9870_v46, %v1257_v0  ;;  %v2009_v62 = vadd.f32 %v2007_v34, %v2003_v61  ;;  %s9877_s10 = sld [smem:[#allocation96_spill]] }
 0x1d6   : > { %v9871_v37 = vstv %s9816_s0  ;;  %v9872_v38 = vstv %s9818_s15  ;;  %v9873_v40 = vstv %s9819_s19  ;;  %v2093_v12 = vadd.f32 %v2091_v56, %v2087_v49  ;;  %s9878_s30 = sld [smem:[#allocation82_spill]] }
 0x1d7   : > { %v1707_v54 = vmul.f32 %v9871_v37, %v1257_v0  ;;  %v1779_v20 = vmul.f32 %v9872_v38, %v1257_v0  ;;  %v1863_v43 = vmul.f32 %v9873_v40, %v1257_v0  ;;  %v2171_v58 = vadd.f32 %v2169_v28, %v2165_v39  ;;  %s9879_s0 = sld [smem:[#allocation83_spill]] }
 0x1d8   : > { %v2243_v57 = vadd.f32 %v2241_v14, %v2237_v6  ;;  %v9875_v18 = vstv %s9820_s25  ;;  %v6955_v13 = vadd.f32 %v1393_v32, %v1389_v23  ;;  %v6957_v61 = vadd.f32 %v1472_v42, %v1468_v50  ;;  %s9880_s15 = sld [smem:[#allocation84_spill]] }
 0x1d9   : > { %v1941_v51 = vmul.f32 %v9875_v18, %v1257_v0  ;;  %v6959_v34 = vadd.f32 %v1544_v15, %v1540_v52  ;;  %v6961_v45 = vadd.f32 %v1629_v44, %v1625_v24  ;;  %s9881_s19 = sld [smem:[#allocation85_spill]]  ;;  %v6963_v49 = vadd.f32 %v1707_v54, %v1703_v59 }
 0x1da   : > { %v6965_v39 = vadd.f32 %v1779_v20, %v1775_v29  ;;  %s9883_s25 = sld [smem:[#allocation87_spill]]  ;;  %v6967_v6 = vadd.f32 %v1863_v43, %v1859_v3  ;;  %v9884_v23 = vstv %s9825_s12  ;;  %v9886_v50 = vstv %s9826_s16 }
 0x1db   : > { %v2013_v56 = vmul.f32 %v9884_v23, %v1257_v0  ;;  %v2097_v28 = vmul.f32 %v9886_v50, %v1257_v0  ;;  %v9888_v52 = vstv %s9827_s21  ;;  %v9889_v32 = vstv %s9828_s7  ;;  %s9899_s12 = sld [smem:[#allocation90_spill]] }
 0x1dc   : > { %v2175_v14 = vmul.f32 %v9888_v52, %v1257_v0  ;;  %v2247_v24 = vmul.f32 %v9889_v32, %v1257_v0  ;;  %v1280_v59 = vsel %vm1237_vm10, %v1278_v19, %v6874_v9  ;;  %v6979_v11 = vadd.f32 %v1941_v51, %v1937_v41  ;;  %s9901_s16 = sld [smem:[#allocation91_spill]] }
 0x1dd   : > { %v9890_v29 = vstv %s9874_s24  ;;  %v9891_v3 = vstv %s9876_s14  ;;  %v9892_v15 = vstv %s9877_s10  ;;  %v9893_v44 = vstv %s9878_s30  ;;  %s9903_s21 = sld [smem:[#allocation92_spill]] }
 0x1de   : > { %v1404_v42 = vmul.f32 %v9890_v29, %v6934_v48  ;;  %v1483_v55 = vmul.f32 %v9891_v3, %v6934_v48  ;;  %v1555_v46 = vmul.f32 %v9892_v15, %v6934_v48  ;;  %v1398_v37 = vmul.f32 %v9893_v44, %v1280_v59  ;;  %s9904_s7 = sld [smem:[#allocation93_spill]] }
 0x1df   : > { %v9894_v54 = vstv %s9879_s0  ;;  %v9895_v20 = vstv %s9880_s15  ;;  %v9896_v40 = vstv %s9881_s19  ;;  %v9897_v9 = vstv %s9882_s8  ;;  %s9926_s29 = sld [smem:[#allocation107_spill]] }
 0x1e0   : > { %v1477_v38 = vmul.f32 %v9894_v54, %v1280_v59  ;;  %v1549_v0 = vmul.f32 %v9895_v20, %v1280_v59  ;;  %v1634_v43 = vmul.f32 %v9896_v40, %v1280_v59  ;;  %v1712_v41 = vmul.f32 %v9897_v9, %v1280_v59  ;;  %s9927_s17 = sld [smem:[#allocation108_spill]] }
 0x1e1   : > { %v9898_v19 = vstv %s9883_s25  ;;  %v9900_v51 = vstv %s9885_s6  ;;  %v9902_v50 = vstv %s9887_s20  ;;  %v7006_v32 = vadd.f32 %v2013_v56, %v2009_v62  ;;  %v1293_v62 = vpop.permute.xlu0 %1292  ;;  %v1275_v56 = vpop.permute.xlu1 %1274  ;;  %s9929_s26 = sld [smem:[#allocation109_spill]] }
 0x1e2   : > { %v1784_v18 = vmul.f32 %v9898_v19, %v1280_v59  ;;  %v1868_v23 = vmul.f32 %v9900_v51, %v1280_v59  ;;  %v1946_v52 = vmul.f32 %v9902_v50, %v1280_v59  ;;  %v7008_v29 = vadd.f32 %v2097_v28, %v2093_v12  ;;  %s9931_s18 = sld [smem:[#allocation110_spill]] }
 0x1e3   : > { %v7010_v3 = vadd.f32 %v2175_v14, %v2171_v58  ;;  %v7012_v15 = vadd.f32 %v2247_v24, %v2243_v57  ;;  %v1400_v44 = vadd.f32 %v1398_v37, %v6819_v27  ;;  %v1479_v54 = vadd.f32 %v1477_v38, %v6821_v21  ;;  %s9932_s28 = sld [smem:[#allocation111_spill]] }
 0x1e4   : > { %v1551_v20 = vadd.f32 %v1549_v0, %v6823_v2  ;;  %v1636_v40 = vadd.f32 %v1634_v43, %v6825_v5  ;;  %v1714_v12 = vadd.f32 %v1712_v41, %v6837_v8  ;;  %v1786_v58 = vadd.f32 %v1784_v18, %v6845_v1 }
 0x1e5   : > { %v9909_v57 = vstv %s9899_s12  ;;  %v9911_v27 = vstv %s9901_s16  ;;  %v1870_v2 = vadd.f32 %v1868_v23, %v6847_v22  ;;  %v1948_v5 = vadd.f32 %v1946_v52, %v6849_v26 }
 0x1e6   : > { %v2018_v28 = vmul.f32 %v9909_v57, %v1280_v59  ;;  %v2102_v21 = vmul.f32 %v9911_v27, %v1280_v59  ;;  %v9914_v14 = vstv %s9903_s21  ;;  %v9915_v37 = vstv %s9904_s7  ;;  %v7061_v27 = vpop.permute.xlu0 %1302 }
 0x1e7   : > { %v2180_v24 = vmul.f32 %v9914_v14, %v1280_v59  ;;  %v2252_v38 = vmul.f32 %v9915_v37, %v1280_v59  ;;  %v1406_v8 = vadd.f32 %v1404_v42, %v1400_v44  ;;  %v1485_v0 = vadd.f32 %v1483_v55, %v1479_v54 }
 0x1e8   : > { %v1557_v1 = vadd.f32 %v1555_v46, %v1551_v20  ;;  %v9918_v43 = vstv %s9905_s3  ;;  %v2020_v41 = vadd.f32 %v2018_v28, %v6853_v16  ;;  %v9919_v19 = vstv %s9906_s2 }
 0x1e9   : > { %v1640_v9 = vmul.f32 %v9918_v43, %v6934_v48  ;;  %v1718_v18 = vmul.f32 %v9919_v19, %v6934_v48  ;;  %v9920_v22 = vstv %s9907_s4  ;;  %v9921_v51 = vstv %s9908_s27 }
 0x1ea   : > { %v1790_v26 = vmul.f32 %v9920_v22, %v6934_v48  ;;  %v1874_v23 = vmul.f32 %v9921_v51, %v6934_v48  ;;  %v2104_v59 = vadd.f32 %v2102_v21, %v6855_v35  ;;  %v9922_v42 = vstv %s9910_s9  ;;  %v1285_v21 = vpop.permute.xlu1 %1284  ;;  %s9943_s9 = sld [smem:[#allocation117_spill]] }
 0x1eb   : > { %v1952_v55 = vmul.f32 %v9922_v42, %v6934_v48  ;;  %v9923_v46 = vstv %s9912_s1  ;;  %v9924_v52 = vstv %s9913_s11  ;;  %v2182_v44 = vadd.f32 %v2180_v24, %v6857_v33  ;;  %s9934_s11 = sld [smem:[#allocation113_spill]] }
 0x1ec   : > { %v2024_v50 = vmul.f32 %v9923_v46, %v6934_v48  ;;  %v2108_v16 = vmul.f32 %v9924_v52, %v6934_v48  ;;  %v2254_v54 = vadd.f32 %v2252_v38, %v6859_v4  ;;  %v9928_v20 = vstv %s9916_s13  ;;  %s9940_s13 = sld [smem:[#allocation115_spill]] }
 0x1ed   : > { %v2186_v35 = vmul.f32 %v9928_v20, %v6934_v48  ;;  %v9930_v57 = vstv %s9917_s22  ;;  %v1642_v14 = vadd.f32 %v1640_v9, %v1636_v40  ;;  %v1720_v37 = vadd.f32 %v1718_v18, %v1714_v12  ;;  %s9939_s22 = sld [smem:[#allocation114_spill]] }
 0x1ee   : > { %v2258_v28 = vmul.f32 %v9930_v57, %v6934_v48  ;;  %v1792_v43 = vadd.f32 %v1790_v26, %v1786_v58  ;;  %v1876_v33 = vadd.f32 %v1874_v23, %v1870_v2  ;;  %v1954_v24 = vadd.f32 %v1952_v55, %v1948_v5  ;;  %s9941_s1 = sld [smem:[#allocation116_spill]] }
 0x1ef   : > { %v2026_v4 = vadd.f32 %v2024_v50, %v2020_v41  ;;  %v2110_v38 = vadd.f32 %v2108_v16, %v2104_v59  ;;  %v1298_v19 = vsel %vm1211_vm8, %v6289_v36, %v1293_v62  ;;  %v9935_v22 = vstv %s9925_s5 }
 0x1f0   : > { %v1410_v51 = vmul.f32 %v9935_v22, %v1298_v19  ;;  %v9936_v48 = vstv %s9926_s29  ;;  %v9937_v46 = vstv %s9927_s17  ;;  %v9938_v20 = vstv %s9929_s26 }
 0x1f1   : > { %v1489_v42 = vmul.f32 %v9936_v48, %v1298_v19  ;;  %v1561_v52 = vmul.f32 %v9937_v46, %v1298_v19  ;;  %v1646_v40 = vmul.f32 %v9938_v20, %v1298_v19  ;;  %v2188_v12 = vadd.f32 %v2186_v35, %v2182_v44  ;;  %v1295_v44 = vpop.permute.xlu1 %1294 }
 0x1f2   : > { %v2260_v58 = vadd.f32 %v2258_v28, %v2254_v54  ;;  %v9942_v2 = vstv %s9931_s18  ;;  %v1281_v9 = vsel %vm1237_vm10, %v6937_v53, %v1275_v56  ;;  %v9944_v36 = vstv %s9932_s28  ;;  %v7095_v56 = vpop.permute.xlu0 %1308 }
 0x1f3   : > { %v1724_v5 = vmul.f32 %v9942_v2, %v1298_v19  ;;  %v1796_v62 = vmul.f32 %v9944_v36, %v1298_v19  ;;  %v9945_v41 = vstv %s9933_s23  ;;  %v9946_v26 = vstv %s9934_s11 }
 0x1f4   : > { %v1880_v18 = vmul.f32 %v9945_v41, %v1298_v19  ;;  %v1958_v23 = vmul.f32 %v9946_v26, %v1298_v19  ;;  %v7085_v59 = vsel %vm440_vm1, %v6124_v63, %v1285_v21  ;;  %v7087_v55 = vadd.f32 %v1410_v51, %v1406_v8 }
 0x1f5   : > { %v7089_v50 = vadd.f32 %v1489_v42, %v1485_v0  ;;  %v7091_v16 = vadd.f32 %v1561_v52, %v1557_v1  ;;  %v7093_v53 = vadd.f32 %v1646_v40, %v1642_v14  ;;  %v9947_v54 = vstv %s9939_s22 }
 0x1f6   : > { %v2030_v35 = vmul.f32 %v9947_v54, %v1298_v19  ;;  %v9948_v57 = vstv %s9940_s13  ;;  %v9949_v22 = vstv %s9941_s1  ;;  %v9950_v8 = vstv %s9943_s9 }
 0x1f7   : > { %v2114_v28 = vmul.f32 %v9948_v57, %v1298_v19  ;;  %v2192_v63 = vmul.f32 %v9949_v22, %v1298_v19  ;;  %v2264_v0 = vmul.f32 %v9950_v8, %v1298_v19  ;;  %v7105_v21 = vadd.f32 %v1724_v5, %v1720_v37  ;;  %v7142_v57 = vpop.permute.xlu0 %1314 }
 0x1f8   : > { %v9951_v1 = vstv %s9878_s30  ;;  %v9952_v51 = vstv %s9879_s0  ;;  %v9953_v42 = vstv %s9880_s15  ;;  %v7113_v52 = vadd.f32 %v1796_v62, %v1792_v43  ;;  %s9963_s30 = sld [smem:[#allocation101_spill]] }
 0x1f9   : > { %v1399_v14 = vmul.f32 %v9951_v1, %v1281_v9  ;;  %v1478_v48 = vmul.f32 %v9952_v51, %v1281_v9  ;;  %v1550_v46 = vmul.f32 %v9953_v42, %v1281_v9  ;;  %v7115_v20 = vadd.f32 %v1880_v18, %v1876_v33  ;;  %s9970_s0 = sld [smem:[#allocation102_spill]] }
 0x1fa   : > { %v7117_v40 = vadd.f32 %v1958_v23, %v1954_v24  ;;  %v9954_v2 = vstv %s9881_s19  ;;  %v7121_v19 = vadd.f32 %v2030_v35, %v2026_v4  ;;  %v7123_v37 = vadd.f32 %v2114_v28, %v2110_v38  ;;  %v1305_v28 = vpop.permute.xlu1 %1304  ;;  %s9987_s15 = sld [smem:[#allocation130_spill]] }
 0x1fb   : > { %v1635_v36 = vmul.f32 %v9954_v2, %v1281_v9  ;;  %v7125_v5 = vadd.f32 %v2192_v63, %v2188_v12  ;;  %v7127_v41 = vadd.f32 %v2264_v0, %v2260_v58  ;;  %v9955_v26 = vstv %s9882_s8  ;;  %s9989_s19 = sld [smem:[#allocation131_spill]] }
 0x1fc   : > { %v1713_v43 = vmul.f32 %v9955_v26, %v1281_v9  ;;  %v9956_v62 = vstv %s9883_s25  ;;  %v9957_v18 = vstv %s9885_s6  ;;  %v9958_v23 = vstv %s9887_s20  ;;  %s9990_s8 = sld [smem:[#allocation132_spill]] }
 0x1fd   : > { %v1785_v33 = vmul.f32 %v9956_v62, %v1281_v9  ;;  %v1869_v24 = vmul.f32 %v9957_v18, %v1281_v9  ;;  %v1947_v54 = vmul.f32 %v9958_v23, %v1281_v9  ;;  %v1401_v4 = vadd.f32 %v1399_v14, %v6955_v13  ;;  %s9991_s25 = sld [smem:[#allocation118_spill]] }
 0x1fe   : > { %v1480_v38 = vadd.f32 %v1478_v48, %v6957_v61  ;;  %v1552_v12 = vadd.f32 %v1550_v46, %v6959_v34  ;;  %v9959_v58 = vstv %s9899_s12  ;;  %v1637_v22 = vadd.f32 %v1635_v36, %v6961_v45  ;;  %s9992_s6 = sld [smem:[#allocation119_spill]] }
 0x1ff   : > { %v2019_v35 = vmul.f32 %v9959_v58, %v1281_v9  ;;  %v9960_v63 = vstv %s9901_s16  ;;  %v9961_v0 = vstv %s9903_s21  ;;  %v9962_v1 = vstv %s9904_s7  ;;  %s9993_s20 = sld [smem:[#allocation120_spill]] }
 0x200   : > { %v2103_v8 = vmul.f32 %v9960_v63, %v1281_v9  ;;  %v2181_v13 = vmul.f32 %v9961_v0, %v1281_v9  ;;  %v2253_v14 = vmul.f32 %v9962_v1, %v1281_v9  ;;  %v1715_v61 = vadd.f32 %v1713_v43, %v6963_v49  ;;  %s9995_s12 = sld [smem:[#allocation122_spill]] }
 0x201   : > { %v1787_v34 = vadd.f32 %v1785_v33, %v6965_v39  ;;  %v1871_v51 = vadd.f32 %v1869_v24, %v6967_v6  ;;  %v1949_v48 = vadd.f32 %v1947_v54, %v6979_v11  ;;  %v9964_v42 = vstv %s9874_s24  ;;  %s9972_s24 = sld [smem:[#allocation103_spill]] }
 0x202   : > { %v1405_v46 = vmul.f32 %v9964_v42, %v7085_v59  ;;  %v9965_v45 = vstv %s9876_s14  ;;  %v9966_v36 = vstv %s9877_s10  ;;  %v9967_v9 = vstv %s9905_s3  ;;  %s9973_s14 = sld [smem:[#allocation104_spill]]  ;;  %v1325_v42 = vpop.permute.xlu0 %1324 }
 0x203   : > { %v1484_v2 = vmul.f32 %v9965_v45, %v7085_v59  ;;  %v1556_v26 = vmul.f32 %v9966_v36, %v7085_v59  ;;  %v1641_v62 = vmul.f32 %v9967_v9, %v7085_v59  ;;  %v2021_v49 = vadd.f32 %v2019_v35, %v7006_v32  ;;  %s9974_s10 = sld [smem:[#allocation105_spill]]  ;;  %v1311_v45 = vpop.permute.xlu1 %1310 }
 0x204   : > { %v9968_v39 = vstv %s9906_s2  ;;  %v9969_v6 = vstv %s9907_s4  ;;  %v9971_v33 = vstv %s9908_s27  ;;  %v2105_v24 = vadd.f32 %v2103_v8, %v7008_v29  ;;  %s9997_s16 = sld [smem:[#allocation123_spill]] }
 0x205   : > { %v1719_v43 = vmul.f32 %v9968_v39, %v7085_v59  ;;  %v1791_v11 = vmul.f32 %v9969_v6, %v7085_v59  ;;  %v1875_v18 = vmul.f32 %v9971_v33, %v7085_v59  ;;  %v2183_v23 = vadd.f32 %v2181_v13, %v7010_v3  ;;  %s9999_s21 = sld [smem:[#allocation124_spill]] }
 0x206   : > { %v2255_v54 = vadd.f32 %v2253_v14, %v7012_v15  ;;  %v9975_v32 = vstv %s9963_s30  ;;  %v1407_v35 = vadd.f32 %v1405_v46, %v1401_v4  ;;  %v1486_v63 = vadd.f32 %v1484_v2, %v1480_v38  ;;  %s10001_s7 = sld [smem:[#allocation125_spill]] }
 0x207   : > { %v1953_v58 = vmul.f32 %v9975_v32, %v7085_v59  ;;  %v1558_v0 = vadd.f32 %v1556_v26, %v1552_v12  ;;  %v1643_v1 = vadd.f32 %v1641_v62, %v1637_v22  ;;  %v1721_v36 = vadd.f32 %v1719_v43, %v1715_v61  ;;  %s10012_s3 = sld [smem:[#allocation126_spill]] }
 0x208   : > { %v1793_v29 = vadd.f32 %v1791_v11, %v1787_v34  ;;  %v1877_v8 = vadd.f32 %v1875_v18, %v1871_v51  ;;  %v9976_v3 = vstv %s9970_s0  ;;  %v9977_v13 = vstv %s9972_s24  ;;  %s10015_s2 = sld [smem:[#allocation127_spill]] }
 0x209   : > { %v2025_v15 = vmul.f32 %v9976_v3, %v7085_v59  ;;  %v2109_v4 = vmul.f32 %v9977_v13, %v7085_v59  ;;  %v9978_v38 = vstv %s9973_s14  ;;  %v9979_v22 = vstv %s9974_s10  ;;  %s10016_s4 = sld [smem:[#allocation128_spill]] }
 0x20a   : > { %v2187_v12 = vmul.f32 %v9978_v38, %v7085_v59  ;;  %v2259_v14 = vmul.f32 %v9979_v22, %v7085_v59  ;;  %v1299_v61 = vsel %vm1211_vm8, %v6374_v7, %v1295_v44  ;;  %v1955_v34 = vadd.f32 %v1953_v58, %v1949_v48  ;;  %s10017_s27 = sld [smem:[#allocation129_spill]] }
 0x20b   : > { %v1320_v51 = vsel %vm1234_vm9, %v7061_v27, %v7095_v56  ;;  %v7202_v46 = vsel %vm440_vm1, %v6198_v30, %v1325_v42  ;;  %v7205_v2 = vsel %vm1234_vm9, %v1305_v28, %v1311_v45  ;;  %v9980_v26 = vstv %s9925_s5  ;;  %s7293_s5 = sld [smem:[#allocation2 + $0x8a]] }
 0x20c   : > { %v1411_v9 = vmul.f32 %v9980_v26, %v1299_v61  ;;  %v9981_v62 = vstv %s9926_s29  ;;  %v9982_v39 = vstv %s9927_s17  ;;  %v9983_v7 = vstv %s9929_s26  ;;  %s10023_s29 = sld [smem:[#allocation137_spill]] }
 0x20d   : > { %v1490_v59 = vmul.f32 %v9981_v62, %v1299_v61  ;;  %v1562_v43 = vmul.f32 %v9982_v39, %v1299_v61  ;;  %v1647_v44 = vmul.f32 %v9983_v7, %v1299_v61  ;;  %v2027_v48 = vadd.f32 %v2025_v15, %v2021_v49  ;;  %s10025_s17 = sld [smem:[#allocation138_spill]] }
 0x20e   : > { %v9984_v6 = vstv %s9931_s18  ;;  %v9985_v56 = vstv %s9932_s28  ;;  %v9986_v11 = vstv %s9933_s23  ;;  %v2111_v33 = vadd.f32 %v2109_v4, %v2105_v24  ;;  %s9994_s23 = sld [smem:[#allocation121_spill]] }
 0x20f   : > { %v1725_v27 = vmul.f32 %v9984_v6, %v1299_v61  ;;  %v1797_v30 = vmul.f32 %v9985_v56, %v1299_v61  ;;  %v1881_v28 = vmul.f32 %v9986_v11, %v1299_v61  ;;  %v2189_v18 = vadd.f32 %v2187_v12, %v2183_v23  ;;  %s10027_s26 = sld [smem:[#allocation139_spill]] }
 0x210   : > { %v2261_v32 = vadd.f32 %v2259_v14, %v2255_v54  ;;  %v9988_v58 = vstv %s9934_s11  ;;  %v7223_v45 = vadd.f32 %v1411_v9, %v1407_v35  ;;  %v7225_v49 = vadd.f32 %v1490_v59, %v1486_v63  ;;  %s10019_s11 = sld [smem:[#allocation134_spill]] }
 0x211   : > { %v1959_v42 = vmul.f32 %v9988_v58, %v1299_v61  ;;  %v7227_v3 = vadd.f32 %v1562_v43, %v1558_v0  ;;  %v7229_v15 = vadd.f32 %v1647_v44, %v1643_v1  ;;  %v7231_v24 = vadd.f32 %v1725_v27, %v1721_v36  ;;  %s10029_s18 = sld [smem:[#allocation140_spill]] }
 0x212   : > { %v7233_v23 = vadd.f32 %v1797_v30, %v1793_v29  ;;  %v7235_v54 = vadd.f32 %v1881_v28, %v1877_v8  ;;  %v9996_v13 = vstv %s9939_s22  ;;  %v9998_v4 = vstv %s9940_s13  ;;  %s10021_s13 = sld [smem:[#allocation135_spill]] }
 0x213   : > { %v2031_v35 = vmul.f32 %v9996_v13, %v1299_v61  ;;  %v2115_v63 = vmul.f32 %v9998_v4, %v1299_v61  ;;  %v10000_v38 = vstv %s9941_s1  ;;  %v10002_v12 = vstv %s9943_s9  ;;  %s10018_s9 = sld [smem:[#allocation133_spill]] }
 0x214   : > { %v2193_v0 = vmul.f32 %v10000_v38, %v1299_v61  ;;  %v2265_v1 = vmul.f32 %v10002_v12, %v1299_v61  ;;  %v1322_v36 = vsel %vm1237_vm10, %v1320_v51, %v7142_v57  ;;  %v7247_v22 = vadd.f32 %v1959_v42, %v1955_v34  ;;  %v1335_v57 = vpop.permute.xlu0 %1334  ;;  %s7286_s1 = sld [smem:[#allocation2 + $0x87]] }
 0x215   : > { %v10003_v29 = vstv %s9987_s15  ;;  %v10004_v14 = vstv %s9989_s19  ;;  %v10005_v9 = vstv %s9990_s8  ;;  %v10006_v59 = vstv %s9991_s25  ;;  %s10022_s22 = sld [smem:[#allocation136_spill]] }
 0x216   : > { %v1422_v8 = vmul.f32 %v10003_v29, %v7202_v46  ;;  %v1501_v26 = vmul.f32 %v10004_v14, %v7202_v46  ;;  %v1573_v62 = vmul.f32 %v10005_v9, %v7202_v46  ;;  %v1416_v39 = vmul.f32 %v10006_v59, %v1322_v36  ;;  %s10030_s28 = sld [smem:[#allocation141_spill]] }
 0x217   : > { %v10007_v43 = vstv %s9992_s6  ;;  %v10008_v44 = vstv %s9993_s20  ;;  %v10009_v6 = vstv %s9994_s23  ;;  %v10010_v34 = vstv %s9995_s12  ;;  %s7305_s30 = sld [smem:[#allocation2 + $0x8d]] }
 0x218   : > { %v1495_v7 = vmul.f32 %v10007_v43, %v1322_v36  ;;  %v1567_v61 = vmul.f32 %v10008_v44, %v1322_v36  ;;  %v1652_v27 = vmul.f32 %v10009_v6, %v1322_v36  ;;  %v1730_v51 = vmul.f32 %v10010_v34, %v1322_v36  ;;  %s10040_s0 = sld [smem:[#allocation142_spill]] }
 0x219   : > { %v10011_v56 = vstv %s9997_s16  ;;  %v10013_v11 = vstv %s9999_s21  ;;  %v10014_v58 = vstv %s10001_s7  ;;  %v7274_v13 = vadd.f32 %v2031_v35, %v2027_v48  ;;  %s10041_s24 = sld [smem:[#allocation143_spill]] }
 0x21a   : > { %v1802_v30 = vmul.f32 %v10011_v56, %v1322_v36  ;;  %v1886_v28 = vmul.f32 %v10013_v11, %v1322_v36  ;;  %v1964_v42 = vmul.f32 %v10014_v58, %v1322_v36  ;;  %v7276_v4 = vadd.f32 %v2115_v63, %v2111_v33  ;;  %s10042_s14 = sld [smem:[#allocation144_spill]] }
 0x21b   : > { %v7278_v38 = vadd.f32 %v2193_v0, %v2189_v18  ;;  %v7280_v12 = vadd.f32 %v2265_v1, %v2261_v32  ;;  %v1418_v29 = vadd.f32 %v1416_v39, %v7087_v55  ;;  %v1497_v14 = vadd.f32 %v1495_v7, %v7089_v50  ;;  %v1317_v0 = vpop.permute.xlu1 %1316  ;;  %s10043_s10 = sld [smem:[#allocation34_spill]] }
 0x21c   : > { %v1569_v9 = vadd.f32 %v1567_v61, %v7091_v16  ;;  %v1654_v59 = vadd.f32 %v1652_v27, %v7093_v53  ;;  %v1732_v48 = vadd.f32 %v1730_v51, %v7105_v21  ;;  %v1804_v33 = vadd.f32 %v1802_v30, %v7113_v52 }
 0x21d   : > { %v1888_v18 = vadd.f32 %v1886_v28, %v7115_v20  ;;  %v10020_v32 = vstv %s10012_s3  ;;  %v1966_v55 = vadd.f32 %v1964_v42, %v7117_v40  ;;  %v10024_v50 = vstv %s10015_s2  ;;  %v1345_v40 = vpop.permute.xlu0 %1344 }
 0x21e   : > { %v2036_v35 = vmul.f32 %v10020_v32, %v1322_v36  ;;  %v2120_v16 = vmul.f32 %v10024_v50, %v1322_v36  ;;  %v10026_v53 = vstv %s10016_s4  ;;  %v10028_v63 = vstv %s10017_s27 }
 0x21f   : > { %v2198_v21 = vmul.f32 %v10026_v53, %v1322_v36  ;;  %v2270_v52 = vmul.f32 %v10028_v63, %v1322_v36  ;;  %v1424_v20 = vadd.f32 %v1422_v8, %v1418_v29  ;;  %v1503_v1 = vadd.f32 %v1501_v26, %v1497_v14 }
 0x220   : > { %v1575_v39 = vadd.f32 %v1573_v62, %v1569_v9  ;;  %v10031_v43 = vstv %s10018_s9  ;;  %v2038_v44 = vadd.f32 %v2036_v35, %v7121_v19  ;;  %v10032_v61 = vstv %s10019_s11 }
 0x221   : > { %v1658_v7 = vmul.f32 %v10031_v43, %v7202_v46  ;;  %v1736_v6 = vmul.f32 %v10032_v61, %v7202_v46  ;;  %v10033_v27 = vstv %s10021_s13  ;;  %v10034_v36 = vstv %s10022_s22 }
 0x222   : > { %v1808_v34 = vmul.f32 %v10033_v27, %v7202_v46  ;;  %v1892_v8 = vmul.f32 %v10034_v36, %v7202_v46  ;;  %v10035_v26 = vstv %s10023_s29  ;;  %v10036_v51 = vstv %s10025_s17  ;;  %s10046_s17 = sld [smem:[#allocation37_spill]] }
 0x223   : > { %v1970_v62 = vmul.f32 %v10035_v26, %v7202_v46  ;;  %v2042_v56 = vmul.f32 %v10036_v51, %v7202_v46  ;;  %v10037_v30 = vstv %s10027_s26  ;;  %v10038_v19 = vstv %s10029_s18  ;;  %s10044_s18 = sld [smem:[#allocation35_spill]] }
 0x224   : > { %v2126_v11 = vmul.f32 %v10037_v30, %v7202_v46  ;;  %v2204_v28 = vmul.f32 %v10038_v19, %v7202_v46  ;;  %v2122_v58 = vadd.f32 %v2120_v16, %v7123_v37  ;;  %v2200_v42 = vadd.f32 %v2198_v21, %v7125_v5  ;;  %s10045_s26 = sld [smem:[#allocation36_spill]] }
 0x225   : > { %v2272_v29 = vadd.f32 %v2270_v52, %v7127_v41  ;;  %v10039_v14 = vstv %s10030_s28  ;;  %v1660_v32 = vadd.f32 %v1658_v7, %v1654_v59  ;;  %v1738_v35 = vadd.f32 %v1736_v6, %v1732_v48  ;;  %v1327_v41 = vpop.permute.xlu1 %1326  ;;  %s10047_s29 = sld [smem:[#allocation38_spill]]  ;;  %v1351_v48 = vpop.permute.xlu0 %1350 }
 0x226   : > { %v2276_v9 = vmul.f32 %v10039_v14, %v7202_v46  ;;  %v1810_v50 = vadd.f32 %v1808_v34, %v1804_v33  ;;  %v1894_v53 = vadd.f32 %v1892_v8, %v1888_v18  ;;  %v1972_v63 = vadd.f32 %v1970_v62, %v1966_v55  ;;  %s7577_s28 = sld [smem:[#allocation2 + $0x6b]] }
 0x227   : > { %v2044_v43 = vadd.f32 %v2042_v56, %v2038_v44  ;;  %v2128_v37 = vadd.f32 %v2126_v11, %v2122_v58  ;;  %v2206_v5 = vadd.f32 %v2204_v28, %v2200_v42  ;;  %v2131_v21 = vstv %s7286_s1  ;;  %s7552_s1 = sld [smem:[#allocation2 + $0x47]] }
 0x228   : > { %v2278_v16 = vadd.f32 %v2276_v9, %v2272_v29  ;;  %v2209_v46 = vstv %s7293_s5  ;;  %v1340_v59 = vsel %vm1211_vm8, %v6416_v25, %v1335_v57  ;;  %v10048_v52 = vstv %s10040_s0  ;;  %s7560_s5 = sld [smem:[#allocation2 + $0x65]] }
 0x229   : > { %v1428_v33 = vmul.f32 %v10048_v52, %v1340_v59  ;;  %v10049_v7 = vstv %s10041_s24  ;;  %v10051_v55 = vstv %s10042_s14  ;;  %v10052_v61 = vstv %s10043_s10 }
 0x22a   : > { %v1507_v18 = vmul.f32 %v10049_v7, %v1340_v59  ;;  %v1579_v44 = vmul.f32 %v10051_v55, %v1340_v59  ;;  %v1664_v6 = vmul.f32 %v10052_v61, %v1340_v59  ;;  %v2281_v27 = vstv %s7305_s30  ;;  %s7587_s30 = sld [smem:[#allocation2 + $0x89]] }
 0x22b   : > { %v10053_v34 = vstv %s10044_s18  ;;  %v1323_v25 = vsel %vm1237_vm10, %v7205_v2, %v1317_v0  ;;  %v7354_v57 = vsel %vm440_vm1, %v6347_v17, %v1327_v41  ;;  %v10054_v8 = vstv %s10045_s26 }
 0x22c   : > { %v1742_v36 = vmul.f32 %v10053_v34, %v1340_v59  ;;  %v1814_v26 = vmul.f32 %v10054_v8, %v1340_v59  ;;  %v10055_v62 = vstv %s10046_s17  ;;  %v10056_v56 = vstv %s10047_s29 }
 0x22d   : > { %v1898_v51 = vmul.f32 %v10055_v62, %v1340_v59  ;;  %v1976_v30 = vmul.f32 %v10056_v56, %v1340_v59  ;;  %v7363_v11 = vsel %vm1234_vm9, %v1345_v40, %v1351_v48  ;;  %v7365_v19 = vadd.f32 %v1428_v33, %v1424_v20 }
 0x22e   : > { %v7367_v28 = vadd.f32 %v1507_v18, %v1503_v1  ;;  %v7369_v2 = vadd.f32 %v1579_v44, %v1575_v39  ;;  %v7371_v0 = vadd.f32 %v1664_v6, %v1660_v32  ;;  %v2048_v17 = vmul.f32 %v2047_v60, %v1340_v59 }
 0x22f   : > { %v2132_v58 = vmul.f32 %v2131_v21, %v1340_v59  ;;  %v2210_v42 = vmul.f32 %v2209_v46, %v1340_v59  ;;  %v2282_v40 = vmul.f32 %v2281_v27, %v1340_v59  ;;  %v7381_v20 = vadd.f32 %v1742_v36, %v1738_v35 }
 0x230   : > { %v10057_v1 = vstv %s9991_s25  ;;  %v10058_v39 = vstv %s9992_s6  ;;  %v10059_v9 = vstv %s9993_s20  ;;  %v7389_v41 = vadd.f32 %v1814_v26, %v1810_v50  ;;  %s7413_s25 = sld [smem:[#allocation2 + $0x1c]] }
 0x231   : > { %v1417_v29 = vmul.f32 %v10057_v1, %v1323_v25  ;;  %v1496_v14 = vmul.f32 %v10058_v39, %v1323_v25  ;;  %v1568_v32 = vmul.f32 %v10059_v9, %v1323_v25  ;;  %v7391_v48 = vadd.f32 %v1898_v51, %v1894_v53  ;;  %s7420_s6 = sld [smem:[#allocation2 + $0x1f]] }
 0x232   : > { %v7393_v52 = vadd.f32 %v1976_v30, %v1972_v63  ;;  %v10060_v33 = vstv %s9994_s23  ;;  %v7397_v59 = vadd.f32 %v2048_v17, %v2044_v43  ;;  %v7399_v35 = vadd.f32 %v2132_v58, %v2128_v37  ;;  %s7429_s20 = sld [smem:[#allocation2 + $0x22]] }
 0x233   : > { %v1653_v7 = vmul.f32 %v10060_v33, %v1323_v25  ;;  %v7401_v18 = vadd.f32 %v2210_v42, %v2206_v5  ;;  %v7403_v55 = vadd.f32 %v2282_v40, %v2278_v16  ;;  %v10061_v50 = vstv %s9995_s12  ;;  %s10069_s23 = sld [smem:[#allocation137_spill]] }
 0x234   : > { %v1731_v44 = vmul.f32 %v10061_v50, %v1323_v25  ;;  %v10062_v61 = vstv %s9997_s16  ;;  %v10063_v6 = vstv %s9999_s21  ;;  %v10064_v34 = vstv %s10001_s7  ;;  %s7435_s12 = sld [smem:[#allocation2 + $0x40]] }
 0x235   : > { %v1803_v53 = vmul.f32 %v10062_v61, %v1323_v25  ;;  %v1887_v63 = vmul.f32 %v10063_v6, %v1323_v25  ;;  %v1965_v36 = vmul.f32 %v10064_v34, %v1323_v25  ;;  %v1419_v43 = vadd.f32 %v1417_v29, %v7223_v45  ;;  %s7449_s16 = sld [smem:[#allocation2 + $0x43]]  ;;  %v1337_v6 = vpop.permute.xlu1 %1336 }
 0x236   : > { %v1498_v37 = vadd.f32 %v1496_v14, %v7225_v49  ;;  %v1570_v5 = vadd.f32 %v1568_v32, %v7227_v3  ;;  %v10065_v16 = vstv %s10012_s3  ;;  %v1655_v26 = vadd.f32 %v1653_v7, %v7229_v15  ;;  %s10079_s21 = sld [smem:[#allocation140_spill]] }
 0x237   : > { %v2037_v8 = vmul.f32 %v10065_v16, %v1323_v25  ;;  %v10066_v62 = vstv %s10015_s2  ;;  %v10067_v56 = vstv %s10016_s4  ;;  %v10068_v45 = vstv %s10017_s27  ;;  %s10081_s7 = sld [smem:[#allocation141_spill]] }
 0x238   : > { %v2121_v51 = vmul.f32 %v10066_v62, %v1323_v25  ;;  %v2199_v30 = vmul.f32 %v10067_v56, %v1323_v25  ;;  %v2271_v17 = vmul.f32 %v10068_v45, %v1323_v25  ;;  %v1733_v49 = vadd.f32 %v1731_v44, %v7231_v24  ;;  %s7469_s3 = sld [smem:[#allocation2 + $0x64]] }
 0x239   : > { %v1805_v3 = vadd.f32 %v1803_v53, %v7233_v23  ;;  %v1889_v58 = vadd.f32 %v1887_v63, %v7235_v54  ;;  %v1967_v15 = vadd.f32 %v1965_v36, %v7247_v22  ;;  %v10070_v42 = vstv %s9987_s15  ;;  %s10077_s15 = sld [smem:[#allocation138_spill]] }
 0x23a   : > { %v1423_v40 = vmul.f32 %v10070_v42, %v7354_v57  ;;  %v10071_v1 = vstv %s9989_s19  ;;  %v10072_v25 = vstv %s9990_s8  ;;  %v10073_v24 = vstv %s10018_s9  ;;  %s7461_s19 = sld [smem:[#allocation2 + $0x46]] }
 0x23b   : > { %v1502_v29 = vmul.f32 %v10071_v1, %v7354_v57  ;;  %v1574_v39 = vmul.f32 %v10072_v25, %v7354_v57  ;;  %v1659_v14 = vmul.f32 %v10073_v24, %v7354_v57  ;;  %v2039_v23 = vadd.f32 %v2037_v8, %v7274_v13  ;;  %s10078_s8 = sld [smem:[#allocation139_spill]] }
 0x23c   : > { %v10074_v54 = vstv %s10019_s11  ;;  %v10075_v9 = vstv %s10021_s13  ;;  %v10076_v33 = vstv %s10022_s22  ;;  %v2123_v50 = vadd.f32 %v2121_v51, %v7276_v4  ;;  %s7471_s2 = sld [smem:[#allocation2 + $0x67]] }
 0x23d   : > { %v1737_v22 = vmul.f32 %v10074_v54, %v7354_v57  ;;  %v1809_v32 = vmul.f32 %v10075_v9, %v7354_v57  ;;  %v1893_v7 = vmul.f32 %v10076_v33, %v7354_v57  ;;  %v2201_v44 = vadd.f32 %v2199_v30, %v7278_v38  ;;  %s7476_s4 = sld [smem:[#allocation2 + $0x6a]] }
 0x23e   : > { %v2273_v13 = vadd.f32 %v2271_v17, %v7280_v12  ;;  %v10080_v61 = vstv %s10069_s23  ;;  %v1425_v63 = vadd.f32 %v1423_v40, %v1419_v43  ;;  %v1504_v34 = vadd.f32 %v1502_v29, %v1498_v37  ;;  %s7489_s27 = sld [smem:[#allocation2 + $0x88]] }
 0x23f   : > { %v1971_v53 = vmul.f32 %v10080_v61, %v7354_v57  ;;  %v1576_v36 = vadd.f32 %v1574_v39, %v1570_v5  ;;  %v1661_v4 = vadd.f32 %v1659_v14, %v1655_v26  ;;  %v1739_v38 = vadd.f32 %v1737_v22, %v1733_v49  ;;  %s7494_s9 = sld [smem:[#allocation2 + $0x8b]] }
 0x240   : > { %v1811_v12 = vadd.f32 %v1809_v32, %v1805_v3  ;;  %v1895_v16 = vadd.f32 %v1893_v7, %v1889_v58  ;;  %v10082_v8 = vstv %s10077_s15  ;;  %v10084_v5 = vstv %s10079_s21  ;;  %s7504_s11 = sld [smem:[#allocation2 + $0x8e]]  ;;  %s10108_s15 = smov 127  }
 0x241   : > { %v2043_v62 = vmul.f32 %v10082_v8, %v7354_v57  ;;  %v10083_v43 = vstv %s10078_s8  ;;  %v2205_v26 = vmul.f32 %v10084_v5, %v7354_v57  ;;  %v10085_v51 = vstv %s10081_s7  ;;  %s7514_s13 = sld [smem:[#allocation2 + $0x1d]]  ;;  %s5303_s8 = smov 126  }
 0x242   : > { %v2127_v37 = vmul.f32 %v10083_v43, %v7354_v57  ;;  %v2277_v56 = vmul.f32 %v10085_v51, %v7354_v57  ;;  %v1341_v30 = vsel %vm1211_vm8, %v6465_v31, %v1337_v6  ;;  %v1973_v45 = vadd.f32 %v1971_v53, %v1967_v15  ;;  %s7516_s22 = sld [smem:[#allocation2 + $0x20]] }
 0x243   : > { %v1433_v17 = vstv %s7413_s25  ;;  %v1512_v49 = vstv %s7420_s6  ;;  %v1584_v3 = vstv %s7429_s20  ;;  %v10086_v58 = vstv %s10040_s0  ;;  %s7595_s0 = sld [smem:[#allocation2 + $0x8c]] }
 0x244   : > { %v1429_v42 = vmul.f32 %v10086_v58, %v1341_v30  ;;  %v10087_v40 = vstv %s10041_s24  ;;  %v10088_v29 = vstv %s10042_s14  ;;  %v10089_v39 = vstv %s10043_s10  ;;  %s7601_s24 = sld [smem:[#allocation2 + $0x8f]] }
 0x245   : > { %v1508_v1 = vmul.f32 %v10087_v40, %v1341_v30  ;;  %v1580_v25 = vmul.f32 %v10088_v29, %v1341_v30  ;;  %v1665_v57 = vmul.f32 %v10089_v39, %v1341_v30  ;;  %v10090_v24 = vstv %s10044_s18  ;;  %s7567_s18 = sld [smem:[#allocation2 + $0x68]] }
 0x246   : > { %v1743_v31 = vmul.f32 %v10090_v24, %v1341_v30  ;;  %v10091_v14 = vstv %s10045_s26  ;;  %v10092_v15 = vstv %s10046_s17  ;;  %v10093_v9 = vstv %s10047_s29  ;;  %s7526_s29 = sld [smem:[#allocation2 + $0x23]] }
 0x247   : > { %v1815_v54 = vmul.f32 %v10091_v14, %v1341_v30  ;;  %v1899_v22 = vmul.f32 %v10092_v15, %v1341_v30  ;;  %v1977_v32 = vmul.f32 %v10093_v9, %v1341_v30  ;;  %v2045_v33 = vadd.f32 %v2043_v62, %v2039_v23  ;;  %s7536_s17 = sld [smem:[#allocation2 + $0x41]] }
 0x248   : > { %v2129_v7 = vadd.f32 %v2127_v37, %v2123_v50  ;;  %v2207_v61 = vadd.f32 %v2205_v26, %v2201_v44  ;;  %v2279_v53 = vadd.f32 %v2277_v56, %v2273_v13  ;;  %v7518_v6 = vadd.f32 %v1429_v42, %v1425_v63  ;;  %s7546_s26 = sld [smem:[#allocation2 + $0x44]] }
 0x249   : > { %v7520_v8 = vadd.f32 %v1508_v1, %v1504_v34  ;;  %v7522_v43 = vadd.f32 %v1580_v25, %v1576_v36  ;;  %v7524_v5 = vadd.f32 %v1665_v57, %v1661_v4  ;;  %v7528_v23 = vadd.f32 %v1743_v31, %v1739_v38  ;;  %v1357_v38 = vpop.permute.xlu0 %1356  ;;  %s7651_s14 = sld [smem:[#allocation5]] }
 0x24a   : > { %v7530_v50 = vadd.f32 %v1815_v54, %v1811_v12  ;;  %v2049_v44 = vmul.f32 %v2047_v60, %v1341_v30  ;;  %v2133_v13 = vmul.f32 %v2131_v21, %v1341_v30  ;;  %v7538_v63 = vadd.f32 %v1899_v22, %v1895_v16  ;;  %s7665_s10 = sld [smem:[#allocation5 + $0x1]] }
 0x24b   : > { %v7540_v34 = vadd.f32 %v1977_v32, %v1973_v45  ;;  %v2211_v36 = vmul.f32 %v2209_v46, %v1341_v30  ;;  %v2283_v4 = vmul.f32 %v2281_v27, %v1341_v30  ;;  %v1669_v60 = vstv %s7435_s12  ;;  %s7672_s23 = sld [smem:[#allocation5 + $0x2]] }
 0x24c   : > { %v1747_v21 = vstv %s7449_s16  ;;  %v1819_v12 = vstv %s7461_s19  ;;  %v1903_v16 = vstv %s7469_s3  ;;  %v7554_v62 = vadd.f32 %v2049_v44, %v2045_v33  ;;  %s7790_s25 = sld [smem:[#allocation5 + $0x3]] }
 0x24d   : > { %v7556_v46 = vadd.f32 %v2133_v13, %v2129_v7  ;;  %v1981_v27 = vstv %s7471_s2  ;;  %v2053_v37 = vstv %s7476_s4  ;;  %v2137_v26 = vstv %s7489_s27  ;;  %s7912_s6 = sld [smem:[#allocation7 + $0x1]] }
 0x24e   : > { %v2215_v51 = vstv %s7494_s9  ;;  %v2287_v56 = vstv %s7504_s11  ;;  %v1364_v30 = vsel %vm1237_vm10, %v7363_v11, %v1357_v38  ;;  %v7589_v39 = vadd.f32 %v2211_v36, %v2207_v61  ;;  %v1367_v61 = vpop.permute.xlu0 %1366  ;;  %s7920_s20 = sld [smem:[#allocation7 + $0x2]] }
 0x24f   : > { %v1434_v45 = vmul.f32 %v1433_v17, %v1364_v30  ;;  %v1513_v58 = vmul.f32 %v1512_v49, %v1364_v30  ;;  %v1585_v42 = vmul.f32 %v1584_v3, %v1364_v30  ;;  %v1670_v40 = vmul.f32 %v1669_v60, %v1364_v30  ;;  %s8072_s12 = sld [smem:[#allocation7 + $0xa]] }
 0x250   : > { %v1748_v1 = vmul.f32 %v1747_v21, %v1364_v30  ;;  %v1820_v29 = vmul.f32 %v1819_v12, %v1364_v30  ;;  %v1904_v11 = vmul.f32 %v1903_v16, %v1364_v30  ;;  %v1982_v25 = vmul.f32 %v1981_v27, %v1364_v30  ;;  %s8100_s16 = sld [smem:[#allocation7 + $0xb]] }
 0x251   : > { %v7591_v57 = vadd.f32 %v2283_v4, %v2279_v53  ;;  %v1436_v24 = vadd.f32 %v1434_v45, %v7365_v19  ;;  %v1439_v31 = vstv %s7514_s13  ;;  %v1515_v14 = vadd.f32 %v1513_v58, %v7367_v28  ;;  %s8116_s19 = sld [smem:[#allocation7 + $0x13]] }
 0x252   : > { %v1587_v54 = vadd.f32 %v1585_v42, %v7369_v2  ;;  %v1672_v15 = vadd.f32 %v1670_v40, %v7371_v0  ;;  %v1750_v22 = vadd.f32 %v1748_v1, %v7381_v20  ;;  %v2054_v9 = vmul.f32 %v2053_v37, %v1364_v30  ;;  %v7611_v2 = vpop.permute.xlu1 %1346  ;;  %s8139_s21 = sld [smem:[#allocation7 + $0x14]] }
 0x253   : > { %v2138_v19 = vmul.f32 %v2137_v26, %v1364_v30  ;;  %v2216_v32 = vmul.f32 %v2215_v51, %v1364_v30  ;;  %v2288_v28 = vmul.f32 %v2287_v56, %v1364_v30  ;;  %v1822_v0 = vadd.f32 %v1820_v29, %v7389_v41  ;;  %s4745_s7 = sld [smem:[#allocation7 + $0x1c]] }
 0x254   : > { %v1906_v20 = vadd.f32 %v1904_v11, %v7391_v48  ;;  %v1984_v33 = vadd.f32 %v1982_v25, %v7393_v52  ;;  %v1518_v7 = vstv %s7516_s22  ;;  %v2056_v53 = vadd.f32 %v2054_v9, %v7397_v59  ;;  %s4746_s3 = sld [smem:[#allocation7 + $0x1d]] }
 0x255   : > { %v1590_v44 = vstv %s7526_s29  ;;  %v9508_v13 = vstv %s7536_s17  ;;  %v9507_v36 = vstv %s7546_s26  ;;  %v2140_v41 = vadd.f32 %v2138_v19, %v7399_v35  ;;  %s4748_s2 = sld [smem:[#allocation7 + $0x4]] }
 0x256   : > { %v2218_v48 = vadd.f32 %v2216_v32, %v7401_v18  ;;  %v9505_v52 = vstv %s7552_s1  ;;  %v9506_v4 = vstv %s7560_s5  ;;  %v2290_v38 = vadd.f32 %v2288_v28, %v7403_v55  ;;  %v1353_v11 = vpop.permute.xlu1 %1352  ;;  %s4749_s4 = sld [smem:[#allocation7 + $0x5]] }
 0x257   : > { %v1987_v30 = vstv %s7567_s18  ;;  %v2059_v45 = vstv %s7577_s28  ;;  %v1372_v59 = vsel %vm440_vm1, %v6392_v47, %v1367_v61  ;;  %v2143_v40 = vstv %s7587_s30  ;;  %s4751_s27 = sld [smem:[#allocation7 + $0xd]] }
 0x258   : > { %v1440_v58 = vmul.f32 %v1439_v31, %v1372_v59  ;;  %v1519_v42 = vmul.f32 %v1518_v7, %v1372_v59  ;;  %v1591_v35 = vmul.f32 %v1590_v44, %v1372_v59  ;;  %v1676_v18 = vmul.f32 %v9508_v13, %v1372_v59  ;;  %s4752_s9 = sld [smem:[#allocation7 + $0xe]] }
 0x259   : > { %v1754_v1 = vmul.f32 %v9507_v36, %v1372_v59  ;;  %v1826_v55 = vmul.f32 %v9505_v52, %v1372_v59  ;;  %v1910_v29 = vmul.f32 %v9506_v4, %v1372_v59  ;;  %v9509_v25 = vstv %s7595_s0  ;;  %s4754_s11 = sld [smem:[#allocation7 + $0x16]] }
 0x25a   : > { %v9510_v47 = vstv %s7601_s24  ;;  %v7647_v9 = vadd.f32 %v1440_v58, %v1436_v24  ;;  %v7649_v19 = vadd.f32 %v1676_v18, %v1672_v15  ;;  %v1521_v32 = vadd.f32 %v1519_v42, %v1515_v14  ;;  %s4755_s13 = sld [smem:[#allocation7 + $0x17]] }
 0x25b   : > { %v7653_v28 = vadd.f32 %v1591_v35, %v1587_v54  ;;  %v7655_v61 = vadd.f32 %v1910_v29, %v1906_v20  ;;  %v1988_v52 = vmul.f32 %v1987_v30, %v1372_v59  ;;  %v7661_v13 = vadd.f32 %v1826_v55, %v1822_v0  ;;  %v1359_v29 = vpop.permute.xlu1 %1358  ;;  %s4757_s22 = sld [smem:[#allocation7 + $0x1f]] }
 0x25c   : > { %v1447_v4 = vrot.slane %v7647_v9, 7  ;;  %v1682_v36 = vrot.slane %v7649_v19, 7  ;;  %v2060_v24 = vmul.f32 %v2059_v45, %v1372_v59  ;;  %v1756_v15 = vadd.f32 %v1754_v1, %v1750_v22  ;;  %s4758_s29 = sld [smem:[#allocation7 + $0x20]] }
 0x25d   : > { %v1916_v14 = vrot.slane %v7655_v61, 7  ;;  %v2144_v54 = vmul.f32 %v2143_v40, %v1372_v59  ;;  %v2222_v20 = vmul.f32 %v9509_v25, %v1372_v59  ;;  %v2294_v22 = vmul.f32 %v9510_v47, %v1372_v59  ;;  %s4766_s18 = sld [smem:[#allocation7 + $0x19]] }
 0x25e   : > { %v1452_v58 = vsel %vm1446_vm11, 0.0, %v1447_v4  ;;  %v1687_v0 = vsel %vm1446_vm11, 0.0, %v1682_v36  ;;  %v7680_v42 = vadd.f32 %v2060_v24, %v2056_v53  ;;  %v1598_v35 = vrot.slane %v7653_v28, 1  ;;  %s4767_s28 = sld [smem:[#allocation7 + $0x1a]] }
 0x25f   : > { %v1921_v18 = vsel %vm1446_vm11, 0.0, %v1916_v14  ;;  %v1990_v1 = vadd.f32 %v1988_v52, %v1984_v33  ;;  %v7688_v55 = vadd.f32 %v2144_v54, %v2140_v41  ;;  %v7690_v25 = vadd.f32 %v1521_v32, %v1452_v58  ;;  %s4769_s30 = sld [smem:[#allocation7 + $0x22]] }
 0x260   : > { %v7692_v53 = vadd.f32 %v1756_v15, %v1687_v0  ;;  %v1832_v59 = vrot.slane %v7661_v13, 1  ;;  %v7695_v24 = vadd.f32 %v2294_v22, %v2290_v38  ;;  %v2066_v33 = vrot.slane %v7680_v42, 1 }
 0x261   : > { %v7697_v47 = vadd.f32 %v1990_v1, %v1921_v18  ;;  %v2150_v41 = vrot.slane %v7688_v55, 7  ;;  %v1363_v52 = vsel %vm1234_vm9, %v7611_v2, %v1353_v11  ;;  %v2224_v32 = vadd.f32 %v2222_v20, %v2218_v48 }
 0x262   : > { %v2300_v15 = vrot.slane %v7695_v24, 1  ;;  %v1365_v54 = vsel %vm1237_vm10, %v1363_v52, %v1359_v29  ;;  %v1607_v58 = vstv %s7651_s14  ;;  %v1841_v20 = vstv %s7665_s10  ;;  %s4773_s14 = sld [smem:[#allocation7 + $0x26]] }
 0x263   : > { %v2155_v38 = vsel %vm1446_vm11, 0.0, %v2150_v41  ;;  %v1435_v0 = vmul.f32 %v1433_v17, %v1365_v54  ;;  %v1514_v22 = vmul.f32 %v1512_v49, %v1365_v54  ;;  %v1586_v18 = vmul.f32 %v1584_v3, %v1365_v54  ;;  %s4775_s10 = sld [smem:[#allocation7 + $0x2e]] }
 0x264   : > { %v1671_v2 = vmul.f32 %v1669_v60, %v1365_v54  ;;  %v1749_v48 = vmul.f32 %v1747_v21, %v1365_v54  ;;  %v1821_v11 = vmul.f32 %v1819_v12, %v1365_v54  ;;  %v7722_v1 = vadd.f32 %v2224_v32, %v2155_v38  ;;  %v1369_v12 = vpop.permute.xlu1 %1368 }
 0x265   : > { %v1437_v29 = vadd.f32 %v1435_v0, %v7518_v6  ;;  %v1905_v17 = vmul.f32 %v1903_v16, %v1365_v54  ;;  %v2075_v49 = vstv %s7672_s23  ;;  %v1516_v3 = vadd.f32 %v1514_v22, %v7520_v8  ;;  %s4776_s23 = sld [smem:[#allocation7 + $0x2f]] }
 0x266   : > { %v1588_v60 = vadd.f32 %v1586_v18, %v7522_v43  ;;  %v1673_v52 = vadd.f32 %v1671_v2, %v7524_v5  ;;  %v1983_v21 = vmul.f32 %v1981_v27, %v1365_v54  ;;  %v1751_v32 = vadd.f32 %v1749_v48, %v7528_v23 }
 0x267   : > { %v2055_v6 = vmul.f32 %v2053_v37, %v1365_v54  ;;  %v2139_v16 = vmul.f32 %v2137_v26, %v1365_v54  ;;  %v2217_v8 = vmul.f32 %v2215_v51, %v1365_v54  ;;  %v1823_v43 = vadd.f32 %v1821_v11, %v7530_v50 }
 0x268   : > { %v1907_v5 = vadd.f32 %v1905_v17, %v7538_v63  ;;  %v1985_v27 = vadd.f32 %v1983_v21, %v7540_v34  ;;  %v2289_v38 = vmul.f32 %v2287_v56, %v1365_v54  ;;  %v1373_v26 = vsel %vm440_vm1, %v6445_v10, %v1369_v12 }
 0x269   : > { %v2057_v23 = vadd.f32 %v2055_v6, %v7554_v62  ;;  %v2141_v37 = vadd.f32 %v2139_v16, %v7556_v46  ;;  %v2219_v0 = vadd.f32 %v2217_v8, %v7589_v39  ;;  %v1441_v50 = vmul.f32 %v1439_v31, %v1373_v26 }
 0x26a   : > { %v2291_v51 = vadd.f32 %v2289_v38, %v7591_v57  ;;  %v1520_v63 = vmul.f32 %v1518_v7, %v1373_v26  ;;  %v1592_v34 = vmul.f32 %v1590_v44, %v1373_v26  ;;  %v10094_v22 = vstv %s7536_s17  ;;  %s4760_s17 = sld [smem:[#allocation7 + $0x7]] }
 0x26b   : > { %v1677_v56 = vmul.f32 %v10094_v22, %v1373_v26  ;;  %v10095_v54 = vstv %s7546_s26  ;;  %v10096_v18 = vstv %s7552_s1  ;;  %v10097_v2 = vstv %s7560_s5  ;;  %s4761_s26 = sld [smem:[#allocation7 + $0x8]] }
 0x26c   : > { %v1755_v62 = vmul.f32 %v10095_v54, %v1373_v26  ;;  %v1827_v46 = vmul.f32 %v10096_v18, %v1373_v26  ;;  %v1911_v39 = vmul.f32 %v10097_v2, %v1373_v26  ;;  %v1443_v10 = vadd.f32 %v1441_v50, %v1437_v29  ;;  %s4763_s1 = sld [smem:[#allocation7 + $0x10]] }
 0x26d   : > { %v1522_v48 = vadd.f32 %v1520_v63, %v1516_v3  ;;  %v1594_v57 = vadd.f32 %v1592_v34, %v1588_v60  ;;  %v1989_v31 = vmul.f32 %v1987_v30, %v1373_v26  ;;  %v1679_v11 = vadd.f32 %v1677_v56, %v1673_v52  ;;  %s4764_s5 = sld [smem:[#allocation7 + $0x11]] }
 0x26e   : > { %v1757_v7 = vadd.f32 %v1755_v62, %v1751_v32  ;;  %v1829_v17 = vadd.f32 %v1827_v46, %v1823_v43  ;;  %v1913_v44 = vadd.f32 %v1911_v39, %v1907_v5  ;;  %v1448_v21 = vrot.slane %v1443_v10, 7 }
 0x26f   : > { %v1599_v12 = vrot.slane %v1594_v57, 1  ;;  %v1991_v6 = vadd.f32 %v1989_v31, %v1985_v27  ;;  %v2061_v16 = vmul.f32 %v2059_v45, %v1373_v26  ;;  %v1683_v8 = vrot.slane %v1679_v11, 7 }
 0x270   : > { %v1833_v38 = vrot.slane %v1829_v17, 1  ;;  %v1917_v22 = vrot.slane %v1913_v44, 7  ;;  %v2145_v54 = vmul.f32 %v2143_v40, %v1373_v26  ;;  %v1449_v29 = vsel %vm1446_vm11, %v1447_v4, %v1448_v21 }
 0x271   : > { %v1600_v30 = vsel %vm1597_vm12, %v1598_v35, %v1599_v12  ;;  %v1603_v3 = vsel %vm1597_vm12, %v1599_v12, 0.0  ;;  %v2063_v60 = vadd.f32 %v2061_v16, %v2057_v23  ;;  %v1524_v52 = vadd.f32 %v1522_v48, %v1449_v29 }
 0x272   : > { %v1604_v45 = vadd.f32 %v1600_v30, %v7690_v25  ;;  %v1684_v40 = vsel %vm1446_vm11, %v1682_v36, %v1683_v8  ;;  %v1834_v4 = vsel %vm1597_vm12, %v1832_v59, %v1833_v38  ;;  %v1837_v28 = vsel %vm1597_vm12, %v1833_v38, 0.0 }
 0x273   : > { %v1759_v9 = vadd.f32 %v1757_v7, %v1684_v40  ;;  %v1838_v35 = vadd.f32 %v1834_v4, %v7692_v53  ;;  %v1918_v25 = vsel %vm1446_vm11, %v1916_v14, %v1917_v22  ;;  %v1605_v19 = vadd.f32 %v1603_v3, %v1524_v52 }
 0x274   : > { %v7794_v36 = vadd.f32 %v1607_v58, %v1604_v45  ;;  %v1993_v13 = vadd.f32 %v1991_v6, %v1918_v25  ;;  %v2067_v32 = vrot.slane %v2063_v60, 1  ;;  %v2147_v5 = vadd.f32 %v2145_v54, %v2141_v37 }
 0x275   : > { %v1839_v59 = vadd.f32 %v1837_v28, %v1759_v9  ;;  %v7798_v43 = vadd.f32 %v1841_v20, %v1838_v35  ;;  %v10098_v53 = vstv %s7595_s0  ;;  %v1609_v61 = vadd.f32 %v1607_v58, %v1605_v19  ;;  %s4770_s0 = sld [smem:[#allocation7 + $0x23]] }
 0x276   : > { %v2223_v27 = vmul.f32 %v10098_v53, %v1373_v26  ;;  %v2068_v14 = vsel %vm1597_vm12, %v2066_v33, %v2067_v32  ;;  %v2071_v23 = vsel %vm1597_vm12, %v2067_v32, 0.0  ;;  %v10099_v50 = vstv %s7601_s24  ;;  %s4772_s24 = sld [smem:[#allocation7 + $0x25]] }
 0x277   : > { %v2295_v63 = vmul.f32 %v10099_v50, %v1373_v26  ;;  %v1843_v34 = vadd.f32 %v1841_v20, %v1839_v59  ;;  %v2072_v56 = vadd.f32 %v2068_v14, %v7697_v47  ;;  %v2073_v62 = vadd.f32 %v2071_v23, %v1993_v13 }
 0x278   : > { %v2151_v18 = vrot.slane %v2147_v5, 7  ;;  %v2225_v46 = vadd.f32 %v2223_v27, %v2219_v0  ;;  %v2313_v58 = vsel %vm2312_vm13, %v7794_v36, 0.0  ;;  %v2314_v42 = vsel %vm2312_vm13, %v1609_v61, 0.0 }
 0x279   : > { %v2297_v37 = vadd.f32 %v2295_v63, %v2291_v51  ;;  %v2076_v33 = vadd.f32 %v2075_v49, %v2072_v56  ;;  %v2077_v2 = vadd.f32 %v2075_v49, %v2073_v62  ;;  %v2315_v26 = vadd.f32 %v2314_v42, %v2313_v58 }
 0x27a   : > { %v2152_v20 = vsel %vm1446_vm11, %v2150_v41, %v2151_v18  ;;  %v2407_v0 = vsel %vm2312_vm13, %v7798_v43, 0.0  ;;  %v2408_v51 = vsel %vm2312_vm13, %v1843_v34, 0.0  ;;  %v2309_v11 = vstv %s7790_s25  ;;  %s4778_s25 = sld [smem:[#allocation7 + $0x37]] }
 0x27b   : > { %v2227_v47 = vadd.f32 %v2225_v46, %v2152_v20  ;;  %v2301_v39 = vrot.slane %v2297_v37, 1  ;;  %v2316_v10 = vrot.slane %v2315_v26, 4  ;;  %v2409_v48 = vadd.f32 %v2408_v51, %v2407_v0 }
 0x27c   : > { %v2499_v57 = vsel %vm2312_vm13, %v2076_v33, 0.0  ;;  %v2500_v31 = vsel %vm2312_vm13, %v2077_v2, 0.0 }
 0x27d   : > { %v2302_v55 = vsel %vm1597_vm12, %v2300_v15, %v2301_v39  ;;  %v2305_v41 = vsel %vm1597_vm12, %v2301_v39, 0.0  ;;  %v2501_v49 = vadd.f32 %v2500_v31, %v2499_v57  ;;  %v2317_v44 = vadd.f32 %v2316_v10, %v2315_v26 }
 0x27e   : > { %v2306_v7 = vadd.f32 %v2302_v55, %v7722_v1  ;;  %v2307_v17 = vadd.f32 %v2305_v41, %v2227_v47  ;;  %v2410_v21 = vrot.slane %v2409_v48, 4 }
 0x27f   : > { %v2502_v12 = vrot.slane %v2501_v49, 4  ;;  %v2318_v8 = vrot.slane %v2317_v44, 2 }
 0x280   : > { %v2310_v6 = vadd.f32 %v2309_v11, %v2306_v7  ;;  %v2311_v16 = vadd.f32 %v2309_v11, %v2307_v17  ;;  %v2411_v38 = vadd.f32 %v2410_v21, %v2409_v48 }
 0x281   : > { %v2503_v22 = vadd.f32 %v2502_v12, %v2501_v49  ;;  %v2319_v54 = vadd.f32 %v2318_v8, %v2317_v44 }
 0x282   : > { %v2412_v29 = vrot.slane %v2411_v38, 2  ;;  %v2591_v24 = vsel %vm2312_vm13, %v2310_v6, 0.0  ;;  %v2592_v15 = vsel %vm2312_vm13, %v2311_v16, 0.0 }
 0x283   : > { %v2504_v30 = vrot.slane %v2503_v22, 2  ;;  %v2593_v3 = vadd.f32 %v2592_v15, %v2591_v24  ;;  %v2320_v60 = vrot.slane %v2319_v54, 1 }
 0x284   : > { %v2413_v52 = vadd.f32 %v2412_v29, %v2411_v38 }
 0x285   : > { %v2505_v1 = vadd.f32 %v2504_v30, %v2503_v22  ;;  %v2594_v45 = vrot.slane %v2593_v3, 4  ;;  %v2321_v40 = vadd.f32 %v2320_v60, %v2319_v54 }
 0x286   : > { %v2414_v4 = vrot.slane %v2413_v52, 1 }
 0x287   : > { %v2506_v9 = vrot.slane %v2505_v1, 1  ;;  %v2595_v28 = vadd.f32 %v2594_v45, %v2593_v3  ;;  %v2322_v35 = vmul.f32 0.0625, %v2321_v40 }
 0x288   : > { %v2415_v25 = vadd.f32 %v2414_v4, %v2413_v52 }
 0x289   : > { %v2507_v19 = vadd.f32 %v2506_v9, %v2505_v1  ;;  %v2596_v13 = vrot.slane %v2595_v28, 2  ;;  %v7837_v32 = vsub.f32 %v7794_v36, %v2322_v35  ;;  %v7839_v59 = vsub.f32 %v1609_v61, %v2322_v35 }
 0x28a   : > { %v2416_v5 = vmul.f32 0.0625, %v2415_v25 }
 0x28b   : > { %v2508_v53 = vmul.f32 0.0625, %v2507_v19  ;;  %v2597_v27 = vadd.f32 %v2596_v13, %v2595_v28  ;;  %v2325_v14 = vmul.f32 %v7837_v32, %v7837_v32  ;;  %v2326_v23 = vmul.f32 %v7839_v59, %v7839_v59 }
 0x28c   : > { %v7846_v50 = vsub.f32 %v7798_v43, %v2416_v5  ;;  %v7848_v63 = vsub.f32 %v1843_v34, %v2416_v5 }
 0x28d   : > { %v7850_v56 = vsub.f32 %v2076_v33, %v2508_v53  ;;  %v7852_v36 = vsub.f32 %v2077_v2, %v2508_v53  ;;  %v2598_v61 = vrot.slane %v2597_v27, 1  ;;  %v2327_v62 = vsel %vm2312_vm13, %v2325_v14, 0.0 }
 0x28e   : > { %v2328_v18 = vsel %vm2312_vm13, %v2326_v23, 0.0  ;;  %v2419_v46 = vmul.f32 %v7846_v50, %v7846_v50  ;;  %v2420_v37 = vmul.f32 %v7848_v63, %v7848_v63 }
 0x28f   : > { %v2329_v58 = vadd.f32 %v2328_v18, %v2327_v62  ;;  %v2511_v43 = vmul.f32 %v7850_v56, %v7850_v56  ;;  %v2512_v34 = vmul.f32 %v7852_v36, %v7852_v36  ;;  %v2599_v42 = vadd.f32 %v2598_v61, %v2597_v27  ;;  %v10100_v18 = vld [vmem:[#allocation26_spill] sm:$0xff] }
 0x290   : > { %v2421_v33 = vsel %vm2312_vm13, %v2419_v46, 0.0  ;;  %v2422_v2 = vsel %vm2312_vm13, %v2420_v37, 0.0  ;;  %v10101_v37 = vld [vmem:[#allocation29_spill] sm:$0xff] }
 0x291   : > { %v2330_v20 = vrot.slane %v2329_v58, 4  ;;  %v2423_v26 = vadd.f32 %v2422_v2, %v2421_v33  ;;  %v2513_v47 = vsel %vm2312_vm13, %v2511_v43, 0.0  ;;  %v2514_v39 = vsel %vm2312_vm13, %v2512_v34, 0.0  ;;  %v10103_v2 = vld [vmem:[#allocation32_spill] sm:$0xff] }
 0x292   : > { %v2515_v0 = vadd.f32 %v2514_v39, %v2513_v47  ;;  %v2600_v51 = vmul.f32 0.0625, %v2599_v42  ;;  %v10102_v42 = vld [vmem:[#allocation27_spill] sm:$0xff] }
 0x293   : > { %v2331_v10 = vadd.f32 %v2330_v20, %v2329_v58  ;;  %v2424_v48 = vrot.slane %v2423_v26, 4 }
 0x294   : > { %v2516_v57 = vrot.slane %v2515_v0, 4  ;;  %v7868_v31 = vsub.f32 %v2310_v6, %v2600_v51  ;;  %v7870_v11 = vsub.f32 %v2311_v16, %v2600_v51 }
 0x295   : > { %v2332_v55 = vrot.slane %v2331_v10, 2  ;;  %v2425_v41 = vadd.f32 %v2424_v48, %v2423_v26 }
 0x296   : > { %v2517_v49 = vadd.f32 %v2516_v57, %v2515_v0  ;;  %v2603_v7 = vmul.f32 %v7868_v31, %v7868_v31  ;;  %v2604_v17 = vmul.f32 %v7870_v11, %v7870_v11 }
 0x297   : > { %v2333_v44 = vadd.f32 %v2332_v55, %v2331_v10  ;;  %v2426_v21 = vrot.slane %v2425_v41, 2 }
 0x298   : > { %v2518_v12 = vrot.slane %v2517_v49, 2  ;;  %v2605_v8 = vsel %vm2312_vm13, %v2603_v7, 0.0  ;;  %v2606_v38 = vsel %vm2312_vm13, %v2604_v17, 0.0 }
 0x299   : > { %v2334_v6 = vrot.slane %v2333_v44, 1  ;;  %v2427_v22 = vadd.f32 %v2426_v21, %v2425_v41  ;;  %v2607_v16 = vadd.f32 %v2606_v38, %v2605_v8 }
 0x29a   : > { %v2519_v54 = vadd.f32 %v2518_v12, %v2517_v49 }
 0x29b   : > { %v2335_v29 = vadd.f32 %v2334_v6, %v2333_v44  ;;  %v2428_v24 = vrot.slane %v2427_v22, 1  ;;  %v2608_v15 = vrot.slane %v2607_v16, 4 }
 0x29c   : > { %v2520_v30 = vrot.slane %v2519_v54, 1 }
 0x29d   : > { %v2336_v3 = vmul.f32 0.0625, %v2335_v29  ;;  %v2429_v60 = vadd.f32 %v2428_v24, %v2427_v22  ;;  %v2609_v52 = vadd.f32 %v2608_v15, %v2607_v16 }
 0x29e   : > { %v2521_v1 = vadd.f32 %v2520_v30, %v2519_v54  ;;  %v10104_v30 = vld [vmem:[#allocation28_spill] sm:$0xff] }
 0x29f   : > { %v2337_v45 = vadd.f32 1e-05, %v2336_v3  ;;  %v2430_v40 = vmul.f32 0.0625, %v2429_v60  ;;  %v2610_v4 = vrot.slane %v2609_v52, 2  ;;  %v7932_v3 = vadd.s32 4294967295, %v10104_v30 }
 0x2a0   : > { %v2522_v9 = vmul.f32 0.0625, %v2521_v1 }
 0x2a1   : > { %5097 = vrsqrt.f32 %v2337_v45  ;;  %v2431_v28 = vadd.f32 1e-05, %v2430_v40  ;;  %v2611_v35 = vadd.f32 %v2610_v4, %v2609_v52  ;;  %v2688_v52 = vstv %s7912_s6  ;;  %s4779_s6 = sld [smem:[#allocation7 + $0x38]] }
 0x2a2   : > { %v2523_v25 = vadd.f32 1e-05, %v2522_v9  ;;  %v2702_v4 = vstv %s7920_s20  ;;  %vm399_vm3 = vcmp.ge.s32.totalorder %v7932_v3, 0  ;;  %vm400_vm4 = vcmp.lt.s32.totalorder %v7932_v3, 16  ;;  %s4781_s20 = sld [smem:[#allocation7 + $0x40]] }
 0x2a3   : > { %5099 = vrsqrt.f32 %v2431_v28  ;;  %v2612_v19 = vrot.slane %v2611_v35, 1  ;;  %vm8067_vm6 = vmand %vm399_vm3, %vm400_vm4 }
 0x2a4   : > { %5101 = vrsqrt.f32 %v2523_v25 }
 0x2a5   : > { %v2613_v13 = vadd.f32 %v2612_v19, %v2611_v35 }
 0x2a7   : > { %v2614_v5 = vmul.f32 0.0625, %v2613_v13 }
 0x2a9   : > { %v2615_v61 = vadd.f32 1e-05, %v2614_v5 }
 0x2ab   : > { %5103 = vrsqrt.f32 %v2615_v61 }
 0x2ae   : > { %v5098_v53 = vpop.eup %5097 }
 0x2af   : > { %v2339_v27 = vmul.f32 %v5098_v53, %v7837_v32  ;;  %v2340_v14 = vmul.f32 %v5098_v53, %v7839_v59 }
 0x2b0   : > { %v5100_v23 = vpop.eup %5099 }
 0x2b1   : > { %v5102_v62 = vpop.eup %5101  ;;  %v2341_v46 = vmul.f32 %v2339_v27, %v10100_v18  ;;  %v2342_v58 = vmul.f32 %v2340_v14, %v10101_v37  ;;  %v2433_v43 = vmul.f32 %v5100_v23, %v7846_v50  ;;  %v2434_v34 = vmul.f32 %v5100_v23, %v7848_v63 }
 0x2b2   : > { %v2525_v59 = vmul.f32 %v5102_v62, %v7850_v56  ;;  %v2526_v47 = vmul.f32 %v5102_v62, %v7852_v36 }
 0x2b3   : > { %v2343_v33 = vadd.f32 %v2341_v46, %v10102_v42  ;;  %v2344_v20 = vadd.f32 %v2342_v58, %v10103_v2  ;;  %v2435_v26 = vmul.f32 %v2433_v43, %v10100_v18  ;;  %v2436_v32 = vmul.f32 %v2434_v34, %v10101_v37 }
 0x2b4   : > { %v2527_v36 = vmul.f32 %v2525_v59, %v10100_v18  ;;  %v2528_v57 = vmul.f32 %v2526_v47, %v10101_v37  ;;  %v10105_v34 = vmov -1.0  }
 0x2b5   : > { %v7890_v39 = vmul.f32 0.70710677, %v2343_v33  ;;  %v7892_v0 = vmul.f32 0.70710677, %v2344_v20  ;;  %v7895_v50 = vadd.f32 %v2435_v26, %v10102_v42  ;;  %v7898_v63 = vadd.f32 %v2436_v32, %v10103_v2 }
 0x2b6   : > { %v7915_v8 = vadd.f32 %v2527_v36, %v10102_v42  ;;  %v7918_v38 = vadd.f32 %v2528_v57, %v10103_v2  ;;  %v7944_v28 = vmul.f32 0.5, %v2343_v33  ;;  %v7946_v35 = vmul.f32 0.5, %v2344_v20 }
 0x2b7   : > { %v2351_v51 = vand.u32 2147483647, %v7890_v39  ;;  %v2352_v10 = vand.u32 2147483647, %v7892_v0  ;;  %v7903_v48 = vmul.f32 0.70710677, %v7895_v50 }
 0x2b8   : > { %v7906_v56 = vmul.f32 0.70710677, %v7898_v63  ;;  %v7925_v16 = vmul.f32 0.70710677, %v7915_v8  ;;  %v7928_v54 = vmul.f32 0.70710677, %v7918_v38  ;;  %v5104_v29 = vpop.eup %5103 }
 0x2b9   : > { %v2353_v55 = vmul.f32 0.3275911, %v2351_v51  ;;  %v2354_v41 = vmul.f32 0.3275911, %v2352_v10  ;;  %v2445_v49 = vand.u32 2147483647, %v7903_v48  ;;  %v2617_v45 = vmul.f32 %v5104_v29, %v7868_v31 }
 0x2ba   : > { %v2446_v7 = vand.u32 2147483647, %v7906_v56  ;;  %v2383_v24 = vsub.f32 0.0, %v2351_v51  ;;  %v2384_v15 = vsub.f32 0.0, %v2352_v10  ;;  %v7935_v60 = vand.u32 2147483647, %v7925_v16 }
 0x2bb   : > { %v2355_v17 = vadd.f32 1.0, %v2353_v55  ;;  %v2356_v44 = vadd.f32 1.0, %v2354_v41  ;;  %v2447_v21 = vmul.f32 0.3275911, %v2445_v49  ;;  %v7939_v1 = vand.u32 2147483647, %v7928_v54 }
 0x2bc   : > { %v2448_v12 = vmul.f32 0.3275911, %v2446_v7  ;;  %v2618_v40 = vmul.f32 %v5104_v29, %v7870_v11  ;;  %v2385_v9 = vmul.f32 %v2383_v24, %v2351_v51  ;;  %v2539_v25 = vmul.f32 0.3275911, %v7935_v60 }
 0x2bd   : > { %5105 = vrcp.f32 %v2355_v17  ;;  %v2449_v6 = vadd.f32 1.0, %v2447_v21  ;;  %v2386_v19 = vmul.f32 %v2384_v15, %v2352_v10  ;;  %v2540_v13 = vmul.f32 0.3275911, %v7939_v1 }
 0x2be   : > { %5107 = vrcp.f32 %v2356_v44  ;;  %v7922_v22 = vadd.f32 1.0, %v2448_v12  ;;  %v2619_v5 = vmul.f32 %v2617_v45, %v10100_v18  ;;  %v2620_v53 = vmul.f32 %v2618_v40, %v10101_v37 }
 0x2bf   : > { %5109 = vrcp.f32 %v2449_v6  ;;  %vm2347_vm14 = vcmp.ge.f32.partialorder %v7890_v39, 0.0  ;;  %vm2348_vm15 = vcmp.ge.f32.partialorder %v7892_v0, 0.0  ;;  %v2477_v31 = vsub.f32 0.0, %v2445_v49 }
 0x2c0   : > { %5111 = vrcp.f32 %v7922_v22  ;;  %v7954_v11 = vadd.f32 1.0, %v2539_v25  ;;  %v2478_v27 = vsub.f32 0.0, %v2446_v7  ;;  %v7956_v14 = vadd.f32 1.0, %v2540_v13 }
 0x2c1   : > { %v7959_v23 = vadd.f32 %v2619_v5, %v10102_v42  ;;  %v7962_v61 = vadd.f32 %v2620_v53, %v10103_v2  ;;  %v2387_v62 = vmul.f32 1.442695, %v2385_v9  ;;  %vm2441_vm0 = vcmp.ge.f32.partialorder %v7903_v48, 0.0 }
 0x2c2   : > { %vm2442_vm2 = vcmp.ge.f32.partialorder %v7906_v56, 0.0  ;;  %5113 = vrcp.f32 %v7954_v11  ;;  %v2389_v46 = vmul.f32 1.442695, %v2386_v19  ;;  %v7977_v42 = vsel %vm2347_vm14, 1.0, %v10105_v34 }
 0x2c3   : > { %5115 = vrcp.f32 %v7956_v14  ;;  %v7969_v37 = vmul.f32 0.70710677, %v7959_v23  ;;  %v7972_v58 = vmul.f32 0.70710677, %v7962_v61  ;;  %v7982_v33 = vsel %vm2348_vm15, 1.0, %v10105_v34 }
 0x2c4   : > { %v2479_v20 = vmul.f32 %v2477_v31, %v2445_v49  ;;  %v7985_v32 = vsel %vm2441_vm0, 1.0, %v10105_v34  ;;  %v7988_v59 = vsel %vm2442_vm2, 1.0, %v10105_v34  ;;  %v2480_v47 = vmul.f32 %v2478_v27, %v2446_v7 }
 0x2c5   : > { %5117 = vpow2.f32 %v2387_v62  ;;  %v7991_v39 = vmul.f32 0.5, %v7895_v50  ;;  %v2629_v10 = vand.u32 2147483647, %v7969_v37  ;;  %v7995_v56 = vmul.f32 0.5, %v7898_v63 }
 0x2c6   : > { %5119 = vpow2.f32 %v2389_v46  ;;  %v2630_v36 = vand.u32 2147483647, %v7972_v58  ;;  %v2481_v49 = vmul.f32 1.442695, %v2479_v20  ;;  %v2569_v63 = vsub.f32 0.0, %v7935_v60 }
 0x2c7   : > { %v2631_v7 = vmul.f32 0.3275911, %v2629_v10  ;;  %vm2533_vm5 = vcmp.ge.f32.partialorder %v7925_v16, 0.0  ;;  %vm2534_vm7 = vcmp.ge.f32.partialorder %v7928_v54, 0.0  ;;  %vm2625_vm8 = vcmp.ge.f32.partialorder %v7969_v37, 0.0 }
 0x2c8   : > { %v2632_v21 = vmul.f32 0.3275911, %v2630_v36  ;;  %v2662_v13 = vsub.f32 0.0, %v2630_v36  ;;  %v2571_v31 = vmul.f32 %v2569_v63, %v7935_v60  ;;  %vm2626_vm9 = vcmp.ge.f32.partialorder %v7972_v58, 0.0 }
 0x2c9   : > { %v8005_v24 = vadd.f32 1.0, %v2631_v7 }
 0x2ca   : > { %v5106_v18 = vpop.eup %5105  ;;  %v8009_v45 = vadd.f32 1.0, %v2632_v21  ;;  %v2573_v7 = vmul.f32 1.442695, %v2571_v31 }
 0x2cb   : > { %v5108_v43 = vpop.eup %5107  ;;  %v2359_v2 = vmul.f32 %v5106_v18, %v2355_v17  ;;  %5121 = vrcp.f32 %v8005_v24 }
 0x2cc   : > { %v2360_v26 = vmul.f32 %v5108_v43, %v2356_v44  ;;  %v5110_v0 = vpop.eup %5109  ;;  %v2483_v44 = vmul.f32 1.442695, %v2480_v47  ;;  %5123 = vrcp.f32 %v8009_v45 }
 0x2cd   : > { %v2361_v51 = vsub.f32 2.0, %v2359_v2  ;;  %v5112_v57 = vpop.eup %5111  ;;  %v2453_v41 = vmul.f32 %v5110_v0, %v2449_v6  ;;  %v2570_v6 = vsub.f32 0.0, %v7939_v1  ;;  %5125 = vpow2.f32 %v2481_v49 }
 0x2ce   : > { %v2362_v48 = vsub.f32 2.0, %v2360_v26  ;;  %v2454_v50 = vmul.f32 %v5112_v57, %v7922_v22  ;;  %v2661_v22 = vsub.f32 0.0, %v2629_v10  ;;  %5127 = vpow2.f32 %v2483_v44 }
 0x2cf   : > { %v7998_v55 = vmul.f32 %v5106_v18, %v2361_v51  ;;  %v2455_v29 = vsub.f32 2.0, %v2453_v41  ;;  %v5114_v27 = vpop.eup %5113  ;;  %v2572_v46 = vmul.f32 %v2570_v6, %v7939_v1  ;;  %5129 = vpow2.f32 %v2573_v7 }
 0x2d0   : > { %v8000_v17 = vmul.f32 %v5108_v43, %v2362_v48  ;;  %v2456_v30 = vsub.f32 2.0, %v2454_v50  ;;  %v5116_v43 = vpop.eup %5115  ;;  %v2545_v26 = vmul.f32 %v5114_v27, %v7954_v11  ;;  %v2663_v47 = vmul.f32 %v2661_v22, %v2629_v10 }
 0x2d1   : > { %v2365_v12 = vmul.f32 1.0614054, %v7998_v55  ;;  %v8011_v9 = vmul.f32 %v5110_v0, %v2455_v29  ;;  %v2546_v48 = vmul.f32 %v5116_v43, %v7956_v14 }
 0x2d2   : > { %v2366_v15 = vmul.f32 1.0614054, %v8000_v17  ;;  %v8014_v19 = vmul.f32 %v5112_v57, %v2456_v30  ;;  %v2664_v57 = vmul.f32 %v2662_v13, %v2630_v36  ;;  %v2547_v49 = vsub.f32 2.0, %v2545_v26  ;;  %v5118_v50 = vpop.eup %5117 }
 0x2d3   : > { %v2367_v40 = vadd.f32 -1.4531521, %v2365_v12  ;;  %v2459_v53 = vmul.f32 1.0614054, %v8011_v9  ;;  %v2548_v21 = vsub.f32 2.0, %v2546_v48  ;;  %v5120_v11 = vpop.eup %5119 }
 0x2d4   : > { %v2368_v25 = vadd.f32 -1.4531521, %v2366_v15  ;;  %v2460_v18 = vmul.f32 1.0614054, %v8014_v19  ;;  %v2575_v12 = vmul.f32 1.442695, %v2572_v46  ;;  %v8029_v63 = vmul.f32 %v5114_v27, %v2547_v49 }
 0x2d5   : > { %v2369_v5 = vmul.f32 %v2367_v40, %v7998_v55  ;;  %v2461_v20 = vadd.f32 -1.4531521, %v2459_v53  ;;  %v2665_v14 = vmul.f32 1.442695, %v2663_v47  ;;  %v8031_v30 = vmul.f32 %v5116_v43, %v2548_v21 }
 0x2d6   : > { %v2370_v62 = vmul.f32 %v2368_v25, %v8000_v17  ;;  %v2462_v0 = vadd.f32 -1.4531521, %v2460_v18  ;;  %v2667_v6 = vmul.f32 1.442695, %v2664_v57  ;;  %v2551_v25 = vmul.f32 1.0614054, %v8029_v63 }
 0x2d7   : > { %v2371_v2 = vadd.f32 1.4214138, %v2369_v5  ;;  %v2463_v41 = vmul.f32 %v2461_v20, %v8011_v9  ;;  %v2552_v53 = vmul.f32 1.0614054, %v8031_v30  ;;  %5131 = vpow2.f32 %v2575_v12 }
 0x2d8   : > { %v2372_v51 = vadd.f32 1.4214138, %v2370_v62  ;;  %v2464_v44 = vmul.f32 %v2462_v0, %v8014_v19  ;;  %v2553_v62 = vadd.f32 -1.4531521, %v2551_v25  ;;  %5133 = vpow2.f32 %v2665_v14  ;;  %v5122_v18 = vpop.eup %5121 }
 0x2d9   : > { %v2373_v60 = vmul.f32 %v2371_v2, %v7998_v55  ;;  %v2465_v29 = vadd.f32 1.4214138, %v2463_v41  ;;  %v2554_v2 = vadd.f32 -1.4531521, %v2552_v53  ;;  %5135 = vpow2.f32 %v2667_v6  ;;  %v5124_v20 = vpop.eup %5123 }
 0x2da   : > { %v2374_v1 = vmul.f32 %v2372_v51, %v8000_v17  ;;  %v2466_v15 = vadd.f32 1.4214138, %v2464_v44  ;;  %v2555_v51 = vmul.f32 %v2553_v62, %v8029_v63  ;;  %v2637_v0 = vmul.f32 %v5122_v18, %v8005_v24  ;;  %v5126_v48 = vpop.eup %5125 }
 0x2db   : > { %v2375_v10 = vadd.f32 -0.28449672, %v2373_v60  ;;  %v2467_v22 = vmul.f32 %v2465_v29, %v8011_v9  ;;  %v2556_v41 = vmul.f32 %v2554_v2, %v8031_v30  ;;  %v2638_v49 = vmul.f32 %v5124_v20, %v8009_v45  ;;  %v5128_v7 = vpop.eup %5127 }
 0x2dc   : > { %v2376_v36 = vadd.f32 -0.28449672, %v2374_v1  ;;  %v2468_v5 = vmul.f32 %v2466_v15, %v8014_v19  ;;  %v2557_v21 = vadd.f32 1.4214138, %v2555_v51 }
 0x2dd   : > { %v2377_v40 = vmul.f32 %v2375_v10, %v7998_v55  ;;  %v2469_v27 = vadd.f32 -0.28449672, %v2467_v22  ;;  %v2558_v29 = vadd.f32 1.4214138, %v2556_v41  ;;  %v2640_v14 = vsub.f32 2.0, %v2638_v49 }
 0x2de   : > { %v2378_v13 = vmul.f32 %v2376_v36, %v8000_v17  ;;  %v2470_v43 = vadd.f32 -0.28449672, %v2468_v5 }
 0x2df   : > { %v2379_v31 = vadd.f32 0.2548296, %v2377_v40  ;;  %v2471_v47 = vmul.f32 %v2469_v27, %v8011_v9  ;;  %v2560_v45 = vmul.f32 %v2558_v29, %v8031_v30 }
 0x2e0   : > { %v2380_v46 = vadd.f32 0.2548296, %v2378_v13  ;;  %v2472_v60 = vmul.f32 %v2470_v43, %v8014_v19 }
 0x2e1   : > { %v2381_v26 = vmul.f32 %v2379_v31, %v7998_v55  ;;  %v2473_v44 = vadd.f32 0.2548296, %v2471_v47  ;;  %v2639_v55 = vsub.f32 2.0, %v2637_v0  ;;  %v2562_v53 = vadd.f32 -0.28449672, %v2560_v45 }
 0x2e2   : > { %v2382_v57 = vmul.f32 %v2380_v46, %v8000_v17  ;;  %v2474_v10 = vadd.f32 0.2548296, %v2472_v60  ;;  %v2559_v17 = vmul.f32 %v2557_v21, %v8029_v63  ;;  %v5130_v46 = vpop.eup %5129 }
 0x2e3   : > { %v2391_v1 = vmul.f32 %v5118_v50, %v2381_v26  ;;  %v2475_v24 = vmul.f32 %v2473_v44, %v8011_v9  ;;  %v8051_v15 = vmul.f32 %v5122_v18, %v2639_v55  ;;  %v8055_v50 = vmul.f32 %v5124_v20, %v2640_v14 }
 0x2e4   : > { %v2392_v12 = vmul.f32 %v5120_v11, %v2382_v57  ;;  %v2476_v40 = vmul.f32 %v2474_v10, %v8014_v19  ;;  %v2561_v25 = vadd.f32 -0.28449672, %v2559_v17  ;;  %v2564_v2 = vmul.f32 %v2562_v53, %v8031_v30  ;;  %v5132_v26 = vpop.eup %5131 }
 0x2e5   : > { %v2393_v36 = vsub.f32 1.0, %v2391_v1  ;;  %v2485_v11 = vmul.f32 %v5126_v48, %v2475_v24  ;;  %v2643_v13 = vmul.f32 1.0614054, %v8051_v15  ;;  %v2644_v31 = vmul.f32 1.0614054, %v8055_v50  ;;  %v5134_v3 = vpop.eup %5133 }
 0x2e6   : > { %v2394_v6 = vsub.f32 1.0, %v2392_v12  ;;  %v2486_v5 = vmul.f32 %v5128_v7, %v2476_v40  ;;  %v2563_v62 = vmul.f32 %v2561_v25, %v8029_v63  ;;  %v2566_v41 = vadd.f32 0.2548296, %v2564_v2  ;;  %v5136_v7 = vpop.eup %5135 }
 0x2e7   : > { %v2395_v22 = vmul.f32 %v2393_v36, %v7977_v42  ;;  %v2487_v19 = vsub.f32 1.0, %v2485_v11  ;;  %v2645_v18 = vadd.f32 -1.4531521, %v2643_v13  ;;  %v2646_v20 = vadd.f32 -1.4531521, %v2644_v31 }
 0x2e8   : > { %v2396_v9 = vmul.f32 %v2394_v6, %v7982_v33  ;;  %v2488_v33 = vsub.f32 1.0, %v2486_v5  ;;  %v2565_v0 = vadd.f32 0.2548296, %v2563_v62 }
 0x2e9   : > { %v2399_v27 = vadd.f32 1.0, %v2395_v22  ;;  %v2489_v51 = vmul.f32 %v2487_v19, %v7985_v32  ;;  %v2647_v48 = vmul.f32 %v2645_v18, %v8051_v15  ;;  %v2648_v49 = vmul.f32 %v2646_v20, %v8055_v50 }
 0x2ea   : > { %v2400_v43 = vadd.f32 1.0, %v2396_v9  ;;  %v2490_v60 = vmul.f32 %v2488_v33, %v7988_v59  ;;  %v2567_v32 = vmul.f32 %v2565_v0, %v8029_v63  ;;  %v2568_v59 = vmul.f32 %v2566_v41, %v8031_v30 }
 0x2eb   : > { %v2401_v47 = vmul.f32 %v2399_v27, %v7944_v28  ;;  %v2493_v28 = vadd.f32 1.0, %v2489_v51  ;;  %v2649_v44 = vadd.f32 1.4214138, %v2647_v48  ;;  %v2650_v55 = vadd.f32 1.4214138, %v2648_v49 }
 0x2ec   : > { %v2402_v57 = vmul.f32 %v2400_v43, %v7946_v35  ;;  %v2494_v35 = vadd.f32 1.0, %v2490_v60  ;;  %v2577_v12 = vmul.f32 %v5130_v46, %v2567_v32  ;;  %v2578_v14 = vmul.f32 %v5132_v26, %v2568_v59 }
 0x2ed   : > { %v8082_v1 = vsel %vm8067_vm6, %v2401_v47, 0.0  ;;  %v2651_v10 = vmul.f32 %v2649_v44, %v8051_v15  ;;  %v2652_v36 = vmul.f32 %v2650_v55, %v8055_v50  ;;  %v2495_v30 = vmul.f32 %v2493_v28, %v7991_v39 }
 0x2ee   : > { %v8087_v21 = vsel %vm8067_vm6, %v2402_v57, 0.0  ;;  %v2496_v63 = vmul.f32 %v2494_v35, %v7995_v56  ;;  %v2689_v24 = vmul.f32 %v2688_v52, %v8082_v1  ;;  %v2579_v17 = vsub.f32 1.0, %v2577_v12 }
 0x2ef   : > { %v2690_v29 = vmul.f32 %v2688_v52, %v8087_v21  ;;  %v2653_v6 = vadd.f32 -0.28449672, %v2651_v10  ;;  %v2535_v56 = vsel %vm2533_vm5, 1.0, %v10105_v34  ;;  %v2580_v40 = vsub.f32 1.0, %v2578_v14 }
 0x2f0   : > { %v2654_v45 = vadd.f32 -0.28449672, %v2652_v36  ;;  %2693 = vrot.lane.b32.xlu0 %v2689_v24, %s10108_s15  ;;  %v2722_v22 = vstv %s8072_s12  ;;  %v2536_v52 = vsel %vm2534_vm7, 1.0, %v10105_v34  ;;  %v2581_v11 = vmul.f32 %v2579_v17, %v2535_v56  ;;  %s4782_s12 = sld [smem:[#allocation7 + $0x41]] }
 0x2f1   : > { %2695 = vrot.lane.b32.xlu1 %v2690_v29, %s10108_s15  ;;  %v2655_v39 = vmul.f32 %v2653_v6, %v8051_v15  ;;  %v2704_v25 = vmul.f32 %v2702_v4, %v8087_v21  ;;  %v8120_v16 = vsel %vm8067_vm6, %v2496_v63, 0.0  ;;  %v2582_v13 = vmul.f32 %v2580_v40, %v2536_v52 }
 0x2f2   : > { %v2656_v9 = vmul.f32 %v2654_v45, %v8055_v50  ;;  %v2703_v5 = vmul.f32 %v2702_v4, %v8082_v1  ;;  %v8128_v54 = vsel %vm8067_vm6, %v2495_v30, 0.0  ;;  %v2585_v53 = vadd.f32 1.0, %v2581_v11 }
 0x2f3   : > { %v2657_v31 = vadd.f32 0.2548296, %v2655_v39  ;;  %v2584_v27 = vmul.f32 0.5, %v7918_v38  ;;  %v2586_v19 = vadd.f32 1.0, %v2582_v13  ;;  %v2583_v18 = vmul.f32 0.5, %v7915_v8 }
 0x2f4   : > { %v2658_v62 = vadd.f32 0.2548296, %v2656_v9  ;;  %2707 = vrot.lane.b32.xlu0 %v2703_v5, %s5303_s8  ;;  %v2724_v46 = vmul.f32 %v2722_v22, %v8120_v16  ;;  %v2723_v2 = vmul.f32 %v2722_v22, %v8128_v54  ;;  %v2736_v20 = vstv %s8100_s16  ;;  %s4784_s16 = sld [smem:[#allocation7 + $0x28]] }
 0x2f5   : > { %2709 = vrot.lane.b32.xlu1 %v2704_v25, %s5303_s8  ;;  %v2659_v4 = vmul.f32 %v2657_v31, %v8051_v15  ;;  %v2588_v43 = vmul.f32 %v2586_v19, %v2584_v27  ;;  %v2587_v38 = vmul.f32 %v2585_v53, %v2583_v18  ;;  %v2738_v47 = vmul.f32 %v2736_v20, %v8120_v16 }
 0x2f6   : > { %v2660_v33 = vmul.f32 %v2658_v62, %v8055_v50  ;;  %v2756_v50 = vstv %s8116_s19  ;;  %v2627_v0 = vsel %vm2625_vm8, 1.0, %v10105_v34  ;;  %v2737_v48 = vmul.f32 %v2736_v20, %v8128_v54  ;;  %s4785_s19 = sld [smem:[#allocation7 + $0x29]] }
 0x2f7   : > { %v2669_v26 = vmul.f32 %v5134_v3, %v2659_v4  ;;  %v8149_v51 = vsel %vm8067_vm6, %v2588_v43, 0.0  ;;  %v8155_v58 = vsel %vm8067_vm6, %v2587_v38, 0.0  ;;  %v2628_v3 = vsel %vm2626_vm9, 1.0, %v10105_v34 }
 0x2f8   : > { %v2670_v8 = vmul.f32 %v5136_v7, %v2660_v33  ;;  %2727 = vrot.lane.b32.xlu0 %v2723_v2, %s10108_s15  ;;  %v2675_v41 = vmul.f32 0.5, %v7959_v23  ;;  %v2758_v7 = vmul.f32 %v2756_v50, %v8149_v51  ;;  %v2676_v28 = vmul.f32 0.5, %v7962_v61 }
 0x2f9   : > { %2729 = vrot.lane.b32.xlu1 %v2724_v46, %s10108_s15  ;;  %v2671_v15 = vsub.f32 1.0, %v2669_v26  ;;  %v2757_v44 = vmul.f32 %v2756_v50, %v8155_v58  ;;  %v2770_v35 = vstv %s8139_s21  ;;  %v2790_v61 = vstv %s4745_s7  ;;  %s4787_s21 = sld [smem:[#allocation7 + $0x31]] }
 0x2fa   : > { %v2672_v37 = vsub.f32 1.0, %v2670_v8  ;;  %v2772_v55 = vmul.f32 %v2770_v35, %v8149_v51  ;;  %v2771_v12 = vmul.f32 %v2770_v35, %v8155_v58  ;;  %v2804_v14 = vstv %s4746_s3  ;;  %s4788_s7 = sld [smem:[#allocation7 + $0x32]] }
 0x2fb   : > { %v2673_v57 = vmul.f32 %v2671_v15, %v2627_v0  ;;  %v2830_v24 = vstv %s4748_s2  ;;  %v2844_v6 = vstv %s4749_s4  ;;  %v2864_v45 = vstv %s4751_s27  ;;  %s4790_s3 = sld [smem:[#allocation7 + $0x3a]] }
 0x2fc   : > { %v2674_v60 = vmul.f32 %v2672_v37, %v2628_v3  ;;  %2741 = vrot.lane.b32.xlu0 %v2737_v48, %s5303_s8  ;;  %v2832_v30 = vmul.f32 %v2830_v24, %v8087_v21  ;;  %v2831_v17 = vmul.f32 %v2830_v24, %v8082_v1  ;;  %v2846_v56 = vmul.f32 %v2844_v6, %v8087_v21  ;;  %s4791_s2 = sld [smem:[#allocation7 + $0x3b]] }
 0x2fd   : > { %2743 = vrot.lane.b32.xlu1 %v2738_v47, %s5303_s8  ;;  %v2677_v49 = vadd.f32 1.0, %v2673_v57  ;;  %v2845_v40 = vmul.f32 %v2844_v6, %v8082_v1  ;;  %v2866_v22 = vmul.f32 %v2864_v45, %v8120_v16  ;;  %v2865_v52 = vmul.f32 %v2864_v45, %v8128_v54  ;;  %s4793_s4 = sld [smem:[#allocation7 + $0x43]] }
 0x2fe   : > { %v2678_v32 = vadd.f32 1.0, %v2674_v60  ;;  %v2878_v11 = vstv %s4752_s9  ;;  %v2898_v13 = vstv %s4754_s11  ;;  %v2912_v53 = vstv %s4755_s13  ;;  %s4794_s27 = sld [smem:[#allocation7 + $0x44]] }
 0x2ff   : > { %v2679_v59 = vmul.f32 %v2677_v49, %v2675_v41  ;;  %v2880_v39 = vmul.f32 %v2878_v11, %v8120_v16  ;;  %v2879_v25 = vmul.f32 %v2878_v11, %v8128_v54  ;;  %v2900_v9 = vmul.f32 %v2898_v13, %v8149_v51  ;;  %s4796_s9 = sld [smem:[#allocation7 + $0x2b]] }
 0x300   : > { %v2680_v34 = vmul.f32 %v2678_v32, %v2676_v28  ;;  %2761 = vrot.lane.b32.xlu0 %v2757_v44, %s10108_s15  ;;  %v2899_v5 = vmul.f32 %v2898_v13, %v8155_v58  ;;  %v2914_v31 = vmul.f32 %v2912_v53, %v8149_v51  ;;  %v2913_v27 = vmul.f32 %v2912_v53, %v8155_v58  ;;  %s4797_s11 = sld [smem:[#allocation7 + $0x2c]] }
 0x301   : > { %2763 = vrot.lane.b32.xlu1 %v2758_v7, %s10108_s15  ;;  %v8175_v10 = vsel %vm8067_vm6, %v2679_v59, 0.0  ;;  %v2932_v19 = vstv %s4757_s22  ;;  %v2946_v4 = vstv %s4758_s29  ;;  %v2966_v33 = vstv %s4760_s17  ;;  %s4799_s13 = sld [smem:[#allocation7 + $0x34]] }
 0x302   : > { %v8170_v23 = vsel %vm8067_vm6, %v2680_v34, 0.0  ;;  %v2791_v63 = vmul.f32 %v2790_v61, %v8175_v10  ;;  %v2805_v42 = vmul.f32 %v2804_v14, %v8175_v10  ;;  %v2933_v18 = vmul.f32 %v2932_v19, %v8175_v10  ;;  %s2683_s22 = sld [smem:[#allocation7]] }
 0x303   : > { %v2792_v29 = vmul.f32 %v2790_v61, %v8170_v23  ;;  %v2806_v36 = vmul.f32 %v2804_v14, %v8170_v23  ;;  %v2934_v62 = vmul.f32 %v2932_v19, %v8170_v23  ;;  %v2948_v46 = vmul.f32 %v2946_v4, %v8170_v23  ;;  %s8365_s29 = sld [smem:[#allocation7 + $0x35]] }
 0x304   : > { %2775 = vrot.lane.b32.xlu0 %v2771_v12, %s5303_s8  ;;  %v2947_v43 = vmul.f32 %v2946_v4, %v8175_v10  ;;  %v2968_v2 = vmul.f32 %v2966_v33, %v8087_v21  ;;  %v2967_v20 = vmul.f32 %v2966_v33, %v8082_v1  ;;  %v2980_v38 = vstv %s4761_s26  ;;  %s8368_s17 = sld [smem:[#allocation7 + $0x3]] }
 0x305   : > { %2777 = vrot.lane.b32.xlu1 %v2772_v55, %s5303_s8  ;;  %v2982_v26 = vmul.f32 %v2980_v38, %v8087_v21  ;;  %v2981_v8 = vmul.f32 %v2980_v38, %v8082_v1  ;;  %v3000_v15 = vstv %s4763_s1  ;;  %v3014_v0 = vstv %s4764_s5  ;;  %s8371_s26 = sld [smem:[#allocation7 + $0x9]] }
 0x306   : > { %v3002_v47 = vmul.f32 %v3000_v15, %v8120_v16  ;;  %v3001_v50 = vmul.f32 %v3000_v15, %v8128_v54  ;;  %v3016_v37 = vmul.f32 %v3014_v0, %v8120_v16  ;;  %v3015_v48 = vmul.f32 %v3014_v0, %v8128_v54  ;;  %s8379_s1 = sld [smem:[#allocation7 + $0x3d]] }
 0x307   : > { %v3034_v3 = vstv %s4766_s18  ;;  %v3048_v41 = vstv %s4767_s28  ;;  %v3068_v28 = vstv %s4769_s30  ;;  %v3082_v35 = vstv %s4770_s0  ;;  %s8382_s5 = sld [smem:[#allocation7 + $0xc]] }
 0x308   : > { %2795 = vrot.lane.b32.xlu0 %v2791_v63, %s10108_s15  ;;  %v3036_v57 = vmul.f32 %v3034_v3, %v8149_v51  ;;  %v3035_v60 = vmul.f32 %v3034_v3, %v8155_v58  ;;  %v3050_v49 = vmul.f32 %v3048_v41, %v8149_v51  ;;  %v3049_v7 = vmul.f32 %v3048_v41, %v8155_v58  ;;  %s8388_s18 = sld [smem:[#allocation7 + $0x3e]] }
 0x309   : > { %2797 = vrot.lane.b32.xlu1 %v2792_v29, %s10108_s15  ;;  %v3070_v32 = vmul.f32 %v3068_v28, %v8170_v23  ;;  %v3069_v44 = vmul.f32 %v3068_v28, %v8175_v10  ;;  %v3084_v59 = vmul.f32 %v3082_v35, %v8170_v23  ;;  %v3083_v34 = vmul.f32 %v3082_v35, %v8175_v10  ;;  %s8397_s28 = sld [smem:[#allocation7 + $0x6]] }
 0x30a   : > { %v3114_v55 = vstv %s4772_s24  ;;  %v3128_v29 = vstv %s4773_s14  ;;  %v3216_v13 = vstv %s4781_s20  ;;  %v3270_v38 = vstv %s4785_s19  ;;  %s8401_s30 = sld [smem:[#allocation7 + $0x12]] }
 0x30b   : > { %v3116_v12 = vmul.f32 %v3114_v55, %v8087_v21  ;;  %v3115_v61 = vmul.f32 %v3114_v55, %v8082_v1  ;;  %v3130_v63 = vmul.f32 %v3128_v29, %v8087_v21  ;;  %v3129_v14 = vmul.f32 %v3128_v29, %v8082_v1  ;;  %s8409_s0 = sld [smem:[#allocation7 + $0x46]] }
 0x30c   : > { %2809 = vrot.lane.b32.xlu0 %v2805_v42, %s5303_s8  ;;  %v3324_v28 = vstv %s4790_s3  ;;  %s8419_s24 = sld [smem:[#allocation7 + $0xf]] }
 0x30d   : > { %2811 = vrot.lane.b32.xlu1 %v2806_v36, %s5303_s8  ;;  %v3148_v36 = vstv %s4775_s10  ;;  %s8431_s14 = sld [smem:[#allocation7 + $0x47]] }
 0x30e   : > { %v3150_v42 = vmul.f32 %v3148_v36, %v8120_v16  ;;  %v3149_v24 = vmul.f32 %v3148_v36, %v8128_v54  ;;  %s8438_s10 = sld [smem:[#allocation7 + $0x15]] }
 0x30f   : > { %s8462_s20 = sld [smem:[#allocation7 + $0x4a]] }
 0x310   : > { %2835 = vrot.lane.b32.xlu0 %v2831_v17, %s10108_s15  ;;  %s8494_s19 = sld [smem:[#allocation7 + $0x21]] }
 0x311   : > { %2837 = vrot.lane.b32.xlu1 %v2832_v30, %s10108_s15  ;;  %v3162_v30 = vstv %s4776_s23  ;;  %s8443_s23 = sld [smem:[#allocation7 + $0x1b]] }
 0x312   : > { %v3164_v17 = vmul.f32 %v3162_v30, %v8120_v16  ;;  %v3163_v6 = vmul.f32 %v3162_v30, %v8128_v54  ;;  %v3372_v30 = vstv %s4794_s27  ;;  %s8532_s3 = sld [smem:[#allocation7 + $0x5c]] }
 0x313   : > { %s10109_s27 = sld [smem:[#allocation16_spill]] }
 0x314   : > { %2849 = vrot.lane.b32.xlu0 %v2845_v40, %s5303_s8 }
 0x315   : > { %2851 = vrot.lane.b32.xlu1 %v2846_v56, %s5303_s8  ;;  %v3182_v56 = vstv %s4778_s25  ;;  %s8451_s25 = sld [smem:[#allocation7 + $0x49]] }
 0x316   : > { %v3184_v40 = vmul.f32 %v3182_v56, %v8149_v51  ;;  %v3183_v45 = vmul.f32 %v3182_v56, %v8155_v58 }
 0x318   : > { %2869 = vrot.lane.b32.xlu0 %v2865_v52, %s10108_s15 }
 0x319   : > { %2871 = vrot.lane.b32.xlu1 %v2866_v22, %s10108_s15  ;;  %v3196_v22 = vstv %s4779_s6  ;;  %s8457_s6 = sld [smem:[#allocation7 + $0x18]] }
 0x31a   : > { %v3198_v11 = vmul.f32 %v3196_v22, %v8149_v51 }
 0x31c   : > { %2883 = vrot.lane.b32.xlu0 %v2879_v25, %s5303_s8  ;;  %v3197_v25 = vmul.f32 %v3196_v22, %v8155_v58 }
 0x31d   : > { %2885 = vrot.lane.b32.xlu1 %v2880_v39, %s5303_s8 }
 0x320   : > { %2903 = vrot.lane.b32.xlu0 %v2899_v5, %s10108_s15  ;;  %v3218_v5 = vmul.f32 %v3216_v13, %v8170_v23 }
 0x321   : > { %2905 = vrot.lane.b32.xlu1 %v2900_v9, %s10108_s15 }
 0x324   : > { %2917 = vrot.lane.b32.xlu0 %v2913_v27, %s5303_s8  ;;  %v3230_v27 = vstv %s4782_s12  ;;  %s8478_s12 = sld [smem:[#allocation7 + $0x1e]] }
 0x325   : > { %2919 = vrot.lane.b32.xlu1 %v2914_v31, %s5303_s8  ;;  %v3217_v31 = vmul.f32 %v3216_v13, %v8175_v10  ;;  %v3231_v4 = vmul.f32 %v3230_v27, %v8175_v10 }
 0x328   : > { %2937 = vrot.lane.b32.xlu0 %v2933_v18, %s10108_s15 }
 0x329   : > { %2939 = vrot.lane.b32.xlu1 %v2934_v62, %s10108_s15  ;;  %v3232_v62 = vmul.f32 %v3230_v27, %v8170_v23 }
 0x32c   : > { %2951 = vrot.lane.b32.xlu0 %v2947_v43, %s5303_s8 }
 0x32d   : > { %2953 = vrot.lane.b32.xlu1 %v2948_v46, %s5303_s8  ;;  %v3256_v46 = vstv %s4784_s16  ;;  %s8484_s16 = sld [smem:[#allocation7 + $0x52]] }
 0x32e   : > { %v3258_v33 = vmul.f32 %v3256_v46, %v8087_v21 }
 0x330   : > { %2971 = vrot.lane.b32.xlu0 %v2967_v20, %s10108_s15  ;;  %v3257_v20 = vmul.f32 %v3256_v46, %v8082_v1  ;;  %v3426_v46 = vstv %s4799_s13  ;;  %s10110_s13 = sld [smem:[#allocation25_spill]] }
 0x331   : > { %2973 = vrot.lane.b32.xlu1 %v2968_v2, %s10108_s15 }
 0x334   : > { %2985 = vrot.lane.b32.xlu0 %v2981_v8, %s5303_s8  ;;  %v3272_v8 = vmul.f32 %v3270_v38, %v8087_v21 }
 0x335   : > { %2987 = vrot.lane.b32.xlu1 %v2982_v26, %s5303_s8 }
 0x338   : > { %3005 = vrot.lane.b32.xlu0 %v3001_v50, %s10108_s15  ;;  %v3290_v50 = vstv %s4787_s21  ;;  %s8500_s21 = sld [smem:[#allocation7 + $0x53]] }
 0x339   : > { %3007 = vrot.lane.b32.xlu1 %v3002_v47, %s10108_s15  ;;  %v3271_v47 = vmul.f32 %v3270_v38, %v8082_v1  ;;  %v3291_v3 = vmul.f32 %v3290_v50, %v8128_v54  ;;  %v3428_v38 = vmul.f32 %v3426_v46, %v8120_v16 }
 0x33c   : > { %3019 = vrot.lane.b32.xlu0 %v3015_v48, %s5303_s8 }
 0x33d   : > { %3021 = vrot.lane.b32.xlu1 %v3016_v37, %s5303_s8  ;;  %v3292_v37 = vmul.f32 %v3290_v50, %v8120_v16 }
 0x340   : > { %3039 = vrot.lane.b32.xlu0 %v3035_v60, %s10108_s15 }
 0x341   : > { %3041 = vrot.lane.b32.xlu1 %v3036_v57, %s10108_s15  ;;  %v3304_v57 = vstv %s4788_s7  ;;  %s8517_s7 = sld [smem:[#allocation7 + $0x5b]] }
 0x342   : > { %v3306_v41 = vmul.f32 %v3304_v57, %v8120_v16 }
 0x344   : > { %3053 = vrot.lane.b32.xlu0 %v3049_v7, %s5303_s8  ;;  %v3305_v7 = vmul.f32 %v3304_v57, %v8128_v54 }
 0x345   : > { %3055 = vrot.lane.b32.xlu1 %v3050_v49, %s5303_s8 }
 0x348   : > { %3073 = vrot.lane.b32.xlu0 %v3069_v44, %s10108_s15  ;;  %v3326_v44 = vmul.f32 %v3324_v28, %v8149_v51 }
 0x349   : > { %3075 = vrot.lane.b32.xlu1 %v3070_v32, %s10108_s15 }
 0x34c   : > { %3087 = vrot.lane.b32.xlu0 %v3083_v34, %s5303_s8  ;;  %v3338_v34 = vstv %s4791_s2  ;;  %s8539_s2 = sld [smem:[#allocation7 + $0x64]] }
 0x34d   : > { %3089 = vrot.lane.b32.xlu1 %v3084_v59, %s5303_s8  ;;  %v3325_v59 = vmul.f32 %v3324_v28, %v8155_v58  ;;  %v3339_v29 = vmul.f32 %v3338_v34, %v8155_v58  ;;  %v2716_v28 = vstv %s8371_s26 }
 0x350   : > { %3119 = vrot.lane.b32.xlu0 %v3115_v61, %s10108_s15 }
 0x351   : > { %3121 = vrot.lane.b32.xlu1 %v3116_v12, %s10108_s15  ;;  %v3340_v12 = vmul.f32 %v3338_v34, %v8149_v51 }
 0x354   : > { %3133 = vrot.lane.b32.xlu0 %v3129_v14, %s5303_s8 }
 0x355   : > { %3135 = vrot.lane.b32.xlu1 %v3130_v63, %s5303_s8  ;;  %v3358_v63 = vstv %s4793_s4  ;;  %s8543_s4 = sld [smem:[#allocation8]] }
 0x356   : > { %v3360_v36 = vmul.f32 %v3358_v63, %v8170_v23 }
 0x358   : > { %3153 = vrot.lane.b32.xlu0 %v3149_v24, %s10108_s15  ;;  %v3359_v24 = vmul.f32 %v3358_v63, %v8175_v10 }
 0x359   : > { %3155 = vrot.lane.b32.xlu1 %v3150_v42, %s10108_s15 }
 0x35c   : > { %3167 = vrot.lane.b32.xlu0 %v3163_v6, %s5303_s8  ;;  %v3374_v6 = vmul.f32 %v3372_v30, %v8170_v23 }
 0x35d   : > { %3169 = vrot.lane.b32.xlu1 %v3164_v17, %s5303_s8 }
 0x360   : > { %3187 = vrot.lane.b32.xlu0 %v3183_v45, %s10108_s15  ;;  %v3392_v45 = vstv %s4796_s9  ;;  %s8555_s9 = sld [smem:[#allocation7 + $0x65]] }
 0x361   : > { %3189 = vrot.lane.b32.xlu1 %v3184_v40, %s10108_s15  ;;  %v3373_v40 = vmul.f32 %v3372_v30, %v8175_v10  ;;  %v3393_v13 = vmul.f32 %v3392_v45, %v8082_v1  ;;  %v2858_v30 = vstv %s8382_s5  ;;  %s4825_s5 = sld [smem:[#allocation7 + $0x56]] }
 0x362   : > { %v8274_v39 = vpop.permute.xlu0 %2693 }
 0x363   : > { %v8271_v52 = vpop.permute.xlu1 %2695 }
 0x364   : > { %3201 = vrot.lane.b32.xlu0 %v3197_v25, %s5303_s8 }
 0x365   : > { %3203 = vrot.lane.b32.xlu1 %v3198_v11, %s5303_s8  ;;  %v3394_v11 = vmul.f32 %v3392_v45, %v8087_v21  ;;  %v3474_v45 = vstv %s8388_s18  ;;  %s4827_s18 = sld [smem:[#allocation7 + $0x5e]] }
 0x366   : > { %v8282_v53 = vpop.permute.xlu0 %2707 }
 0x367   : > { %v8279_v9 = vpop.permute.xlu1 %2709 }
 0x368   : > { %3221 = vrot.lane.b32.xlu0 %v3217_v31, %s10108_s15 }
 0x369   : > { %3223 = vrot.lane.b32.xlu1 %v3218_v5, %s10108_s15  ;;  %v3406_v5 = vstv %s4797_s11  ;;  %s363_s11 = sand.u32 1, %s10109_s27  }
 0x36a   : > { %v8290_v18 = vpop.permute.xlu0 %2727  ;;  %v3408_v27 = vmul.f32 %v3406_v5, %v8087_v21 }
 0x36b   : > { %v8287_v19 = vpop.permute.xlu1 %2729 }
 0x36c   : > { %3235 = vrot.lane.b32.xlu0 %v3231_v4, %s5303_s8  ;;  %v3407_v4 = vmul.f32 %v3406_v5, %v8082_v1 }
 0x36d   : > { %3237 = vrot.lane.b32.xlu1 %v3232_v62, %s5303_s8 }
 0x36e   : > { %v8298_v2 = vpop.permute.xlu0 %2741 }
 0x36f   : > { %v8295_v43 = vpop.permute.xlu1 %2743 }
 0x370   : > { %3261 = vrot.lane.b32.xlu0 %v3257_v20, %s10108_s15 }
 0x371   : > { %3263 = vrot.lane.b32.xlu1 %v3258_v33, %s10108_s15  ;;  %v2684_v33 = vstv %s2683_s22  ;;  %s8571_s22 = sld [smem:[#allocation7 + $0x4c]] }
 0x372   : > { %v8306_v15 = vpop.permute.xlu0 %2761 }
 0x373   : > { %v8303_v26 = vpop.permute.xlu1 %2763 }
 0x374   : > { %3275 = vrot.lane.b32.xlu0 %v3271_v47, %s5303_s8  ;;  %v2685_v47 = vmul.f32 %v2684_v33, %v8082_v1 }
 0x375   : > { %3277 = vrot.lane.b32.xlu1 %v3272_v8, %s5303_s8  ;;  %v2686_v8 = vmul.f32 %v2684_v33, %v8087_v21  ;;  %v2750_v33 = vstv %s8401_s30  ;;  %s4830_s30 = sld [smem:[#allocation7 + $0x67]] }
 0x376   : > { %v8314_v48 = vpop.permute.xlu0 %2775 }
 0x377   : > { %v8311_v0 = vpop.permute.xlu1 %2777  ;;  %v2700_v57 = vadd.f32 %v8271_v52, %v2686_v8  ;;  %v2859_v8 = vmul.f32 %v2858_v30, %v8128_v54 }
 0x378   : > { %3295 = vrot.lane.b32.xlu0 %v3291_v3, %s10108_s15  ;;  %v3440_v3 = vstv %s8365_s29  ;;  %s4571_s29 = sshll.u32 %s363_s11, 6 }
 0x379   : > { %3297 = vrot.lane.b32.xlu1 %v3292_v37, %s10108_s15  ;;  %v3427_v37 = vmul.f32 %v3426_v46, %v8128_v54  ;;  %v2714_v34 = vadd.f32 %v8279_v9, %v2700_v57  ;;  %s8589_s26 = scalar_lea.vmem [#allocation10], %s4571_s29  ;;  %s8767_s29 = sld [smem:[#allocation7 + $0x3c]] }
 0x37a   : > { %v8322_v49 = vpop.permute.xlu0 %2795 }
 0x37b   : > { %v8319_v60 = vpop.permute.xlu1 %2797 }
 0x37c   : > { %3309 = vrot.lane.b32.xlu0 %v3305_v7, %s5303_s8  ;;  %v2826_v7 = vstv %s8368_s17  ;;  %s4822_s17 = sld [smem:[#allocation7 + $0x4d]] }
 0x37d   : > { %3311 = vrot.lane.b32.xlu1 %v3306_v41, %s5303_s8  ;;  %v2699_v41 = vadd.f32 %v8274_v39, %v2685_v47  ;;  %v3441_v39 = vmul.f32 %v3440_v3, %v8128_v54  ;;  %v2828_v63 = vmul.f32 %v2826_v7, %v8087_v21  ;;  %v2827_v9 = vmul.f32 %v2826_v7, %v8082_v1 }
 0x37e   : > { %v8330_v35 = vpop.permute.xlu0 %2809  ;;  %v3475_v7 = vmul.f32 %v3474_v45, %v8155_v58 }
 0x37f   : > { %v8327_v32 = vpop.permute.xlu1 %2811  ;;  %v2713_v52 = vadd.f32 %v8282_v53, %v2699_v41 }
 0x380   : > { %3329 = vrot.lane.b32.xlu0 %v3325_v59, %s10108_s15  ;;  %v3442_v59 = vmul.f32 %v3440_v3, %v8120_v16 }
 0x381   : > { %3331 = vrot.lane.b32.xlu1 %v3326_v44, %s10108_s15 }
 0x382   : > { %v8338_v61 = vpop.permute.xlu0 %2835 }
 0x383   : > { %v8335_v55 = vpop.permute.xlu1 %2837  ;;  %v2841_v5 = vadd.f32 %v8338_v61, %v2827_v9  ;;  %v2860_v61 = vmul.f32 %v2858_v30, %v8120_v16  ;;  %v3508_v9 = vstv %s8431_s14  ;;  %s4834_s14 = sld [smem:[#allocation7 + $0x50]] }
 0x384   : > { %3343 = vrot.lane.b32.xlu0 %v3339_v29, %s5303_s8  ;;  %v3460_v29 = vstv %s8379_s1  ;;  %v2842_v53 = vadd.f32 %v8335_v55, %v2828_v63  ;;  %v2962_v55 = vstv %s8397_s28  ;;  %s4824_s1 = sld [smem:[#allocation7 + $0x55]] }
 0x385   : > { %3345 = vrot.lane.b32.xlu1 %v3340_v12, %s5303_s8  ;;  %v2964_v41 = vmul.f32 %v2962_v55, %v8087_v21  ;;  %s4828_s28 = sld [smem:[#allocation7 + $0x5f]] }
 0x386   : > { %v8346_v42 = vpop.permute.xlu0 %2849 }
 0x387   : > { %v8343_v14 = vpop.permute.xlu1 %2851 }
 0x388   : > { %3363 = vrot.lane.b32.xlu0 %v3359_v24, %s10108_s15  ;;  %v2717_v24 = vmul.f32 %v2716_v28, %v8128_v54  ;;  %v2856_v46 = vadd.f32 %v8343_v14, %v2842_v53  ;;  %v3476_v14 = vmul.f32 %v3474_v45, %v8149_v51  ;;  %v2751_v53 = vmul.f32 %v2750_v33, %v8155_v58 }
 0x389   : > { %3365 = vrot.lane.b32.xlu1 %v3360_v36, %s10108_s15  ;;  %v2718_v36 = vmul.f32 %v2716_v28, %v8120_v16 }
 0x38a   : > { %v8354_v56 = vpop.permute.xlu0 %2869  ;;  %v2862_v28 = vadd.f32 %v2860_v61, %v2856_v46 }
 0x38b   : > { %v8351_v17 = vpop.permute.xlu1 %2871 }
 0x38c   : > { %3377 = vrot.lane.b32.xlu0 %v3373_v40, %s5303_s8  ;;  %v3462_v40 = vmul.f32 %v3460_v29, %v8149_v51 }
 0x38d   : > { %3379 = vrot.lane.b32.xlu1 %v3374_v6, %s5303_s8 }
 0x38e   : > { %v8362_v25 = vpop.permute.xlu0 %2883 }
 0x38f   : > { %v8359_v22 = vpop.permute.xlu1 %2885 }
 0x390   : > { %3397 = vrot.lane.b32.xlu0 %v3393_v13, %s10108_s15  ;;  %v2719_v13 = vadd.f32 %v2717_v24, %v2713_v52 }
 0x391   : > { %3399 = vrot.lane.b32.xlu1 %v3394_v11, %s10108_s15  ;;  %v2720_v11 = vadd.f32 %v2718_v36, %v2714_v34  ;;  %v2994_v34 = vstv %s8419_s24  ;;  %s4833_s24 = sld [smem:[#allocation7 + $0x4f]] }
 0x392   : > { %v8376_v62 = vpop.permute.xlu0 %2903  ;;  %v2733_v57 = vadd.f32 %v8290_v18, %v2719_v13  ;;  %v2996_v45 = vmul.f32 %v2994_v34, %v8120_v16 }
 0x393   : > { %v8373_v31 = vpop.permute.xlu1 %2905  ;;  %v2734_v3 = vadd.f32 %v8287_v19, %v2720_v11  ;;  %v2892_v11 = vstv %s8438_s10  ;;  %s8666_s10 = sld [smem:[#allocation7 + $0x58]] }
 0x394   : > { %3411 = vrot.lane.b32.xlu0 %v3407_v4, %s5303_s8  ;;  %v3461_v4 = vmul.f32 %v3460_v29, %v8155_v58  ;;  %v2747_v18 = vadd.f32 %v8298_v2, %v2733_v57  ;;  %v2752_v29 = vmul.f32 %v2750_v33, %v8149_v51  ;;  %v2876_v2 = vadd.f32 %v8351_v17, %v2862_v28 }
 0x395   : > { %3413 = vrot.lane.b32.xlu1 %v3408_v27, %s5303_s8  ;;  %v2748_v19 = vadd.f32 %v8295_v43, %v2734_v3  ;;  %v3028_v3 = vstv %s8457_s6  ;;  %v2784_v57 = vstv %s8443_s23  ;;  %s4771_s23 = sld [smem:[#allocation7 + $0x24]] }
 0x396   : > { %v8392_v50 = vpop.permute.xlu0 %2917  ;;  %v2753_v46 = vadd.f32 %v2751_v53, %v2747_v18  ;;  %v2890_v17 = vadd.f32 %v8359_v22, %v2876_v2  ;;  %v3554_v22 = vstv %s8462_s20  ;;  %v2786_v53 = vmul.f32 %v2784_v57, %v8170_v23  ;;  %s8679_s6 = sld [smem:[#allocation7 + $0x27]] }
 0x397   : > { %v8385_v20 = vpop.permute.xlu1 %2919  ;;  %v3556_v2 = vmul.f32 %v3554_v22, %v8087_v21  ;;  %s8682_s20 = sld [smem:[#allocation7 + $0x2d]] }
 0x398   : > { %3431 = vrot.lane.b32.xlu0 %v3427_v37, %s10108_s15  ;;  %v3494_v37 = vstv %s8409_s0  ;;  %v2767_v28 = vadd.f32 %v8306_v15, %v2753_v46  ;;  %s4831_s0 = sld [smem:[#allocation7 + $0x68]] }
 0x399   : > { %3433 = vrot.lane.b32.xlu1 %v3428_v38, %s10108_s15  ;;  %v2855_v38 = vadd.f32 %v8346_v42, %v2841_v5  ;;  %v3496_v24 = vmul.f32 %v3494_v37, %v8170_v23  ;;  %v3495_v43 = vmul.f32 %v3494_v37, %v8175_v10  ;;  %v2995_v5 = vmul.f32 %v2994_v34, %v8128_v54 }
 0x39a   : > { %v8413_v12 = vpop.permute.xlu0 %2937 }
 0x39b   : > { %v8406_v44 = vpop.permute.xlu1 %2939  ;;  %v2861_v52 = vadd.f32 %v2859_v8, %v2855_v38  ;;  %v3510_v8 = vmul.f32 %v3508_v9, %v8170_v23 }
 0x39c   : > { %3445 = vrot.lane.b32.xlu0 %v3441_v39, %s5303_s8 }
 0x39d   : > { %3447 = vrot.lane.b32.xlu1 %v3442_v59, %s5303_s8  ;;  %v2963_v59 = vmul.f32 %v2962_v55, %v8082_v1  ;;  %v2875_v55 = vadd.f32 %v8354_v56, %v2861_v52  ;;  %v3509_v56 = vmul.f32 %v3508_v9, %v8175_v10  ;;  %v3029_v9 = vmul.f32 %v3028_v3, %v8155_v58 }
 0x39e   : > { %v8434_v27 = vpop.permute.xlu0 %2951 }
 0x39f   : > { %v8427_v6 = vpop.permute.xlu1 %2953 }
 0x3a0   : > { %3465 = vrot.lane.b32.xlu0 %v3461_v4, %s10108_s15  ;;  %v2754_v4 = vadd.f32 %v2752_v29, %v2748_v19 }
 0x3a1   : > { %3467 = vrot.lane.b32.xlu1 %v3462_v40, %s10108_s15 }
 0x3a2   : > { %v2972_v42 = vpop.permute.xlu0 %2971 }
 0x3a3   : > { %v2974_v47 = vpop.permute.xlu1 %2973  ;;  %v2977_v63 = vadd.f32 %v2972_v42, %v2963_v59  ;;  %v2893_v42 = vmul.f32 %v2892_v11, %v8155_v58 }
 0x3a4   : > { %v2978_v39 = vadd.f32 %v2974_v47, %v2964_v41  ;;  %3479 = vrot.lane.b32.xlu0 %v3475_v7, %s5303_s8  ;;  %v3540_v47 = vstv %s8451_s25  ;;  %v2894_v41 = vmul.f32 %v2892_v11, %v8149_v51  ;;  %v2768_v7 = vadd.f32 %v8303_v26, %v2754_v4  ;;  %s8676_s25 = sld [smem:[#allocation7 + $0x59]] }
 0x3a5   : > { %3481 = vrot.lane.b32.xlu1 %v3476_v14, %s5303_s8  ;;  %v2889_v14 = vadd.f32 %v8362_v25, %v2875_v55  ;;  %v3542_v25 = vmul.f32 %v3540_v47, %v8087_v21  ;;  %v3541_v52 = vmul.f32 %v3540_v47, %v8082_v1  ;;  %v2781_v26 = vadd.f32 %v8314_v48, %v2767_v28 }
 0x3a6   : > { %v2986_v40 = vpop.permute.xlu0 %2985  ;;  %v2896_v34 = vadd.f32 %v2894_v41, %v2890_v17  ;;  %v2782_v29 = vadd.f32 %v8311_v0, %v2768_v7  ;;  %v3574_v11 = vstv %s8484_s16  ;;  %v3555_v55 = vmul.f32 %v3554_v22, %v8082_v1  ;;  %s8693_s16 = sld [smem:[#allocation7 + $0x30]] }
 0x3a7   : > { %v2988_v36 = vpop.permute.xlu1 %2987  ;;  %v2991_v13 = vadd.f32 %v2986_v40, %v2977_v63  ;;  %v2895_v15 = vadd.f32 %v2893_v42, %v2889_v14  ;;  %v2926_v40 = vstv %s8478_s12  ;;  %s8691_s12 = sld [smem:[#allocation7 + $0x61]] }
 0x3a8   : > { %v2992_v30 = vadd.f32 %v2988_v36, %v2978_v39  ;;  %3499 = vrot.lane.b32.xlu0 %v3495_v43, %s10108_s15  ;;  %v3030_v39 = vmul.f32 %v3028_v3, %v8149_v51  ;;  %v2910_v48 = vadd.f32 %v8373_v31, %v2896_v34  ;;  %v3062_v31 = vstv %s8494_s19  ;;  %s8697_s19 = sld [smem:[#allocation7 + $0x2a]] }
 0x3a9   : > { %3501 = vrot.lane.b32.xlu1 %v3496_v24, %s10108_s15  ;;  %v2997_v61 = vadd.f32 %v2995_v5, %v2991_v13  ;;  %v2788_v13 = vadd.f32 %v2786_v53, %v2782_v29  ;;  %v2909_v4 = vadd.f32 %v8376_v62, %v2895_v15  ;;  %v2927_v62 = vmul.f32 %v2926_v40, %v8175_v10 }
 0x3aa   : > { %v2998_v33 = vadd.f32 %v2996_v45, %v2992_v30  ;;  %v3006_v37 = vpop.permute.xlu0 %3005  ;;  %v2785_v30 = vmul.f32 %v2784_v57, %v8175_v10  ;;  %v3064_v41 = vmul.f32 %v3062_v31, %v8170_v23  ;;  %v3063_v7 = vmul.f32 %v3062_v31, %v8175_v10 }
 0x3ab   : > { %v3008_v38 = vpop.permute.xlu1 %3007  ;;  %v3011_v19 = vadd.f32 %v3006_v37, %v2997_v61  ;;  %v2923_v17 = vadd.f32 %v8392_v50, %v2909_v4  ;;  %v3576_v37 = vmul.f32 %v3574_v11, %v8120_v16  ;;  %v3106_v4 = vstv %s8543_s4  ;;  %s8739_s4 = sld [smem:[#allocation7 + $0x39]] }
 0x3ac   : > { %v3012_v59 = vadd.f32 %v3008_v38, %v2998_v33  ;;  %3513 = vrot.lane.b32.xlu0 %v3509_v56, %s5303_s8  ;;  %v2787_v5 = vadd.f32 %v2785_v30, %v2781_v26  ;;  %v2924_v33 = vadd.f32 %v8385_v20, %v2910_v48  ;;  %v2928_v38 = vmul.f32 %v2926_v40, %v8170_v23 }
 0x3ad   : > { %3515 = vrot.lane.b32.xlu1 %v3510_v8, %s5303_s8  ;;  %v3588_v8 = vstv %s8500_s21  ;;  %v3575_v56 = vmul.f32 %v3574_v11, %v8128_v54  ;;  %v2802_v20 = vadd.f32 %v8319_v60, %v2788_v13  ;;  %v2929_v60 = vadd.f32 %v2927_v62, %v2923_v17  ;;  %s8702_s21 = sld [smem:[#allocation7 + $0x62]] }
 0x3ae   : > { %v3020_v36 = vpop.permute.xlu0 %3019  ;;  %v2801_v3 = vadd.f32 %v8322_v49, %v2787_v5  ;;  %v2930_v42 = vadd.f32 %v2928_v38, %v2924_v33 }
 0x3af   : > { %v3022_v18 = vpop.permute.xlu1 %3021  ;;  %v3025_v24 = vadd.f32 %v3020_v36, %v3011_v19  ;;  %v2816_v28 = vadd.f32 %v8327_v32, %v2802_v20  ;;  %v3590_v19 = vmul.f32 %v3588_v8, %v8120_v16  ;;  %v2943_v26 = vadd.f32 %v8413_v12, %v2929_v60  ;;  %v5137_v20 = vld [vmem:[%s10110_s13 + $0x8] sm:$0xff] }
 0x3b0   : > { %v3026_v63 = vadd.f32 %v3022_v18, %v3012_v59  ;;  %3545 = vrot.lane.b32.xlu0 %v3541_v52, %s10108_s15  ;;  %v2815_v59 = vadd.f32 %v8330_v35, %v2801_v3  ;;  %v3589_v52 = vmul.f32 %v3588_v8, %v8128_v54  ;;  %v2944_v32 = vadd.f32 %v8406_v44, %v2930_v42 }
 0x3b1   : > { %3547 = vrot.lane.b32.xlu1 %v3542_v25, %s10108_s15  ;;  %v3031_v45 = vadd.f32 %v3029_v9, %v3025_v24  ;;  %v2820_v35 = vrot.slane %v2816_v28, 7  ;;  %v2957_v53 = vadd.f32 %v8434_v27, %v2943_v26  ;;  %v3682_v28 = vstv %s8571_s22  ;;  %s8754_s22 = sld [smem:[#allocation7 + $0x6d]] }
 0x3b2   : > { %v3032_v0 = vadd.f32 %v3030_v39, %v3026_v63  ;;  %v3040_v46 = vpop.permute.xlu0 %3039  ;;  %v3608_v39 = vstv %s8517_s7  ;;  %v2819_v29 = vrot.slane %v2815_v59, 7  ;;  %v2958_v63 = vadd.f32 %v8427_v6, %v2944_v32  ;;  %s8713_s7 = sld [smem:[#allocation7 + $0x36]] }
 0x3b3   : > { %v3042_v43 = vpop.permute.xlu1 %3041  ;;  %v3045_v47 = vadd.f32 %v3040_v46, %v3031_v45  ;;  %v3610_v9 = vmul.f32 %v3608_v39, %v8149_v51  ;;  %v3609_v40 = vmul.f32 %v3608_v39, %v8155_v58  ;;  %v3684_v60 = vmul.f32 %v3682_v28, %v8087_v21 }
 0x3b4   : > { %v3046_v61 = vadd.f32 %v3042_v43, %v3032_v0  ;;  %3559 = vrot.lane.b32.xlu0 %v3555_v55, %s5303_s8  ;;  %v3622_v0 = vstv %s8532_s3  ;;  %v2821_v6 = vsel %vm1446_vm11, %v2819_v29, %v2820_v35  ;;  %v3642_v43 = vstv %s8539_s2  ;;  %s8727_s3 = sld [smem:[#allocation7 + $0x6a]] }
 0x3b5   : > { %3561 = vrot.lane.b32.xlu1 %v3556_v2, %s5303_s8  ;;  %v2824_v27 = vsel %vm1446_vm11, 0.0, %v2819_v29  ;;  %v2960_v45 = vadd.f32 %v2958_v63, %v2821_v6  ;;  %v3624_v13 = vmul.f32 %v3622_v0, %v8149_v51  ;;  %v3623_v33 = vmul.f32 %v3622_v0, %v8155_v58  ;;  %s8731_s2 = sld [smem:[#allocation7 + $0x33]] }
 0x3b6   : > { %v3054_v50 = vpop.permute.xlu0 %3053  ;;  %v2959_v5 = vadd.f32 %v2957_v53, %v2824_v27  ;;  %v3644_v62 = vmul.f32 %v3642_v43, %v8170_v23  ;;  %v3716_v32 = vstv %s4824_s1  ;;  %v3730_v63 = vstv %s4825_s5  ;;  %s8781_s1 = sld [smem:[#allocation7 + $0x6e]] }
 0x3b7   : > { %v3056_v14 = vpop.permute.xlu1 %3055  ;;  %v3059_v22 = vadd.f32 %v3054_v50, %v3045_v47  ;;  %v3718_v29 = vmul.f32 %v3716_v32, %v8120_v16  ;;  %v3731_v53 = vmul.f32 %v3730_v63, %v8128_v54  ;;  %v3764_v6 = vstv %s4828_s28  ;;  %s8791_s5 = sld [smem:[#allocation7 + $0x42]] }
 0x3b8   : > { %v3060_v57 = vadd.f32 %v3056_v14, %v3046_v61  ;;  %3579 = vrot.lane.b32.xlu0 %v3575_v56, %s10108_s15  ;;  %v3656_v56 = vstv %s8555_s9  ;;  %s8750_s9 = sld [smem:[#allocation7 + $0x6b]] }
 0x3b9   : > { %3581 = vrot.lane.b32.xlu1 %v3576_v37, %s10108_s15  ;;  %v3065_v34 = vadd.f32 %v3063_v7, %v3059_v22  ;;  %v3643_v37 = vmul.f32 %v3642_v43, %v8175_v10  ;;  %v3658_v42 = vmul.f32 %v3656_v56, %v8170_v23  ;;  %v3657_v7 = vmul.f32 %v3656_v56, %v8175_v10  ;;  %s8806_s28 = sld [smem:[#allocation7 + $0x45]] }
 0x3ba   : > { %v3066_v49 = vadd.f32 %v3064_v41, %v3060_v57  ;;  %v3074_v18 = vpop.permute.xlu0 %3073  ;;  %v5138_v57 = vld [vmem:[%s10110_s13] sm:$0xff]  ;;  %v3766_v43 = vmul.f32 %v3764_v6, %v8149_v51 }
 0x3bb   : > { %v3076_v25 = vpop.permute.xlu1 %3075  ;;  %v3079_v36 = vadd.f32 %v3074_v18, %v3065_v34  ;;  %v3696_v34 = vstv %s4822_s17  ;;  %s8770_s17 = sld [smem:[#allocation7 + $0x3f]] }
 0x3bc   : > { %v3080_v15 = vadd.f32 %v3076_v25, %v3066_v49  ;;  %3593 = vrot.lane.b32.xlu0 %v3589_v52, %s5303_s8  ;;  %v3683_v25 = vmul.f32 %v3682_v28, %v8082_v1  ;;  %v3698_v18 = vmul.f32 %v3696_v34, %v8087_v21  ;;  %v3697_v39 = vmul.f32 %v3696_v34, %v8082_v1 }
 0x3bd   : > { %3595 = vrot.lane.b32.xlu1 %v3590_v19, %s5303_s8  ;;  %v3852_v28 = vstv %s8666_s10  ;;  %s8855_s10 = sld [smem:[#allocation7 + $0x76]] }
 0x3be   : > { %v3088_v30 = vpop.permute.xlu0 %3087  ;;  %v3854_v34 = vmul.f32 %v3852_v28, %v8120_v16 }
 0x3bf   : > { %v3090_v24 = vpop.permute.xlu1 %3089  ;;  %v3093_v12 = vadd.f32 %v3088_v30, %v3079_v36 }
 0x3c0   : > { %v3094_v44 = vadd.f32 %v3090_v24, %v3080_v15  ;;  %3613 = vrot.lane.b32.xlu0 %v3609_v40, %s10108_s15  ;;  %v3717_v15 = vmul.f32 %v3716_v32, %v8128_v54  ;;  %v3732_v24 = vmul.f32 %v3730_v63, %v8120_v16 }
 0x3c1   : > { %3615 = vrot.lane.b32.xlu1 %v3610_v9, %s10108_s15  ;;  %v3097_v2 = vrot.slane %v3093_v12, 1 }
 0x3c2   : > { %v3098_v48 = vrot.slane %v3094_v44, 1  ;;  %v8568_v55 = vpop.permute.xlu0 %3119  ;;  %v3750_v44 = vstv %s4827_s18  ;;  %s8796_s18 = sld [smem:[#allocation7 + $0x73]] }
 0x3c3   : > { %v8563_v11 = vpop.permute.xlu1 %3121  ;;  %v3752_v40 = vmul.f32 %v3750_v44, %v8149_v51  ;;  %v3751_v12 = vmul.f32 %v3750_v44, %v8155_v58  ;;  %v3142_v44 = vstv %s8682_s20  ;;  %s8884_s20 = sld [smem:[#allocation7 + $0x7c]] }
 0x3c4   : > { %v3102_v46 = vsel %vm1597_vm12, %v3098_v48, 0.0  ;;  %v3099_v17 = vsel %vm1597_vm12, %v3097_v2, %v3098_v48  ;;  %3627 = vrot.lane.b32.xlu0 %v3623_v33, %s5303_s8  ;;  %v3784_v2 = vstv %s4830_s30  ;;  %v3798_v33 = vstv %s4831_s0  ;;  %s8814_s30 = sld [smem:[#allocation7 + $0x70]] }
 0x3c5   : > { %v3104_v31 = vadd.f32 %v3102_v46, %v2960_v45  ;;  %3629 = vrot.lane.b32.xlu1 %v3624_v13, %s5303_s8  ;;  %v3103_v38 = vadd.f32 %v3099_v17, %v2959_v5  ;;  %v3765_v45 = vmul.f32 %v3764_v6, %v8155_v58  ;;  %v3786_v5 = vmul.f32 %v3784_v2, %v8170_v23  ;;  %s8820_s0 = sld [smem:[#allocation7 + $0x74]] }
 0x3c6   : > { %v8581_v14 = vpop.permute.xlu0 %3133  ;;  %v3785_v46 = vmul.f32 %v3784_v2, %v8175_v10  ;;  %v3800_v17 = vmul.f32 %v3798_v33, %v8170_v23 }
 0x3c7   : > { %v3108_v61 = vadd.f32 %v3106_v4, %v3104_v31  ;;  %v8578_v8 = vpop.permute.xlu1 %3135  ;;  %v3107_v47 = vadd.f32 %v3106_v4, %v3103_v38 }
 0x3c8   : > { %3647 = vrot.lane.b32.xlu0 %v3643_v37, %s10108_s15 }
 0x3c9   : > { %v4388_v3 = vadd.f32 %v5137_v20, %v3108_v61  ;;  %3649 = vrot.lane.b32.xlu1 %v3644_v62, %s10108_s15  ;;  %v4387_v50 = vadd.f32 %v5138_v57, %v3107_v47  ;;  %v3799_v61 = vmul.f32 %v3798_v33, %v8175_v10  ;;  %v3818_v62 = vstv %s4833_s24  ;;  %s8838_s24 = sld [smem:[#allocation7 + $0x48]] }
 0x3ca   : > { %v8598_v22 = vpop.permute.xlu0 %3153  ;;  %v3820_v37 = vmul.f32 %v3818_v62, %v8087_v21  ;;  %v3819_v20 = vmul.f32 %v3818_v62, %v8082_v1  ;;  %v3388_v62 = vstv %s8697_s19  ;;  %s8911_s19 = sld [smem:[#allocation7 + $0x7d]] }
 0x3cb   : > { %4390 = vst.msk [vmem:[%s8589_s26 + $0x8] sm:$0xff] %vm440_vm1, %v4388_v3  ;;  %v8593_v41 = vpop.permute.xlu1 %3155  ;;  %4389 = vst.msk [vmem:[%s8589_s26] sm:$0xff] %vm440_vm1, %v4387_v50  ;;  %v3832_v3 = vstv %s4834_s14  ;;  %s8843_s14 = sld [smem:[#allocation7 + $0x71]] }
 0x3cc   : > { %3661 = vrot.lane.b32.xlu0 %v3657_v7, %s5303_s8  ;;  %v3834_v50 = vmul.f32 %v3832_v3, %v8087_v21  ;;  %v3833_v7 = vmul.f32 %v3832_v3, %v8082_v1 }
 0x3cd   : > { %3663 = vrot.lane.b32.xlu1 %v3658_v42, %s5303_s8 }
 0x3ce   : > { %v8607_v49 = vpop.permute.xlu0 %3167 }
 0x3cf   : > { %v8604_v59 = vpop.permute.xlu1 %3169 }
 0x3d0   : > { %3687 = vrot.lane.b32.xlu0 %v3683_v25, %s10108_s15 }
 0x3d1   : > { %3689 = vrot.lane.b32.xlu1 %v3684_v60, %s10108_s15  ;;  %v3110_v60 = vstv %s4771_s23  ;;  %s8858_s23 = sld [smem:[#allocation8 + $0x1]] }
 0x3d2   : > { %v8615_v52 = vpop.permute.xlu0 %3187 }
 0x3d3   : > { %v8612_v19 = vpop.permute.xlu1 %3189 }
 0x3d4   : > { %3701 = vrot.lane.b32.xlu0 %v3697_v39, %s5303_s8  ;;  %v3111_v39 = vmul.f32 %v3110_v60, %v8082_v1 }
 0x3d5   : > { %3703 = vrot.lane.b32.xlu1 %v3698_v18, %s5303_s8  ;;  %v3112_v18 = vmul.f32 %v3110_v60, %v8087_v21  ;;  %v3176_v60 = vstv %s8713_s7  ;;  %s8922_s7 = sld [smem:[#allocation7 + $0x7a]] }
 0x3d6   : > { %v8623_v26 = vpop.permute.xlu0 %3201 }
 0x3d7   : > { %v8620_v35 = vpop.permute.xlu1 %3203  ;;  %v3126_v63 = vadd.f32 %v8563_v11, %v3112_v18 }
 0x3d8   : > { %3721 = vrot.lane.b32.xlu0 %v3717_v15, %s10108_s15  ;;  %v3866_v15 = vstv %s8676_s25  ;;  %s8863_s25 = sld [smem:[#allocation7 + $0x51]] }
 0x3d9   : > { %3723 = vrot.lane.b32.xlu1 %v3718_v29, %s10108_s15  ;;  %v3853_v29 = vmul.f32 %v3852_v28, %v8128_v54  ;;  %v3140_v6 = vadd.f32 %v8578_v8, %v3126_v63  ;;  %v3867_v11 = vmul.f32 %v3866_v15, %v8128_v54  ;;  %v3143_v8 = vmul.f32 %v3142_v44, %v8128_v54 }
 0x3da   : > { %v8631_v9 = vpop.permute.xlu0 %3221 }
 0x3db   : > { %v8628_v36 = vpop.permute.xlu1 %3223 }
 0x3dc   : > { %3735 = vrot.lane.b32.xlu0 %v3731_v53, %s5303_s8  ;;  %v3252_v53 = vstv %s8679_s6  ;;  %s8870_s6 = sld [smem:[#allocation7 + $0x77]] }
 0x3dd   : > { %3737 = vrot.lane.b32.xlu1 %v3732_v24, %s5303_s8  ;;  %v3125_v24 = vadd.f32 %v8568_v55, %v3111_v39  ;;  %v3886_v55 = vstv %s8691_s12  ;;  %v3254_v2 = vmul.f32 %v3252_v53, %v8087_v21  ;;  %v3390_v39 = vmul.f32 %v3388_v62, %v8087_v21  ;;  %s8890_s12 = sld [smem:[#allocation7 + $0x5a]] }
 0x3de   : > { %v8639_v0 = vpop.permute.xlu0 %3235  ;;  %v3887_v28 = vmul.f32 %v3886_v55, %v8155_v58 }
 0x3df   : > { %v8636_v30 = vpop.permute.xlu1 %3237 }
 0x3e0   : > { %3755 = vrot.lane.b32.xlu0 %v3751_v12, %s10108_s15  ;;  %v3868_v12 = vmul.f32 %v3866_v15, %v8120_v16 }
 0x3e1   : > { %3757 = vrot.lane.b32.xlu1 %v3752_v40, %s10108_s15 }
 0x3e2   : > { %v8647_v27 = vpop.permute.xlu0 %3261 }
 0x3e3   : > { %v8644_v48 = vpop.permute.xlu1 %3263 }
 0x3e4   : > { %3769 = vrot.lane.b32.xlu0 %v3765_v45, %s5303_s8  ;;  %v3268_v33 = vadd.f32 %v8644_v48, %v3254_v2  ;;  %v3177_v2 = vmul.f32 %v3176_v60, %v8155_v58 }
 0x3e5   : > { %3771 = vrot.lane.b32.xlu1 %v3766_v43, %s5303_s8  ;;  %v3139_v43 = vadd.f32 %v8581_v14, %v3125_v24  ;;  %v3253_v14 = vmul.f32 %v3252_v53, %v8082_v1  ;;  %v3920_v53 = vstv %s8727_s3  ;;  %s8930_s3 = sld [smem:[#allocation7 + $0x7f]] }
 0x3e6   : > { %v8655_v4 = vpop.permute.xlu0 %3275 }
 0x3e7   : > { %v8652_v13 = vpop.permute.xlu1 %3277  ;;  %v3145_v3 = vadd.f32 %v3143_v8, %v3139_v43  ;;  %v3420_v43 = vstv %s8731_s2  ;;  %s8939_s2 = sld [smem:[#allocation7 + $0x80]] }
 0x3e8   : > { %3789 = vrot.lane.b32.xlu0 %v3785_v46, %s10108_s15  ;;  %v3284_v46 = vstv %s8693_s16  ;;  %v3282_v48 = vadd.f32 %v8652_v13, %v3268_v33  ;;  %s8899_s16 = sld [smem:[#allocation7 + $0x79]] }
 0x3e9   : > { %3791 = vrot.lane.b32.xlu1 %v3786_v5, %s10108_s15  ;;  %v3144_v5 = vmul.f32 %v3142_v44, %v8120_v16  ;;  %v3285_v18 = vmul.f32 %v3284_v46, %v8128_v54  ;;  %v3159_v63 = vadd.f32 %v8598_v22, %v3145_v3  ;;  %v3178_v44 = vmul.f32 %v3176_v60, %v8149_v51 }
 0x3ea   : > { %v8663_v38 = vpop.permute.xlu0 %3295  ;;  %v3421_v3 = vmul.f32 %v3420_v43, %v8128_v54 }
 0x3eb   : > { %v8660_v31 = vpop.permute.xlu1 %3297  ;;  %v3173_v22 = vadd.f32 %v8607_v49, %v3159_v63  ;;  %v3422_v49 = vmul.f32 %v3420_v43, %v8120_v16  ;;  %v3454_v63 = vstv %s8767_s29  ;;  %s4865_s29 = sld [smem:[#allocation7 + $0x83]] }
 0x3ec   : > { %3803 = vrot.lane.b32.xlu0 %v3799_v61, %s5303_s8  ;;  %v3888_v61 = vmul.f32 %v3886_v55, %v8149_v51 }
 0x3ed   : > { %3805 = vrot.lane.b32.xlu1 %v3800_v17, %s5303_s8 }
 0x3ee   : > { %v8673_v56 = vpop.permute.xlu0 %3309 }
 0x3ef   : > { %v8670_v47 = vpop.permute.xlu1 %3311 }
 0x3f0   : > { %3823 = vrot.lane.b32.xlu0 %v3819_v20, %s10108_s15  ;;  %v3146_v20 = vadd.f32 %v3144_v5, %v3140_v6  ;;  %v3389_v6 = vmul.f32 %v3388_v62, %v8082_v1  ;;  %v3318_v5 = vstv %s8739_s4  ;;  %v3934_v62 = vstv %s8750_s9  ;;  %s4876_s4 = sld [smem:[#allocation7 + $0x85]] }
 0x3f1   : > { %3825 = vrot.lane.b32.xlu1 %v3820_v37, %s10108_s15  ;;  %v3900_v37 = vstv %s8702_s21  ;;  %s8915_s21 = sld [smem:[#allocation7 + $0x63]] }
 0x3f2   : > { %v8687_v42 = vpop.permute.xlu0 %3329  ;;  %v3902_v15 = vmul.f32 %v3900_v37, %v8149_v51  ;;  %v3160_v13 = vadd.f32 %v8593_v41, %v3146_v20  ;;  %s4864_s9 = sld [smem:[#allocation7 + $0x82]] }
 0x3f3   : > { %v8684_v57 = vpop.permute.xlu1 %3331 }
 0x3f4   : > { %3837 = vrot.lane.b32.xlu0 %v3833_v7, %s5303_s8  ;;  %v3174_v41 = vadd.f32 %v8604_v59, %v3160_v13  ;;  %v3921_v59 = vmul.f32 %v3920_v53, %v8175_v10  ;;  %v3935_v13 = vmul.f32 %v3934_v62, %v8175_v10 }
 0x3f5   : > { %3839 = vrot.lane.b32.xlu1 %v3834_v50, %s5303_s8  ;;  %v3267_v50 = vadd.f32 %v8647_v27, %v3253_v14  ;;  %v3286_v27 = vmul.f32 %v3284_v46, %v8120_v16  ;;  %v3922_v46 = vmul.f32 %v3920_v53, %v8170_v23 }
 0x3f6   : > { %v8706_v32 = vpop.permute.xlu0 %3343 }
 0x3f7   : > { %v8699_v25 = vpop.permute.xlu1 %3345 }
 0x3f8   : > { %3857 = vrot.lane.b32.xlu0 %v3853_v29, %s10108_s15 }
 0x3f9   : > { %3859 = vrot.lane.b32.xlu1 %v3854_v34, %s10108_s15  ;;  %v3281_v34 = vadd.f32 %v8655_v4, %v3267_v50  ;;  %v3901_v4 = vmul.f32 %v3900_v37, %v8155_v58  ;;  %v3966_v50 = vstv %s8754_s22  ;;  %s4877_s22 = sld [smem:[#allocation7 + $0x86]] }
 0x3fa   : > { %v8723_v45 = vpop.permute.xlu0 %3363 }
 0x3fb   : > { %v8718_v40 = vpop.permute.xlu1 %3365 }
 0x3fc   : > { %3871 = vrot.lane.b32.xlu0 %v3867_v11, %s5303_s8  ;;  %v3287_v11 = vadd.f32 %v3285_v18, %v3281_v34 }
 0x3fd   : > { %3873 = vrot.lane.b32.xlu1 %v3868_v12, %s5303_s8  ;;  %v3288_v12 = vadd.f32 %v3286_v27, %v3282_v48  ;;  %v3179_v48 = vadd.f32 %v3177_v2, %v3173_v22  ;;  %v3456_v22 = vmul.f32 %v3454_v63, %v8149_v51 }
 0x3fe   : > { %v8747_v7 = vpop.permute.xlu0 %3377  ;;  %v3301_v60 = vadd.f32 %v8663_v38, %v3287_v11  ;;  %v3210_v38 = vstv %s8770_s17  ;;  %v3980_v11 = vstv %s8781_s1  ;;  %s4855_s17 = sld [smem:[#allocation7 + $0x88]] }
 0x3ff   : > { %v8741_v17 = vpop.permute.xlu1 %3379  ;;  %v3302_v37 = vadd.f32 %v8660_v31, %v3288_v12  ;;  %v3967_v12 = vmul.f32 %v3966_v50, %v8082_v1  ;;  %s4856_s1 = sld [smem:[#allocation7 + $0x89]] }
 0x400   : > { %3891 = vrot.lane.b32.xlu0 %v3887_v28, %s10108_s15  ;;  %v3180_v28 = vadd.f32 %v3178_v44, %v3174_v41 }
 0x401   : > { %3893 = vrot.lane.b32.xlu1 %v3888_v61, %s10108_s15  ;;  %v3316_v27 = vadd.f32 %v8670_v47, %v3302_v37  ;;  %v3968_v47 = vmul.f32 %v3966_v50, %v8087_v21  ;;  %v4244_v37 = vstv %s8796_s18  ;;  %s9000_s18 = sld [smem:[#allocation7 + $0x8e]] }
 0x402   : > { %v3398_v24 = vpop.permute.xlu0 %3397  ;;  %v3194_v53 = vadd.f32 %v8612_v19, %v3180_v28 }
 0x403   : > { %v3400_v29 = vpop.permute.xlu1 %3399  ;;  %v3403_v8 = vadd.f32 %v3398_v24, %v3389_v6  ;;  %v3320_v24 = vmul.f32 %v3318_v5, %v8149_v51 }
 0x404   : > { %v3404_v55 = vadd.f32 %v3400_v29, %v3390_v39  ;;  %3905 = vrot.lane.b32.xlu0 %v3901_v4, %s5303_s8  ;;  %v3936_v39 = vmul.f32 %v3934_v62, %v8170_v23  ;;  %v3315_v29 = vadd.f32 %v8673_v56, %v3301_v60  ;;  %v3319_v4 = vmul.f32 %v3318_v5, %v8155_v58 }
 0x405   : > { %3907 = vrot.lane.b32.xlu1 %v3902_v15, %s5303_s8  ;;  %v3193_v56 = vadd.f32 %v8615_v52, %v3179_v48  ;;  %v3322_v6 = vadd.f32 %v3320_v24, %v3316_v27  ;;  %v3982_v62 = vmul.f32 %v3980_v11, %v8087_v21  ;;  %v3981_v48 = vmul.f32 %v3980_v11, %v8082_v1 }
 0x406   : > { %v3412_v61 = vpop.permute.xlu0 %3411  ;;  %v3321_v2 = vadd.f32 %v3319_v4, %v3315_v29  ;;  %v4246_v29 = vmul.f32 %v4244_v37, %v8087_v21 }
 0x407   : > { %v3414_v14 = vpop.permute.xlu1 %3413  ;;  %v3417_v20 = vadd.f32 %v3412_v61, %v3403_v8  ;;  %v3207_v19 = vadd.f32 %v8623_v26, %v3193_v56  ;;  %v3352_v61 = vstv %s8791_s5  ;;  %v3336_v26 = vadd.f32 %v8684_v57, %v3322_v6  ;;  %s4820_s5 = sld [smem:[#allocation7 + $0x4b]] }
 0x408   : > { %v3418_v33 = vadd.f32 %v3414_v14, %v3404_v55  ;;  %3925 = vrot.lane.b32.xlu0 %v3921_v59, %s10108_s15  ;;  %v3208_v55 = vadd.f32 %v8620_v35, %v3194_v53  ;;  %v3455_v14 = vmul.f32 %v3454_v63, %v8155_v58  ;;  %v3335_v50 = vadd.f32 %v8687_v42, %v3321_v2 }
 0x409   : > { %3927 = vrot.lane.b32.xlu1 %v3922_v46, %s10108_s15  ;;  %v3423_v18 = vadd.f32 %v3421_v3, %v3417_v20  ;;  %v3212_v46 = vmul.f32 %v3210_v38, %v8170_v23  ;;  %v3350_v60 = vadd.f32 %v8699_v25, %v3336_v26  ;;  %v3354_v27 = vmul.f32 %v3352_v61, %v8170_v23 }
 0x40a   : > { %v3424_v34 = vadd.f32 %v3422_v49, %v3418_v33  ;;  %v3432_v15 = vpop.permute.xlu0 %3431  ;;  %v3211_v33 = vmul.f32 %v3210_v38, %v8175_v10  ;;  %v3349_v57 = vadd.f32 %v8706_v32, %v3335_v50  ;;  %v4245_v25 = vmul.f32 %v4244_v37, %v8082_v1 }
 0x40b   : > { %v3434_v31 = vpop.permute.xlu1 %3433  ;;  %v3437_v43 = vadd.f32 %v3432_v15, %v3423_v18  ;;  %v3214_v20 = vadd.f32 %v3212_v46, %v3208_v55  ;;  %v4108_v15 = vstv %s8814_s30  ;;  %v3356_v4 = vadd.f32 %v3354_v27, %v3350_v60  ;;  %s9012_s30 = sld [smem:[#allocation7 + $0x8b]] }
 0x40c   : > { %v3438_v44 = vadd.f32 %v3434_v31, %v3424_v34  ;;  %3939 = vrot.lane.b32.xlu0 %v3935_v13, %s5303_s8  ;;  %v3213_v3 = vadd.f32 %v3211_v33, %v3207_v19  ;;  %v3488_v34 = vstv %s8806_s28  ;;  %v3353_v31 = vmul.f32 %v3352_v61, %v8175_v10  ;;  %s9004_s28 = sld [smem:[#allocation7 + $0x54]] }
 0x40d   : > { %3941 = vrot.lane.b32.xlu1 %v3936_v39, %s5303_s8  ;;  %v3228_v32 = vadd.f32 %v8628_v36, %v3214_v20  ;;  %v3490_v24 = vmul.f32 %v3488_v34, %v8170_v23  ;;  %v3489_v53 = vmul.f32 %v3488_v34, %v8175_v10  ;;  %v4258_v56 = vstv %s8820_s0  ;;  %s9015_s0 = sld [smem:[#allocation7 + $0x4e]] }
 0x40e   : > { %v3446_v5 = vpop.permute.xlu0 %3445  ;;  %v3227_v13 = vadd.f32 %v8631_v9, %v3213_v3  ;;  %v3355_v6 = vadd.f32 %v3353_v31, %v3349_v57  ;;  %v4109_v11 = vmul.f32 %v4108_v15, %v8082_v1  ;;  %v3536_v46 = vstv %s8838_s24  ;;  %s9025_s24 = sld [smem:[#allocation7 + $0x8f]] }
 0x40f   : > { %v3448_v41 = vpop.permute.xlu1 %3447  ;;  %v3451_v8 = vadd.f32 %v3446_v5, %v3437_v43  ;;  %v4122_v33 = vstv %s8843_s14  ;;  %v4259_v26 = vmul.f32 %v4258_v56, %v8082_v1  ;;  %v4000_v57 = vstv %s8855_s10  ;;  %s9029_s14 = sld [smem:[#allocation7 + $0x57]] }
 0x410   : > { %v3452_v52 = vadd.f32 %v3448_v41, %v3438_v44  ;;  %3971 = vrot.lane.b32.xlu0 %v3967_v12, %s10108_s15  ;;  %v3242_v44 = vadd.f32 %v8636_v30, %v3228_v32  ;;  %v3241_v12 = vadd.f32 %v8639_v0, %v3227_v13  ;;  %v4110_v41 = vmul.f32 %v4108_v15, %v8087_v21  ;;  %v4882_v32 = vld [vmem:[%s10110_s13 + $0x10] sm:$0xff]  ;;  %s9043_s10 = sld [smem:[#allocation7 + $0x8c]] }
 0x411   : > { %3973 = vrot.lane.b32.xlu1 %v3968_v47, %s10108_s15  ;;  %v3457_v49 = vadd.f32 %v3455_v14, %v3451_v8  ;;  %v3370_v30 = vadd.f32 %v8718_v40, %v3356_v4  ;;  %v4260_v0 = vmul.f32 %v4258_v56, %v8087_v21  ;;  %v3369_v2 = vadd.f32 %v8723_v45, %v3355_v6 }
 0x412   : > { %v3458_v35 = vadd.f32 %v3456_v22, %v3452_v52  ;;  %v3466_v28 = vpop.permute.xlu0 %3465  ;;  %v3246_v55 = vrot.slane %v3242_v44, 7  ;;  %v3245_v19 = vrot.slane %v3241_v12, 7  ;;  %v4123_v50 = vmul.f32 %v4122_v33, %v8082_v1 }
 0x413   : > { %v3468_v59 = vpop.permute.xlu1 %3467  ;;  %v3471_v42 = vadd.f32 %v3466_v28, %v3457_v49  ;;  %v3384_v5 = vadd.f32 %v8741_v17, %v3370_v30  ;;  %v3383_v40 = vadd.f32 %v8747_v7, %v3369_v2  ;;  %v3538_v49 = vmul.f32 %v3536_v46, %v8087_v21 }
 0x414   : > { %v3472_v18 = vadd.f32 %v3468_v59, %v3458_v35  ;;  %3985 = vrot.lane.b32.xlu0 %v3981_v48, %s5303_s8  ;;  %v3247_v45 = vsel %vm1446_vm11, %v3245_v19, %v3246_v55  ;;  %v3250_v7 = vsel %vm1446_vm11, 0.0, %v3245_v19  ;;  %v3532_v48 = vstv %s8858_s23  ;;  %s9049_s23 = sld [smem:[#allocation7 + $0x5d]] }
 0x415   : > { %3987 = vrot.lane.b32.xlu1 %v3982_v62, %s5303_s8  ;;  %v4124_v62 = vmul.f32 %v4122_v33, %v8087_v21  ;;  %v3386_v37 = vadd.f32 %v3384_v5, %v3247_v45  ;;  %v3385_v28 = vadd.f32 %v3383_v40, %v3250_v7  ;;  %v4001_v56 = vmul.f32 %v4000_v57, %v8128_v54 }
 0x416   : > { %v3480_v38 = vpop.permute.xlu0 %3479  ;;  %v4278_v19 = vstv %s8884_s20  ;;  %s9099_s20 = sld [smem:[#allocation8 + $0x2]] }
 0x417   : > { %v3482_v39 = vpop.permute.xlu1 %3481  ;;  %v3485_v47 = vadd.f32 %v3480_v38, %v3471_v42  ;;  %v3568_v42 = vstv %s8863_s25  ;;  %v4002_v38 = vmul.f32 %v4000_v57, %v8120_v16  ;;  %v4279_v33 = vmul.f32 %v4278_v19, %v8128_v54  ;;  %s9061_s25 = sld [smem:[#allocation7 + $0x60]] }
 0x418   : > { %v3486_v63 = vadd.f32 %v3482_v39, %v3472_v18  ;;  %4249 = vrot.lane.b32.xlu0 %v4245_v25, %s10108_s15  ;;  %v3537_v18 = vmul.f32 %v3536_v46, %v8082_v1  ;;  %v4883_v39 = vld [vmem:[%s10110_s13 + $0x18] sm:$0xff]  ;;  %v3570_v44 = vmul.f32 %v3568_v42, %v8120_v16 }
 0x419   : > { %4251 = vrot.lane.b32.xlu1 %v4246_v29, %s10108_s15  ;;  %v3491_v43 = vadd.f32 %v3489_v53, %v3485_v47 }
 0x41a   : > { %v3492_v36 = vadd.f32 %v3490_v24, %v3486_v63  ;;  %v3500_v22 = vpop.permute.xlu0 %3499  ;;  %v4014_v24 = vstv %s8870_s6  ;;  %s9083_s6 = sld [smem:[#allocation7 + $0x69]] }
 0x41b   : > { %v3502_v9 = vpop.permute.xlu1 %3501  ;;  %v3505_v8 = vadd.f32 %v3500_v22, %v3491_v43  ;;  %v4015_v55 = vmul.f32 %v4014_v24, %v8128_v54 }
 0x41c   : > { %v3506_v52 = vadd.f32 %v3502_v9, %v3492_v36  ;;  %4113 = vrot.lane.b32.xlu0 %v4109_v11, %s10108_s15  ;;  %v3569_v36 = vmul.f32 %v3568_v42, %v8128_v54  ;;  %v4016_v11 = vmul.f32 %v4014_v24, %v8120_v16 }
 0x41d   : > { %4115 = vrot.lane.b32.xlu1 %v4110_v41, %s10108_s15 }
 0x41e   : > { %v3514_v35 = vpop.permute.xlu0 %3513 }
 0x41f   : > { %v3516_v14 = vpop.permute.xlu1 %3515  ;;  %v3519_v59 = vadd.f32 %v3514_v35, %v3505_v8  ;;  %v4280_v8 = vmul.f32 %v4278_v19, %v8120_v16 }
 0x420   : > { %v3520_v61 = vadd.f32 %v3516_v14, %v3506_v52  ;;  %4263 = vrot.lane.b32.xlu0 %v4259_v26, %s5303_s8  ;;  %v3602_v52 = vstv %s8890_s12  ;;  %s4848_s12 = sld [smem:[#allocation7 + $0x75]] }
 0x421   : > { %4265 = vrot.lane.b32.xlu1 %v4260_v0, %s5303_s8  ;;  %v3523_v20 = vrot.slane %v3519_v59, 1  ;;  %v3604_v40 = vmul.f32 %v3602_v52, %v8149_v51  ;;  %v3603_v26 = vmul.f32 %v3602_v52, %v8155_v58 }
 0x422   : > { %v3524_v17 = vrot.slane %v3520_v61, 1  ;;  %v3546_v34 = vpop.permute.xlu0 %3545  ;;  %v4142_v61 = vstv %s8899_s16  ;;  %s4869_s16 = sld [smem:[#allocation7 + $0x72]] }
 0x423   : > { %v3548_v3 = vpop.permute.xlu1 %3547  ;;  %v3551_v13 = vadd.f32 %v3546_v34, %v3537_v18 }
 0x424   : > { %v3528_v60 = vsel %vm1597_vm12, %v3524_v17, 0.0  ;;  %v3525_v31 = vsel %vm1597_vm12, %v3523_v20, %v3524_v17  ;;  %v3552_v25 = vadd.f32 %v3548_v3, %v3538_v49  ;;  %4127 = vrot.lane.b32.xlu0 %v4123_v50, %s5303_s8  ;;  %v4144_v49 = vmul.f32 %v4142_v61, %v8120_v16 }
 0x425   : > { %v3530_v27 = vadd.f32 %v3528_v60, %v3386_v37  ;;  %4129 = vrot.lane.b32.xlu1 %v4124_v62, %s5303_s8  ;;  %v3529_v29 = vadd.f32 %v3525_v31, %v3385_v28  ;;  %v4143_v37 = vmul.f32 %v4142_v61, %v8128_v54  ;;  %v4292_v20 = vstv %s8911_s19  ;;  %s4851_s19 = sld [smem:[#allocation7 + $0x7e]] }
 0x426   : > { %v3560_v53 = vpop.permute.xlu0 %3559  ;;  %v3636_v50 = vstv %s8915_s21  ;;  %v4293_v57 = vmul.f32 %v4292_v20, %v8128_v54  ;;  %v4156_v31 = vstv %s8922_s7  ;;  %s9142_s21 = sld [smem:[#allocation7 + $0x6f]] }
 0x427   : > { %v3534_v15 = vadd.f32 %v3532_v48, %v3530_v27  ;;  %v3562_v63 = vpop.permute.xlu1 %3561  ;;  %v3533_v4 = vadd.f32 %v3532_v48, %v3529_v29  ;;  %v3565_v6 = vadd.f32 %v3560_v53, %v3551_v13  ;;  %v4294_v48 = vmul.f32 %v4292_v20, %v8120_v16  ;;  %s9146_s7 = sld [smem:[#allocation7 + $0x7b]] }
 0x428   : > { %v3566_v47 = vadd.f32 %v3562_v63, %v3552_v25  ;;  %4005 = vrot.lane.b32.xlu0 %v4001_v56, %s10108_s15  ;;  %v3638_v27 = vmul.f32 %v3636_v50, %v8170_v23  ;;  %v3637_v42 = vmul.f32 %v3636_v50, %v8175_v10  ;;  %v4157_v63 = vmul.f32 %v4156_v31, %v8128_v54 }
 0x429   : > { %v4394_v12 = vadd.f32 %v4883_v39, %v3534_v15  ;;  %4007 = vrot.lane.b32.xlu1 %v4002_v38, %s10108_s15  ;;  %v4393_v9 = vadd.f32 %v4882_v32, %v3533_v4  ;;  %v3571_v22 = vadd.f32 %v3569_v36, %v3565_v6  ;;  %v4158_v15 = vmul.f32 %v4156_v31, %v8120_v16 }
 0x42a   : > { %v3572_v43 = vadd.f32 %v3570_v44, %v3566_v47  ;;  %v3580_v0 = vpop.permute.xlu0 %3579  ;;  %v4034_v38 = vstv %s8930_s3  ;;  %s9152_s3 = sld [smem:[#allocation7 + $0x78]] }
 0x42b   : > { %4885 = vst.msk [vmem:[%s8589_s26 + $0x18] sm:$0xff] %vm440_vm1, %v4394_v12  ;;  %v3582_v41 = vpop.permute.xlu1 %3581  ;;  %4884 = vst.msk [vmem:[%s8589_s26 + $0x10] sm:$0xff] %vm440_vm1, %v4393_v9  ;;  %v3585_v2 = vadd.f32 %v3580_v0, %v3571_v22  ;;  %v4036_v47 = vmul.f32 %v4034_v38, %v8149_v51  ;;  %v4035_v44 = vmul.f32 %v4034_v38, %v8155_v58  ;;  %v4048_v12 = vstv %s8939_s2  ;;  %s9156_s2 = sld [smem:[#allocation7 + $0x87]] }
 0x42c   : > { %v3586_v30 = vadd.f32 %v3582_v41, %v3572_v43  ;;  %4019 = vrot.lane.b32.xlu0 %v4015_v55, %s5303_s8  ;;  %v4050_v41 = vmul.f32 %v4048_v12, %v8149_v51 }
 0x42d   : > { %4021 = vrot.lane.b32.xlu1 %v4016_v11, %s5303_s8  ;;  %v4049_v11 = vmul.f32 %v4048_v12, %v8155_v58 }
 0x42e   : > { %v3594_v46 = vpop.permute.xlu0 %3593 }
 0x42f   : > { %v3596_v5 = vpop.permute.xlu1 %3595  ;;  %v3599_v35 = vadd.f32 %v3594_v46, %v3585_v2 }
 0x430   : > { %v3600_v14 = vadd.f32 %v3596_v5, %v3586_v30  ;;  %4283 = vrot.lane.b32.xlu0 %v4279_v33, %s10108_s15  ;;  %v4312_v30 = vstv %s4876_s4  ;;  %v4176_v5 = vstv %s4864_s9  ;;  %s9166_s4 = sld [smem:[#allocation7 + $0x84]] }
 0x431   : > { %4285 = vrot.lane.b32.xlu1 %v4280_v8, %s10108_s15  ;;  %v3605_v17 = vadd.f32 %v3603_v26, %v3599_v35  ;;  %v4314_v19 = vmul.f32 %v4312_v30, %v8149_v51  ;;  %v4313_v52 = vmul.f32 %v4312_v30, %v8155_v58  ;;  %v4177_v33 = vmul.f32 %v4176_v5, %v8155_v58  ;;  %s9178_s9 = sld [smem:[#allocation7 + $0x81]] }
 0x432   : > { %v3606_v59 = vadd.f32 %v3604_v40, %v3600_v14  ;;  %v3614_v7 = vpop.permute.xlu0 %3613  ;;  %v4178_v14 = vmul.f32 %v4176_v5, %v8149_v51  ;;  %v4326_v40 = vstv %s4877_s22  ;;  %s9190_s22 = sld [smem:[#allocation7 + $0x8d]] }
 0x433   : > { %v3616_v45 = vpop.permute.xlu1 %3615  ;;  %v3619_v3 = vadd.f32 %v3614_v7, %v3605_v17  ;;  %v4328_v35 = vmul.f32 %v4326_v40, %v8149_v51 }
 0x434   : > { %v3620_v62 = vadd.f32 %v3616_v45, %v3606_v59  ;;  %4147 = vrot.lane.b32.xlu0 %v4143_v37, %s10108_s15  ;;  %v4327_v59 = vmul.f32 %v4326_v40, %v8155_v58  ;;  %v4190_v45 = vstv %s4865_s29  ;;  %v4068_v37 = vstv %s4855_s17  ;;  %s9199_s29 = sld [smem:[#allocation7 + $0x8a]] }
 0x435   : > { %4149 = vrot.lane.b32.xlu1 %v4144_v49, %s10108_s15  ;;  %v4192_v49 = vmul.f32 %v4190_v45, %v8149_v51  ;;  %v4191_v7 = vmul.f32 %v4190_v45, %v8155_v58  ;;  %s4881_s17 = sld [smem:[#allocation8 + $0x3]] }
 0x436   : > { %v3628_v34 = vpop.permute.xlu0 %3627 }
 0x437   : > { %v3630_v28 = vpop.permute.xlu1 %3629  ;;  %v3633_v18 = vadd.f32 %v3628_v34, %v3619_v3  ;;  %v4070_v3 = vmul.f32 %v4068_v37, %v8170_v23 }
 0x438   : > { %v3634_v60 = vadd.f32 %v3630_v28, %v3620_v62  ;;  %4297 = vrot.lane.b32.xlu0 %v4293_v57, %s5303_s8  ;;  %v4069_v28 = vmul.f32 %v4068_v37, %v8175_v10 }
 0x439   : > { %4299 = vrot.lane.b32.xlu1 %v4294_v48, %s5303_s8  ;;  %v3639_v25 = vadd.f32 %v3637_v42, %v3633_v18  ;;  %v4082_v48 = vstv %s4856_s1  ;;  %v4346_v18 = vstv %s9000_s18  ;;  %s10111_s1 = sld [smem:[#allocation18_spill]] }
 0x43a   : > { %v3640_v39 = vadd.f32 %v3638_v27, %v3634_v60  ;;  %v3648_v13 = vpop.permute.xlu0 %3647  ;;  %v3678_v60 = vstv %s4820_s5  ;;  %v4084_v57 = vmul.f32 %v4082_v48, %v8170_v23  ;;  %v4083_v31 = vmul.f32 %v4082_v48, %v8175_v10  ;;  %s10112_s5 = sld [smem:[#allocation22_spill]] }
 0x43b   : > { %v3650_v29 = vpop.permute.xlu1 %3649  ;;  %v3653_v24 = vadd.f32 %v3648_v13, %v3639_v25  ;;  %v3680_v42 = vmul.f32 %v3678_v60, %v8087_v21  ;;  %v3710_v13 = vstv %s9004_s28  ;;  %v4347_v38 = vmul.f32 %v4346_v18, %v8175_v10  ;;  %s4427_s28 = sshll.u32 %s8589_s26, 4  ;;  %s9230_s28 = int_to_ptr.vmem [resolvable:$true] %s4427_s28 }
 0x43c   : > { %v3654_v32 = vadd.f32 %v3650_v29, %v3640_v39  ;;  %4161 = vrot.lane.b32.xlu0 %v4157_v63, %s5303_s8  ;;  %v3679_v39 = vmul.f32 %v3678_v60, %v8082_v1  ;;  %v3744_v48 = vstv %s9049_s23  ;;  %s9238_s23 = scalar_lea.sflag [#allocation3], %s363_s11 }
 0x43d   : > { %4163 = vrot.lane.b32.xlu1 %v4158_v15, %s5303_s8  ;;  %v4348_v15 = vmul.f32 %v4346_v18, %v8170_v23 }
 0x43e   : > { %v3662_v56 = vpop.permute.xlu0 %3661 }
 0x43f   : > { %v3664_v4 = vpop.permute.xlu1 %3663  ;;  %v8952_v6 = vadd.f32 %v3662_v56, %v3653_v24  ;;  %v4210_v24 = vstv %s9012_s30  ;;  %v3712_v56 = vmul.f32 %v3710_v13, %v8120_v16  ;;  %s4901_s18 = sshll.u32 %s10111_s1, 10 }
 0x440   : > { %v3668_v53 = vadd.f32 %v3664_v4, %v3654_v32  ;;  %4039 = vrot.lane.b32.xlu0 %v4035_v44, %s10108_s15  ;;  %v4212_v12 = vmul.f32 %v4210_v24, %v8170_v23  ;;  %p10115_p9 = scmp.ne.s32.totalorder %s10112_s5, 0 }
 0x441   : > { %4041 = vrot.lane.b32.xlu1 %v4036_v47, %s10108_s15  ;;  %v3671_v9 = vrot.slane %v8952_v6, 7  ;;  %v3814_v47 = vstv %s9015_s0 }
 0x442   : > { %v3672_v36 = vrot.slane %v3668_v53, 7  ;;  %v8960_v22 = vpop.permute.xlu0 %3687 }
 0x443   : > { %v8957_v43 = vpop.permute.xlu1 %3689  ;;  %v3693_v32 = vadd.f32 %v8960_v22, %v3679_v39  ;;  %v4211_v22 = vmul.f32 %v4210_v24, %v8175_v10 }
 0x444   : > { %v8967_v0 = vsel %vm1446_vm11, %v3671_v9, %v3672_v36  ;;  %4053 = vrot.lane.b32.xlu0 %v4049_v11, %s5303_s8  ;;  %v3694_v29 = vadd.f32 %v8957_v43, %v3680_v42  ;;  %v3711_v36 = vmul.f32 %v3710_v13, %v8128_v54  ;;  %v3816_v43 = vmul.f32 %v3814_v47, %v8087_v21 }
 0x445   : > { %4055 = vrot.lane.b32.xlu1 %v4050_v41, %s5303_s8  ;;  %v4360_v11 = vstv %s9025_s24  ;;  %s10113_s24 = sld [smem:[#allocation152_spill]] }
 0x446   : > { %v8973_v2 = vpop.permute.xlu0 %3701 }
 0x447   : > { %v8970_v55 = vpop.permute.xlu1 %3703  ;;  %v3707_v53 = vadd.f32 %v8973_v2, %v3693_v32 }
 0x448   : > { %4317 = vrot.lane.b32.xlu0 %v4313_v52, %s10108_s15  ;;  %v3708_v4 = vadd.f32 %v8970_v55, %v3694_v29  ;;  %v3815_v55 = vmul.f32 %v3814_v47, %v8082_v1 }
 0x449   : > { %4319 = vrot.lane.b32.xlu1 %v4314_v19, %s10108_s15  ;;  %v3846_v19 = vstv %s9029_s14  ;;  %v3713_v2 = vadd.f32 %v3711_v36, %v3707_v53 }
 0x44a   : > { %v8981_v46 = vpop.permute.xlu0 %3721  ;;  %v3714_v30 = vadd.f32 %v3712_v56, %v3708_v4  ;;  %v3848_v45 = vmul.f32 %v3846_v19, %v8120_v16 }
 0x44b   : > { %v8978_v8 = vpop.permute.xlu1 %3723  ;;  %s10114_s14 = smov %s10113_s24 }
 0x44c   : > { %4181 = vrot.lane.b32.xlu0 %v4177_v33, %s10108_s15  ;;  %v4362_v33 = vmul.f32 %v4360_v11, %v8170_v23 }
 0x44d   : > { %4183 = vrot.lane.b32.xlu1 %v4178_v14, %s10108_s15 }
 0x44e   : > { %v8989_v26 = vpop.permute.xlu0 %3735 }
 0x44f   : > { %v8986_v61 = vpop.permute.xlu1 %3737 }
 0x450   : > { %4331 = vrot.lane.b32.xlu0 %v4327_v59, %s5303_s8  ;;  %v4361_v59 = vmul.f32 %v4360_v11, %v8175_v10 }
 0x451   : > { %4333 = vrot.lane.b32.xlu1 %v4328_v35, %s5303_s8 }
 0x452   : > { %v8997_v62 = vpop.permute.xlu0 %3755 }
 0x453   : > { %v8994_v17 = vpop.permute.xlu1 %3757 }
 0x454   : > { %4195 = vrot.lane.b32.xlu0 %v4191_v7, %s5303_s8  ;;  %v3728_v7 = vadd.f32 %v8978_v8, %v3714_v30 }
 0x455   : > { %4197 = vrot.lane.b32.xlu1 %v4192_v49, %s5303_s8  ;;  %v4224_v49 = vstv %s9043_s10  ;;  %s9228_s10 = scalar_lea.hbm %s10113_s24, %s4901_s18 }
 0x456   : > { %v9009_v50 = vpop.permute.xlu0 %3769  ;;  %v4226_v42 = vmul.f32 %v4224_v49, %v8170_v23  ;;  %v4225_v29 = vmul.f32 %v4224_v49, %v8175_v10 }
 0x457   : > { %v9006_v20 = vpop.permute.xlu1 %3771 }
 0x458   : > { %4073 = vrot.lane.b32.xlu0 %v4069_v28, %s10108_s15  ;;  %v3727_v28 = vadd.f32 %v8981_v46, %v3713_v2  ;;  %v3880_v46 = vstv %s9061_s25  ;;  %s5304_s25 = smov [#allocation10]  }
 0x459   : > { %4075 = vrot.lane.b32.xlu1 %v4070_v3, %s10108_s15  ;;  %v3847_v3 = vmul.f32 %v3846_v19, %v8128_v54  ;;  %v3882_v53 = vmul.f32 %v3880_v46, %v8149_v51  ;;  %v3914_v19 = vstv %s9083_s6 }
 0x45a   : > { %v9021_v27 = vpop.permute.xlu0 %3789  ;;  %v3741_v8 = vadd.f32 %v8989_v26, %v3727_v28  ;;  %v3915_v49 = vmul.f32 %v3914_v19, %v8175_v10 }
 0x45b   : > { %v9018_v34 = vpop.permute.xlu1 %3791 }
 0x45c   : > { %4087 = vrot.lane.b32.xlu0 %v4083_v31, %s5303_s8 }
 0x45d   : > { %4089 = vrot.lane.b32.xlu1 %v4084_v57, %s5303_s8  ;;  %v3742_v57 = vadd.f32 %v8986_v61, %v3728_v7  ;;  %v3745_v61 = vmul.f32 %v3744_v48, %v8155_v58 }
 0x45e   : > { %v9039_v63 = vpop.permute.xlu0 %3803 }
 0x45f   : > { %v9034_v25 = vpop.permute.xlu1 %3805  ;;  %v3747_v24 = vadd.f32 %v3745_v61, %v3741_v8 }
 0x460   : > { %4351 = vrot.lane.b32.xlu0 %v4347_v38, %s10108_s15 }
 0x461   : > { %4353 = vrot.lane.b32.xlu1 %v4348_v15, %s10108_s15  ;;  %v3746_v15 = vmul.f32 %v3744_v48, %v8149_v51 }
 0x462   : > { %v3824_v41 = vpop.permute.xlu0 %3823 }
 0x463   : > { %v3826_v44 = vpop.permute.xlu1 %3825  ;;  %v3829_v5 = vadd.f32 %v3824_v41, %v3815_v55  ;;  %v3748_v13 = vadd.f32 %v3746_v15, %v3742_v57 }
 0x464   : > { %v3830_v52 = vadd.f32 %v3826_v44, %v3816_v43  ;;  %4215 = vrot.lane.b32.xlu0 %v4211_v22, %s10108_s15  ;;  %v3881_v44 = vmul.f32 %v3880_v46, %v8155_v58  ;;  %v3761_v22 = vadd.f32 %v8997_v62, %v3747_v24 }
 0x465   : > { %4217 = vrot.lane.b32.xlu1 %v4212_v12, %s10108_s15  ;;  %s9077_s15 = sld [smem:[#allocation7 + $0x66]]  ;;  %v3762_v36 = vadd.f32 %v8994_v17, %v3748_v13  ;;  %v3958_v13 = vstv %s9099_s20 }
 0x466   : > { %v3838_v35 = vpop.permute.xlu0 %3837  ;;  %v3775_v2 = vadd.f32 %v9009_v50, %v3761_v22 }
 0x467   : > { %v3840_v14 = vpop.permute.xlu1 %3839  ;;  %v3843_v37 = vadd.f32 %v3838_v35, %v3829_v5  ;;  %v3776_v55 = vadd.f32 %v9006_v20, %v3762_v36 }
 0x468   : > { %v3844_v40 = vadd.f32 %v3840_v14, %v3830_v52  ;;  %4365 = vrot.lane.b32.xlu0 %v4361_v59, %s5303_s8  ;;  %v3916_v59 = vmul.f32 %v3914_v19, %v8170_v23 }
 0x469   : > { %4367 = vrot.lane.b32.xlu1 %v4362_v33, %s5303_s8  ;;  %v3849_v18 = vadd.f32 %v3847_v3, %v3843_v37 }
 0x46a   : > { %v3850_v60 = vadd.f32 %v3848_v45, %v3844_v40  ;;  %v3858_v39 = vpop.permute.xlu0 %3857 }
 0x46b   : > { %v3860_v31 = vpop.permute.xlu1 %3859  ;;  %v3863_v26 = vadd.f32 %v3858_v39, %v3849_v18  ;;  %v3778_v11 = vstv %s9077_s15  ;;  %s5203_s15 = sshll.u32 %s5304_s25, 4  ;;  %s5204_s15 = int_to_ptr.vmem [resolvable:$false] %s5203_s15 }
 0x46c   : > { %v3864_v32 = vadd.f32 %v3860_v31, %v3850_v60  ;;  %4229 = vrot.lane.b32.xlu0 %v4225_v29, %s5303_s8  ;;  %v3780_v5 = vmul.f32 %v3778_v11, %v8170_v23  ;;  %v3779_v40 = vmul.f32 %v3778_v11, %v8175_v10  ;;  %s5205_s6 = scalar_lea.vmem %s5204_s15, 2048  ;;  %p5206_p4 = scmp.lt.s32.totalorder %s9230_s28, %s5204_s15 }
 0x46d   : > { %4231 = vrot.lane.b32.xlu1 %v4226_v42, %s5303_s8  ;;  %s4845_s8 = sld [smem:[#allocation7 + $0x6c]] }
 0x46e   : > { %v3872_v47 = vpop.permute.xlu0 %3871  ;;  %v3782_v45 = vadd.f32 %v3780_v5, %v3776_v55  ;;  %v3781_v20 = vadd.f32 %v3779_v40, %v3775_v2 }
 0x46f   : > { %v3874_v38 = vpop.permute.xlu1 %3873  ;;  %v3877_v56 = vadd.f32 %v3872_v47, %v3863_v26 }
 0x470   : > { %v3878_v4 = vadd.f32 %v3874_v38, %v3864_v32  ;;  %v3796_v28 = vadd.f32 %v9018_v34, %v3782_v45  ;;  %v3795_v48 = vadd.f32 %v9021_v27, %v3781_v20  ;;  %v3676_v34 = vsel %vm1446_vm11, 0.0, %v3671_v9  ;;  %v4887_v9 = vld [vmem:[%s10110_s13 + $0x28] sm:$0xff] }
 0x471   : > { %v3883_v41 = vadd.f32 %v3881_v44, %v3877_v56  ;;  %v4886_v56 = vld [vmem:[%s10110_s13 + $0x20] sm:$0xff] }
 0x472   : > { %v3884_v12 = vadd.f32 %v3882_v53, %v3878_v4  ;;  %v3892_v30 = vpop.permute.xlu0 %3891  ;;  %v3810_v57 = vadd.f32 %v9034_v25, %v3796_v28  ;;  %v3809_v42 = vadd.f32 %v9039_v63, %v3795_v48 }
 0x473   : > { %v3894_v43 = vpop.permute.xlu1 %3893  ;;  %v3897_v14 = vadd.f32 %v3892_v30, %v3883_v41  ;;  %v3962_v15 = vstv %s4845_s8 }
 0x474   : > { %v3898_v52 = vadd.f32 %v3894_v43, %v3884_v12  ;;  %v3812_v27 = vadd.f32 %v3810_v57, %v8967_v0  ;;  %v3811_v25 = vadd.f32 %v3809_v42, %v3676_v34  ;;  %v3964_v63 = vmul.f32 %v3962_v15, %v8087_v21 }
 0x475   : > { %v3963_v6 = vmul.f32 %v3962_v15, %v8082_v1  ;;  %v3994_v57 = vstv %s4848_s12 }
 0x476   : > { %v3906_v17 = vpop.permute.xlu0 %3905  ;;  %v3996_v42 = vmul.f32 %v3994_v57, %v8120_v16 }
 0x477   : > { %v3908_v33 = vpop.permute.xlu1 %3907  ;;  %v3911_v62 = vadd.f32 %v3906_v17, %v3897_v14 }
 0x478   : > { %v3912_v35 = vadd.f32 %v3908_v33, %v3898_v52 }
 0x479   : > { %v3917_v50 = vadd.f32 %v3915_v49, %v3911_v62 }
 0x47a   : > { %v3918_v7 = vadd.f32 %v3916_v59, %v3912_v35  ;;  %v3926_v3 = vpop.permute.xlu0 %3925 }
 0x47b   : > { %v3928_v37 = vpop.permute.xlu1 %3927  ;;  %v3931_v31 = vadd.f32 %v3926_v3, %v3917_v50 }
 0x47c   : > { %v3932_v60 = vadd.f32 %v3928_v37, %v3918_v7 }
 0x47e   : > { %v3940_v39 = vpop.permute.xlu0 %3939 }
 0x47f   : > { %v3942_v18 = vpop.permute.xlu1 %3941  ;;  %v3945_v29 = vadd.f32 %v3940_v39, %v3931_v31 }
 0x480   : > { %v3946_v8 = vadd.f32 %v3942_v18, %v3932_v60 }
 0x481   : > { %v3949_v61 = vrot.slane %v3945_v29, 1 }
 0x482   : > { %v3950_v46 = vrot.slane %v3946_v8, 1  ;;  %v3972_v38 = vpop.permute.xlu0 %3971  ;;  %v3995_v8 = vmul.f32 %v3994_v57, %v8128_v54 }
 0x483   : > { %v3974_v32 = vpop.permute.xlu1 %3973  ;;  %v3977_v44 = vadd.f32 %v3972_v38, %v3963_v6 }
 0x484   : > { %v3954_v26 = vsel %vm1597_vm12, %v3950_v46, 0.0  ;;  %v3951_v4 = vsel %vm1597_vm12, %v3949_v61, %v3950_v46  ;;  %v3978_v53 = vadd.f32 %v3974_v32, %v3964_v63  ;;  %v4240_v46 = vstv %s4869_s16 }
 0x485   : > { %v3956_v24 = vadd.f32 %v3954_v26, %v3812_v27  ;;  %v3955_v47 = vadd.f32 %v3951_v4, %v3811_v25  ;;  %v4028_v32 = vstv %s4851_s19  ;;  %v4241_v38 = vmul.f32 %v4240_v46, %v8082_v1 }
 0x486   : > { %v3986_v41 = vpop.permute.xlu0 %3985 }
 0x487   : > { %v3960_v0 = vadd.f32 %v3958_v13, %v3956_v24  ;;  %v3988_v12 = vpop.permute.xlu1 %3987  ;;  %v3959_v36 = vadd.f32 %v3958_v13, %v3955_v47  ;;  %v3991_v11 = vadd.f32 %v3986_v41, %v3977_v44  ;;  %v4242_v13 = vmul.f32 %v4240_v46, %v8087_v21 }
 0x488   : > { %v3992_v43 = vadd.f32 %v3988_v12, %v3978_v53  ;;  %v4104_v24 = vstv %s9142_s21  ;;  %v4272_v53 = vstv %s9146_s7 }
 0x489   : > { %v4401_v22 = vadd.f32 %v4887_v9, %v3960_v0  ;;  %v4400_v30 = vadd.f32 %v4886_v56, %v3959_v36  ;;  %v3997_v34 = vadd.f32 %v3995_v8, %v3991_v11  ;;  %v4030_v9 = vmul.f32 %v4028_v32, %v8149_v51 }
 0x48a   : > { %v4250_v19 = vpop.permute.xlu0 %4249  ;;  %v3998_v29 = vadd.f32 %v3996_v42, %v3992_v43  ;;  %v4029_v0 = vmul.f32 %v4028_v32, %v8155_v58  ;;  %v4106_v44 = vmul.f32 %v4104_v24, %v8087_v21  ;;  %v4105_v41 = vmul.f32 %v4104_v24, %v8082_v1 }
 0x48b   : > { %4889 = vst.msk [vmem:[%s8589_s26 + $0x28] sm:$0xff] %vm440_vm1, %v4401_v22  ;;  %v4252_v55 = vpop.permute.xlu1 %4251  ;;  %4888 = vst.msk [vmem:[%s8589_s26 + $0x20] sm:$0xff] %vm440_vm1, %v4400_v30  ;;  %v4255_v47 = vadd.f32 %v4250_v19, %v4241_v38  ;;  %v4136_v19 = vstv %s9152_s3 }
 0x48c   : > { %v4256_v6 = vadd.f32 %v4252_v55, %v4242_v13  ;;  %v4274_v55 = vmul.f32 %v4272_v53, %v8120_v16 }
 0x48e   : > { %v9120_v52 = vpop.permute.xlu0 %4113 }
 0x48f   : > { %v4116_v2 = vpop.permute.xlu1 %4115 }
 0x490   : > { %v4120_v30 = vadd.f32 %v4116_v2, %v4106_v44 }
 0x492   : > { %v4264_v14 = vpop.permute.xlu0 %4263 }
 0x493   : > { %v4266_v5 = vpop.permute.xlu1 %4265  ;;  %v4269_v22 = vadd.f32 %v4264_v14, %v4255_v47 }
 0x494   : > { %v4270_v12 = vadd.f32 %v4266_v5, %v4256_v6  ;;  %v4062_v5 = vstv %s9156_s2 }
 0x496   : > { %v9124_v40 = vpop.permute.xlu0 %4127  ;;  %v4276_v1 = vadd.f32 %v4274_v55, %v4270_v12 }
 0x497   : > { %v9122_v33 = vpop.permute.xlu1 %4129 }
 0x498   : > { %v4134_v57 = vadd.f32 %v9122_v33, %v4120_v30  ;;  %v4340_v30 = vstv %s9190_s22 }
 0x49a   : > { %v4006_v17 = vpop.permute.xlu0 %4005 }
 0x49b   : > { %v4008_v35 = vpop.permute.xlu1 %4007  ;;  %v4011_v61 = vadd.f32 %v4006_v17, %v3997_v34  ;;  %v4119_v17 = vadd.f32 %v9120_v52, %v4105_v41  ;;  %v4138_v52 = vmul.f32 %v4136_v19, %v8120_v16  ;;  %v4137_v34 = vmul.f32 %v4136_v19, %v8128_v54 }
 0x49c   : > { %v4012_v27 = vadd.f32 %v4008_v35, %v3998_v29 }
 0x49d   : > { %v4133_v2 = vadd.f32 %v9124_v40, %v4119_v17  ;;  %v4140_v40 = vadd.f32 %v4138_v52, %v4134_v57 }
 0x49e   : > { %v4020_v45 = vpop.permute.xlu0 %4019 }
 0x49f   : > { %v4022_v59 = vpop.permute.xlu1 %4021  ;;  %v4025_v4 = vadd.f32 %v4020_v45, %v4011_v61  ;;  %v4139_v32 = vadd.f32 %v4137_v34, %v4133_v2 }
 0x4a0   : > { %v4026_v26 = vadd.f32 %v4022_v59, %v4012_v27  ;;  %v4273_v59 = vmul.f32 %v4272_v53, %v8128_v54  ;;  %v4306_v27 = vstv %s9166_s4 }
 0x4a1   : > { %v4031_v11 = vadd.f32 %v4029_v0, %v4025_v4  ;;  %v4308_v54 = vmul.f32 %v4306_v27, %v8149_v51  ;;  %v4307_v24 = vmul.f32 %v4306_v27, %v8155_v58  ;;  %v4170_v4 = vstv %s9178_s9 }
 0x4a2   : > { %v9128_v49 = vpop.permute.xlu0 %4283  ;;  %v4032_v36 = vadd.f32 %v4030_v9, %v4026_v26  ;;  %v4275_v8 = vadd.f32 %v4273_v59, %v4269_v22  ;;  %v4171_v22 = vmul.f32 %v4170_v4, %v8155_v58  ;;  %v4342_v59 = vmul.f32 %v4340_v30, %v8170_v23 }
 0x4a3   : > { %v9126_v62 = vpop.permute.xlu1 %4285  ;;  %v4341_v58 = vmul.f32 %v4340_v30, %v8175_v10 }
 0x4a4   : > { %v4289_v46 = vadd.f32 %v9128_v49, %v4275_v8 }
 0x4a6   : > { %v9132_v7 = vpop.permute.xlu0 %4147 }
 0x4a7   : > { %v9130_v20 = vpop.permute.xlu1 %4149  ;;  %v4153_v38 = vadd.f32 %v9132_v7, %v4139_v32  ;;  %v4172_v7 = vmul.f32 %v4170_v4, %v8149_v51  ;;  %v4384_v32 = vstv %s4881_s17 }
 0x4a8   : > { %v4154_v49 = vadd.f32 %v9130_v20, %v4140_v40 }
 0x4aa   : > { %v9136_v50 = vpop.permute.xlu0 %4297 }
 0x4ab   : > { %v9134_v37 = vpop.permute.xlu1 %4299  ;;  %v4303_v16 = vadd.f32 %v9136_v50, %v4289_v46 }
 0x4ad   : > { %v4309_v0 = vadd.f32 %v4307_v24, %v4303_v16  ;;  %v4890_v24 = vld [vmem:[%s10110_s13 + $0x30] sm:$0xff] }
 0x4ae   : > { %v9140_v28 = vpop.permute.xlu0 %4161 }
 0x4af   : > { %v9138_v3 = vpop.permute.xlu1 %4163  ;;  %v4167_v20 = vadd.f32 %v9140_v28, %v4153_v38 }
 0x4b1   : > { %v4173_v28 = vadd.f32 %v4171_v22, %v4167_v20 }
 0x4b2   : > { %v4040_v60 = vpop.permute.xlu0 %4039 }
 0x4b3   : > { %v4042_v48 = vpop.permute.xlu1 %4041  ;;  %v4045_v45 = vadd.f32 %v4040_v60, %v4031_v11  ;;  %v4064_v60 = vmul.f32 %v4062_v5, %v8170_v23 }
 0x4b4   : > { %v4046_v35 = vadd.f32 %v4042_v48, %v4032_v36  ;;  %v4290_v48 = vadd.f32 %v9126_v62, %v4276_v1 }
 0x4b6   : > { %v4054_v18 = vpop.permute.xlu0 %4053 }
 0x4b7   : > { %v4056_v31 = vpop.permute.xlu1 %4055  ;;  %v4059_v29 = vadd.f32 %v4054_v18, %v4045_v45  ;;  %v4304_v18 = vadd.f32 %v9134_v37, %v4290_v48  ;;  %v4168_v37 = vadd.f32 %v9138_v3, %v4154_v49  ;;  %v4204_v45 = vstv %s9199_s29 }
 0x4b8   : > { %v4060_v14 = vadd.f32 %v4056_v31, %v4046_v35  ;;  %v4063_v31 = vmul.f32 %v4062_v5, %v8175_v10  ;;  %v4205_v48 = vmul.f32 %v4204_v45, %v8175_v10 }
 0x4b9   : > { %v4310_v47 = vadd.f32 %v4308_v54, %v4304_v18  ;;  %v4174_v55 = vadd.f32 %v4172_v7, %v4168_v37  ;;  %v4891_v54 = vld [vmem:[%s10110_s13 + $0x38] sm:$0xff]  ;;  %s5199_s13 = scalar_lea.vmem %s9230_s28, 1024 }
 0x4ba   : > { %v9150_v15 = vpop.permute.xlu0 %4317  ;;  %v4066_v61 = vadd.f32 %v4064_v60, %v4060_v14  ;;  %v4065_v13 = vadd.f32 %v4063_v31, %v4059_v29  ;;  %p5200_p1 = scmp.ne.s32.totalorder %s9230_s28, %s5199_s13  ;;  %p5207_p10 = scmp.lt.s32.totalorder %s5205_s6, %s5199_s13 }
 0x4bb   : > { %v9148_v39 = vpop.permute.xlu1 %4319  ;;  %v4323_v41 = vadd.f32 %v9150_v15, %v4309_v0 }
 0x4bc   : > { %v4324_v12 = vadd.f32 %v9148_v39, %v4310_v47  ;;  %p5201_p8 = pnand %p5200_p1, %p10115_p9  ;;  %p5208_p11 = por %p5207_p10, %p5206_p4 }
 0x4be   : > { %v9159_v63 = vpop.permute.xlu0 %4181  ;;  %p5202_p12 = pneg %p5201_p8 }
 0x4bf   : > { %v9154_v25 = vpop.permute.xlu1 %4183  ;;  %v4187_v15 = vadd.f32 %v9159_v63, %v4173_v28 }
 0x4c0   : > { %v4188_v51 = vadd.f32 %v9154_v25, %v4174_v55  ;;  %p5209_p0 = pnand %p5208_p11, %p5202_p12 }
 0x4c2   : > { %v9171_v43 = vpop.permute.xlu0 %4331 }
 0x4c3   : > { %v9168_v56 = vpop.permute.xlu1 %4333  ;;  %v4337_v17 = vadd.f32 %v9171_v43, %v4323_v41  ;;  %v4206_v43 = vmul.f32 %v4204_v45, %v8170_v23 }
 0x4c4   : > { %v4338_v19 = vadd.f32 %v9168_v56, %v4324_v12 }
 0x4c5   : > { %v4343_v2 = vadd.f32 %v4341_v58, %v4337_v17 }
 0x4c6   : > { %v4196_v42 = vpop.permute.xlu0 %4195  ;;  %v4344_v1 = vadd.f32 %v4342_v59, %v4338_v19 }
 0x4c7   : > { %v4198_v21 = vpop.permute.xlu1 %4197  ;;  %v4201_v56 = vadd.f32 %v4196_v42, %v4187_v15 }
 0x4c8   : > { %v4202_v57 = vadd.f32 %v4198_v21, %v4188_v51 }
 0x4c9   : > { %v4207_v46 = vadd.f32 %v4205_v48, %v4201_v56 }
 0x4ca   : > { %v4074_v62 = vpop.permute.xlu0 %4073  ;;  %v4208_v52 = vadd.f32 %v4206_v43, %v4202_v57 }
 0x4cb   : > { %v4076_v33 = vpop.permute.xlu1 %4075  ;;  %v4079_v6 = vadd.f32 %v4074_v62, %v4065_v13 }
 0x4cc   : > { %v4080_v26 = vadd.f32 %v4076_v33, %v4066_v61 }
 0x4ce   : > { %v4088_v53 = vpop.permute.xlu0 %4087 }
 0x4cf   : > { %v4090_v9 = vpop.permute.xlu1 %4089  ;;  %v4093_v44 = vadd.f32 %v4088_v53, %v4079_v6 }
 0x4d0   : > { %v4094_v50 = vadd.f32 %v4090_v9, %v4080_v26 }
 0x4d1   : > { %v4097_v11 = vrot.slane %v4093_v44, 7 }
 0x4d2   : > { %v4098_v36 = vrot.slane %v4094_v50, 7  ;;  %v4352_v35 = vpop.permute.xlu0 %4351 }
 0x4d3   : > { %v4354_v3 = vpop.permute.xlu1 %4353  ;;  %v4357_v29 = vadd.f32 %v4352_v35, %v4343_v2  ;;  %v4102_v10 = vsel %vm1446_vm11, 0.0, %v4097_v11 }
 0x4d4   : > { %v4099_v39 = vsel %vm1446_vm11, %v4097_v11, %v4098_v36  ;;  %v4358_v8 = vadd.f32 %v4354_v3, %v4344_v1 }
 0x4d6   : > { %v4216_v14 = vpop.permute.xlu0 %4215 }
 0x4d7   : > { %v4218_v5 = vpop.permute.xlu1 %4217  ;;  %v4221_v21 = vadd.f32 %v4216_v14, %v4207_v46 }
 0x4d8   : > { %v4222_v27 = vadd.f32 %v4218_v5, %v4208_v52 }
 0x4da   : > { %v4366_v63 = vpop.permute.xlu0 %4365 }
 0x4db   : > { %v4368_v25 = vpop.permute.xlu1 %4367  ;;  %v4371_v34 = vadd.f32 %v4366_v63, %v4357_v29 }
 0x4dc   : > { %v4372_v60 = vadd.f32 %v4368_v25, %v4358_v8 }
 0x4dd   : > { %v4375_v31 = vrot.slane %v4371_v34, 1 }
 0x4de   : > { %v4376_v33 = vrot.slane %v4372_v60, 1  ;;  %v4230_v40 = vpop.permute.xlu0 %4229 }
 0x4df   : > { %v4232_v42 = vpop.permute.xlu1 %4231  ;;  %v4235_v18 = vadd.f32 %v4230_v40, %v4221_v21 }
 0x4e0   : > { %v4236_v23 = vadd.f32 %v4232_v42, %v4222_v27  ;;  %v4380_v62 = vsel %vm1597_vm12, %v4376_v33, 0.0  ;;  %v4377_v49 = vsel %vm1597_vm12, %v4375_v31, %v4376_v33 }
 0x4e1   : > { %v4237_v16 = vadd.f32 %v4235_v18, %v4102_v10 }
 0x4e2   : > { %v4238_v61 = vadd.f32 %v4236_v23, %v4099_v39 }
 0x4e3   : > { %v4381_v26 = vadd.f32 %v4377_v49, %v4237_v16 }
 0x4e4   : > { %v4382_v13 = vadd.f32 %v4380_v62, %v4238_v61 }
 0x4e5   : > { %v4385_v4 = vadd.f32 %v4384_v32, %v4381_v26 }
 0x4e6   : > { %v4386_v38 = vadd.f32 %v4384_v32, %v4382_v13 }
 0x4e7   : > { %v4407_v9 = vadd.f32 %v4890_v24, %v4385_v4 }
 0x4e8   : > { %v4408_v6 = vadd.f32 %v4891_v54, %v4386_v38 }
 0x4e9   : > { %4892 = vst.msk [vmem:[%s8589_s26 + $0x30] sm:$0xff] %vm440_vm1, %v4407_v9 }
 0x4ea   : > { %4893 = vst.msk [vmem:[%s8589_s26 + $0x38] sm:$0xff] %vm440_vm1, %v4408_v6 }
 0x4eb   : > { %5212 = shalt.err (!%p5209_p0)
}
 0x4ec   : > { %s5213_s27 = scalar_lea.hbm %s9228_s10, 1024  ;;  %s5217_s8 = scalar_lea.hbm %s10114_s14, 2048 }
 0x4ed   : > { %p5214_p2 = scmp.ne.s32.totalorder %s9228_s10, %s5213_s27  ;;  %p5218_p6 = scmp.lt.s32.totalorder %s9228_s10, %s10114_s14 }
 0x4ee   : > { %p5219_p7 = scmp.lt.s32.totalorder %s5217_s8, %s5213_s27 }
 0x4ef   : > { %p5215_p3 = pnand %p5214_p2, %p10115_p9 }
 0x4f0   : > { %p5220_p13 = por %p5219_p7, %p5218_p6 }
 0x4f1   : > { %p5216_p5 = pneg %p5215_p3 }
 0x4f3   : > { %p5221_p1 = pnand %p5220_p13, %p5216_p5 }
 0x4f5   : > { %5224 = shalt.err (!%p5221_p1)
}
 0x4f6   : > { %s5305_s16 = smov 128   ;;  %s5306_s19 = smov 8  }
 0x4f7   : > { %4918 = dma.vmem_to_hbm [thread:$0]  (%p10115_p9), %s9230_s28, 1024, %s9228_s10, %s9238_s23, %s5305_s16, %s5305_s16, %s5306_s19  }
 0x4f8 PF: > { %s10116_s21 = sld [smem:[#allocation20_spill]] }
 0x4f9   : > { %s10117_s7 = sld [smem:[#allocation15_spill]] }
 0x4fa   : > { %s10118_s3 = sld [smem:[#allocation23_spill]] }
 0x4fe   : > { %p4945_p8 = scmp.ge.s32.totalorder %s10116_s21, 2 }
 0x4ff   : > { %s4442_s2 = sand.u32 1, %s10117_s7  }
 0x500   : > { %p10119_p12 = scmp.ne.s32.totalorder %s10118_s3, 0  ;;  %s4443_s4 = scalar_lea.sflag [#allocation3], %s4442_s2 }
 0x502   : > { %p4934_p4 = pnand %p4945_p8, %p10119_p12 }
 0x504   : > { %p4935_p10 = pneg %p4934_p4 }
 0x506   : > { %5262 = dma.done.wait (%p4935_p10), %s4443_s4, 1024  }
 0x507   : > { %5264 = vsyncadd (%p4935_p10), %s4443_s4, 4294966272  ;;  %s23_s29 = sadd.s32 1, %s10116_s21   ;;  %s10120_s24 = sld [smem:[#allocation16_spill]] }
 0x508   : > { %p20_p11 = scmp.ge.s32.totalorder %s23_s29, 4   ;;  %s10121_s25 = sld [smem:[#allocation17_spill]] }
 0x509   : > { %s10122_s26 = sld [smem:[#allocation24_spill]] }
 0x50a   : > { %s10123_s27 = sld [smem:[#allocation19_spill]]  ;;  %22 = sbr.rel (!%p20_p11) target bundleno = 16 (0x10), region = 112 }
 0x50b   : > { %s10124_s28 = sld [smem:[#allocation21_spill]] }
 0x50f   :  { %4448 = vsyncpa [#allocation3], 1 }
 0x510   :  { %4450 = vsyncpa [#allocation3 + $0x1], 1 }
 0x511   :  { %4451 = vsyncpa [#allocation4], 1 }
 0x512   :  { %4453 = vsyncpa [#allocation4 + $0x1], 1 }
 0x513   :  { %4454 = vsyncpa [#allocation6], 1 }
 0x514   :  { %4455 = vsyncpa [#allocation9], 1 }

</bundles_post_ra>
